<compile_context>
chip_gen: v7x
topology: tpu7x:2x2x1
jax: 0.10.0
libtpu: 0.0.40
codegen_flags: <defaults>
</compile_context>

<pallas_src>
import functools

import jax
import jax.numpy as jnp
from jax.experimental import pallas as pl
from jax.experimental.pallas import tpu as pltpu

LANE = 128


def _round_up(n, m):
    return ((n + m - 1) // m) * m


# ----------------------------------------------------------------------------
# Fused per-level kernel: conv3x3+ReLU -> conv3x3+ReLU -> maxpool2x2
# ----------------------------------------------------------------------------
def _im2col_3x3(src, ho, wo):
    """Patch matrix for a valid 3x3 conv.

    src: (Hin, Win, C) array or VMEM ref (channel-padded, lane-dense).
    Returns (ho*wo, 9*C) with channel order (kh, kw, c), matching
    w.reshape(9*C, Cout) of an HWIO weight.
    """
    zw = jnp.concatenate([src[:, kw:kw + wo, :] for kw in range(3)], axis=-1)
    zz = jnp.concatenate([zw[kh:kh + ho] for kh in range(3)], axis=-1)
    return zz.reshape(ho * wo, zz.shape[-1])


def _encoder_level_kernel(x_ref, w1_ref, b1_ref, w2_ref, b2_ref,
                          feat_ref, pool_ref, mid_ref):
    """One image, one encoder level.

    x_ref:    (H,  W,  Cp)   input (channel padded), compute dtype
    w1_ref:   (9*Cp, Cm)     im2col weights conv1, compute dtype
    b1_ref:   (1, Cm)        f32
    w2_ref:   (9*Cm, Cm)     im2col weights conv2, compute dtype
    b2_ref:   (1, Cm)        f32
    feat_ref: (H-4, W-4, Cm) f32 feature output (pre-pool)
    pool_ref: ((H-4)//2, (W-4)//2, Cm) pooled output, compute dtype
    mid_ref:  (H-2, W-2, Cm) VMEM scratch for the mid activation
    """
    H1, W1, Cm = mid_ref.shape
    H2, W2, _ = feat_ref.shape
    Hp, Wp, _ = pool_ref.shape

    # conv1 + bias + ReLU: single im2col matmul, f32 accumulation on the MXU.
    p1 = _im2col_3x3(x_ref, H1, W1)                          # (H1*W1, 9*Cp)
    y1 = jnp.dot(p1, w1_ref[...], preferred_element_type=jnp.float32)
    y1 = jnp.maximum(y1 + b1_ref[...], 0.0)
    mid_ref[...] = y1.reshape(H1, W1, Cm).astype(mid_ref.dtype)

    # conv2 + bias + ReLU, reading the mid activation straight from VMEM.
    p2 = _im2col_3x3(mid_ref, H2, W2)                        # (H2*W2, 9*Cm)
    y2 = jnp.dot(p2, w2_ref[...], preferred_element_type=jnp.float32)
    y2 = jnp.maximum(y2 + b2_ref[...], 0.0)                  # f32
    y2 = y2.reshape(H2, W2, Cm)
    feat_ref[...] = y2.astype(feat_ref.dtype)

    # Fused MaxPool2d(2) (floor), reshape + elementwise max - pure VPU,
    # no stride-2 sublane slicing.
    yc = y2[:2 * Hp, :2 * Wp, :]
    a4 = yc.reshape(2 * Hp, Wp, 2, Cm)
    wm = jnp.maximum(a4[:, :, 0, :], a4[:, :, 1, :])         # max over W pairs
    b4 = wm.reshape(Hp, 2, Wp, Cm)
    pool_ref[...] = jnp.maximum(b4[:, 0], b4[:, 1]).astype(pool_ref.dtype)


def _encoder_level(x_p, w1, b1, w2, b2, compute_dtype):
    """One encoder level on channel-padded NHWC input.

    x_p: (N, H, W, Cp), Cp a multiple of 128 (zero padded), compute dtype.
    Returns (feature_padded f32 (N, H-4, W-4, Cm),
             pooled_padded  compute_dtype (N, (H-4)//2, (W-4)//2, Cm)).
    """
    N, H, W, Cp = x_p.shape
    cin, cout = w1.shape[2], w1.shape[3]
    Cm = _round_up(cout, LANE)
    H1, W1 = H - 2, W - 2
    H2, W2 = H1 - 2, W1 - 2
    Hp, Wp = H2 // 2, W2 // 2

    # im2col weights: pad channels (lane-dense), reshape (3,3,Ci,Co)->(9*Ci, Co).
    w1p = jnp.pad(w1, ((0, 0), (0, 0), (0, Cp - cin), (0, Cm - cout)))
    w1p = w1p.reshape(9 * Cp, Cm).astype(compute_dtype)
    w2p = jnp.pad(w2, ((0, 0), (0, 0), (0, Cm - cout), (0, Cm - cout)))
    w2p = w2p.reshape(9 * Cm, Cm).astype(compute_dtype)
    b1p = jnp.pad(b1, ((0, 0), (0, Cm - cout))).astype(jnp.float32)
    b2p = jnp.pad(b2, ((0, 0), (0, Cm - cout))).astype(jnp.float32)

    feat, pooled = pl.pallas_call(
        _encoder_level_kernel,
        out_shape=(jax.ShapeDtypeStruct((N, H2, W2, Cm), jnp.float32),
                   jax.ShapeDtypeStruct((N, Hp, Wp, Cm), compute_dtype)),
        grid=(N,),
        in_specs=[
            pl.BlockSpec((None, H, W, Cp), lambda n: (n, 0, 0, 0)),
            pl.BlockSpec((9 * Cp, Cm), lambda n: (0, 0)),
            pl.BlockSpec((1, Cm), lambda n: (0, 0)),
            pl.BlockSpec((9 * Cm, Cm), lambda n: (0, 0)),
            pl.BlockSpec((1, Cm), lambda n: (0, 0)),
        ],
        out_specs=(
            pl.BlockSpec((None, H2, W2, Cm), lambda n: (n, 0, 0, 0)),
            pl.BlockSpec((None, Hp, Wp, Cm), lambda n: (n, 0, 0, 0)),
        ),
        scratch_shapes=[pltpu.VMEM((H1, W1, Cm), compute_dtype)],
        compiler_params=pltpu.CompilerParams(
            dimension_semantics=("parallel",)),
    )(x_p, w1p, b1p, w2p, b2p)
    return feat, pooled


# ----------------------------------------------------------------------------
# Parameter construction (deterministic, mirrors nn.Conv2d shapes, HWIO)
# ----------------------------------------------------------------------------
def init_encoder_params(channels, key):
    params = []
    for i in range(len(channels) - 1):
        cin, cout = channels[i], channels[i + 1]
        key, k1, k2, k3, k4 = jax.random.split(key, 5)
        w1 = jax.random.normal(k1, (3, 3, cin, cout), jnp.float32) * 0.1
        b1 = jax.random.normal(k2, (1, cout), jnp.float32) * 0.1
        w2 = jax.random.normal(k3, (3, 3, cout, cout), jnp.float32) * 0.1
        b2 = jax.random.normal(k4, (1, cout), jnp.float32) * 0.1
        params.append((w1, b1, w2, b2))
    return params


# ----------------------------------------------------------------------------
# Encoder forward (matches the PyTorch module: returns per-level features NCHW)
# ----------------------------------------------------------------------------
@functools.partial(jax.jit, static_argnames=("compute_dtype",))
def encoder_forward(x_nchw, params, compute_dtype=jnp.float32):
    x = jnp.transpose(x_nchw, (0, 2, 3, 1))                  # NCHW -> NHWC
    cin0 = x.shape[-1]
    cp0 = _round_up(cin0, LANE)
    x = jnp.pad(x, ((0, 0), (0, 0), (0, 0), (0, cp0 - cin0))).astype(compute_dtype)

    features = []
    for (w1, b1, w2, b2) in params:
        feat_p, x = _encoder_level(x, w1, b1, w2, b2, compute_dtype)
        cout = w1.shape[-1]
        # Un-pad channels and convert back to the PyTorch NCHW layout.
        features.append(jnp.transpose(feat_p[..., :cout], (0, 3, 1, 2)))
        # x (pooled, channel-padded NHWC) feeds the next level directly.
    return features


# ----------------------------------------------------------------------------
# Pure-JAX reference (mirrors the pipeline; f32 mode == PyTorch semantics)
# ----------------------------------------------------------------------------
def _ref_encoder(x_nchw, params, compute_dtype=jnp.float32):
    x = jnp.transpose(x_nchw, (0, 2, 3, 1)).astype(compute_dtype)
    feats = []
    for (w1, b1, w2, b2) in params:
        y = None
        for (w, b) in ((w1, b1), (w2, b2)):
            y = jax.lax.conv_general_dilated(
                x, w.astype(compute_dtype), (1, 1), "VALID",
                dimension_numbers=("NHWC", "HWIO", "NHWC"),
                preferred_element_type=jnp.float32)
            y = jnp.maximum(y + b[0], 0.0)                   # f32 bias + ReLU
            x = y.astype(compute_dtype)
        feats.append(jnp.transpose(y, (0, 3, 1, 2)))         # f32, NCHW
        x = jax.lax.reduce_window(y, -jnp.inf, jax.lax.max,
                                  (1, 2, 2, 1), (1, 2, 2, 1),
                                  "VALID").astype(compute_dtype)
    return feats


# ----------------------------------------------------------------------------
if __name__ == "__main__":
    key = jax.random.PRNGKey(0)
    k_x, k_p = jax.random.split(key)

    # Small shapes: batch=2, channels (4, 8, 16), spatial 16x16 (NCHW input).
    channels = (4, 8, 16)
    x = jax.random.normal(k_x, (2, 4, 16, 16), jnp.float32)
    params = init_encoder_params(channels, k_p)

    # f32 path: exact PyTorch semantics.
    feats = encoder_forward(x, params)
    feats = [jax.block_until_ready(f) for f in feats]
    ref = _ref_encoder(x, params)
    for f, r in zip(feats, ref):
        assert f.shape == r.shape, (f.shape, r.shape)
        assert jnp.allclose(f, r, atol=1e-4, rtol=1e-4), \
            float(jnp.max(jnp.abs(f - r)))

    # bf16 compute path (recommended on v6e/v7x): bf16 matmuls, f32 accumulate.
    feats_bf16 = encoder_forward(x, params, compute_dtype=jnp.bfloat16)
    feats_bf16 = [jax.block_until_ready(f) for f in feats_bf16]
    ref_bf16 = _ref_encoder(x, params, compute_dtype=jnp.bfloat16)
    for f, r in zip(feats_bf16, ref_bf16):
        assert f.shape == r.shape, (f.shape, r.shape)
        assert jnp.allclose(f, r, atol=2e-2, rtol=2e-2), \
            float(jnp.max(jnp.abs(f - r)))

    print("KERNEL_OK")
</pallas_src>

<mosaic_0001>
module attributes {stable_mosaic.version = 11 : i64} {
  func.func @_encoder_level_kernel(%arg0: i32, %arg1: memref<1x16x16x128xf32, #tpu.memory_space<vmem>>, %arg2: memref<1152x128xf32, #tpu.memory_space<vmem>>, %arg3: memref<1x128xf32, #tpu.memory_space<vmem>>, %arg4: memref<1152x128xf32, #tpu.memory_space<vmem>>, %arg5: memref<1x128xf32, #tpu.memory_space<vmem>>, %arg6: memref<1x12x12x128xf32, #tpu.memory_space<vmem>>, %arg7: memref<1x6x6x128xf32, #tpu.memory_space<vmem>>, %arg8: memref<14x14x128xf32, #tpu.memory_space<vmem>>) attributes {dimension_semantics = [#tpu.dimension_semantics<parallel>], iteration_bounds = array<i64: 2>, scalar_prefetch = 0 : i64, scratch_operands = 1 : i64, tpu.core_type = #tpu.core_type<tc>, window_params = [{transform_indices = @transform_0, window_bounds = array<i64: 1, 16, 16, 128>}, {pipeline_mode = #tpu.pipeline_mode<synchronous>, transform_indices = @transform_1, window_bounds = array<i64: 1152, 128>}, {pipeline_mode = #tpu.pipeline_mode<synchronous>, transform_indices = @transform_2, window_bounds = array<i64: 1, 128>}, {pipeline_mode = #tpu.pipeline_mode<synchronous>, transform_indices = @transform_3, window_bounds = array<i64: 1152, 128>}, {pipeline_mode = #tpu.pipeline_mode<synchronous>, transform_indices = @transform_4, window_bounds = array<i64: 1, 128>}, {transform_indices = @transform_5, window_bounds = array<i64: 1, 12, 12, 128>}, {transform_indices = @transform_6, window_bounds = array<i64: 1, 6, 6, 128>}]} {
    %c0 = arith.constant 0 : index
    %c0_0 = arith.constant 0 : index
    %c0_1 = arith.constant 0 : index
    %c0_2 = arith.constant 0 : index
    %0 = vector.load %arg1[%c0, %c0_0, %c0_1, %c0_2] : memref<1x16x16x128xf32, #tpu.memory_space<vmem>>, vector<1x16x14x128xf32>
    %1 = vector.shape_cast %0 : vector<1x16x14x128xf32> to vector<16x14x128xf32>
    %c0_3 = arith.constant 0 : index
    %c0_4 = arith.constant 0 : index
    %c1 = arith.constant 1 : index
    %c0_5 = arith.constant 0 : index
    %2 = vector.load %arg1[%c0_3, %c0_4, %c1, %c0_5] : memref<1x16x16x128xf32, #tpu.memory_space<vmem>>, vector<1x16x14x128xf32>
    %3 = vector.shape_cast %2 : vector<1x16x14x128xf32> to vector<16x14x128xf32>
    %c0_6 = arith.constant 0 : index
    %c0_7 = arith.constant 0 : index
    %c2 = arith.constant 2 : index
    %c0_8 = arith.constant 0 : index
    %4 = vector.load %arg1[%c0_6, %c0_7, %c2, %c0_8] : memref<1x16x16x128xf32, #tpu.memory_space<vmem>>, vector<1x16x14x128xf32>
    %5 = vector.shape_cast %4 : vector<1x16x14x128xf32> to vector<16x14x128xf32>
    %6 = tpu.concatenate %1, %3, %5 in 2 : vector<16x14x128xf32>, vector<16x14x128xf32>, vector<16x14x128xf32> -> vector<16x14x384xf32>
    %7 = vector.extract_strided_slice %6 {offsets = [0, 0, 0], sizes = [14, 14, 384], strides = [1, 1, 1]} : vector<16x14x384xf32> to vector<14x14x384xf32>
    %8 = vector.extract_strided_slice %6 {offsets = [1, 0, 0], sizes = [14, 14, 384], strides = [1, 1, 1]} : vector<16x14x384xf32> to vector<14x14x384xf32>
    %9 = vector.extract_strided_slice %6 {offsets = [2, 0, 0], sizes = [14, 14, 384], strides = [1, 1, 1]} : vector<16x14x384xf32> to vector<14x14x384xf32>
    %10 = tpu.concatenate %7, %8, %9 in 2 : vector<14x14x384xf32>, vector<14x14x384xf32>, vector<14x14x384xf32> -> vector<14x14x1152xf32>
    %11 = vector.shape_cast %10 : vector<14x14x1152xf32> to vector<196x1152xf32>
    %c0_9 = arith.constant 0 : index
    %c0_10 = arith.constant 0 : index
    %12 = vector.load %arg2[%c0_9, %c0_10] : memref<1152x128xf32, #tpu.memory_space<vmem>>, vector<1152x128xf32>
    %cst = arith.constant dense<0.000000e+00> : vector<196x128xf32>
    %13 = tpu.matmul %11, %12, %cst {dimension_numbers = #tpu.dot_dimension_numbers<[1], [0], [0], [1], [0, 0, 1, 1], [], []>} : vector<196x1152xf32>, vector<1152x128xf32>, vector<196x128xf32> -> vector<196x128xf32>
    %c0_11 = arith.constant 0 : index
    %c0_12 = arith.constant 0 : index
    %14 = vector.load %arg3[%c0_11, %c0_12] : memref<1x128xf32, #tpu.memory_space<vmem>>, vector<1x128xf32>
    %15 = vector.broadcast %14 : vector<1x128xf32> to vector<196x128xf32>
    %16 = arith.addf %13, %15 : vector<196x128xf32>
    %cst_13 = arith.constant 0.000000e+00 : f32
    %17 = vector.broadcast %cst_13 : f32 to vector<196x128xf32>
    %18 = arith.maximumf %16, %17 : vector<196x128xf32>
    %19 = vector.shape_cast %18 : vector<196x128xf32> to vector<14x14x128xf32>
    %c0_14 = arith.constant 0 : index
    %c0_15 = arith.constant 0 : index
    %c0_16 = arith.constant 0 : index
    %20 = vector.load %arg8[%c0_14, %c0_15, %c0_16] : memref<14x14x128xf32, #tpu.memory_space<vmem>>, vector<14x14x128xf32>
    tpu.vector_store %arg8[%c0_14, %c0_15, %c0_16], %19 {strides = array<i32>} : memref<14x14x128xf32, #tpu.memory_space<vmem>>, vector<14x14x128xf32>,
    %c0_17 = arith.constant 0 : index
    %c0_18 = arith.constant 0 : index
    %c0_19 = arith.constant 0 : index
    %21 = vector.load %arg8[%c0_17, %c0_18, %c0_19] : memref<14x14x128xf32, #tpu.memory_space<vmem>>, vector<14x12x128xf32>
    %c0_20 = arith.constant 0 : index
    %c1_21 = arith.constant 1 : index
    %c0_22 = arith.constant 0 : index
    %22 = vector.load %arg8[%c0_20, %c1_21, %c0_22] : memref<14x14x128xf32, #tpu.memory_space<vmem>>, vector<14x12x128xf32>
    %c0_23 = arith.constant 0 : index
    %c2_24 = arith.constant 2 : index
    %c0_25 = arith.constant 0 : index
    %23 = vector.load %arg8[%c0_23, %c2_24, %c0_25] : memref<14x14x128xf32, #tpu.memory_space<vmem>>, vector<14x12x128xf32>
    %24 = tpu.concatenate %21, %22, %23 in 2 : vector<14x12x128xf32>, vector<14x12x128xf32>, vector<14x12x128xf32> -> vector<14x12x384xf32>
    %25 = vector.extract_strided_slice %24 {offsets = [0, 0, 0], sizes = [12, 12, 384], strides = [1, 1, 1]} : vector<14x12x384xf32> to vector<12x12x384xf32>
    %26 = vector.extract_strided_slice %24 {offsets = [1, 0, 0], sizes = [12, 12, 384], strides = [1, 1, 1]} : vector<14x12x384xf32> to vector<12x12x384xf32>
    %27 = vector.extract_strided_slice %24 {offsets = [2, 0, 0], sizes = [12, 12, 384], strides = [1, 1, 1]} : vector<14x12x384xf32> to vector<12x12x384xf32>
    %28 = tpu.concatenate %25, %26, %27 in 2 : vector<12x12x384xf32>, vector<12x12x384xf32>, vector<12x12x384xf32> -> vector<12x12x1152xf32>
    %29 = vector.shape_cast %28 : vector<12x12x1152xf32> to vector<144x1152xf32>
    %c0_26 = arith.constant 0 : index
    %c0_27 = arith.constant 0 : index
    %30 = vector.load %arg4[%c0_26, %c0_27] : memref<1152x128xf32, #tpu.memory_space<vmem>>, vector<1152x128xf32>
    %cst_28 = arith.constant dense<0.000000e+00> : vector<144x128xf32>
    %31 = tpu.matmul %29, %30, %cst_28 {dimension_numbers = #tpu.dot_dimension_numbers<[1], [0], [0], [1], [0, 0, 1, 1], [], []>} : vector<144x1152xf32>, vector<1152x128xf32>, vector<144x128xf32> -> vector<144x128xf32>
    %c0_29 = arith.constant 0 : index
    %c0_30 = arith.constant 0 : index
    %32 = vector.load %arg5[%c0_29, %c0_30] : memref<1x128xf32, #tpu.memory_space<vmem>>, vector<1x128xf32>
    %33 = vector.broadcast %32 : vector<1x128xf32> to vector<144x128xf32>
    %34 = arith.addf %31, %33 : vector<144x128xf32>
    %cst_31 = arith.constant 0.000000e+00 : f32
    %35 = vector.broadcast %cst_31 : f32 to vector<144x128xf32>
    %36 = arith.maximumf %34, %35 : vector<144x128xf32>
    %37 = vector.shape_cast %36 : vector<144x128xf32> to vector<12x12x128xf32>
    %c0_32 = arith.constant 0 : index
    %c0_33 = arith.constant 0 : index
    %c0_34 = arith.constant 0 : index
    %c0_35 = arith.constant 0 : index
    %38 = vector.load %arg6[%c0_32, %c0_33, %c0_34, %c0_35] : memref<1x12x12x128xf32, #tpu.memory_space<vmem>>, vector<1x12x12x128xf32>
    %39 = vector.shape_cast %38 : vector<1x12x12x128xf32> to vector<12x12x128xf32>
    %40 = vector.shape_cast %37 : vector<12x12x128xf32> to vector<1x12x12x128xf32>
    tpu.vector_store %arg6[%c0_32, %c0_33, %c0_34, %c0_35], %40 {strides = array<i32>} : memref<1x12x12x128xf32, #tpu.memory_space<vmem>>, vector<1x12x12x128xf32>,
    %41 = vector.shape_cast %37 : vector<12x12x128xf32> to vector<12x6x2x128xf32>
    %42 = vector.extract_strided_slice %41 {offsets = [0, 0, 0, 0], sizes = [12, 6, 1, 128], strides = [1, 1, 1, 1]} : vector<12x6x2x128xf32> to vector<12x6x1x128xf32>
    %43 = vector.shape_cast %42 : vector<12x6x1x128xf32> to vector<12x6x128xf32>
    %44 = vector.extract_strided_slice %41 {offsets = [0, 0, 1, 0], sizes = [12, 6, 1, 128], strides = [1, 1, 1, 1]} : vector<12x6x2x128xf32> to vector<12x6x1x128xf32>
    %45 = vector.shape_cast %44 : vector<12x6x1x128xf32> to vector<12x6x128xf32>
    %46 = arith.maximumf %43, %45 : vector<12x6x128xf32>
    %47 = vector.shape_cast %46 : vector<12x6x128xf32> to vector<6x2x6x128xf32>
    %48 = vector.extract_strided_slice %47 {offsets = [0, 0, 0, 0], sizes = [6, 1, 6, 128], strides = [1, 1, 1, 1]} : vector<6x2x6x128xf32> to vector<6x1x6x128xf32>
    %49 = vector.shape_cast %48 : vector<6x1x6x128xf32> to vector<6x6x128xf32>
    %50 = vector.extract_strided_slice %47 {offsets = [0, 1, 0, 0], sizes = [6, 1, 6, 128], strides = [1, 1, 1, 1]} : vector<6x2x6x128xf32> to vector<6x1x6x128xf32>
    %51 = vector.shape_cast %50 : vector<6x1x6x128xf32> to vector<6x6x128xf32>
    %52 = arith.maximumf %49, %51 : vector<6x6x128xf32>
    %c0_36 = arith.constant 0 : index
    %c0_37 = arith.constant 0 : index
    %c0_38 = arith.constant 0 : index
    %c0_39 = arith.constant 0 : index
    %53 = vector.load %arg7[%c0_36, %c0_37, %c0_38, %c0_39] : memref<1x6x6x128xf32, #tpu.memory_space<vmem>>, vector<1x6x6x128xf32>
    %54 = vector.shape_cast %53 : vector<1x6x6x128xf32> to vector<6x6x128xf32>
    %55 = vector.shape_cast %52 : vector<6x6x128xf32> to vector<1x6x6x128xf32>
    tpu.vector_store %arg7[%c0_36, %c0_37, %c0_38, %c0_39], %55 {strides = array<i32>} : memref<1x6x6x128xf32, #tpu.memory_space<vmem>>, vector<1x6x6x128xf32>,
    return
  }
  func.func @transform_0(%arg0: i32) -> (i32, i32, i32, i32) {
    %c0_i32 = arith.constant 0 : i32
    %c0_i32_0 = arith.constant 0 : i32
    %c0_i32_1 = arith.constant 0 : i32
    %c0_i32_2 = arith.constant 0 : i32
    return %arg0, %c0_i32, %c0_i32_0, %c0_i32_1 : i32, i32, i32, i32
  }
  func.func @transform_1(%arg0: i32) -> (i32, i32) {
    %c0_i32 = arith.constant 0 : i32
    %c0_i32_0 = arith.constant 0 : i32
    %c0_i32_1 = arith.constant 0 : i32
    return %c0_i32, %c0_i32_0 : i32, i32
  }
  func.func @transform_2(%arg0: i32) -> (i32, i32) {
    %c0_i32 = arith.constant 0 : i32
    %c0_i32_0 = arith.constant 0 : i32
    %c0_i32_1 = arith.constant 0 : i32
    return %c0_i32, %c0_i32_0 : i32, i32
  }
  func.func @transform_3(%arg0: i32) -> (i32, i32) {
    %c0_i32 = arith.constant 0 : i32
    %c0_i32_0 = arith.constant 0 : i32
    %c0_i32_1 = arith.constant 0 : i32
    return %c0_i32, %c0_i32_0 : i32, i32
  }
  func.func @transform_4(%arg0: i32) -> (i32, i32) {
    %c0_i32 = arith.constant 0 : i32
    %c0_i32_0 = arith.constant 0 : i32
    %c0_i32_1 = arith.constant 0 : i32
    return %c0_i32, %c0_i32_0 : i32, i32
  }
  func.func @transform_5(%arg0: i32) -> (i32, i32, i32, i32) {
    %c0_i32 = arith.constant 0 : i32
    %c0_i32_0 = arith.constant 0 : i32
    %c0_i32_1 = arith.constant 0 : i32
    %c0_i32_2 = arith.constant 0 : i32
    return %arg0, %c0_i32, %c0_i32_0, %c0_i32_1 : i32, i32, i32, i32
  }
  func.func @transform_6(%arg0: i32) -> (i32, i32, i32, i32) {
    %c0_i32 = arith.constant 0 : i32
    %c0_i32_0 = arith.constant 0 : i32
    %c0_i32_1 = arith.constant 0 : i32
    %c0_i32_2 = arith.constant 0 : i32
    return %arg0, %c0_i32, %c0_i32_0, %c0_i32_1 : i32, i32, i32, i32
  }
}

module attributes {stable_mosaic.version = 11 : i64} {
  func.func @_encoder_level_kernel(%arg0: i32, %arg1: memref<1x6x6x128xf32, #tpu.memory_space<vmem>>, %arg2: memref<1152x128xf32, #tpu.memory_space<vmem>>, %arg3: memref<1x128xf32, #tpu.memory_space<vmem>>, %arg4: memref<1152x128xf32, #tpu.memory_space<vmem>>, %arg5: memref<1x128xf32, #tpu.memory_space<vmem>>, %arg6: memref<1x2x2x128xf32, #tpu.memory_space<vmem>>, %arg7: memref<1x1x1x128xf32, #tpu.memory_space<vmem>>, %arg8: memref<4x4x128xf32, #tpu.memory_space<vmem>>) attributes {dimension_semantics = [#tpu.dimension_semantics<parallel>], iteration_bounds = array<i64: 2>, scalar_prefetch = 0 : i64, scratch_operands = 1 : i64, tpu.core_type = #tpu.core_type<tc>, window_params = [{transform_indices = @transform_0, window_bounds = array<i64: 1, 6, 6, 128>}, {pipeline_mode = #tpu.pipeline_mode<synchronous>, transform_indices = @transform_1, window_bounds = array<i64: 1152, 128>}, {pipeline_mode = #tpu.pipeline_mode<synchronous>, transform_indices = @transform_2, window_bounds = array<i64: 1, 128>}, {pipeline_mode = #tpu.pipeline_mode<synchronous>, transform_indices = @transform_3, window_bounds = array<i64: 1152, 128>}, {pipeline_mode = #tpu.pipeline_mode<synchronous>, transform_indices = @transform_4, window_bounds = array<i64: 1, 128>}, {transform_indices = @transform_5, window_bounds = array<i64: 1, 2, 2, 128>}, {transform_indices = @transform_6, window_bounds = array<i64: 1, 1, 1, 128>}]} {
    %c0 = arith.constant 0 : index
    %c0_0 = arith.constant 0 : index
    %c0_1 = arith.constant 0 : index
    %c0_2 = arith.constant 0 : index
    %0 = vector.load %arg1[%c0, %c0_0, %c0_1, %c0_2] : memref<1x6x6x128xf32, #tpu.memory_space<vmem>>, vector<1x6x4x128xf32>
    %1 = vector.shape_cast %0 : vector<1x6x4x128xf32> to vector<6x4x128xf32>
    %c0_3 = arith.constant 0 : index
    %c0_4 = arith.constant 0 : index
    %c1 = arith.constant 1 : index
    %c0_5 = arith.constant 0 : index
    %2 = vector.load %arg1[%c0_3, %c0_4, %c1, %c0_5] : memref<1x6x6x128xf32, #tpu.memory_space<vmem>>, vector<1x6x4x128xf32>
    %3 = vector.shape_cast %2 : vector<1x6x4x128xf32> to vector<6x4x128xf32>
    %c0_6 = arith.constant 0 : index
    %c0_7 = arith.constant 0 : index
    %c2 = arith.constant 2 : index
    %c0_8 = arith.constant 0 : index
    %4 = vector.load %arg1[%c0_6, %c0_7, %c2, %c0_8] : memref<1x6x6x128xf32, #tpu.memory_space<vmem>>, vector<1x6x4x128xf32>
    %5 = vector.shape_cast %4 : vector<1x6x4x128xf32> to vector<6x4x128xf32>
    %6 = tpu.concatenate %1, %3, %5 in 2 : vector<6x4x128xf32>, vector<6x4x128xf32>, vector<6x4x128xf32> -> vector<6x4x384xf32>
    %7 = vector.extract_strided_slice %6 {offsets = [0, 0, 0], sizes = [4, 4, 384], strides = [1, 1, 1]} : vector<6x4x384xf32> to vector<4x4x384xf32>
    %8 = vector.extract_strided_slice %6 {offsets = [1, 0, 0], sizes = [4, 4, 384], strides = [1, 1, 1]} : vector<6x4x384xf32> to vector<4x4x384xf32>
    %9 = vector.extract_strided_slice %6 {offsets = [2, 0, 0], sizes = [4, 4, 384], strides = [1, 1, 1]} : vector<6x4x384xf32> to vector<4x4x384xf32>
    %10 = tpu.concatenate %7, %8, %9 in 2 : vector<4x4x384xf32>, vector<4x4x384xf32>, vector<4x4x384xf32> -> vector<4x4x1152xf32>
    %11 = vector.shape_cast %10 : vector<4x4x1152xf32> to vector<16x1152xf32>
    %c0_9 = arith.constant 0 : index
    %c0_10 = arith.constant 0 : index
    %12 = vector.load %arg2[%c0_9, %c0_10] : memref<1152x128xf32, #tpu.memory_space<vmem>>, vector<1152x128xf32>
    %cst = arith.constant dense<0.000000e+00> : vector<16x128xf32>
    %13 = tpu.matmul %11, %12, %cst {dimension_numbers = #tpu.dot_dimension_numbers<[1], [0], [0], [1], [0, 0, 1, 1], [], []>} : vector<16x1152xf32>, vector<1152x128xf32>, vector<16x128xf32> -> vector<16x128xf32>
    %c0_11 = arith.constant 0 : index
    %c0_12 = arith.constant 0 : index
    %14 = vector.load %arg3[%c0_11, %c0_12] : memref<1x128xf32, #tpu.memory_space<vmem>>, vector<1x128xf32>
    %15 = vector.broadcast %14 : vector<1x128xf32> to vector<16x128xf32>
    %16 = arith.addf %13, %15 : vector<16x128xf32>
    %cst_13 = arith.constant 0.000000e+00 : f32
    %17 = vector.broadcast %cst_13 : f32 to vector<16x128xf32>
    %18 = arith.maximumf %16, %17 : vector<16x128xf32>
    %19 = vector.shape_cast %18 : vector<16x128xf32> to vector<4x4x128xf32>
    %c0_14 = arith.constant 0 : index
    %c0_15 = arith.constant 0 : index
    %c0_16 = arith.constant 0 : index
    %20 = vector.load %arg8[%c0_14, %c0_15, %c0_16] : memref<4x4x128xf32, #tpu.memory_space<vmem>>, vector<4x4x128xf32>
    tpu.vector_store %arg8[%c0_14, %c0_15, %c0_16], %19 {strides = array<i32>} : memref<4x4x128xf32, #tpu.memory_space<vmem>>, vector<4x4x128xf32>,
    %c0_17 = arith.constant 0 : index
    %c0_18 = arith.constant 0 : index
    %c0_19 = arith.constant 0 : index
    %21 = vector.load %arg8[%c0_17, %c0_18, %c0_19] : memref<4x4x128xf32, #tpu.memory_space<vmem>>, vector<4x2x128xf32>
    %c0_20 = arith.constant 0 : index
    %c1_21 = arith.constant 1 : index
    %c0_22 = arith.constant 0 : index
    %22 = vector.load %arg8[%c0_20, %c1_21, %c0_22] : memref<4x4x128xf32, #tpu.memory_space<vmem>>, vector<4x2x128xf32>
    %c0_23 = arith.constant 0 : index
    %c2_24 = arith.constant 2 : index
    %c0_25 = arith.constant 0 : index
    %23 = vector.load %arg8[%c0_23, %c2_24, %c0_25] : memref<4x4x128xf32, #tpu.memory_space<vmem>>, vector<4x2x128xf32>
    %24 = tpu.concatenate %21, %22, %23 in 2 : vector<4x2x128xf32>, vector<4x2x128xf32>, vector<4x2x128xf32> -> vector<4x2x384xf32>
    %25 = vector.extract_strided_slice %24 {offsets = [0, 0, 0], sizes = [2, 2, 384], strides = [1, 1, 1]} : vector<4x2x384xf32> to vector<2x2x384xf32>
    %26 = vector.extract_strided_slice %24 {offsets = [1, 0, 0], sizes = [2, 2, 384], strides = [1, 1, 1]} : vector<4x2x384xf32> to vector<2x2x384xf32>
    %27 = vector.extract_strided_slice %24 {offsets = [2, 0, 0], sizes = [2, 2, 384], strides = [1, 1, 1]} : vector<4x2x384xf32> to vector<2x2x384xf32>
    %28 = tpu.concatenate %25, %26, %27 in 2 : vector<2x2x384xf32>, vector<2x2x384xf32>, vector<2x2x384xf32> -> vector<2x2x1152xf32>
    %29 = vector.shape_cast %28 : vector<2x2x1152xf32> to vector<4x1152xf32>
    %c0_26 = arith.constant 0 : index
    %c0_27 = arith.constant 0 : index
    %30 = vector.load %arg4[%c0_26, %c0_27] : memref<1152x128xf32, #tpu.memory_space<vmem>>, vector<1152x128xf32>
    %cst_28 = arith.constant dense<0.000000e+00> : vector<4x128xf32>
    %31 = tpu.matmul %29, %30, %cst_28 {dimension_numbers = #tpu.dot_dimension_numbers<[1], [0], [0], [1], [0, 0, 1, 1], [], []>} : vector<4x1152xf32>, vector<1152x128xf32>, vector<4x128xf32> -> vector<4x128xf32>
    %c0_29 = arith.constant 0 : index
    %c0_30 = arith.constant 0 : index
    %32 = vector.load %arg5[%c0_29, %c0_30] : memref<1x128xf32, #tpu.memory_space<vmem>>, vector<1x128xf32>
    %33 = vector.broadcast %32 : vector<1x128xf32> to vector<4x128xf32>
    %34 = arith.addf %31, %33 : vector<4x128xf32>
    %cst_31 = arith.constant 0.000000e+00 : f32
    %35 = vector.broadcast %cst_31 : f32 to vector<4x128xf32>
    %36 = arith.maximumf %34, %35 : vector<4x128xf32>
    %37 = vector.shape_cast %36 : vector<4x128xf32> to vector<2x2x128xf32>
    %c0_32 = arith.constant 0 : index
    %c0_33 = arith.constant 0 : index
    %c0_34 = arith.constant 0 : index
    %c0_35 = arith.constant 0 : index
    %38 = vector.load %arg6[%c0_32, %c0_33, %c0_34, %c0_35] : memref<1x2x2x128xf32, #tpu.memory_space<vmem>>, vector<1x2x2x128xf32>
    %39 = vector.shape_cast %38 : vector<1x2x2x128xf32> to vector<2x2x128xf32>
    %40 = vector.shape_cast %37 : vector<2x2x128xf32> to vector<1x2x2x128xf32>
    tpu.vector_store %arg6[%c0_32, %c0_33, %c0_34, %c0_35], %40 {strides = array<i32>} : memref<1x2x2x128xf32, #tpu.memory_space<vmem>>, vector<1x2x2x128xf32>,
    %41 = vector.shape_cast %37 : vector<2x2x128xf32> to vector<2x1x2x128xf32>
    %42 = vector.extract_strided_slice %41 {offsets = [0, 0, 0, 0], sizes = [2, 1, 1, 128], strides = [1, 1, 1, 1]} : vector<2x1x2x128xf32> to vector<2x1x1x128xf32>
    %43 = vector.shape_cast %42 : vector<2x1x1x128xf32> to vector<2x1x128xf32>
    %44 = vector.extract_strided_slice %41 {offsets = [0, 0, 1, 0], sizes = [2, 1, 1, 128], strides = [1, 1, 1, 1]} : vector<2x1x2x128xf32> to vector<2x1x1x128xf32>
    %45 = vector.shape_cast %44 : vector<2x1x1x128xf32> to vector<2x1x128xf32>
    %46 = arith.maximumf %43, %45 : vector<2x1x128xf32>
    %47 = vector.shape_cast %46 : vector<2x1x128xf32> to vector<1x2x1x128xf32>
    %48 = vector.extract_strided_slice %47 {offsets = [0, 0, 0, 0], sizes = [1, 1, 1, 128], strides = [1, 1, 1, 1]} : vector<1x2x1x128xf32> to vector<1x1x1x128xf32>
    %49 = vector.shape_cast %48 : vector<1x1x1x128xf32> to vector<1x1x128xf32>
    %50 = vector.extract_strided_slice %47 {offsets = [0, 1, 0, 0], sizes = [1, 1, 1, 128], strides = [1, 1, 1, 1]} : vector<1x2x1x128xf32> to vector<1x1x1x128xf32>
    %51 = vector.shape_cast %50 : vector<1x1x1x128xf32> to vector<1x1x128xf32>
    %52 = arith.maximumf %49, %51 : vector<1x1x128xf32>
    %c0_36 = arith.constant 0 : index
    %c0_37 = arith.constant 0 : index
    %c0_38 = arith.constant 0 : index
    %c0_39 = arith.constant 0 : index
    %53 = vector.load %arg7[%c0_36, %c0_37, %c0_38, %c0_39] : memref<1x1x1x128xf32, #tpu.memory_space<vmem>>, vector<1x1x1x128xf32>
    %54 = vector.shape_cast %53 : vector<1x1x1x128xf32> to vector<1x1x128xf32>
    %55 = vector.shape_cast %52 : vector<1x1x128xf32> to vector<1x1x1x128xf32>
    tpu.vector_store %arg7[%c0_36, %c0_37, %c0_38, %c0_39], %55 {strides = array<i32>} : memref<1x1x1x128xf32, #tpu.memory_space<vmem>>, vector<1x1x1x128xf32>,
    return
  }
  func.func @transform_0(%arg0: i32) -> (i32, i32, i32, i32) {
    %c0_i32 = arith.constant 0 : i32
    %c0_i32_0 = arith.constant 0 : i32
    %c0_i32_1 = arith.constant 0 : i32
    %c0_i32_2 = arith.constant 0 : i32
    return %arg0, %c0_i32, %c0_i32_0, %c0_i32_1 : i32, i32, i32, i32
  }
  func.func @transform_1(%arg0: i32) -> (i32, i32) {
    %c0_i32 = arith.constant 0 : i32
    %c0_i32_0 = arith.constant 0 : i32
    %c0_i32_1 = arith.constant 0 : i32
    return %c0_i32, %c0_i32_0 : i32, i32
  }
  func.func @transform_2(%arg0: i32) -> (i32, i32) {
    %c0_i32 = arith.constant 0 : i32
    %c0_i32_0 = arith.constant 0 : i32
    %c0_i32_1 = arith.constant 0 : i32
    return %c0_i32, %c0_i32_0 : i32, i32
  }
  func.func @transform_3(%arg0: i32) -> (i32, i32) {
    %c0_i32 = arith.constant 0 : i32
    %c0_i32_0 = arith.constant 0 : i32
    %c0_i32_1 = arith.constant 0 : i32
    return %c0_i32, %c0_i32_0 : i32, i32
  }
  func.func @transform_4(%arg0: i32) -> (i32, i32) {
    %c0_i32 = arith.constant 0 : i32
    %c0_i32_0 = arith.constant 0 : i32
    %c0_i32_1 = arith.constant 0 : i32
    return %c0_i32, %c0_i32_0 : i32, i32
  }
  func.func @transform_5(%arg0: i32) -> (i32, i32, i32, i32) {
    %c0_i32 = arith.constant 0 : i32
    %c0_i32_0 = arith.constant 0 : i32
    %c0_i32_1 = arith.constant 0 : i32
    %c0_i32_2 = arith.constant 0 : i32
    return %arg0, %c0_i32, %c0_i32_0, %c0_i32_1 : i32, i32, i32, i32
  }
  func.func @transform_6(%arg0: i32) -> (i32, i32, i32, i32) {
    %c0_i32 = arith.constant 0 : i32
    %c0_i32_0 = arith.constant 0 : i32
    %c0_i32_1 = arith.constant 0 : i32
    %c0_i32_2 = arith.constant 0 : i32
    return %arg0, %c0_i32, %c0_i32_0, %c0_i32_1 : i32, i32, i32, i32
  }
}

</mosaic_0001>

<bundles_post_ra>
// kernel: encoder_forward.3
= control target key start
LH: loop header
LB: loop body
LE: loop exit
PB: predicated region body
PF: predicated region fallthrough
CT: control target
= control target key end

     0   :  { %12 = vsyncpa [#allocation4], 0  ;;  %s3640_s0 = inlined_call_operand.vmem [shape: f32[2,6,6,128], index: 0, kind: input, shape index: {}]   ;;  %s3641_s1 = inlined_call_operand.vmem [shape: f32[1152,128], index: 1, kind: input, shape index: {}]   ;;  %s3642_s2 = inlined_call_operand.vmem [shape: f32[1,128], index: 2, kind: input, shape index: {}]   ;;  %s3643_s3 = inlined_call_operand.vmem [shape: f32[1152,128], index: 3, kind: input, shape index: {}]   ;;  %s3644_s4 = inlined_call_operand.vmem [shape: f32[1,128], index: 4, kind: input, shape index: {}]   ;;  %s3645_s5 = inlined_call_operand.vmem [shape: f32[2,2,2,128], index: 5, kind: output, shape index: {0}]   ;;  %s3646_s6 = inlined_call_operand.hbm [shape: f32[2,1,1,128], index: 6, kind: output, shape index: {1}]  }
   0x1   :  { %14 = vsyncpa [#allocation4 + $0x1], 0  ;;  %s2574_s21 = smov 0   ;;  %s2576_s22 = smov 0  }
   0x2   :  { %s2578_s23 = smov 0   ;;  %s2580_s24 = smov 0  }
   0x3 LB: > { %s2595_s25 = sadd.s32 4294967295, %s2532_s24   ;;  %s1667_s26 = sadd.s32 4294967294, %s2532_s24   ;;  %s2532_s24 = sphi %s2580_s24, %s3652_s24   ;;  %s2528_s23 = sphi %s2578_s23, %s3651_s23   ;;  %s2524_s22 = sphi %s2576_s22, %s3650_s22   ;;  %s2520_s21 = sphi %s2574_s21, %s3649_s21  }
   0x4   : > { %s2599_s27 = sadd.s32 1, %s2532_s24   ;;  %s163_s28 = sadd.s32 1, %s2528_s23 }
   0x5   : > { %s160_s29 = ssub.s32 %s2532_s24, %s2599_s27  ;;  %p173_p0 = scmp.ne.s32.totalorder %s2528_s23, %s2524_s22 }
   0x6   : > { %p161_p1 = scmp.eq.s32.totalorder %s160_s29, 0  ;;  %p174_p2 = scmp.eq.s32.totalorder %s2595_s25, 1 }
   0x7   : > { %p179_p3 = scmp.ne.s32.totalorder %s2524_s22, %s2520_s21  ;;  %p180_p4 = scmp.eq.s32.totalorder %s1667_s26, 1 }
   0x8   : > { %s2610_s30 = scalar_select %p161_p1, %s2528_s23, %s163_s28  }
   0x9   : > { %p2612_p5 = por %p174_p2, %p173_p0  ;;  %p2616_p6 = por %p180_p4, %p179_p3 }
   0xa   : > { %p1670_p7 = scmp.ge.s32.totalorder %s2532_s24, 1  ;;  %p218_p8 = scmp.lt.s32.totalorder %s2532_s24, 3 }
   0xc   : > { %p219_p9 = pnand %p1670_p7, %p218_p8 }
   0xd   : > { %v328_v0 = vld [vmem:[%s3641_s1 + $0x80] sm:$0xff] (!%p219_p9)  ;;  %v329_v1 = vld [vmem:[%s3641_s1 + $0x88] sm:$0xff] (!%p219_p9)  ;;  %v330_v11 = vld [vmem:[%s3641_s1 + $0x90] sm:$0xff] (!%p219_p9)  ;;  %p252_p10 = scmp.lt.s32.totalorder (!%p219_p9), %s2595_s25, 1  ;;  %vm2536_vm0 = vmmov (!%p219_p9), 0   ;;  %s250_s28 = sand.u32 (!%p219_p9), 1, %s2524_s22  }
   0xe   : > { %222 = sbr.rel (%p219_p9) target bundleno = 655 (0x28f), region = 40  ;;  %v312_v2 = vld [vmem:[%s3641_s1] sm:$0xff] (!%p219_p9)  ;;  %v2099_v3 = vpack.c.bf16 (!%p219_p9), %v329_v1, %v328_v0  ;;  %v313_v4 = vld [vmem:[%s3641_s1 + $0x8] sm:$0xff] (!%p219_p9)  ;;  %v331_v13 = vld [vmem:[%s3641_s1 + $0x98] sm:$0xff] (!%p219_p9)  ;;  %s1698_s29 = sshll.u32 (!%p219_p9), %s2595_s25, 4 }
   0xf   : > { %v360_v5 = vld [vmem:[%s3641_s1 + $0x180] sm:$0xff] (!%p219_p9)  ;;  %v361_v6 = vld [vmem:[%s3641_s1 + $0x188] sm:$0xff] (!%p219_p9)  ;;  %v2101_v7 = vpack.c.bf16 (!%p219_p9), %v313_v4, %v312_v2  ;;  %v314_v14 = vld [vmem:[%s3641_s1 + $0x10] sm:$0xff] (!%p219_p9)  ;;  %v2103_v16 = vpack.c.bf16 (!%p219_p9), %v331_v13, %v330_v11  ;;  %s251_s10 = scalar_lea.vmem (!%p219_p9), [#allocation3], %s250_s28  ;;  %s1572_s13 = scalar_lea.sflag (!%p219_p9), [#allocation4], %s250_s28 }
  0x10   : > { %v2131_v8 = vpack.c.bf16 (!%p219_p9), %v361_v6, %v360_v5  ;;  %v344_v9 = vld [vmem:[%s3641_s1 + $0x100] sm:$0xff] (!%p219_p9)  ;;  %v345_v10 = vld [vmem:[%s3641_s1 + $0x108] sm:$0xff] (!%p219_p9)  ;;  %2100 = vmatprep.subr.bf16.mxu0 (!%p219_p9), %v2099_v3  ;;  %v315_v15 = vld [vmem:[%s3641_s1 + $0x18] sm:$0xff] (!%p219_p9) }
  0x11   : > { %v2133_v12 = vpack.c.bf16 (!%p219_p9), %v345_v10, %v344_v9  ;;  %2102 = vmatpush3.bf16.msra.mxu0 (!%p219_p9), %v2101_v7  ;;  %v2105_v17 = vpack.c.bf16 (!%p219_p9), %v315_v15, %v314_v14  ;;  %v362_v18 = vld [vmem:[%s3641_s1 + $0x190] sm:$0xff] (!%p219_p9)  ;;  %v363_v19 = vld [vmem:[%s3641_s1 + $0x198] sm:$0xff] (!%p219_p9)  ;;  %v332_v23 = vld [vmem:[%s3641_s1 + $0xa0] sm:$0xff] (!%p219_p9) }
  0x12   : > { %2132 = vmatprep.subr.bf16.mxu1 (!%p219_p9), %v2131_v8  ;;  %v346_v20 = vld [vmem:[%s3641_s1 + $0x110] sm:$0xff] (!%p219_p9)  ;;  %v2135_v21 = vpack.c.bf16 (!%p219_p9), %v363_v19, %v362_v18  ;;  %v347_v22 = vld [vmem:[%s3641_s1 + $0x118] sm:$0xff] (!%p219_p9)  ;;  %v333_v24 = vld [vmem:[%s3641_s1 + $0xa8] sm:$0xff] (!%p219_p9)  ;;  %2104 = vmatprep.subr.bf16.mxu0 (!%p219_p9), %v2103_v16 }
  0x13   : > { %2134 = vmatpush3.bf16.msra.mxu1 (!%p219_p9), %v2133_v12  ;;  %v2137_v25 = vpack.c.bf16 (!%p219_p9), %v347_v22, %v346_v20  ;;  %v2107_v26 = vpack.c.bf16 (!%p219_p9), %v333_v24, %v332_v23  ;;  %v316_v27 = vld [vmem:[%s3641_s1 + $0x20] sm:$0xff] (!%p219_p9)  ;;  %v317_v28 = vld [vmem:[%s3641_s1 + $0x28] sm:$0xff] (!%p219_p9)  ;;  %v334_v35 = vld [vmem:[%s3641_s1 + $0xb0] sm:$0xff] (!%p219_p9) }
  0x14   : > { %v364_v29 = vld [vmem:[%s3641_s1 + $0x1a0] sm:$0xff] (!%p219_p9)  ;;  %2136 = vmatprep.subr.bf16.mxu1 (!%p219_p9), %v2135_v21  ;;  %v365_v30 = vld [vmem:[%s3641_s1 + $0x1a8] sm:$0xff] (!%p219_p9)  ;;  %v2109_v33 = vpack.c.bf16 (!%p219_p9), %v317_v28, %v316_v27  ;;  %v335_v36 = vld [vmem:[%s3641_s1 + $0xb8] sm:$0xff] (!%p219_p9) }
  0x15   : > { %v348_v31 = vld [vmem:[%s3641_s1 + $0x120] sm:$0xff]  ;;  %v349_v32 = vld [vmem:[%s3641_s1 + $0x128] sm:$0xff]  ;;  %2106 = vmatpush3.bf16.msra.mxu0 %v2105_v17  ;;  %v2139_v34 = vpack.c.bf16 %v365_v30, %v364_v29  ;;  %v318_v37 = vld [vmem:[%s3641_s1 + $0x30] sm:$0xff]  ;;  %v2111_v39 = vpack.c.bf16 %v335_v36, %v334_v35  ;;  %s2716_s9 = scalar_select %p252_p10, %s2595_s25, 1 }
  0x16   : > { %2108 = vmatprep.subr.bf16.mxu0 %v2107_v26  ;;  %v2141_v38 = vpack.c.bf16 %v349_v32, %v348_v31  ;;  %v319_v40 = vld [vmem:[%s3641_s1 + $0x38] sm:$0xff]  ;;  %v366_v41 = vld [vmem:[%s3641_s1 + $0x1b0] sm:$0xff]  ;;  %v336_v46 = vld [vmem:[%s3641_s1 + $0xc0] sm:$0xff]  ;;  %s2538_s25 = smov [#allocation3]  }
  0x17   : > { %2138 = vmatpush3.bf16.msra.mxu1 %v2137_v25  ;;  %v367_v42 = vld [vmem:[%s3641_s1 + $0x1b8] sm:$0xff]  ;;  %v350_v44 = vld [vmem:[%s3641_s1 + $0x130] sm:$0xff]  ;;  %v337_v47 = vld [vmem:[%s3641_s1 + $0xc8] sm:$0xff]  ;;  %v2113_v48 = vpack.c.bf16 %v319_v40, %v318_v37  ;;  %s2411_s14 = smul.u32 48, %s2716_s9  ;;  %s1701_s17 = sshll.u32 %s2716_s9, 2 }
  0x18   : > { %2140 = vmatprep.subr.bf16.mxu1 %v2139_v34  ;;  %v2143_v43 = vpack.c.bf16 %v367_v42, %v366_v41  ;;  %v351_v45 = vld [vmem:[%s3641_s1 + $0x138] sm:$0xff]  ;;  %v368_v49 = vld [vmem:[%s3641_s1 + $0x1c0] sm:$0xff]  ;;  %v369_v50 = vld [vmem:[%s3641_s1 + $0x1c8] sm:$0xff]  ;;  %v2115_v52 = vpack.c.bf16 %v337_v47, %v336_v46  ;;  %s261_s26 = scalar_lea.vmem %s3645_s5, %s1701_s17  ;;  %s1587_s9 = sshll.u32 %s251_s10, 4  ;;  %s3600_s9 = int_to_ptr.vmem [resolvable:$true] %s1587_s9 }
  0x19   : > { %2110 = vmatpush3.bf16.msra.mxu0 %v2109_v33  ;;  %v2145_v51 = vpack.c.bf16 %v351_v45, %v350_v44  ;;  %v320_v53 = vld [vmem:[%s3641_s1 + $0x40] sm:$0xff]  ;;  %v321_v54 = vld [vmem:[%s3641_s1 + $0x48] sm:$0xff]  ;;  %v2147_v56 = vpack.c.bf16 %v369_v50, %v368_v49  ;;  %v338_v58 = vld [vmem:[%s3641_s1 + $0xd0] sm:$0xff]  ;;  %s2773_s20 = scalar_lea.vmem %s3640_s0, %s2411_s14  ;;  %s2470_s15 = scalar_lea.vmem %s3600_s9, 16 }
  0x1a   : > { %2112 = vmatprep.subr.bf16.mxu0 %v2111_v39  ;;  %v352_v55 = vld [vmem:[%s3641_s1 + $0x140] sm:$0xff]  ;;  %v353_v57 = vld [vmem:[%s3641_s1 + $0x148] sm:$0xff]  ;;  %v339_v59 = vld [vmem:[%s3641_s1 + $0xd8] sm:$0xff]  ;;  %v2117_v62 = vpack.c.bf16 %v321_v54, %v320_v53  ;;  %p2471_p11 = scmp.ne.s32.totalorder %s3600_s9, %s2470_s15  ;;  %s2474_s14 = sshll.u32 %s2538_s25, 4  ;;  %s2475_s14 = int_to_ptr.vmem [resolvable:$false] %s2474_s14 }
  0x1b   : > { %2142 = vmatpush3.bf16.msra.mxu1 %v2141_v38  ;;  %v370_v60 = vld [vmem:[%s3641_s1 + $0x1d0] sm:$0xff]  ;;  %v371_v61 = vld [vmem:[%s3641_s1 + $0x1d8] sm:$0xff]  ;;  %v2149_v63 = vpack.c.bf16 %v353_v57, %v352_v55  ;;  %v2119_v0 = vpack.c.bf16 %v339_v59, %v338_v58  ;;  %v340_v6 = vld [vmem:[%s3641_s1 + $0xe0] sm:$0xff]  ;;  %s2476_s16 = scalar_lea.vmem %s2475_s14, 32  ;;  %p2477_p0 = scmp.lt.s32.totalorder %s3600_s9, %s2475_s14 }
  0x1c   : > { %2144 = vmatprep.subr.bf16.mxu1 %v2143_v43  ;;  %v322_v1 = vld [vmem:[%s3641_s1 + $0x50] sm:$0xff]  ;;  %v323_v2 = vld [vmem:[%s3641_s1 + $0x58] sm:$0xff]  ;;  %v2151_v4 = vpack.c.bf16 %v371_v61, %v370_v60  ;;  %v341_v7 = vld [vmem:[%s3641_s1 + $0xe8] sm:$0xff]  ;;  %p2472_p12 = pnand %p2471_p11, %p2612_p5  ;;  %p2478_p1 = scmp.lt.s32.totalorder %s2476_s16, %s2470_s15 }
  0x1d   : > { %2114 = vmatpush3.bf16.msra.mxu0 %v2113_v48  ;;  %v354_v3 = vld [vmem:[%s3641_s1 + $0x150] sm:$0xff]  ;;  %v355_v5 = vld [vmem:[%s3641_s1 + $0x158] sm:$0xff]  ;;  %v372_v8 = vld [vmem:[%s3641_s1 + $0x1e0] sm:$0xff]  ;;  %v2121_v10 = vpack.c.bf16 %v323_v2, %v322_v1  ;;  %v2123_v15 = vpack.c.bf16 %v341_v7, %v340_v6 }
  0x1e   : > { %2116 = vmatprep.subr.bf16.mxu0 %v2115_v52  ;;  %v373_v9 = vld [vmem:[%s3641_s1 + $0x1e8] sm:$0xff]  ;;  %v324_v11 = vld [vmem:[%s3641_s1 + $0x60] sm:$0xff]  ;;  %v2153_v14 = vpack.c.bf16 %v355_v5, %v354_v3  ;;  %v342_v20 = vld [vmem:[%s3641_s1 + $0xf0] sm:$0xff]  ;;  %p2473_p13 = pneg %p2472_p12  ;;  %p2479_p2 = por %p2478_p1, %p2477_p0 }
  0x1f   : > { %2146 = vmatpush3.bf16.msra.mxu1 %v2145_v51  ;;  %v325_v12 = vld [vmem:[%s3641_s1 + $0x68] sm:$0xff]  ;;  %v268_v13 = vld [vmem:[%s2773_s20 + $0x1] sm:$0xf]  ;;  %v2155_v19 = vpack.c.bf16 %v373_v9, %v372_v8  ;;  %v343_v21 = vld [vmem:[%s3641_s1 + $0xf8] sm:$0xff] }
  0x20   : > { %2148 = vmatprep.subr.bf16.mxu1 %v2147_v56  ;;  %v356_v16 = vld [vmem:[%s3641_s1 + $0x160] sm:$0xff]  ;;  %v357_v17 = vld [vmem:[%s3641_s1 + $0x168] sm:$0xff]  ;;  %v374_v24 = vld [vmem:[%s3641_s1 + $0x1f0] sm:$0xff]  ;;  %v2125_v27 = vpack.c.bf16 %v325_v12, %v324_v11  ;;  %v2127_v30 = vpack.c.bf16 %v343_v21, %v342_v20  ;;  %p2480_p3 = pnand %p2479_p2, %p2473_p13 }
  0x21   : > { %2118 = vmatpush3.bf16.msra.mxu0 %v2117_v62  ;;  %v2804_v18 = vld [vmem:[%s2773_s20 + $0x9] sm:$0xf]  ;;  %v375_v25 = vld [vmem:[%s3641_s1 + $0x1f8] sm:$0xff]  ;;  %v2821_v26 = vld [vmem:[%s2773_s20 + $0x10] sm:$0xf]  ;;  %v2157_v29 = vpack.c.bf16 %v357_v17, %v356_v16 }
  0x22   : > { %2120 = vmatprep.subr.bf16.mxu0 %v2119_v0  ;;  %v1676_v22 = vcombine.low %v268_v13, %v2804_v18  ;;  %v263_v23 = vld [vmem:[%s2773_s20 + $0x8] sm:$0xf]  ;;  %v326_v31 = vld [vmem:[%s3641_s1 + $0x70] sm:$0xff]  ;;  %v327_v32 = vld [vmem:[%s3641_s1 + $0x78] sm:$0xff]  ;;  %v2159_v34 = vpack.c.bf16 %v375_v25, %v374_v24 }
  0x23   : > { %2150 = vmatpush3.bf16.msra.mxu1 %v2149_v63  ;;  %v1678_v28 = vcombine.low %v263_v23, %v2821_v26  ;;  %v358_v33 = vld [vmem:[%s3641_s1 + $0x170] sm:$0xff]  ;;  %v359_v35 = vld [vmem:[%s3641_s1 + $0x178] sm:$0xff]  ;;  %v392_v36 = vld [vmem:[%s3641_s1 + $0x280] sm:$0xff]  ;;  %v2129_v40 = vpack.c.bf16 %v327_v32, %v326_v31 }
  0x24   : > { %2152 = vmatprep.subr.bf16.mxu1 %v2151_v4  ;;  %559 = vmatprep.mubr.f32.mxu0 %v1676_v22  ;;  %v393_v37 = vld [vmem:[%s3641_s1 + $0x288] sm:$0xff]  ;;  %v424_v38 = vld [vmem:[%s3641_s1 + $0x380] sm:$0xff]  ;;  %v2161_v44 = vpack.c.bf16 %v359_v35, %v358_v33  ;;  %v394_v51 = vld [vmem:[%s3641_s1 + $0x290] sm:$0xff] }
  0x25   : > { %2122 = vmatpush3.bf16.msra.mxu0 %v2121_v10  ;;  %634 = vmatprep.mubr.f32.mxu1 %v1678_v28  ;;  %v425_v39 = vld [vmem:[%s3641_s1 + $0x388] sm:$0xff]  ;;  %v262_v41 = vld [vmem:[%s2773_s20] sm:$0xf]  ;;  %v2163_v45 = vpack.c.bf16 %v393_v37, %v392_v36  ;;  %v395_v52 = vld [vmem:[%s3641_s1 + $0x298] sm:$0xff] }
  0x26   : > { %2124 = vmatprep.subr.bf16.mxu0 %v2123_v15  ;;  %v376_v42 = vld [vmem:[%s3641_s1 + $0x200] sm:$0xff]  ;;  %v377_v43 = vld [vmem:[%s3641_s1 + $0x208] sm:$0xff]  ;;  %v2195_v49 = vpack.c.bf16 %v425_v39, %v424_v38  ;;  %v1675_v53 = vcombine.low %v262_v41, %v263_v23  ;;  %v426_v54 = vld [vmem:[%s3641_s1 + $0x390] sm:$0xff]  ;;  %v2167_v59 = vpack.c.bf16 %v395_v52, %v394_v51 }
  0x27   : > { %2154 = vmatpush3.bf16.msra.mxu1 %v2153_v14  ;;  %v274_v46 = vld [vmem:[%s2773_s20 + $0x2] sm:$0xf]  ;;  %v2857_v47 = vld [vmem:[%s2773_s20 + $0xa] sm:$0xf]  ;;  %v427_v55 = vld [vmem:[%s3641_s1 + $0x398] sm:$0xff]  ;;  %v2165_v56 = vpack.c.bf16 %v377_v43, %v376_v42 }
  0x28   : > { %2156 = vmatprep.subr.bf16.mxu1 %v2155_v19  ;;  %v408_v48 = vld [vmem:[%s3641_s1 + $0x300] sm:$0xff]  ;;  %v409_v50 = vld [vmem:[%s3641_s1 + $0x308] sm:$0xff]  ;;  %v1677_v57 = vcombine.low %v274_v46, %v2857_v47  ;;  %v378_v60 = vld [vmem:[%s3641_s1 + $0x210] sm:$0xff]  ;;  %v2199_v63 = vpack.c.bf16 %v427_v55, %v426_v54 }
  0x29   : > { %2126 = vmatpush3.bf16.msra.mxu0 %v2125_v27  ;;  %v2197_v58 = vpack.c.bf16 %v409_v50, %v408_v48  ;;  %v379_v61 = vld [vmem:[%s3641_s1 + $0x218] sm:$0xff]  ;;  %v410_v62 = vld [vmem:[%s3641_s1 + $0x310] sm:$0xff]  ;;  %v396_v1 = vld [vmem:[%s3641_s1 + $0x2a0] sm:$0xff] }
  0x2a   : > { %2128 = vmatprep.subr.bf16.mxu0 %v2127_v30  ;;  %v411_v0 = vld [vmem:[%s3641_s1 + $0x318] sm:$0xff]  ;;  %v397_v2 = vld [vmem:[%s3641_s1 + $0x2a8] sm:$0xff]  ;;  %v428_v3 = vld [vmem:[%s3641_s1 + $0x3a0] sm:$0xff]  ;;  %v2169_v5 = vpack.c.bf16 %v379_v61, %v378_v60 }
  0x2b   : > { %2158 = vmatpush3.bf16.msra.mxu1 %v2157_v29  ;;  %v429_v4 = vld [vmem:[%s3641_s1 + $0x3a8] sm:$0xff]  ;;  %v2201_v6 = vpack.c.bf16 %v411_v0, %v410_v62  ;;  %v2171_v7 = vpack.c.bf16 %v397_v2, %v396_v1  ;;  %v380_v8 = vld [vmem:[%s3641_s1 + $0x220] sm:$0xff]  ;;  %v398_v13 = vld [vmem:[%s3641_s1 + $0x2b0] sm:$0xff] }
  0x2c   : > { %2160 = vmatprep.subr.bf16.mxu1 %v2159_v34  ;;  %v381_v9 = vld [vmem:[%s3641_s1 + $0x228] sm:$0xff]  ;;  %v412_v10 = vld [vmem:[%s3641_s1 + $0x320] sm:$0xff]  ;;  %v2203_v11 = vpack.c.bf16 %v429_v4, %v428_v3  ;;  %v399_v14 = vld [vmem:[%s3641_s1 + $0x2b8] sm:$0xff] }
  0x2d   : > { %2130 = vmatpush3.bf16.msra.mxu0 %v2129_v40  ;;  %v413_v12 = vld [vmem:[%s3641_s1 + $0x328] sm:$0xff]  ;;  %v430_v15 = vld [vmem:[%s3641_s1 + $0x3b0] sm:$0xff]  ;;  %v431_v16 = vld [vmem:[%s3641_s1 + $0x3b8] sm:$0xff]  ;;  %v2173_v20 = vpack.c.bf16 %v381_v9, %v380_v8  ;;  %v2175_v23 = vpack.c.bf16 %v399_v14, %v398_v13 }
  0x2e   : > { %2164 = vmatprep.subr.bf16.mxu0 %v2163_v45  ;;  %v2927_v17 = vld [vmem:[%s2773_s20 + $0x11] sm:$0xf]  ;;  %v265_v19 = vld [vmem:[%s2773_s20 + $0x18] sm:$0xf]  ;;  %v2205_v22 = vpack.c.bf16 %v413_v12, %v412_v10  ;;  %v2207_v28 = vpack.c.bf16 %v431_v16, %v430_v15  ;;  %v400_v29 = vld [vmem:[%s3641_s1 + $0x2c0] sm:$0xff] }
  0x2f   : > { %2162 = vmatpush3.bf16.msra.mxu1 %v2161_v44  ;;  %v382_v21 = vld [vmem:[%s3641_s1 + $0x230] sm:$0xff]  ;;  %v383_v24 = vld [vmem:[%s3641_s1 + $0x238] sm:$0xff]  ;;  %v401_v30 = vld [vmem:[%s3641_s1 + $0x2c8] sm:$0xff]  ;;  %v2952_v32 = vcombine.low %v2821_v26, %v265_v19 }
  0x30   : > { %2196 = vmatprep.subr.bf16.mxu1 %v2195_v49  ;;  %560 = vmatmul.mubr.f32.vlgmr.msra.gmra.mrb[0].mxu0 %v1675_v53  ;;  %v414_v25 = vld [vmem:[%s3641_s1 + $0x330] sm:$0xff]  ;;  %v415_v27 = vld [vmem:[%s3641_s1 + $0x338] sm:$0xff]  ;;  %v432_v33 = vld [vmem:[%s3641_s1 + $0x3c0] sm:$0xff]  ;;  %v2177_v36 = vpack.c.bf16 %v383_v24, %v382_v21  ;;  %v2179_v40 = vpack.c.bf16 %v401_v30, %v400_v29 }
  0x31   : > { %2166 = vmatpush3.bf16.msra.mxu0 %v2165_v56  ;;  %v2949_v31 = vld [vmem:[%s2773_s20 + $0x19] sm:$0xf]  ;;  %v433_v34 = vld [vmem:[%s3641_s1 + $0x3c8] sm:$0xff]  ;;  %v384_v37 = vld [vmem:[%s3641_s1 + $0x240] sm:$0xff]  ;;  %v2209_v39 = vpack.c.bf16 %v415_v27, %v414_v25 }
  0x32   : > { %635 = vmatmul.mubr.f32.vlgmr.msra.gmra.mrb[0].mxu1 %v1677_v57  ;;  %2168 = vmatprep.subr.bf16.mxu0 %v2167_v59  ;;  %v1682_v35 = vcombine.low %v2927_v17, %v2949_v31  ;;  %v385_v26 = vld [vmem:[%s3641_s1 + $0x248] sm:$0xff]  ;;  %v2969_v38 = vld [vmem:[%s2773_s20 + $0x20] sm:$0xf]  ;;  %v276_v43 = vld [vmem:[%s2773_s20 + $0x12] sm:$0xf]  ;;  %v2211_v45 = vpack.c.bf16 %v433_v34, %v432_v33  ;;  %v1679_v34 = vcombine.low %v2804_v18, %v2927_v17 }
  0x33   : > { %2198 = vmatpush3.bf16.msra.mxu1 %v2197_v58  ;;  %v416_v41 = vld [vmem:[%s3641_s1 + $0x340] sm:$0xff]  ;;  %v1684_v42 = vcombine.low %v265_v19, %v2969_v38  ;;  %v2977_v44 = vld [vmem:[%s2773_s20 + $0x1a] sm:$0xf]  ;;  %v417_v46 = vld [vmem:[%s3641_s1 + $0x348] sm:$0xff]  ;;  %v1680_v51 = vcombine.low %v2857_v47, %v276_v43  ;;  %v2181_v54 = vpack.c.bf16 %v385_v26, %v384_v37 }
  0x34   : > { %2200 = vmatprep.subr.bf16.mxu1 %v2199_v63  ;;  %v402_v48 = vld [vmem:[%s3641_s1 + $0x2d0] sm:$0xff]  ;;  %v403_v49 = vld [vmem:[%s3641_s1 + $0x2d8] sm:$0xff]  ;;  %564 = vmatprep.mubr.f32.mxu0 %v1682_v35  ;;  %v2989_v50 = vcombine.low %v276_v43, %v2977_v44  ;;  %v2213_v55 = vpack.c.bf16 %v417_v46, %v416_v41  ;;  %v404_v61 = vld [vmem:[%s3641_s1 + $0x2e0] sm:$0xff] }
  0x35   : > { %2170 = vmatpush3.bf16.msra.mxu0 %v2169_v5  ;;  %v434_v52 = vld [vmem:[%s3641_s1 + $0x3d0] sm:$0xff]  ;;  %v435_v53 = vld [vmem:[%s3641_s1 + $0x3d8] sm:$0xff]  ;;  %639 = vmatprep.mubr.f32.mxu1 %v1684_v42  ;;  %v2183_v56 = vpack.c.bf16 %v403_v49, %v402_v48  ;;  %v405_v62 = vld [vmem:[%s3641_s1 + $0x2e8] sm:$0xff] }
  0x36   : > { %2172 = vmatprep.subr.bf16.mxu0 %v2171_v7  ;;  %565 = vmatmul.mubr.f32.gmra.mrb[2].mxu0 %v2952_v32  ;;  %v386_v47 = vld [vmem:[%s3641_s1 + $0x250] sm:$0xff]  ;;  %v387_v57 = vld [vmem:[%s3641_s1 + $0x258] sm:$0xff]  ;;  %v2215_v59 = vpack.c.bf16 %v435_v53, %v434_v52  ;;  %v436_v63 = vld [vmem:[%s3641_s1 + $0x3e0] sm:$0xff]  ;;  %v2187_v3 = vpack.c.bf16 %v405_v62, %v404_v61 }
  0x37   : > { %2202 = vmatpush3.bf16.msra.mxu1 %v2201_v6  ;;  %v418_v58 = vld [vmem:[%s3641_s1 + $0x350] sm:$0xff]  ;;  %v419_v60 = vld [vmem:[%s3641_s1 + $0x358] sm:$0xff]  ;;  %709 = vmatprep.mubr.f32.mxu0 %v1680_v51  ;;  %v437_v0 = vld [vmem:[%s3641_s1 + $0x3e8] sm:$0xff]  ;;  %v2185_v1 = vpack.c.bf16 %v387_v57, %v386_v47 }
  0x38   : > { %2204 = vmatprep.subr.bf16.mxu1 %v2203_v11  ;;  %640 = vmatmul.mubr.f32.gmra.mrb[2].mxu1 %v2989_v50  ;;  %v2217_v2 = vpack.c.bf16 %v419_v60, %v418_v58  ;;  %v388_v4 = vld [vmem:[%s3641_s1 + $0x260] sm:$0xff]  ;;  %v389_v5 = vld [vmem:[%s3641_s1 + $0x268] sm:$0xff]  ;;  %v2219_v7 = vpack.c.bf16 %v437_v0, %v436_v63  ;;  %v406_v9 = vld [vmem:[%s3641_s1 + $0x2f0] sm:$0xff] }
  0x39   : > { %2174 = vmatpush3.bf16.msra.mxu0 %v2173_v20  ;;  %784 = vmatprep.mubr.f32.mxu1 %v1682_v35  ;;  %v420_v6 = vld [vmem:[%s3641_s1 + $0x360] sm:$0xff]  ;;  %v421_v8 = vld [vmem:[%s3641_s1 + $0x368] sm:$0xff]  ;;  %v407_v10 = vld [vmem:[%s3641_s1 + $0x2f8] sm:$0xff]  ;;  %v2189_v13 = vpack.c.bf16 %v389_v5, %v388_v4 }
  0x3a   : > { %2176 = vmatprep.subr.bf16.mxu0 %v2175_v23  ;;  %v438_v11 = vld [vmem:[%s3641_s1 + $0x3f0] sm:$0xff]  ;;  %v439_v12 = vld [vmem:[%s3641_s1 + $0x3f8] sm:$0xff]  ;;  %v2221_v14 = vpack.c.bf16 %v421_v8, %v420_v6  ;;  %v2191_v15 = vpack.c.bf16 %v407_v10, %v406_v9  ;;  %v440_v23 = vld [vmem:[%s3641_s1 + $0x400] sm:$0xff] }
  0x3b   : > { %2206 = vmatpush3.bf16.msra.mxu1 %v2205_v22  ;;  %v390_v16 = vld [vmem:[%s3641_s1 + $0x270] sm:$0xff]  ;;  %v391_v19 = vld [vmem:[%s3641_s1 + $0x278] sm:$0xff]  ;;  %v2223_v21 = vpack.c.bf16 %v439_v12, %v438_v11  ;;  %v441_v24 = vld [vmem:[%s3641_s1 + $0x408] sm:$0xff] }
  0x3c   : > { %2208 = vmatprep.subr.bf16.mxu1 %v2207_v28  ;;  %v422_v20 = vld [vmem:[%s3641_s1 + $0x370] sm:$0xff]  ;;  %v423_v22 = vld [vmem:[%s3641_s1 + $0x378] sm:$0xff]  ;;  %v2193_v25 = vpack.c.bf16 %v391_v19, %v390_v16  ;;  %v2227_v28 = vpack.c.bf16 %v441_v24, %v440_v23  ;;  %v278_v29 = vld [vmem:[%s2773_s20 + $0x22] sm:$0xf] }
  0x3d   : > { %2178 = vmatpush3.bf16.msra.mxu0 %v2177_v36  ;;  %v2225_v27 = vpack.c.bf16 %v423_v22, %v422_v20  ;;  %v442_v30 = vld [vmem:[%s3641_s1 + $0x410] sm:$0xff]  ;;  %v443_v33 = vld [vmem:[%s3641_s1 + $0x418] sm:$0xff]  ;;  %v272_v35 = vld [vmem:[%s2773_s20 + $0x21] sm:$0xf]  ;;  %v1686_v37 = vcombine.low %v2977_v44, %v278_v29 }
  0x3e   : > { %2180 = vmatprep.subr.bf16.mxu0 %v2179_v40  ;;  %v273_v36 = vld [vmem:[%s2773_s20 + $0x29] sm:$0xf]  ;;  %v2231_v26 = vpack.c.bf16 %v443_v33, %v442_v30  ;;  %v444_v41 = vld [vmem:[%s3641_s1 + $0x420] sm:$0xff]  ;;  %v1685_v18 = vcombine.low %v2949_v31, %v272_v35  ;;  %v446_v44 = vld [vmem:[%s3641_s1 + $0x430] sm:$0xff] }
  0x3f   : > { %2210 = vmatpush3.bf16.msra.mxu1 %v2209_v39  ;;  %v267_v39 = vld [vmem:[%s2773_s20 + $0x28] sm:$0xf]  ;;  %v1688_v40 = vcombine.low %v272_v35, %v273_v36  ;;  %v450_v48 = vld [vmem:[%s3641_s1 + $0x450] sm:$0xff]  ;;  %v451_v49 = vld [vmem:[%s3641_s1 + $0x458] sm:$0xff] }
  0x40   : > { %2212 = vmatprep.subr.bf16.mxu1 %v2211_v45  ;;  %v445_v42 = vld [vmem:[%s3641_s1 + $0x428] sm:$0xff]  ;;  %v1687_v17 = vcombine.low %v2969_v38, %v267_v39  ;;  %v447_v45 = vld [vmem:[%s3641_s1 + $0x438] sm:$0xff]  ;;  %v452_v51 = vld [vmem:[%s3641_s1 + $0x460] sm:$0xff] }
  0x41   : > { %2182 = vmatpush3.bf16.msra.mxu0 %v2181_v54  ;;  %v2235_v43 = vpack.c.bf16 %v445_v42, %v444_v41  ;;  %v2239_v31 = vpack.c.bf16 %v447_v45, %v446_v44  ;;  %v449_v38 = vld [vmem:[%s3641_s1 + $0x448] sm:$0xff]  ;;  %v454_v54 = vld [vmem:[%s3641_s1 + $0x470] sm:$0xff]  ;;  %v1004_v58 = vld [vmem:[%s3643_s3 + $0x80] sm:$0xff] }
  0x42   : > { %2184 = vmatprep.subr.bf16.mxu0 %v2183_v56  ;;  %v453_v52 = vld [vmem:[%s3641_s1 + $0x468] sm:$0xff]  ;;  %v1036_v60 = vld [vmem:[%s3643_s3 + $0x180] sm:$0xff]  ;;  %v1006_v5 = vld [vmem:[%s3643_s3 + $0x90] sm:$0xff] }
  0x43   : > { %2214 = vmatpush3.bf16.msra.mxu1 %v2213_v55  ;;  %v2251_v53 = vpack.c.bf16 %v453_v52, %v452_v51  ;;  %v455_v55 = vld [vmem:[%s3641_s1 + $0x478] sm:$0xff]  ;;  %v279_v47 = vld [vmem:[%s2773_s20 + $0x2a] sm:$0xf]  ;;  %v988_v63 = vld [vmem:[%s3643_s3] sm:$0xff]  ;;  %s3598_s20 = scalar_lea.hbm %s3646_s6, %s1698_s29 }
  0x44   : > { %2216 = vmatprep.subr.bf16.mxu1 %v2215_v59  ;;  %v2255_v56 = vpack.c.bf16 %v455_v55, %v454_v54  ;;  %v478_v57 = vcombine.low %v278_v29, %v279_v47  ;;  %v1005_v59 = vld [vmem:[%s3643_s3 + $0x88] sm:$0xff]  ;;  %v1038_v8 = vld [vmem:[%s3643_s3 + $0x190] sm:$0xff]  ;;  %v1039_v9 = vld [vmem:[%s3643_s3 + $0x198] sm:$0xff] }
  0x45   : > { %2186 = vmatpush3.bf16.msra.mxu0 %v2185_v1  ;;  %v2259_v61 = vpack.c.bf16 %v1005_v59, %v1004_v58  ;;  %v1037_v62 = vld [vmem:[%s3643_s3 + $0x188] sm:$0xff]  ;;  %v2295_v11 = vpack.c.bf16 %v1039_v9, %v1038_v8  ;;  %v990_v12 = vld [vmem:[%s3643_s3 + $0x10] sm:$0xff]  ;;  %v1023_v16 = vld [vmem:[%s3643_s3 + $0x118] sm:$0xff] }
  0x46   : > { %2188 = vmatprep.subr.bf16.mxu0 %v2187_v3  ;;  %v989_v0 = vld [vmem:[%s3643_s3 + $0x8] sm:$0xff]  ;;  %v2291_v1 = vpack.c.bf16 %v1037_v62, %v1036_v60  ;;  %v1020_v3 = vld [vmem:[%s3643_s3 + $0x100] sm:$0xff]  ;;  %v1010_v35 = vld [vmem:[%s3643_s3 + $0xb0] sm:$0xff] }
  0x47   : > { %2218 = vmatpush3.bf16.msra.mxu1 %v2217_v2  ;;  %v2261_v2 = vpack.c.bf16 %v989_v0, %v988_v63  ;;  %v1021_v4 = vld [vmem:[%s3643_s3 + $0x108] sm:$0xff]  ;;  %v1008_v20 = vld [vmem:[%s3643_s3 + $0xa0] sm:$0xff]  ;;  %v1011_v36 = vld [vmem:[%s3643_s3 + $0xb8] sm:$0xff] }
  0x48   : > { %2220 = vmatprep.subr.bf16.mxu1 %v2219_v7  ;;  %v2293_v6 = vpack.c.bf16 %v1021_v4, %v1020_v3  ;;  %v1007_v7 = vld [vmem:[%s3643_s3 + $0x98] sm:$0xff]  ;;  %v1040_v22 = vld [vmem:[%s3643_s3 + $0x1a0] sm:$0xff]  ;;  %v1041_v24 = vld [vmem:[%s3643_s3 + $0x1a8] sm:$0xff] }
  0x49   : > { %2190 = vmatpush3.bf16.msra.mxu0 %v2189_v13  ;;  %v2263_v10 = vpack.c.bf16 %v1007_v7, %v1006_v5  ;;  %v991_v13 = vld [vmem:[%s3643_s3 + $0x18] sm:$0xff]  ;;  %v1024_v30 = vld [vmem:[%s3643_s3 + $0x120] sm:$0xff]  ;;  %v1025_v33 = vld [vmem:[%s3643_s3 + $0x128] sm:$0xff] }
  0x4a   : > { %2192 = vmatprep.subr.bf16.mxu0 %v2191_v15  ;;  %v2265_v15 = vpack.c.bf16 %v991_v13, %v990_v12  ;;  %v1043_v39 = vld [vmem:[%s3643_s3 + $0x1b8] sm:$0xff]  ;;  %v1012_v45 = vld [vmem:[%s3643_s3 + $0xc0] sm:$0xff]  ;;  %v1014_v54 = vld [vmem:[%s3643_s3 + $0xd0] sm:$0xff] }
  0x4b   : > { %2222 = vmatpush3.bf16.msra.mxu1 %v2221_v14  ;;  %v1022_v14 = vld [vmem:[%s3643_s3 + $0x110] sm:$0xff]  ;;  %v995_v41 = vld [vmem:[%s3643_s3 + $0x38] sm:$0xff]  ;;  %v1028_v52 = vld [vmem:[%s3643_s3 + $0x140] sm:$0xff] }
  0x4c   : > { %2224 = vmatprep.subr.bf16.mxu1 %v2223_v21  ;;  %v2297_v19 = vpack.c.bf16 %v1023_v16, %v1022_v14  ;;  %v1009_v21 = vld [vmem:[%s3643_s3 + $0xa8] sm:$0xff]  ;;  %v1046_v47 = vld [vmem:[%s3643_s3 + $0x1d0] sm:$0xff]  ;;  %v1031_v0 = vld [vmem:[%s3643_s3 + $0x158] sm:$0xff] }
  0x4d   : > { %2194 = vmatpush3.bf16.msra.mxu0 %v2193_v25  ;;  %v2267_v23 = vpack.c.bf16 %v1009_v21, %v1008_v20  ;;  %v992_v25 = vld [vmem:[%s3643_s3 + $0x20] sm:$0xff]  ;;  %v998_v60 = vld [vmem:[%s3643_s3 + $0x50] sm:$0xff]  ;;  %v1001_v9 = vld [vmem:[%s3643_s3 + $0x68] sm:$0xff] }
  0x4e   : > { %2228 = vmatprep.subr.bf16.mxu0 %v2227_v28  ;;  %v1030_v62 = vld [vmem:[%s3643_s3 + $0x150] sm:$0xff]  ;;  %v1048_v5 = vld [vmem:[%s3643_s3 + $0x1e0] sm:$0xff]  ;;  %v1019_v14 = vld [vmem:[%s3643_s3 + $0xf8] sm:$0xff] }
  0x4f   : > { %2226 = vmatpush3.bf16.msra.mxu1 %v2225_v27  ;;  %v993_v27 = vld [vmem:[%s3643_s3 + $0x28] sm:$0xff]  ;;  %v2313_v3 = vpack.c.bf16 %v1031_v0, %v1030_v62  ;;  %v1000_v7 = vld [vmem:[%s3643_s3 + $0x60] sm:$0xff]  ;;  %v1018_v13 = vld [vmem:[%s3643_s3 + $0xf0] sm:$0xff] }
  0x50   : > { %710 = vmatmul.mubr.f32.vlgmr.msra.gmra.mrb[4].mxu0 %v1679_v34  ;;  %2260 = vmatprep.subr.bf16.mxu1 %v2259_v61  ;;  %v2269_v29 = vpack.c.bf16 %v993_v27, %v992_v25  ;;  %v2301_v34 = vpack.c.bf16 %v1025_v33, %v1024_v30  ;;  %v999_v61 = vld [vmem:[%s3643_s3 + $0x58] sm:$0xff]  ;;  %v2285_v12 = vpack.c.bf16 %v1001_v9, %v1000_v7  ;;  %v1002_v21 = vld [vmem:[%s3643_s3 + $0x70] sm:$0xff]  ;;  %v1069_v30 = vld [vmem:[%s3643_s3 + $0x288] sm:$0xff]  ;;  %v2534_v9 = vmov 1983009808  }
  0x51   : > { %2230 = vmatpush3.bf16.msra.mxu0 %v2227_v28  ;;  %714 = vmatprep.mubr.f32.mxu0 %v1686_v37  ;;  %v2299_v28 = vpack.c.bf16 %v1041_v24, %v1040_v22  ;;  %v1042_v37 = vld [vmem:[%s3643_s3 + $0x1b0] sm:$0xff]  ;;  %v2281_v63 = vpack.c.bf16 %v999_v61, %v998_v60  ;;  %v1051_v20 = vld [vmem:[%s3643_s3 + $0x1f8] sm:$0xff]  ;;  %v1100_v33 = vld [vmem:[%s3643_s3 + $0x380] sm:$0xff] }
  0x52   : > { %785 = vmatmul.mubr.f32.vlgmr.msra.gmra.mrb[4].mxu1 %v2952_v32  ;;  %2232 = vmatprep.subr.bf16.mxu0 %v2231_v26  ;;  %v448_v32 = vld [vmem:[%s3641_s1 + $0x440] sm:$0xff]  ;;  %v2303_v42 = vpack.c.bf16 %v1043_v39, %v1042_v37  ;;  %v1003_v22 = vld [vmem:[%s3643_s3 + $0x78] sm:$0xff]  ;;  %v1034_v24 = vld [vmem:[%s3643_s3 + $0x170] sm:$0xff] }
  0x53   : > { %789 = vmatprep.mubr.f32.mxu1 %v1688_v40  ;;  %v2243_v46 = vpack.c.bf16 %v449_v38, %v448_v32  ;;  %2262 = vmatpush3.bf16.msra.mxu1 %v2261_v2  ;;  %v994_v40 = vld [vmem:[%s3643_s3 + $0x30] sm:$0xff]  ;;  %v1044_v32 = vld [vmem:[%s3643_s3 + $0x1c0] sm:$0xff]  ;;  %v1017_v2 = vld [vmem:[%s3643_s3 + $0xe8] sm:$0xff]  ;;  %v2289_v27 = vpack.c.bf16 %v1003_v22, %v1002_v21 }
  0x54   : > { %715 = vmatmul.mubr.f32.gmra.mrb[6].mxu0 %v1685_v18  ;;  %2264 = vmatprep.subr.bf16.mxu1 %v2263_v10  ;;  %v2273_v18 = vpack.c.bf16 %v995_v41, %v994_v40  ;;  %v1032_v10 = vld [vmem:[%s3643_s3 + $0x160] sm:$0xff]  ;;  %v1035_v25 = vld [vmem:[%s3643_s3 + $0x178] sm:$0xff] }
  0x55   : > { %2234 = vmatpush3.bf16.msra.mxu0 %v2231_v26  ;;  %2061 = vmatprep.mubr.f32.mxu0 %v2989_v50  ;;  %v2247_v50 = vpack.c.bf16 %v451_v49, %v450_v48  ;;  %v2271_v26 = vpack.c.bf16 %v1011_v36, %v1010_v35  ;;  %v996_v48 = vld [vmem:[%s3643_s3 + $0x40] sm:$0xff]  ;;  %v997_v49 = vld [vmem:[%s3643_s3 + $0x48] sm:$0xff] }
  0x56   : > { %790 = vmatmul.mubr.f32.gmra.mrb[6].mxu1 %v1687_v17  ;;  %2236 = vmatprep.subr.bf16.mxu0 %v2235_v43  ;;  %v1026_v17 = vld [vmem:[%s3643_s3 + $0x130] sm:$0xff]  ;;  %v2277_v51 = vpack.c.bf16 %v997_v49, %v996_v48  ;;  %v1101_v35 = vld [vmem:[%s3643_s3 + $0x388] sm:$0xff] }
  0x57   : > { %2266 = vmatpush3.bf16.msra.mxu1 %v2265_v15  ;;  %v1050_v15 = vld [vmem:[%s3643_s3 + $0x1f0] sm:$0xff]  ;;  %v2355_v36 = vpack.c.bf16 %v1101_v35, %v1100_v33 }
  0x58   : > { %2268 = vmatprep.subr.bf16.mxu1 %v2267_v23  ;;  %v2319_v23 = vpack.c.bf16 %v1051_v20, %v1050_v15 }
  0x59   : > { %2238 = vmatpush3.bf16.msra.mxu0 %v2235_v43  ;;  %v1027_v43 = vld [vmem:[%s3643_s3 + $0x138] sm:$0xff] }
  0x5a   : > { %2240 = vmatprep.subr.bf16.mxu0 %v2239_v31  ;;  %v2305_v44 = vpack.c.bf16 %v1027_v43, %v1026_v17 }
  0x5b   : > { %2270 = vmatpush3.bf16.msra.mxu1 %v2269_v29  ;;  %v1068_v29 = vld [vmem:[%s3643_s3 + $0x280] sm:$0xff] }
  0x5c   : > { %2272 = vmatprep.subr.bf16.mxu1 %v2271_v26  ;;  %v1674_v26 = vld [vmem:[%s3642_s2] ss:$0 sm:$0xff] }
  0x5d   : > { %2242 = vmatpush3.bf16.msra.mxu0 %v2239_v31  ;;  %v1013_v31 = vld [vmem:[%s3643_s3 + $0xc8] sm:$0xff] }
  0x5e   : > { %2244 = vmatprep.subr.bf16.mxu0 %v2243_v46  ;;  %v2275_v38 = vpack.c.bf16 %v1013_v31, %v1012_v45 }
  0x5f   : > { %2274 = vmatpush3.bf16.msra.mxu1 %v2273_v18 }
  0x60   : > { %2276 = vmatprep.subr.bf16.mxu1 %v2275_v38 }
  0x61   : > { %2246 = vmatpush3.bf16.msra.mxu0 %v2243_v46  ;;  %v1045_v46 = vld [vmem:[%s3643_s3 + $0x1c8] sm:$0xff] }
  0x62   : > { %2248 = vmatprep.subr.bf16.mxu0 %v2247_v50 }
  0x63   : > { %2278 = vmatpush3.bf16.msra.mxu1 %v2277_v51 }
  0x65   : > { %2250 = vmatpush3.bf16.msra.mxu0 %v2247_v50  ;;  %v2307_v50 = vpack.c.bf16 %v1045_v46, %v1044_v32 }
  0x66   : > { %2252 = vmatprep.subr.bf16.mxu0 %v2251_v53 }
  0x69   : > { %2254 = vmatpush3.bf16.msra.mxu0 %v2251_v53  ;;  %v1029_v53 = vld [vmem:[%s3643_s3 + $0x148] sm:$0xff] }
  0x6a   : > { %2256 = vmatprep.subr.bf16.mxu0 %v2255_v56  ;;  %v2309_v55 = vpack.c.bf16 %v1029_v53, %v1028_v52 }
  0x6d   : > { %2258 = vmatpush3.bf16.msra.mxu0 %v2255_v56  ;;  %v1015_v56 = vld [vmem:[%s3643_s3 + $0xd8] sm:$0xff] }
  0x6e   : > { %2292 = vmatprep.subr.bf16.mxu0 %v2291_v1  ;;  %v2279_v58 = vpack.c.bf16 %v1015_v56, %v1014_v54  ;;  %v1016_v1 = vld [vmem:[%s3643_s3 + $0xe0] sm:$0xff] }
  0x6f   : > { %v2283_v4 = vpack.c.bf16 %v1017_v2, %v1016_v1 }
  0x70   : > { %2062 = vmatmul.mubr.f32.vlgmr.msra.gmra.mrb[8].mxu0 %v478_v57  ;;  %v1047_v57 = vld [vmem:[%s3643_s3 + $0x1d8] sm:$0xff]  ;;  %2280 = vmatprep.subr.bf16.mxu1 %v2279_v58 }
  0x71   : > { %2294 = vmatpush3.bf16.msra.mxu0 %v2293_v6  ;;  %v2311_v59 = vpack.c.bf16 %v1047_v57, %v1046_v47  ;;  %v1049_v6 = vld [vmem:[%s3643_s3 + $0x1e8] sm:$0xff]  ;;  %2282 = vmatpush3.bf16.msra.mxu1 %v2281_v63 }
  0x72   : > { %2296 = vmatprep.subr.bf16.mxu0 %v2295_v11  ;;  %v2315_v8 = vpack.c.bf16 %v1049_v6, %v1048_v5  ;;  %v1033_v11 = vld [vmem:[%s3643_s3 + $0x168] sm:$0xff]  ;;  %2284 = vmatprep.subr.bf16.mxu1 %v2283_v4 }
  0x73   : > { %v2317_v16 = vpack.c.bf16 %v1033_v11, %v1032_v10  ;;  %v909_v10 = vunpack.c.l.s4 %v2534_v9  ;;  %v911_v11 = vlaneseq }
  0x75   : > { %2298 = vmatpush3.bf16.msra.mxu0 %v2297_v19  ;;  %v2287_v19 = vpack.c.bf16 %v1019_v14, %v1018_v13  ;;  %2286 = vmatpush3.bf16.msra.mxu1 %v2285_v12  ;;  %v910_v12 = vunpack.c.0.s8 %v909_v10  ;;  %v912_v13 = vshrl.u32 %v911_v11, 7 }
  0x76   : > { %2300 = vmatprep.subr.bf16.mxu0 %v2299_v28  ;;  %v2321_v28 = vpack.c.bf16 %v1035_v25, %v1034_v24 }
  0x77   : > { %2288 = vmatprep.subr.bf16.mxu1 %v2287_v19 }
  0x79   : > { %2302 = vmatpush3.bf16.msra.mxu0 %v2301_v34  ;;  %2290 = vmatpush3.bf16.msra.mxu1 %v2289_v27  ;;  %v2323_v34 = vpack.c.bf16 %v1069_v30, %v1068_v29  ;;  %v3329_v29 = vsub.s32 %v910_v12, %v912_v13  ;;  %v1056_v12 = vld [vmem:[%s3643_s3 + $0x220] sm:$0xff]  ;;  %v1057_v13 = vld [vmem:[%s3643_s3 + $0x228] sm:$0xff] }
  0x7a   : > { %2304 = vmatprep.subr.bf16.mxu0 %v2303_v42 }
  0x7b   : > { %2324 = vmatprep.subr.bf16.mxu1 %v2323_v34 }
  0x7d   : > { %2306 = vmatpush3.bf16.msra.mxu0 %v2305_v44 }
  0x7e   : > { %2308 = vmatprep.subr.bf16.mxu0 %v2307_v50 }
  0x81   : > { %2310 = vmatpush3.bf16.msra.mxu0 %v2309_v55 }
  0x82   : > { %2312 = vmatprep.subr.bf16.mxu0 %v2311_v59 }
  0x85   : > { %2314 = vmatpush3.bf16.msra.mxu0 %v2313_v3 }
  0x86   : > { %2316 = vmatprep.subr.bf16.mxu0 %v2315_v8 }
  0x89   : > { %2318 = vmatpush3.bf16.msra.mxu0 %v2317_v16 }
  0x8a   : > { %2320 = vmatprep.subr.bf16.mxu0 %v2319_v23 }
  0x8d   : > { %2322 = vmatpush3.bf16.msra.mxu0 %v2321_v28 }
  0x8e   : > { %2356 = vmatprep.subr.bf16.mxu0 %v2355_v36 }
 0x103   : > { %v1734_v37 = vpop.f32.mrb[0].mxu0 }
 0x104   : > { %v1735_v39 = vpop.f32.mrb[1].mxu0 }
 0x105   : > { %v1772_v40 = vpop.f32.mrb[0].mxu1  ;;  %v1736_v41 = vadd.f32 %v1735_v39, %v1734_v37 }
 0x106   : > { %v1773_v42 = vpop.f32.mrb[1].mxu1 }
 0x107   : > { %v1774_v18 = vadd.f32 %v1773_v42, %v1772_v40  ;;  %v562_v17 = vadd.f32 %v1736_v41, %v1674_v26 }
 0x109   : > { %v637_v43 = vadd.f32 %v1774_v18, %v562_v17  ;;  %v1737_v44 = vpop.f32.mrb[2].mxu0 }
 0x10a   : > { %v1738_v45 = vpop.f32.mrb[3].mxu0 }
 0x10b   : > { %v1775_v31 = vpop.f32.mrb[2].mxu1  ;;  %v1739_v32 = vadd.f32 %v1738_v45, %v1737_v44 }
 0x10c   : > { %v1776_v38 = vpop.f32.mrb[3].mxu1 }
 0x10d   : > { %v1777_v46 = vadd.f32 %v1776_v38, %v1775_v31  ;;  %v567_v48 = vadd.f32 %v1739_v32, %v1674_v26  ;;  %v1052_v38 = vld [vmem:[%s3643_s3 + $0x200] sm:$0xff] }
 0x10f   : > { %v642_v49 = vadd.f32 %v1777_v46, %v567_v48  ;;  %v1053_v46 = vld [vmem:[%s3643_s3 + $0x208] sm:$0xff]  ;;  %v1084_v48 = vld [vmem:[%s3643_s3 + $0x300] sm:$0xff] }
 0x123   : > { %v1810_v50 = vpop.f32.mrb[4].mxu0 }
 0x124   : > { %v1811_v51 = vpop.f32.mrb[5].mxu0 }
 0x125   : > { %v1848_v52 = vpop.f32.mrb[4].mxu1  ;;  %v1812_v53 = vadd.f32 %v1811_v51, %v1810_v50 }
 0x126   : > { %v1849_v54 = vpop.f32.mrb[5].mxu1 }
 0x127   : > { %v1850_v55 = vadd.f32 %v1849_v54, %v1848_v52  ;;  %v712_v56 = vadd.f32 %v1812_v53, %v637_v43  ;;  %v1813_v47 = vpop.f32.mrb[6].mxu0  ;;  %v1070_v53 = vld [vmem:[%s3643_s3 + $0x290] sm:$0xff] }
 0x128   : > { %v1814_v57 = vpop.f32.mrb[7].mxu0 }
 0x129   : > { %v1851_v58 = vpop.f32.mrb[6].mxu1  ;;  %v1815_v59 = vadd.f32 %v1814_v57, %v1813_v47  ;;  %v787_v61 = vadd.f32 %v1850_v55, %v712_v56  ;;  %v1071_v56 = vld [vmem:[%s3643_s3 + $0x298] sm:$0xff]  ;;  %v1102_v47 = vld [vmem:[%s3643_s3 + $0x390] sm:$0xff] }
 0x12a   : > { %v1852_v60 = vpop.f32.mrb[7].mxu1  ;;  %v1103_v57 = vld [vmem:[%s3643_s3 + $0x398] sm:$0xff] }
 0x12b   : > { %v1853_v62 = vadd.f32 %v1852_v60, %v1851_v58  ;;  %v717_v63 = vadd.f32 %v1815_v59, %v642_v49  ;;  %v1085_v49 = vld [vmem:[%s3643_s3 + $0x308] sm:$0xff]  ;;  %v2325_v60 = vpack.c.bf16 %v1053_v46, %v1052_v38  ;;  %v1079_v38 = vld [vmem:[%s3643_s3 + $0x2d8] sm:$0xff]  ;;  %v1110_v46 = vld [vmem:[%s3643_s3 + $0x3d0] sm:$0xff] }
 0x12d   : > { %v792_v0 = vadd.f32 %v1853_v62, %v717_v63  ;;  %v1054_v62 = vld [vmem:[%s3643_s3 + $0x210] sm:$0xff]  ;;  %v1055_v63 = vld [vmem:[%s3643_s3 + $0x218] sm:$0xff] }
 0x12e   : > { %v2329_v10 = vpack.c.bf16 %v1055_v63, %v1054_v62 }
 0x143   : > { %v2063_v1 = vpop.f32.mrb[8].mxu0 }
 0x144   : > { %v867_v2 = vadd.f32 %v2063_v1, %v792_v0  ;;  %v861_v3 = vpop.f32.mrb[9].mxu0  ;;  %v1086_v0 = vld [vmem:[%s3643_s3 + $0x310] sm:$0xff]  ;;  %v1087_v1 = vld [vmem:[%s3643_s3 + $0x318] sm:$0xff] }
 0x145   : > { %v862_v4 = vadd.f32 %v861_v3, %v787_v61  ;;  %v2357_v61 = vpack.c.bf16 %v1085_v49, %v1084_v48  ;;  %v2327_v3 = vpack.c.bf16 %v1071_v56, %v1070_v53  ;;  %v2361_v11 = vpack.c.bf16 %v1087_v1, %v1086_v0  ;;  %v1111_v48 = vld [vmem:[%s3643_s3 + $0x3d8] sm:$0xff]  ;;  %v1064_v0 = vld [vmem:[%s3643_s3 + $0x260] sm:$0xff]  ;;  %v1065_v1 = vld [vmem:[%s3643_s3 + $0x268] sm:$0xff] }
 0x146   : > { %v871_v5 = vmax.f32 %v867_v2, 0.0  ;;  %v1072_v2 = vld [vmem:[%s3643_s3 + $0x2a0] sm:$0xff]  ;;  %v2375_v56 = vpack.c.bf16 %v1111_v48, %v1110_v46 }
 0x147   : > { %v870_v6 = vmax.f32 %v862_v4, 0.0  ;;  %v2359_v4 = vpack.c.bf16 %v1103_v57, %v1102_v47  ;;  %v1094_v47 = vld [vmem:[%s3643_s3 + $0x350] sm:$0xff]  ;;  %v1095_v57 = vld [vmem:[%s3643_s3 + $0x358] sm:$0xff] }
 0x148   : > { %v875_v7 = vcombine.high %v871_v5, %v871_v5  ;;  %880 = vst [vmem:[#allocation2 + $0x8] sm:$0xf] %v871_v5  ;;  %v1073_v5 = vld [vmem:[%s3643_s3 + $0x2a8] sm:$0xff]  ;;  %v2377_v63 = vpack.c.bf16 %v1095_v57, %v1094_v47 }
 0x149   : > { %v874_v8 = vcombine.high %v870_v6, %v870_v6  ;;  %878 = vst [vmem:[#allocation2] sm:$0xf] %v870_v6  ;;  %v1104_v6 = vld [vmem:[%s3643_s3 + $0x3a0] sm:$0xff] }
 0x14a   : > { %881 = vst [vmem:[#allocation2 + $0xc] sm:$0xf] %v875_v7  ;;  %v1105_v7 = vld [vmem:[%s3643_s3 + $0x3a8] sm:$0xff] }
 0x14b   : > { %879 = vst [vmem:[#allocation2 + $0x4] sm:$0xf] %v874_v8 }
 0x14f   : > { %v884_v14 = vld [vmem:[#allocation2 + $0x8] sm:$0x3]  ;;  %v3327_v16 = vld [vmem:[#allocation2 + $0xa] sm:$0x3] }
 0x150   : > { %v888_v15 = vld [vmem:[#allocation2 + $0x9] sm:$0x3]  ;;  %v882_v19 = vld [vmem:[#allocation2] sm:$0x3]  ;;  %v890_v23 = vld [vmem:[#allocation2 + $0x2] sm:$0x3] }
 0x151   : > { %v886_v20 = vld [vmem:[#allocation2 + $0x1] sm:$0x3]  ;;  %v924_v21 = vcombine.low %v884_v14, %v888_v15  ;;  %v885_v24 = vld [vmem:[#allocation2 + $0xc] sm:$0x3]  ;;  %v964_v33 = vcombine.low %v888_v15, %v3327_v16  ;;  %v2363_v15 = vpack.c.bf16 %v1105_v7, %v1104_v6  ;;  %v1082_v6 = vld [vmem:[%s3643_s3 + $0x2f0] sm:$0xff] }
 0x152   : > { %v906_v22 = vcombine.low %v882_v19, %v886_v20  ;;  %v889_v25 = vld [vmem:[#allocation2 + $0xd] sm:$0x3]  ;;  %v883_v27 = vld [vmem:[#allocation2 + $0x4] sm:$0x3]  ;;  %v891_v30 = vld [vmem:[#allocation2 + $0x6] sm:$0x3] }
 0x153   : > { %v887_v28 = vld [vmem:[#allocation2 + $0x5] sm:$0x3]  ;;  %v965_v34 = vcombine.low %v885_v24, %v889_v25  ;;  %v907_v36 = vcombine.low %v890_v23, %v883_v27  ;;  %v948_v37 = vcombine.low %v891_v30, %v884_v14  ;;  %v938_v39 = vrot.slane %v924_v21, %v3329_v29  ;;  %v1089_v20 = vld [vmem:[%s3643_s3 + $0x328] sm:$0xff]  ;;  %v1074_v21 = vld [vmem:[%s3643_s3 + $0x2b0] sm:$0xff] }
 0x154   : > { %v947_v35 = vcombine.low %v883_v27, %v887_v28  ;;  %v923_v26 = vcombine.low %v887_v28, %v891_v30  ;;  %v914_v41 = vrot.slane %v906_v22, %v3329_v29  ;;  %v972_v44 = vrot.slane %v964_v33, %v3329_v29  ;;  %v1088_v19 = vld [vmem:[%s3643_s3 + $0x320] sm:$0xff]  ;;  %v1075_v22 = vld [vmem:[%s3643_s3 + $0x2b8] sm:$0xff]  ;;  %v1106_v23 = vld [vmem:[%s3643_s3 + $0x3b0] sm:$0xff] }
 0x155   : > { %v979_v40 = vrot.slane %v965_v34, %v3329_v29  ;;  %v921_v18 = vrot.slane %v907_v36, %v3329_v29  ;;  %v962_v17 = vrot.slane %v948_v37, %v3329_v29  ;;  %v2331_v14 = vpack.c.bf16 %v1073_v5, %v1072_v2  ;;  %v1107_v24 = vld [vmem:[%s3643_s3 + $0x3b8] sm:$0xff]  ;;  %v1058_v28 = vld [vmem:[%s3643_s3 + $0x230] sm:$0xff]  ;;  %v1076_v37 = vld [vmem:[%s3643_s3 + $0x2c0] sm:$0xff] }
 0x156   : > { %v955_v42 = vrot.slane %v947_v35, %v3329_v29  ;;  %v931_v43 = vrot.slane %v923_v26, %v3329_v29  ;;  %v2333_v25 = vpack.c.bf16 %v1057_v13, %v1056_v12  ;;  %v2365_v27 = vpack.c.bf16 %v1089_v20, %v1088_v19  ;;  %v1059_v30 = vld [vmem:[%s3643_s3 + $0x238] sm:$0xff]  ;;  %v1090_v35 = vld [vmem:[%s3643_s3 + $0x330] sm:$0xff]  ;;  %v1077_v26 = vld [vmem:[%s3643_s3 + $0x2c8] sm:$0xff] }
 0x157   : > { %v1694_v45 = vcombine.low %v938_v39, %v979_v40  ;;  %v1692_v32 = vcombine.low %v921_v18, %v962_v17  ;;  %v2335_v33 = vpack.c.bf16 %v1075_v22, %v1074_v21  ;;  %v2367_v34 = vpack.c.bf16 %v1107_v24, %v1106_v23  ;;  %v1091_v36 = vld [vmem:[%s3643_s3 + $0x338] sm:$0xff]  ;;  %v1108_v39 = vld [vmem:[%s3643_s3 + $0x3c0] sm:$0xff]  ;;  %v1109_v40 = vld [vmem:[%s3643_s3 + $0x3c8] sm:$0xff] }
 0x158   : > { %v1691_v31 = vcombine.low %v914_v41, %v955_v42  ;;  %v1693_v50 = vcombine.low %v931_v43, %v972_v44  ;;  %v2337_v41 = vpack.c.bf16 %v1059_v30, %v1058_v28  ;;  %v2369_v42 = vpack.c.bf16 %v1091_v36, %v1090_v35  ;;  %v1060_v18 = vld [vmem:[%s3643_s3 + $0x240] sm:$0xff]  ;;  %v1061_v17 = vld [vmem:[%s3643_s3 + $0x248] sm:$0xff]  ;;  %v1083_v7 = vld [vmem:[%s3643_s3 + $0x2f8] sm:$0xff] }
 0x159   : > { %v1154_v52 = vrot.slane %v1692_v32, %v3329_v29  ;;  %v3361_v55 = vrot.slane %v1694_v45, %v3329_v29  ;;  %v2339_v43 = vpack.c.bf16 %v1077_v26, %v1076_v37  ;;  %v2371_v44 = vpack.c.bf16 %v1109_v40, %v1108_v39  ;;  %v1092_v45 = vld [vmem:[%s3643_s3 + $0x340] sm:$0xff]  ;;  %v1078_v32 = vld [vmem:[%s3643_s3 + $0x2d0] sm:$0xff]  ;;  %v1097_v5 = vld [vmem:[%s3643_s3 + $0x368] sm:$0xff] }
 0x15a   : > { %v1147_v51 = vrot.slane %v1691_v31, %v3329_v29  ;;  %v3358_v54 = vrot.slane %v1693_v50, %v3329_v29  ;;  %v1093_v31 = vld [vmem:[%s3643_s3 + $0x348] sm:$0xff]  ;;  %v2341_v49 = vpack.c.bf16 %v1061_v17, %v1060_v18  ;;  %v2343_v53 = vpack.c.bf16 %v1079_v38, %v1078_v32  ;;  %v1066_v12 = vld [vmem:[%s3643_s3 + $0x270] sm:$0xff]  ;;  %v1099_v20 = vld [vmem:[%s3643_s3 + $0x378] sm:$0xff] }
 0x15b   : > { %v1156_v59 = vcombine.high %v1154_v52, %v1154_v52  ;;  %v1174_v9 = vcombine.high %v3361_v55, %v3361_v55  ;;  %v2373_v50 = vpack.c.bf16 %v1093_v31, %v1092_v45  ;;  %v2351_v13 = vpack.c.bf16 %v1083_v7, %v1082_v6  ;;  %v1098_v19 = vld [vmem:[%s3643_s3 + $0x370] sm:$0xff]  ;;  %v1116_v23 = vld [vmem:[%s3643_s3 + $0x400] sm:$0xff]  ;;  %v1117_v24 = vld [vmem:[%s3643_s3 + $0x408] sm:$0xff] }
 0x15c   : > { %v1155_v58 = vcombine.high %v1147_v51, %v1147_v51  ;;  %v1173_v8 = vcombine.high %v3358_v54, %v3358_v54  ;;  %v2385_v22 = vpack.c.bf16 %v1099_v20, %v1098_v19  ;;  %v1118_v28 = vld [vmem:[%s3643_s3 + $0x410] sm:$0xff]  ;;  %v1119_v30 = vld [vmem:[%s3643_s3 + $0x418] sm:$0xff]  ;;  %v1120_v35 = vld [vmem:[%s3643_s3 + $0x420] sm:$0xff]  ;;  %v946_v38 = vrot.slane %v3327_v16, %v3329_v29 }
 0x15d   : > { %1326 = vmatprep.mubr.f32.mxu0 %v1156_v59  ;;  %v1081_v59 = vld [vmem:[%s3643_s3 + $0x2e8] sm:$0xff]  ;;  %v1124_v39 = vld [vmem:[%s3643_s3 + $0x440] sm:$0xff]  ;;  %v1127_v18 = vld [vmem:[%s3643_s3 + $0x458] sm:$0xff] }
 0x15e   : > { %1256 = vmatprep.mubr.f32.mxu1 %v1155_v58  ;;  %1327 = vmatmul.mubr.f32.vlgmr.msra.gmra.mrb[10].mxu0 %v1154_v52  ;;  %v1063_v52 = vld [vmem:[%s3643_s3 + $0x258] sm:$0xff]  ;;  %v1080_v58 = vld [vmem:[%s3643_s3 + $0x2e0] sm:$0xff]  ;;  %v1121_v36 = vld [vmem:[%s3643_s3 + $0x428] sm:$0xff] }
 0x15f   : > { %1257 = vmatmul.mubr.f32.vlgmr.msra.gmra.mrb[8].mxu1 %v1147_v51  ;;  %2358 = vmatpush3.bf16.msra.mxu0 %v2357_v61  ;;  %v1062_v51 = vld [vmem:[%s3643_s3 + $0x250] sm:$0xff]  ;;  %v1113_v61 = vld [vmem:[%s3643_s3 + $0x3e8] sm:$0xff]  ;;  %v2347_v2 = vpack.c.bf16 %v1081_v59, %v1080_v58  ;;  %v2394_v37 = vpack.c.bf16 %v1121_v36, %v1120_v35  ;;  %v1131_v32 = vld [vmem:[%s3643_s3 + $0x478] sm:$0xff] }
 0x160   : > { %2326 = vmatpush3.bf16.msra.mxu1 %v2325_v60  ;;  %1396 = vmatprep.mubr.f32.mxu1 %v1173_v8  ;;  %v1112_v60 = vld [vmem:[%s3643_s3 + $0x3e0] sm:$0xff]  ;;  %v2345_v62 = vpack.c.bf16 %v1063_v52, %v1062_v51  ;;  %v1114_v8 = vld [vmem:[%s3643_s3 + $0x3f0] sm:$0xff]  ;;  %v1125_v40 = vld [vmem:[%s3643_s3 + $0x448] sm:$0xff] }
 0x161   : > { %1466 = vmatprep.mubr.f32.mxu0 %v1174_v9  ;;  %2328 = vmatprep.subr.bf16.mxu1 %v2327_v3  ;;  %v2379_v3 = vpack.c.bf16 %v1113_v61, %v1112_v60  ;;  %v1115_v9 = vld [vmem:[%s3643_s3 + $0x3f8] sm:$0xff]  ;;  %v1130_v31 = vld [vmem:[%s3643_s3 + $0x470] sm:$0xff]  ;;  %v1689_v46 = vld.sshfl [vmem:[#allocation2 + $0xe] sm:$0x3 pattern:$0x76325410] }
 0x162   : > { %2360 = vmatprep.subr.bf16.mxu0 %v2359_v4  ;;  %v1096_v4 = vld [vmem:[%s3643_s3 + $0x360] sm:$0xff]  ;;  %v2409_v48 = vpack.c.bf16 %v1131_v32, %v1130_v31 }
 0x163   : > { %2362 = vmatpush3.bf16.msra.mxu0 %v2361_v11  ;;  %v2381_v11 = vpack.c.bf16 %v1097_v5, %v1096_v4 }
 0x164   : > { %2330 = vmatpush3.bf16.msra.mxu1 %v2329_v10  ;;  %2364 = vmatprep.subr.bf16.mxu0 %v2363_v15  ;;  %v2349_v10 = vpack.c.bf16 %v1065_v1, %v1064_v0  ;;  %v1067_v15 = vld [vmem:[%s3643_s3 + $0x278] sm:$0xff] }
 0x165   : > { %2332 = vmatprep.subr.bf16.mxu1 %v2331_v14  ;;  %v2383_v14 = vpack.c.bf16 %v1115_v9, %v1114_v8  ;;  %v2353_v21 = vpack.c.bf16 %v1067_v15, %v1066_v12 }
 0x167   : > { %2366 = vmatpush3.bf16.msra.mxu0 %v2365_v27  ;;  %v2535_v27 = vmov 0.0|0.0  }
 0x168   : > { %2334 = vmatpush3.bf16.msra.mxu1 %v2333_v25  ;;  %2368 = vmatprep.subr.bf16.mxu0 %v2367_v34  ;;  %v2388_v25 = vpack.c.bf16 %v1117_v24, %v1116_v23  ;;  %v2537_v34 = vmov 0.0  }
 0x169   : > { %2336 = vmatprep.subr.bf16.mxu1 %v2335_v33  ;;  %v2391_v33 = vpack.c.bf16 %v1119_v30, %v1118_v28 }
 0x16b   : > { %2370 = vmatpush3.bf16.msra.mxu0 %v2369_v42  ;;  %v1126_v42 = vld [vmem:[%s3643_s3 + $0x450] sm:$0xff] }
 0x16c   : > { %2338 = vmatpush3.bf16.msra.mxu1 %v2337_v41  ;;  %2372 = vmatprep.subr.bf16.mxu0 %v2371_v44  ;;  %v2400_v41 = vpack.c.bf16 %v1125_v40, %v1124_v39  ;;  %v2403_v17 = vpack.c.bf16 %v1127_v18, %v1126_v42  ;;  %v1129_v44 = vld [vmem:[%s3643_s3 + $0x468] sm:$0xff] }
 0x16d   : > { %2340 = vmatprep.subr.bf16.mxu1 %v2339_v43  ;;  %v1128_v43 = vld [vmem:[%s3643_s3 + $0x460] sm:$0xff] }
 0x16e   : > { %v2406_v45 = vpack.c.bf16 %v1129_v44, %v1128_v43 }
 0x16f   : > { %2374 = vmatpush3.bf16.msra.mxu0 %v2373_v50 }
 0x170   : > { %2342 = vmatpush3.bf16.msra.mxu1 %v2341_v49  ;;  %2376 = vmatprep.subr.bf16.mxu0 %v2375_v56  ;;  %v1175_v49 = vcombine.low %v946_v38, %v1689_v46 }
 0x171   : > { %2344 = vmatprep.subr.bf16.mxu1 %v2343_v53  ;;  %v1690_v53 = vld [vmem:[%s3644_s4] ss:$0 sm:$0xff] }
 0x172   : > { %v1182_v50 = vrot.slane %v1175_v49, %v3329_v29 }
 0x173   : > { %2378 = vmatpush3.bf16.msra.mxu0 %v2377_v63 }
 0x174   : > { %2346 = vmatpush3.bf16.msra.mxu1 %v2345_v62  ;;  %2380 = vmatprep.subr.bf16.mxu0 %v2379_v3 }
 0x175   : > { %2348 = vmatprep.subr.bf16.mxu1 %v2347_v2 }
 0x177   : > { %2382 = vmatpush3.bf16.msra.mxu0 %v2381_v11 }
 0x178   : > { %2350 = vmatpush3.bf16.msra.mxu1 %v2349_v10  ;;  %2384 = vmatprep.subr.bf16.mxu0 %v2383_v14 }
 0x179   : > { %2352 = vmatprep.subr.bf16.mxu1 %v2351_v13 }
 0x17b   : > { %2386 = vmatpush3.bf16.msra.mxu0 %v2385_v22 }
 0x17c   : > { %2354 = vmatpush3.bf16.msra.mxu1 %v2353_v21 }
 0x17d   : > { %2387 = vmatprep.subr.bf16.mxu1 %v2535_v27 }
 0x17e   : > { %1467 = vmatmul.mubr.f32.vlgmr.msra.gmra.mrb[12].mxu0 %v3361_v55  ;;  %v1123_v55 = vld [vmem:[%s3643_s3 + $0x438] sm:$0xff] }
 0x17f   : > { %1397 = vmatmul.mubr.f32.vlgmr.msra.gmra.mrb[10].mxu1 %v3358_v54  ;;  %v1122_v54 = vld [vmem:[%s3643_s3 + $0x430] sm:$0xff] }
 0x180   : > { %2389 = vmatpush3.bf16.msra.mxu1 %v2388_v25  ;;  %2096 = vmatprep.mubr.msk.f32.mxu1 %vm2536_vm0, %v2537_v34  ;;  %v2397_v26 = vpack.c.bf16 %v1123_v55, %v1122_v54 }
 0x181   : > { %2390 = vmatprep.subr.bf16.mxu1 %v2535_v27 }
 0x184   : > { %2392 = vmatpush3.bf16.msra.mxu1 %v2391_v33 }
 0x185   : > { %2393 = vmatprep.subr.bf16.mxu1 %v2535_v27 }
 0x188   : > { %2395 = vmatpush3.bf16.msra.mxu1 %v2394_v37 }
 0x189   : > { %2396 = vmatprep.subr.bf16.mxu1 %v2535_v27 }
 0x18c   : > { %2398 = vmatpush3.bf16.msra.mxu1 %v2397_v26 }
 0x18d   : > { %2399 = vmatprep.subr.bf16.mxu1 %v2535_v27 }
 0x190   : > { %2401 = vmatpush3.bf16.msra.mxu1 %v2400_v41 }
 0x191   : > { %2402 = vmatprep.subr.bf16.mxu1 %v2535_v27 }
 0x194   : > { %2404 = vmatpush3.bf16.msra.mxu1 %v2403_v17 }
 0x195   : > { %2405 = vmatprep.subr.bf16.mxu1 %v2535_v27 }
 0x198   : > { %2407 = vmatpush3.bf16.msra.mxu1 %v2406_v45 }
 0x199   : > { %2408 = vmatprep.subr.bf16.mxu1 %v2535_v27 }
 0x19c   : > { %2410 = vmatpush3.bf16.msra.mxu1 %v2409_v48 }
 0x19f   : > { %2097 = vmatmul.mubr.f32.vlgmr.msra.gmra.mrb[12].mxu1 %v1182_v50 }
 0x231   : > { %v1939_v52 = vpop.f32.mrb[10].mxu0 }
 0x232   : > { %v1904_v51 = vpop.f32.mrb[8].mxu1  ;;  %v1940_v47 = vpop.f32.mrb[11].mxu0 }
 0x233   : > { %v1905_v56 = vpop.f32.mrb[9].mxu1  ;;  %v1941_v16 = vadd.f32 %v1940_v47, %v1939_v52 }
 0x234   : > { %v1906_v57 = vadd.f32 %v1905_v56, %v1904_v51 }
 0x236   : > { %v1259_v58 = vadd.f32 %v1906_v57, %v1690_v53 }
 0x238   : > { %v1329_v59 = vadd.f32 %v1941_v16, %v1259_v58 }
 0x251   : > { %v2009_v61 = vpop.f32.mrb[12].mxu0 }
 0x252   : > { %v1974_v60 = vpop.f32.mrb[10].mxu1  ;;  %v2010_v63 = vpop.f32.mrb[13].mxu0 }
 0x253   : > { %v1975_v62 = vpop.f32.mrb[11].mxu1  ;;  %v2011_v1 = vadd.f32 %v2010_v63, %v2009_v61 }
 0x254   : > { %v1976_v0 = vadd.f32 %v1975_v62, %v1974_v60 }
 0x256   : > { %v1399_v2 = vadd.f32 %v1976_v0, %v1329_v59 }
 0x258   : > { %v1469_v3 = vadd.f32 %v2011_v1, %v1399_v2 }
 0x272   : > { %v1538_v4 = vpop.f32.mrb[12].mxu1 }
 0x273   : > { %v1539_v5 = vadd.f32 %v1538_v4, %v1469_v3  ;;  %v2098_v6 = vpop.f32.mrb[13].mxu1 }
 0x275   : > { %v1542_v7 = vmax.f32 %v1539_v5, 0.0 }
 0x277   : > { %v1550_v8 = vrot.slane %v1542_v7, %v3329_v29  ;;  %1695 = vst.sshfl [vmem:[%s261_s26] sm:$0x3 pattern:$0x76325410] %v1542_v7 }
 0x279   : > { %v1551_v9 = vcombine.high %v1550_v8, %v1550_v8  ;;  %v1696_v10 = vrot.slane %v1550_v8, 9 }
 0x27b   : > { %1555 = vst [vmem:[%s261_s26 + $0x2] sm:$0x3] %v1551_v9  ;;  %v1697_v11 = vrot.slane %v1551_v9, 9  ;;  %v1562_v12 = vmax.f32 %v1550_v8, %v1696_v10 }
 0x27d   : > { %v1563_v13 = vmax.f32 %v1551_v9, %v1697_v11 }
 0x27f   : > { %v1564_v14 = vmax.f32 %v1562_v12, %v1563_v13 }
 0x281   : > { %1565 = vst [vmem:[%s251_s10] sm:$0x1] %v1564_v14 }
 0x282   : > { %2483 = shalt.err (!%p2480_p3)
}
 0x283   : > { %s2484_s17 = scalar_lea.hbm %s3598_s20, 16  ;;  %s2488_s26 = scalar_lea.hbm %s3646_s6, 32 }
 0x284   : > { %p2485_p4 = scmp.ne.s32.totalorder %s3598_s20, %s2484_s17  ;;  %p2489_p9 = scmp.lt.u32.totalorder %s3598_s20, %s3646_s6 }
 0x285   : > { %p2490_p10 = scmp.lt.u32.totalorder %s2488_s26, %s2484_s17  ;;  %p2492_p12 = scmp.lt.u32.totalorder %s2484_s17, %s3598_s20 }
 0x286   : > { %p2486_p7 = pnand %p2485_p4, %p2612_p5 }
 0x287   : > { %p2491_p11 = por %p2490_p10, %p2489_p9 }
 0x288   : > { %p2487_p8 = pneg %p2486_p7 }
 0x289   : > { %p2493_p13 = por %p2492_p12, %p2491_p11 }
 0x28b   : > { %p2494_p0 = pnand %p2493_p13, %p2487_p8 }
 0x28d   : > { %2497 = shalt.err (!%p2494_p0)
}
 0x28e   : > { %2412 = dma.vmem_to_hbm [thread:$0]  (%p2612_p5), %s3600_s9, 16, %s3598_s20, %s1572_s13  }
 0x28f PF: > { %p2418_p1 = scmp.ge.s32.totalorder %s2532_s24, 2  ;;  %s1607_s10 = sand.u32 1, %s2520_s21  }
 0x290   : > { %s1608_s11 = scalar_lea.sflag [#allocation4], %s1607_s10 }
 0x291   : > { %p2415_p2 = pnand %p2418_p1, %p2616_p6 }
 0x293   : > { %2515 = dma.done.wait (!%p2415_p2), %s1608_s11, 16  }
 0x294   : > { %2517 = vsyncadd (!%p2415_p2), %s1608_s11, 4294967280  ;;  %p17_p3 = scmp.ge.s32.totalorder %s2599_s27, 4   ;;  %s3649_s21 = smov %s2524_s22 }
 0x295   : > { %s3650_s22 = smov %s2528_s23  ;;  %s3651_s23 = smov %s2610_s30 }
 0x296   : > { %s3652_s24 = smov %s2599_s27  ;;  %19 = sbr.rel (!%p17_p3) target bundleno = 3 (0x3), region = 87 }
 0x29d   :  { %1612 = vsyncpa [#allocation4], 1 }
 0x29e   :  { %1614 = vsyncpa [#allocation4 + $0x1], 1 }

// kernel: encoder_forward.2
= control target key start
LH: loop header
LB: loop body
LE: loop exit
PB: predicated region body
PF: predicated region fallthrough
CT: control target
= control target key end

     0   :  { %s11162_s21 = smov 0   ;;  %s16070_s0 = inlined_call_operand.vmem [shape: f32[2,16,16,128], index: 0, kind: input, shape index: {}]   ;;  %s16071_s1 = inlined_call_operand.vmem [shape: f32[1152,128], index: 1, kind: input, shape index: {}]   ;;  %s16072_s2 = inlined_call_operand.vmem [shape: f32[1,128], index: 2, kind: input, shape index: {}]   ;;  %s16073_s3 = inlined_call_operand.vmem [shape: f32[1152,128], index: 3, kind: input, shape index: {}]   ;;  %s16074_s4 = inlined_call_operand.vmem [shape: f32[1,128], index: 4, kind: input, shape index: {}]   ;;  %s16075_s5 = inlined_call_operand.vmem [shape: f32[2,12,12,128], index: 5, kind: output, shape index: {0}]   ;;  %s16076_s6 = inlined_call_operand.vmem [shape: f32[2,6,6,128], index: 6, kind: output, shape index: {1}]  }
   0x1 LB: > { %s9604_s22 = sadd.s32 4294967295, %s11121_s21   ;;  %p9608_p0 = scmp.ge.s32.totalorder %s11121_s21, 1  ;;  %s11121_s21 = sphi %s11162_s21, %s17_s21  }
   0x2   : > { %p215_p1 = scmp.lt.s32.totalorder %s11121_s21, 3 }
   0x4   : > { %p216_p2 = pnand %p9608_p0, %p215_p1 }
   0x6   : > { %219 = sbr.rel (%p216_p2) target bundleno = 1261 (0x4ed), region = 40 }
   0xd   : > { %v2523_v0 = vld [vmem:[%s16071_s1] sm:$0xff]  ;;  %v2524_v1 = vld [vmem:[%s16071_s1 + $0x8] sm:$0xff]  ;;  %v2525_v2 = vld [vmem:[%s16071_s1 + $0x10] sm:$0xff]  ;;  %p250_p3 = scmp.lt.s32.totalorder %s9604_s22, 1  ;;  %v16077_v3 = vmov 0.0|0.0   ;;  %v464_v8 = vlaneseq  ;;  %vm11125_vm0 = vmmov 0  }
   0xe   : > { %10119 = vmatprep.subr.bf16.mxu0 %v16077_v3  ;;  %v10120_v4 = vpack.c.bf16 %v2524_v1, %v2523_v0  ;;  %v2526_v5 = vld [vmem:[%s16071_s1 + $0x18] sm:$0xff]  ;;  %10311 = vmatprep.subr.bf16.mxu1 %v16077_v3  ;;  %v11124_v6 = vmov 1983009808   ;;  %v2527_v10 = vld [vmem:[%s16071_s1 + $0x20] sm:$0xff]  ;;  %v2528_v11 = vld [vmem:[%s16071_s1 + $0x28] sm:$0xff]  ;;  %vm9469_vm1 = vcmask 1041409  }
   0xf   : > { %s16768_s22 = smov (!%p250_p3, %s9604_s22), 1  ;;  %v462_v7 = vunpack.c.l.s4 %v11124_v6  ;;  %v10123_v9 = vpack.c.bf16 %v2526_v5, %v2525_v2  ;;  %v11194_v13 = vshrl.u32 %v464_v8, 7  ;;  %v10126_v14 = vpack.c.bf16 %v2528_v11, %v2527_v10  ;;  %v2529_v15 = vld [vmem:[%s16071_s1 + $0x30] sm:$0xff]  ;;  %v2530_v16 = vld [vmem:[%s16071_s1 + $0x38] sm:$0xff]  ;;  %v2531_v21 = vld [vmem:[%s16071_s1 + $0x40] sm:$0xff] }
  0x10   : > { %10121 = vmatpush1.bf16.msra.mxu0 %v10120_v4  ;;  %s9877_s11 = sshll.u32 %s16768_s22, 8  ;;  %v10129_v19 = vpack.c.bf16 %v2530_v16, %v2529_v15  ;;  %v2532_v22 = vld [vmem:[%s16071_s1 + $0x48] sm:$0xff]  ;;  %v2533_v28 = vld [vmem:[%s16071_s1 + $0x50] sm:$0xff]  ;;  %v2534_v29 = vld [vmem:[%s16071_s1 + $0x58] sm:$0xff]  ;;  %s10885_s29 = smul.u32 192, %s16768_s22  ;;  %vm9471_vm2 = vcmask 1042434  }
  0x11   : > { %10122 = vmatprep.subr.bf16.mxu0 %v16077_v3  ;;  %v463_v12 = vunpack.c.0.s8 %v462_v7  ;;  %16320 = vst [vmem:[#allocation3_spill] sm:$0xff] %v11194_v13  ;;  %s11199_s14 = scalar_lea.vmem %s16070_s0, %s9877_s11  ;;  %v10132_v27 = vpack.c.bf16 %v2532_v22, %v2531_v21  ;;  %v10135_v33 = vpack.c.bf16 %v2534_v29, %v2533_v28  ;;  %v2535_v34 = vld [vmem:[%s16071_s1 + $0x60] sm:$0xff]  ;;  %v2536_v35 = vld [vmem:[%s16071_s1 + $0x68] sm:$0xff]  ;;  %v2537_v37 = vld [vmem:[%s16071_s1 + $0x70] sm:$0xff]  ;;  %vm9473_vm3 = vcmask 1043459   ;;  %s10886_s9 = smul.u32 48, %s16768_s22 }
  0x12   : > { %v265_v17 = vld [vmem:[%s11199_s14] sm:$0xff]  ;;  %v10138_v36 = vpack.c.bf16 %v2536_v35, %v2535_v34  ;;  %v2538_v38 = vld [vmem:[%s16071_s1 + $0x78] sm:$0xff]  ;;  %v2540_v41 = vld [vmem:[%s16071_s1 + $0x88] sm:$0xff]  ;;  %s15778_s8 = scalar_lea.vmem %s16075_s5, %s10885_s29  ;;  %vm9475_vm4 = vcmask 1044484   ;;  %vm9477_vm5 = vcmask 1045509  }
  0x13   : > { %v11210_v18 = vsub.s32 %v463_v12, %v11194_v13  ;;  %v297_v20 = vld [vmem:[%s11199_s14 + $0x1] sm:$0xff]  ;;  %v10141_v39 = vpack.c.bf16 %v2538_v38, %v2537_v37  ;;  %v2541_v43 = vld [vmem:[%s16071_s1 + $0x90] sm:$0xff]  ;;  %v2542_v44 = vld [vmem:[%s16071_s1 + $0x98] sm:$0xff] }
  0x14   : > { %10124 = vmatpush1.bf16.msra.mxu0 %v10123_v9  ;;  %v457_v23 = vcombine.low %v265_v17, %v297_v20  ;;  %v458_v24 = vcombine.high %v265_v17, %v297_v20  ;;  %v2539_v40 = vld [vmem:[%s16071_s1 + $0x80] sm:$0xff]  ;;  %v10147_v45 = vpack.c.bf16 %v2542_v44, %v2541_v43  ;;  %v2544_v47 = vld [vmem:[%s16071_s1 + $0xa8] sm:$0xff]  ;;  %v2545_v49 = vld [vmem:[%s16071_s1 + $0xb0] sm:$0xff] }
  0x15   : > { %10125 = vmatprep.subr.bf16.mxu0 %v16077_v3  ;;  %16321 = vst [vmem:[#allocation4_spill] sm:$0xff] %v11210_v18  ;;  %v10144_v42 = vpack.c.bf16 %v2540_v41, %v2539_v40  ;;  %v2543_v46 = vld [vmem:[%s16071_s1 + $0xa0] sm:$0xff]  ;;  %v2546_v50 = vld [vmem:[%s16071_s1 + $0xb8] sm:$0xff]  ;;  %v266_v51 = vld [vmem:[%s11199_s14 + $0x8] sm:$0x3f] }
  0x16   : > { %v467_v25 = vrot.slane %v457_v23, %v11210_v18  ;;  %v474_v26 = vrot.slane %v458_v24, %v11210_v18  ;;  %v10150_v48 = vpack.c.bf16 %v2544_v47, %v2543_v46  ;;  %v11281_v52 = vld [vmem:[%s11199_s14 + $0x20] sm:$0xff]  ;;  %v331_v53 = vld [vmem:[%s11199_s14 + $0x12] sm:$0xff]  ;;  %v10153_v54 = vpack.c.bf16 %v2546_v50, %v2545_v49  ;;  %v298_v56 = vld [vmem:[%s11199_s14 + $0x9] sm:$0x3f] }
  0x17   : > { %v11285_v55 = vld [vmem:[%s11199_s14 + $0x10] sm:$0xff]  ;;  %v2547_v58 = vld [vmem:[%s16071_s1 + $0xc0] sm:$0xff]  ;;  %v2548_v59 = vld [vmem:[%s16071_s1 + $0xc8] sm:$0xff]  ;;  %v634_v61 = vcombine.low %v331_v53, %v11281_v52  ;;  %v635_v62 = vcombine.high %v331_v53, %v11281_v52  ;;  %v547_v63 = vcombine.high %v266_v51, %v298_v56 }
  0x18   : > { %10127 = vmatpush1.bf16.msra.mxu0 %v10126_v14  ;;  %v11230_v30 = vrot.slane %v467_v25, %v11210_v18  ;;  %v11233_v31 = vrot.slane %v474_v26, %v11210_v18  ;;  %v299_v57 = vld [vmem:[%s11199_s14 + $0x11] sm:$0xff]  ;;  %v300_v2 = vld [vmem:[%s11199_s14 + $0x19] sm:$0x3f]  ;;  %v10156_v4 = vpack.c.bf16 %v2548_v59, %v2547_v58  ;;  %v11312_v7 = vld [vmem:[%s11199_s14 + $0x28] sm:$0x3f]  ;;  %v546_v14 = vcombine.low %v266_v51, %v298_v56 }
  0x19   : > { %10128 = vmatprep.subr.bf16.mxu0 %v16077_v3  ;;  %v633_v60 = vcombine.high %v11285_v55, %v299_v57  ;;  %v632_v0 = vcombine.low %v11285_v55, %v299_v57  ;;  %v11301_v1 = vld [vmem:[%s11199_s14 + $0x18] sm:$0x3f]  ;;  %v2549_v5 = vld [vmem:[%s16071_s1 + $0xd0] sm:$0xff]  ;;  %v11319_v10 = vrot.slane %v634_v61, %v11210_v18  ;;  %v11322_v11 = vrot.slane %v635_v62, %v11210_v18  ;;  %v2551_v20 = vld [vmem:[%s16071_s1 + $0xe0] sm:$0xff] }
  0x1a   : > { %v2707_v32 = vcombine.high %v11230_v30, %v11233_v31  ;;  %v2550_v6 = vld [vmem:[%s16071_s1 + $0xd8] sm:$0xff]  ;;  %v721_v12 = vcombine.low %v11301_v1, %v300_v2  ;;  %v563_v15 = vrot.slane %v547_v63, %v11210_v18  ;;  %v2552_v21 = vld [vmem:[%s16071_s1 + $0xe8] sm:$0xff]  ;;  %v2553_v26 = vld [vmem:[%s16071_s1 + $0xf0] sm:$0xff]  ;;  %v722_v35 = vcombine.high %v11301_v1, %v300_v2 }
  0x1b   : > { %v332_v8 = vld [vmem:[%s11199_s14 + $0x1a] sm:$0x3f]  ;;  %v11316_v9 = vrot.slane %v633_v60, %v11210_v18  ;;  %v642_v16 = vrot.slane %v632_v0, %v11210_v18  ;;  %v10159_v17 = vpack.c.bf16 %v2550_v6, %v2549_v5  ;;  %v301_v25 = vld [vmem:[%s11199_s14 + $0x21] sm:$0xff]  ;;  %v11347_v29 = vld [vmem:[%s11199_s14 + $0x30] sm:$0xff]  ;;  %v2706_v60 = vcombine.low %v11230_v30, %v11233_v31 }
  0x1c   : > { %10130 = vmatpush1.bf16.msra.mxu0 %v10129_v19  ;;  %5143 = vmatprep.mubr.f32.mxu0 %v2707_v32  ;;  %v723_v19 = vcombine.low %v332_v8, %v11312_v7  ;;  %v11339_v24 = vrot.slane %v721_v12, %v11210_v18  ;;  %v303_v32 = vld [vmem:[%s11199_s14 + $0x31] sm:$0xff]  ;;  %v11358_v37 = vld [vmem:[%s11199_s14 + $0x40] sm:$0xff]  ;;  %v302_v40 = vld [vmem:[%s11199_s14 + $0x29] sm:$0x3f]  ;;  %v11380_v51 = vrot.slane %v722_v35, %v11210_v18 }
  0x1d   : > { %10131 = vmatprep.subr.bf16.mxu0 %v16077_v3  ;;  %v665_v22 = vcombine.high %v642_v16, %v11319_v10  ;;  %v667_v23 = vcombine.high %v11316_v9, %v11322_v11  ;;  %v9614_v28 = vcombine.low %v563_v15, %v642_v16  ;;  %v2554_v34 = vld [vmem:[%s16071_s1 + $0xf8] sm:$0xff]  ;;  %v2555_v41 = vld [vmem:[%s16071_s1 + $0x100] sm:$0xff]  ;;  %v583_v56 = vcombine.low %v11312_v7, %v302_v40  ;;  %v11387_v57 = vld [vmem:[%s11199_s14 + $0x48] sm:$0x3f] }
  0x1e   : > { %v335_v38 = vld [vmem:[%s11199_s14 + $0x32] sm:$0xff]  ;;  %v10165_v46 = vpack.c.bf16 %v2554_v34, %v2553_v26  ;;  %v11391_v59 = vld [vmem:[%s11199_s14 + $0x3a] sm:$0x3f]  ;;  %v584_v63 = vcombine.high %v11312_v7, %v302_v40  ;;  %v671_v30 = vcombine.high %v11347_v29, %v303_v32 }
  0x1f   : > { %v9618_v43 = vcombine.low %v665_v22, %v11316_v9  ;;  %v9620_v44 = vcombine.low %v667_v23, %v11339_v24  ;;  %v950_v49 = vcombine.low %v335_v38, %v11358_v37  ;;  %v11377_v50 = vld [vmem:[%s11199_s14 + $0x38] sm:$0x3f]  ;;  %v2557_v2 = vld [vmem:[%s16071_s1 + $0x110] sm:$0xff]  ;;  %v951_v7 = vcombine.high %v335_v38, %v11358_v37  ;;  %v2559_v23 = vld [vmem:[%s16071_s1 + $0x120] sm:$0xff] }
  0x20   : > { %10133 = vmatpush1.bf16.msra.mxu0 %v10132_v27  ;;  %v556_v27 = vrot.slane %v546_v14, %v11210_v18  ;;  %v304_v58 = vld [vmem:[%s11199_s14 + $0x39] sm:$0x3f]  ;;  %v1023_v8 = vcombine.low %v11391_v59, %v11387_v57  ;;  %v605_v16 = vrot.slane %v583_v56, %v11210_v18  ;;  %v305_v56 = vld [vmem:[%s11199_s14 + $0x41] sm:$0xff] }
  0x21   : > { %10134 = vmatprep.subr.bf16.mxu0 %v16077_v3  ;;  %v11399_v0 = vrot.slane %v9618_v43, %v11210_v18  ;;  %v11415_v5 = vrot.slane %v950_v49, %v11210_v18  ;;  %v758_v6 = vcombine.low %v11377_v50, %v304_v58  ;;  %v759_v26 = vcombine.high %v11377_v50, %v304_v58  ;;  %v306_v58 = vld [vmem:[%s11199_s14 + $0x49] sm:$0x3f]  ;;  %v11618_v13 = vld [vmem:[%s11199_s14 + $0x72] sm:$0xff] }
  0x22   : > { %v2773_v47 = vrot.slane %v556_v27, %v11210_v18  ;;  %v2560_v27 = vld [vmem:[%s16071_s1 + $0x128] sm:$0xff]  ;;  %v11457_v35 = vrot.slane %v951_v7, %v11210_v18  ;;  %v11460_v38 = vrot.slane %v1023_v8, %v11210_v18 }
  0x23   : > { %16323 = vst [vmem:[#allocation6_spill] sm:$0xff] %v11415_v5  ;;  %v11454_v34 = vrot.slane %v758_v6, %v11210_v18  ;;  %v11481_v49 = vrot.slane %v759_v26, %v11210_v18  ;;  %v11515_v6 = vld [vmem:[%s11199_s14 + $0x59] sm:$0x3f] }
  0x24   : > { %10136 = vmatpush1.bf16.msra.mxu0 %v10135_v33  ;;  %v10162_v33 = vpack.c.bf16 %v2552_v21, %v2551_v20  ;;  %v612_v20 = vrot.slane %v584_v63, %v11210_v18  ;;  %v11496_v63 = vld [vmem:[%s16071_s1 + $0x140] sm:$0xff] }
  0x25   : > { %10137 = vmatprep.subr.bf16.mxu0 %v16077_v3  ;;  %16326 = vst [vmem:[#allocation9_spill] sm:$0xff] %v11454_v34  ;;  %16329 = vst [vmem:[#allocation12_spill] sm:$0xff] %v11481_v49 }
  0x28   : > { %10139 = vmatpush1.bf16.msra.mxu0 %v10138_v36  ;;  %v11355_v36 = vrot.slane %v723_v19, %v11210_v18 }
  0x29   : > { %10140 = vmatprep.subr.bf16.mxu0 %v16077_v3 }
  0x2a   : > { %v754_v53 = vcombine.high %v11339_v24, %v11355_v36 }
  0x2c   : > { %10142 = vmatpush1.bf16.msra.mxu0 %v10141_v39  ;;  %v495_v39 = vcombine.low %v11281_v52, %v301_v25  ;;  %v9626_v14 = vcombine.low %v754_v53, %v11380_v51 }
  0x2d   : > { %10143 = vmatprep.subr.bf16.mxu0 %v16077_v3 }
  0x2e   : > { %v517_v62 = vrot.slane %v495_v39, %v11210_v18  ;;  %v2951_v39 = vrot.slane %v9626_v14, %v11210_v18  ;;  %v829_v14 = vcombine.low %v11358_v37, %v305_v56 }
  0x30   : > { %10145 = vmatpush1.bf16.msra.mxu0 %v10144_v42  ;;  %v2556_v42 = vld [vmem:[%s16071_s1 + $0x108] sm:$0xff]  ;;  %v11429_v22 = vrot.slane %v517_v62, %v11210_v18 }
  0x31   : > { %10146 = vmatprep.subr.bf16.mxu0 %v16077_v3  ;;  %v10168_v61 = vpack.c.bf16 %v2556_v42, %v2555_v41  ;;  %v11467_v41 = vrot.slane %v605_v16, %v11210_v18  ;;  %v901_v16 = vcombine.low %v11387_v57, %v306_v58 }
  0x32   : > { %16324 = vst [vmem:[#allocation7_spill] sm:$0xff] %v11429_v22 }
  0x33   : > { %16328 = vst [vmem:[#allocation11_spill] sm:$0xff] %v11467_v41 }
  0x34   : > { %10148 = vmatpush1.bf16.msra.mxu0 %v10147_v45  ;;  %v670_v45 = vcombine.low %v11347_v29, %v303_v32  ;;  %v11446_v32 = vld [vmem:[%s16071_s1 + $0x130] sm:$0xff] }
  0x35   : > { %10149 = vmatprep.subr.bf16.mxu0 %v16077_v3 }
  0x36   : > { %v11412_v31 = vrot.slane %v670_v45, %v11210_v18 }
  0x38   : > { %10151 = vmatpush1.bf16.msra.mxu0 %v10150_v48  ;;  %v2787_v48 = vrot.slane %v9614_v28, %v11210_v18  ;;  %16322 = vst [vmem:[#allocation5_spill] sm:$0xff] %v11412_v31  ;;  %v967_v28 = vcombine.high %v11412_v31, %v11415_v5  ;;  %v9617_v42 = vcombine.low %v612_v20, %v11412_v31  ;;  %v11528_v20 = vld [vmem:[%s11199_s14 + $0x5a] sm:$0x3f]  ;;  %v315_v31 = vld [vmem:[%s11199_s14 + $0x91] sm:$0xff] }
  0x39   : > { %10152 = vmatprep.subr.bf16.mxu0 %v16077_v3  ;;  %16334 = vst [vmem:[#allocation17_spill] sm:$0xff] %v11528_v20 }
  0x3a   : > { %v2796_v12 = vcombine.high %v2773_v47, %v2787_v48 }
  0x3c   : > { %10154 = vmatpush1.bf16.msra.mxu0 %v10153_v54  ;;  %v496_v54 = vcombine.high %v11281_v52, %v301_v25  ;;  %v11402_v52 = vrot.slane %v9620_v44, %v11210_v18  ;;  %v11435_v25 = vrot.slane %v671_v30, %v11210_v18  ;;  %v10174_v44 = vpack.c.bf16 %v2560_v27, %v2559_v23  ;;  %v11512_v30 = vld [vmem:[%s11199_s14 + $0x58] sm:$0x3f] }
  0x3d   : > { %10155 = vmatprep.subr.bf16.mxu0 %v16077_v3  ;;  %16332 = vst [vmem:[#allocation15_spill] sm:$0xff] %v11512_v30 }
  0x3e   : > { %v524_v15 = vrot.slane %v496_v54, %v11210_v18  ;;  %v2885_v21 = vcombine.high %v11399_v0, %v11402_v52  ;;  %16325 = vst [vmem:[#allocation8_spill] sm:$0xff] %v11435_v25  ;;  %v2884_v43 = vcombine.low %v11399_v0, %v11402_v52  ;;  %v969_v53 = vcombine.high %v11435_v25, %v11457_v35  ;;  %v11499_v0 = vld [vmem:[%s11199_s14 + $0x50] sm:$0xff] }
  0x3f   : > { %v1040_v54 = vcombine.high %v11454_v34, %v11460_v38  ;;  %16330 = vst [vmem:[#allocation13_spill] sm:$0xff] %v11499_v0  ;;  %v307_v52 = vld [vmem:[%s11199_s14 + $0x51] sm:$0xff] }
  0x40   : > { %10157 = vmatpush1.bf16.msra.mxu0 %v10156_v4  ;;  %v2558_v4 = vld [vmem:[%s16071_s1 + $0x118] sm:$0xff]  ;;  %v11464_v40 = vrot.slane %v524_v15, %v11210_v18  ;;  %v973_v7 = vcombine.high %v11499_v0, %v307_v52  ;;  %v830_v15 = vcombine.high %v11358_v37, %v305_v56  ;;  %v9638_v23 = vcombine.low %v969_v53, %v11454_v34 }
  0x41   : > { %10158 = vmatprep.subr.bf16.mxu0 %v16077_v3  ;;  %v10171_v19 = vpack.c.bf16 %v2558_v4, %v2557_v2  ;;  %v11504_v2 = vrot.slane %v9617_v42, %v11210_v18  ;;  %v11509_v4 = vld [vmem:[%s16071_s1 + $0x148] sm:$0xff]  ;;  %v9640_v26 = vcombine.low %v1040_v54, %v11481_v49  ;;  %v972_v27 = vcombine.low %v11499_v0, %v307_v52 }
  0x42   : > { %16327 = vst [vmem:[#allocation10_spill] sm:$0xff] %v11464_v40  ;;  %v3063_v62 = vcombine.high %v11464_v40, %v11467_v41  ;;  %v3062_v37 = vcombine.low %v11464_v40, %v11467_v41  ;;  %v923_v53 = vrot.slane %v901_v16, %v11210_v18  ;;  %v309_v52 = vld [vmem:[%s11199_s14 + $0x61] sm:$0xff]  ;;  %v11646_v41 = vld [vmem:[%s11199_s14 + $0x78] sm:$0x3f] }
  0x43   : > { %16331 = vst [vmem:[#allocation14_spill] sm:$0xff] %v11504_v2  ;;  %16347 = vst [vmem:[#allocation29_spill] sm:$0xff] %v11646_v41  ;;  %v312_v40 = vld [vmem:[%s11199_s14 + $0x79] sm:$0x3f] }
  0x44   : > { %10160 = vmatpush1.bf16.msra.mxu0 %v10159_v17  ;;  %v2795_v17 = vcombine.low %v2773_v47, %v2787_v48  ;;  %v339_v47 = vld [vmem:[%s11199_s14 + $0x52] sm:$0xff]  ;;  %v9632_v48 = vcombine.low %v967_v28, %v11435_v25  ;;  %v10180_v28 = vpack.c.bf16 %v11509_v4, %v11496_v63  ;;  %v11570_v63 = vrot.slane %v972_v27, %v11210_v18 }
  0x45   : > { %10161 = vmatprep.subr.bf16.mxu0 %v16077_v3  ;;  %v2566_v4 = vld [vmem:[%s16071_s1 + $0x158] sm:$0xff] }
  0x46   : > { %16338 = vst [vmem:[#allocation21_spill] sm:$0xff] %v11570_v63  ;;  %v311_v27 = vld [vmem:[%s11199_s14 + $0x71] sm:$0xff] }
  0x48   : > { %10163 = vmatpush1.bf16.msra.mxu0 %v10162_v33  ;;  %v11451_v33 = vld [vmem:[%s16071_s1 + $0x138] sm:$0xff] }
  0x49   : > { %10164 = vmatprep.subr.bf16.mxu0 %v16077_v3  ;;  %v10177_v45 = vpack.c.bf16 %v11451_v33, %v11446_v32  ;;  %v1044_v32 = vcombine.low %v11512_v30, %v11515_v6  ;;  %v11544_v33 = vrot.slane %v973_v7, %v11210_v18  ;;  %v1045_v7 = vcombine.high %v11512_v30, %v11515_v6 }
  0x4b   : > { %16335 = vst [vmem:[#allocation18_spill] sm:$0xff] %v11544_v33 }
  0x4c   : > { %10166 = vmatpush1.bf16.msra.mxu0 %v10165_v46  ;;  %v11476_v46 = vld [vmem:[%s11199_s14 + $0x60] sm:$0xff] }
  0x4d   : > { %10167 = vmatprep.subr.bf16.mxu0 %v16077_v3  ;;  %v1236_v8 = vcombine.low %v339_v47, %v11476_v46 }
  0x4f   : > { %5144 = vmatmul.mubr.f32.vlgmr.msra.gmra.mrb[0].mxu0 %v2706_v60  ;;  %v2974_v60 = vcombine.high %v2951_v39, %v11429_v22 }
  0x50   : > { %10169 = vmatpush1.bf16.msra.mxu0 %v10168_v61  ;;  %5148 = vmatprep.mubr.f32.mxu0 %v2796_v12  ;;  %v2973_v61 = vcombine.low %v2951_v39, %v11429_v22  ;;  %v1237_v12 = vcombine.high %v339_v47, %v11476_v46  ;;  %v11547_v39 = vrot.slane %v1236_v8, %v11210_v18 }
  0x51   : > { %10170 = vmatprep.subr.bf16.mxu0 %v16077_v3  ;;  %v851_v47 = vrot.slane %v829_v14, %v11210_v18  ;;  %v1116_v8 = vcombine.high %v11476_v46, %v309_v52 }
  0x52   : > { %16336 = vst [vmem:[#allocation19_spill] sm:$0xff] %v11547_v39  ;;  %v11550_v42 = vrot.slane %v1237_v12, %v11210_v18 }
  0x53   : > { %5149 = vmatmul.mubr.f32.gmra.mrb[2].mxu0 %v2795_v17  ;;  %v902_v17 = vcombine.high %v11387_v57, %v306_v58  ;;  %v11564_v58 = vrot.slane %v9638_v23, %v11210_v18  ;;  %v11598_v16 = vrot.slane %v851_v47, %v11210_v18  ;;  %v11604_v23 = vrot.slane %v923_v53, %v11210_v18  ;;  %v11615_v47 = vld [vmem:[%s11199_s14 + $0x80] sm:$0xff]  ;;  %v2568_v53 = vld [vmem:[%s16071_s1 + $0x168] sm:$0xff] }
  0x54   : > { %5153 = vmatprep.mubr.f32.mxu0 %v2885_v21  ;;  %10172 = vmatpush1.bf16.msra.mxu0 %v10171_v19  ;;  %v11525_v19 = vld [vmem:[%s11199_s14 + $0x68] sm:$0x3f]  ;;  %v11531_v21 = vrot.slane %v9632_v48, %v11210_v18  ;;  %16337 = vst [vmem:[#allocation20_spill] sm:$0xff] %v11550_v42  ;;  %v858_v48 = vrot.slane %v830_v15, %v11210_v18 }
  0x55   : > { %10173 = vmatprep.subr.bf16.mxu0 %v16077_v3  ;;  %16333 = vst [vmem:[#allocation16_spill] sm:$0xff] %v11525_v19  ;;  %v930_v54 = vrot.slane %v902_v17, %v11210_v18  ;;  %v1255_v14 = vcombine.high %v11544_v33, %v11550_v42  ;;  %16341 = vst [vmem:[#allocation24_spill] sm:$0xff] %v11598_v16 }
  0x56   : > { %v3152_v56 = vcombine.high %v11504_v2, %v11531_v21  ;;  %v3151_v15 = vcombine.low %v11504_v2, %v11531_v21  ;;  %v11601_v17 = vrot.slane %v858_v48, %v11210_v18  ;;  %16343 = vst [vmem:[#allocation26_spill] sm:$0xff] %v11604_v23  ;;  %v1115_v21 = vcombine.low %v11476_v46, %v309_v52 }
  0x57   : > { %5154 = vmatmul.mubr.f32.gmra.mrb[4].mxu0 %v2884_v43  ;;  %v1309_v43 = vcombine.low %v11528_v20, %v11525_v19  ;;  %v11621_v48 = vrot.slane %v1045_v7, %v11210_v18  ;;  %v1144_v46 = vrot.slane %v1116_v8, %v11210_v18  ;;  %v16346_v52 = vmov 0.0|0.0  }
  0x58   : > { %5158 = vmatprep.mubr.f32.mxu0 %v2974_v60  ;;  %10175 = vmatpush1.bf16.msra.mxu0 %v10174_v44  ;;  %v11555_v44 = vld [vmem:[%s11199_s14 + $0x69] sm:$0x3f]  ;;  %v11567_v60 = vrot.slane %v9640_v26, %v11210_v18  ;;  %16342 = vst [vmem:[#allocation25_spill] sm:$0xff] %v11601_v17  ;;  %v11607_v26 = vld [vmem:[%s11199_s14 + $0x70] sm:$0xff]  ;;  %v3330_v8 = vcombine.high %v11598_v16, %v11601_v17 }
  0x59   : > { %10176 = vmatprep.subr.bf16.mxu0 %v16077_v3  ;;  %v1187_v12 = vcombine.low %v11525_v19, %v11555_v44  ;;  %v11593_v6 = vrot.slane %v1309_v43, %v11210_v18  ;;  %16344 = vst [vmem:[#allocation27_spill] sm:$0xff] %v11607_v26  ;;  %v9635_v43 = vcombine.low %v930_v54, %v11570_v63  ;;  %16345 = vst [vmem:[#allocation28_spill] sm:$0xff] %v11621_v48 }
  0x5a   : > { %v3240_v7 = vcombine.low %v11564_v58, %v11567_v60  ;;  %v1137_v2 = vrot.slane %v1115_v21, %v11210_v18  ;;  %v1259_v21 = vcombine.high %v11607_v26, %v311_v27 }
  0x5b   : > { %5159 = vmatmul.mubr.f32.gmra.mrb[6].mxu0 %v2973_v61  ;;  %v2565_v61 = vld [vmem:[%s16071_s1 + $0x150] sm:$0xff]  ;;  %16340 = vst [vmem:[#allocation23_spill] sm:$0xff] %v11593_v6  ;;  %v1209_v54 = vrot.slane %v1187_v12, %v11210_v18  ;;  %v3329_v12 = vcombine.low %v11598_v16, %v11601_v17  ;;  %v11662_v17 = vrot.slane %v1144_v46, %v11210_v18 }
  0x5c   : > { %5163 = vmatprep.mubr.f32.mxu0 %v3063_v62  ;;  %10178 = vmatpush1.bf16.msra.mxu0 %v10177_v45  ;;  %v11586_v45 = vrot.slane %v1044_v32, %v11210_v18  ;;  %v1253_v62 = vcombine.high %v11570_v63, %v11547_v39  ;;  %v3241_v32 = vcombine.high %v11564_v58, %v11567_v60  ;;  %v11655_v60 = vld [vmem:[%s11199_s14 + $0x88] sm:$0x3f]  ;;  %v11659_v63 = vld [vmem:[%s11199_s14 + $0x7a] sm:$0x3f]  ;;  %v11728_v16 = vld [vmem:[%s11199_s14 + $0x90] sm:$0xff] }
  0x5d   : > { %10179 = vmatprep.subr.bf16.mxu0 %v16077_v3  ;;  %v10183_v3 = vpack.c.bf16 %v2566_v4, %v2565_v61  ;;  %v1258_v4 = vcombine.low %v11607_v26, %v311_v27  ;;  %v1188_v58 = vcombine.high %v11525_v19, %v11555_v44  ;;  %16349 = vst [vmem:[#allocation31_spill] sm:$0xff] %v11655_v60  ;;  %16350 = vst [vmem:[#allocation32_spill] sm:$0xff] %v11659_v63  ;;  %v2570_v44 = vld [vmem:[%s16071_s1 + $0x178] sm:$0xff]  ;;  %v11780_v19 = vld [vmem:[%s11199_s14 + $0xa8] sm:$0x3f] }
  0x5e   : > { %16339 = vst [vmem:[#allocation22_spill] sm:$0xff] %v11586_v45  ;;  %v1326_v61 = vcombine.high %v11586_v45, %v11593_v6  ;;  %16351 = vst [vmem:[#allocation33_spill] sm:$0xff] %v11662_v17  ;;  %v1523_v27 = vcombine.high %v11618_v13, %v11615_v47  ;;  %v11761_v26 = vld [vmem:[%s11199_s14 + $0x98] sm:$0x3f] }
  0x5f   : > { %5164 = vmatmul.mubr.f32.gmra.mrb[8].mxu0 %v3062_v37  ;;  %v2567_v37 = vld [vmem:[%s16071_s1 + $0x160] sm:$0xff]  ;;  %16357 = vst [vmem:[#allocation39_spill] sm:$0xff] %v11728_v16  ;;  %16361 = vst [vmem:[#allocation43_spill] sm:$0xff] %v11761_v26  ;;  %v11764_v39 = vld [vmem:[%s11199_s14 + $0x99] sm:$0x3f] }
  0x60   : > { %5168 = vmatprep.mubr.f32.mxu0 %v3152_v56  ;;  %10181 = vmatpush1.bf16.msra.mxu0 %v10180_v28  ;;  %v9650_v28 = vcombine.low %v1253_v62, %v11544_v33  ;;  %v9652_v56 = vcombine.low %v1255_v14, %v11586_v45  ;;  %v1522_v62 = vcombine.low %v11618_v13, %v11615_v47  ;;  %v2571_v13 = vld [vmem:[%s16071_s1 + $0x180] sm:$0xff]  ;;  %v11783_v45 = vld [vmem:[%s11199_s14 + $0x9a] sm:$0x3f] }
  0x61   : > { %10182 = vmatprep.subr.bf16.mxu0 %v16346_v52  ;;  %v11649_v14 = vrot.slane %v9635_v43, %v11210_v18  ;;  %v10186_v22 = vpack.c.bf16 %v2568_v53, %v2567_v37  ;;  %v2569_v43 = vld [vmem:[%s16071_s1 + $0x170] sm:$0xff]  ;;  %v11683_v53 = vrot.slane %v1258_v4, %v11210_v18  ;;  %16363 = vst [vmem:[#allocation45_spill] sm:$0xff] %v11780_v19  ;;  %16364 = vst [vmem:[#allocation46_spill] sm:$0xff] %v11783_v45  ;;  %v12011_v6 = vld [vmem:[%s11199_s14 + $0xd8] sm:$0x3f] }
  0x62   : > { %v11675_v37 = vrot.slane %v9650_v28, %v11210_v18  ;;  %v11686_v46 = vrot.slane %v1522_v62, %v11210_v18  ;;  %v1595_v28 = vcombine.low %v11659_v63, %v11655_v60  ;;  %v10189_v4 = vpack.c.bf16 %v2570_v44, %v2569_v43  ;;  %v11715_v44 = vld [vmem:[%s11199_s14 + $0xa0] sm:$0xff]  ;;  %v324_v33 = vld [vmem:[%s11199_s14 + $0xd9] sm:$0x3f] }
  0x63   : > { %5169 = vmatmul.mubr.f32.gmra.mrb[10].mxu0 %v3151_v15  ;;  %16348 = vst [vmem:[#allocation30_spill] sm:$0xff] %v11649_v14  ;;  %v11665_v15 = vrot.slane %v1209_v54, %v11210_v18  ;;  %16353 = vst [vmem:[#allocation35_spill] sm:$0xff] %v11683_v53  ;;  %v1330_v54 = vcombine.low %v11646_v41, %v312_v40  ;;  %v11698_v62 = vrot.slane %v1188_v58, %v11210_v18  ;;  %v2572_v58 = vld [vmem:[%s16071_s1 + $0x188] sm:$0xff] }
  0x64   : > { %5173 = vmatprep.mubr.f32.mxu0 %v3241_v32  ;;  %10184 = vmatpush1.bf16.msra.mxu0 %v10183_v3  ;;  %v11678_v3 = vrot.slane %v9652_v56, %v11210_v18  ;;  %v9658_v32 = vcombine.low %v1326_v61, %v11621_v48  ;;  %16354 = vst [vmem:[#allocation36_spill] sm:$0xff] %v11686_v46 }
  0x65   : > { %16352 = vst [vmem:[#allocation34_spill] sm:$0xff] %v11665_v15  ;;  %10185 = vmatprep.subr.bf16.mxu0 %v16346_v52  ;;  %v3419_v56 = vcombine.high %v11604_v23, %v11649_v14  ;;  %v3418_v61 = vcombine.low %v11604_v23, %v11649_v14  ;;  %v11709_v43 = vrot.slane %v1259_v21, %v11210_v18  ;;  %v347_v14 = vld [vmem:[%s11199_s14 + $0x92] sm:$0xff]  ;;  %v11731_v23 = vld [vmem:[%s11199_s14 + $0x89] sm:$0x3f] }
  0x66   : > { %v1331_v21 = vcombine.high %v11646_v41, %v312_v40  ;;  %v1539_v48 = vcombine.high %v11683_v53, %v11686_v46  ;;  %v11737_v63 = vrot.slane %v1330_v54, %v11210_v18  ;;  %v313_v40 = vld [vmem:[%s11199_s14 + $0x81] sm:$0xff]  ;;  %v2573_v46 = vld [vmem:[%s16071_s1 + $0x190] sm:$0xff]  ;;  %v2574_v54 = vld [vmem:[%s16071_s1 + $0x198] sm:$0xff]  ;;  %v1808_v41 = vcombine.low %v347_v14, %v11715_v44 }
  0x67   : > { %5174 = vmatmul.mubr.f32.gmra.mrb[12].mxu0 %v3240_v7  ;;  %v11704_v7 = vrot.slane %v1137_v2, %v11210_v18  ;;  %16356 = vst [vmem:[#allocation38_spill] sm:$0xff] %v11709_v43  ;;  %v11723_v2 = vrot.slane %v9658_v32, %v11210_v18  ;;  %v9649_v32 = vcombine.low %v11698_v62, %v11683_v53 }
  0x68   : > { %5178 = vmatprep.mubr.f32.mxu0 %v3330_v8  ;;  %10187 = vmatpush1.bf16.msra.mxu0 %v10186_v22  ;;  %v3508_v8 = vcombine.high %v11675_v37, %v11678_v3  ;;  %v3507_v22 = vcombine.low %v11675_v37, %v11678_v3  ;;  %16358 = vst [vmem:[#allocation40_spill] sm:$0xff] %v11737_v63 }
  0x69   : > { %16355 = vst [vmem:[#allocation37_spill] sm:$0xff] %v11704_v7  ;;  %10188 = vmatprep.subr.bf16.mxu0 %v16346_v52  ;;  %v11740_v37 = vrot.slane %v1523_v27, %v11210_v18  ;;  %v11743_v3 = vrot.slane %v1595_v28, %v11210_v18  ;;  %v1545_v27 = vcombine.high %v11728_v16, %v315_v31 }
  0x6a   : > { %v1809_v28 = vcombine.high %v347_v14, %v11715_v44  ;;  %v1474_v62 = vcombine.high %v11655_v60, %v11731_v23  ;;  %v1544_v53 = vcombine.low %v11728_v16, %v315_v31  ;;  %v3597_v20 = vcombine.high %v11723_v2, %v11704_v7 }
  0x6b   : > { %16359 = vst [vmem:[#allocation41_spill] sm:$0xff] %v11740_v37  ;;  %16360 = vst [vmem:[#allocation42_spill] sm:$0xff] %v11743_v3  ;;  %5179 = vmatmul.mubr.f32.gmra.mrb[14].mxu0 %v3329_v12  ;;  %v10192_v12 = vpack.c.bf16 %v2572_v58, %v2571_v13  ;;  %v11770_v14 = vrot.slane %v1331_v21, %v11210_v18  ;;  %v9664_v13 = vcombine.low %v1539_v48, %v11709_v43 }
  0x6c   : > { %5183 = vmatprep.mubr.f32.mxu0 %v3419_v56  ;;  %10190 = vmatpush1.bf16.msra.mxu0 %v10189_v4  ;;  %v1401_v56 = vcombine.low %v11615_v47, %v313_v40  ;;  %v1402_v4 = vcombine.high %v11615_v47, %v313_v40  ;;  %v1541_v31 = vcombine.high %v11709_v43, %v11740_v37 }
  0x6d   : > { %10191 = vmatprep.subr.bf16.mxu0 %v16346_v52  ;;  %16362 = vst [vmem:[#allocation44_spill] sm:$0xff] %v11770_v14  ;;  %v1612_v58 = vcombine.high %v11737_v63, %v11743_v3  ;;  %v10195_v16 = vpack.c.bf16 %v2574_v54, %v2573_v46  ;;  %v11786_v21 = vrot.slane %v1545_v27, %v11210_v18 }
  0x6e   : > { %v1616_v47 = vcombine.low %v11761_v26, %v11764_v39  ;;  %v11791_v48 = vrot.slane %v1808_v41, %v11210_v18  ;;  %v11794_v40 = vrot.slane %v1809_v28, %v11210_v18  ;;  %v1473_v46 = vcombine.low %v11655_v60, %v11731_v23  ;;  %v2575_v23 = vld [vmem:[%s16071_s1 + $0x1a0] sm:$0xff] }
  0x6f   : > { %5184 = vmatmul.mubr.f32.gmra.mrb[16].mxu0 %v3418_v61  ;;  %16365 = vst [vmem:[#allocation47_spill] sm:$0xff] %v11786_v21  ;;  %v1502_v54 = vrot.slane %v1474_v62, %v11210_v18  ;;  %v11800_v61 = vrot.slane %v1544_v53, %v11210_v18  ;;  %v3685_v27 = vcombine.low %v11662_v17, %v11665_v15  ;;  %v2576_v53 = vld [vmem:[%s16071_s1 + $0x1a8] sm:$0xff] }
  0x70   : > { %16366 = vst [vmem:[#allocation48_spill] sm:$0xff] %v11791_v48  ;;  %16367 = vst [vmem:[#allocation49_spill] sm:$0xff] %v11794_v40  ;;  %5188 = vmatprep.mubr.f32.mxu0 %v3508_v8  ;;  %10193 = vmatpush1.bf16.msra.mxu0 %v10192_v12  ;;  %v1423_v41 = vrot.slane %v1401_v56, %v11210_v18  ;;  %v1430_v28 = vrot.slane %v1402_v4, %v11210_v18 }
  0x71   : > { %16368 = vst [vmem:[#allocation50_spill] sm:$0xff] %v11800_v61  ;;  %10194 = vmatprep.subr.bf16.mxu0 %v16346_v52  ;;  %v1881_v8 = vcombine.low %v11783_v45, %v11780_v19  ;;  %v3596_v12 = vcombine.low %v11723_v2, %v11704_v7  ;;  %v11818_v62 = vrot.slane %v9649_v32, %v11210_v18  ;;  %v317_v7 = vld [vmem:[%s11199_s14 + $0xa1] sm:$0xff]  ;;  %v11834_v32 = vld [vmem:[%s11199_s14 + $0xa9] sm:$0x3f] }
  0x72   : > { %v11821_v56 = vrot.slane %v9664_v13, %v11210_v18  ;;  %v9670_v4 = vcombine.low %v1541_v31, %v11737_v63  ;;  %v9672_v3 = vcombine.low %v1612_v58, %v11770_v14  ;;  %v11826_v43 = vrot.slane %v1616_v47, %v11210_v18 }
  0x73   : > { %16369 = vst [vmem:[#allocation51_spill] sm:$0xff] %v11818_v62  ;;  %5189 = vmatmul.mubr.f32.gmra.mrb[18].mxu0 %v3507_v22  ;;  %v1825_v45 = vcombine.high %v11800_v61, %v11791_v48  ;;  %v1827_v2 = vcombine.high %v11786_v21, %v11794_v40  ;;  %v1495_v13 = vrot.slane %v1473_v46, %v11210_v18 }
  0x74   : > { %16370 = vst [vmem:[#allocation52_spill] sm:$0xff] %v11826_v43  ;;  %5193 = vmatprep.mubr.f32.mxu0 %v3597_v20  ;;  %10196 = vmatpush1.bf16.msra.mxu0 %v10195_v16  ;;  %v9667_v22 = vcombine.low %v1502_v54, %v11800_v61  ;;  %v10198_v31 = vpack.c.bf16 %v2576_v53, %v2575_v23  ;;  %v2577_v20 = vld [vmem:[%s16071_s1 + $0x1b0] sm:$0xff]  ;;  %v2578_v16 = vld [vmem:[%s16071_s1 + $0x1b8] sm:$0xff] }
  0x75   : > { %v11839_v58 = vrot.slane %v1423_v41, %v11210_v18  ;;  %v11842_v47 = vrot.slane %v1430_v28, %v11210_v18  ;;  %10197 = vmatprep.subr.bf16.mxu0 %v16346_v52  ;;  %v1617_v48 = vcombine.high %v11761_v26, %v11764_v39  ;;  %v11848_v40 = vrot.slane %v1881_v8, %v11210_v18 }
  0x76   : > { %v3775_v46 = vcombine.high %v11818_v62, %v11821_v56  ;;  %v1687_v54 = vcombine.low %v11715_v44, %v317_v7  ;;  %v1688_v41 = vcombine.high %v11715_v44, %v317_v7  ;;  %v1759_v39 = vcombine.low %v11780_v19, %v11834_v32 }
  0x77   : > { %16371 = vst [vmem:[#allocation53_spill] sm:$0xff] %v11839_v58  ;;  %16372 = vst [vmem:[#allocation54_spill] sm:$0xff] %v11842_v47  ;;  %5194 = vmatmul.mubr.f32.gmra.mrb[20].mxu0 %v3596_v12  ;;  %v11863_v28 = vrot.slane %v9670_v4, %v11210_v18  ;;  %v11866_v23 = vrot.slane %v9672_v3, %v11210_v18  ;;  %v9682_v53 = vcombine.low %v1825_v45, %v11786_v21  ;;  %v319_v12 = vld [vmem:[%s11199_s14 + $0xb1] sm:$0xff] }
  0x78   : > { %16373 = vst [vmem:[#allocation55_spill] sm:$0xff] %v11848_v40  ;;  %v9684_v8 = vcombine.low %v1827_v2, %v11826_v43  ;;  %v16374_v61 = vcombine.high %v11662_v17, %v11665_v15  ;;  %v11874_v7 = vrot.slane %v1495_v13, %v11210_v18  ;;  %v11877_v44 = vrot.slane %v9667_v22, %v11210_v18  ;;  %v11890_v2 = vld [vmem:[%s11199_s14 + $0xb0] sm:$0xff]  ;;  %v2579_v13 = vld [vmem:[%s16071_s1 + $0x1c0] sm:$0xff] }
  0x79   : > { %10199 = vmatpush1.bf16.msra.mxu0 %v10198_v31  ;;  %v10201_v3 = vpack.c.bf16 %v2578_v16, %v2577_v20  ;;  %v3774_v45 = vcombine.low %v11818_v62, %v11821_v56  ;;  %v11884_v4 = vrot.slane %v1617_v48, %v11210_v18  ;;  %16378 = vst [vmem:[#allocation59_spill] sm:$0xff] %v11890_v2  ;;  %v2580_v56 = vld [vmem:[%s16071_s1 + $0x1c8] sm:$0xff]  ;;  %v11904_v16 = vld [vmem:[%s11199_s14 + $0xc0] sm:$0xff]  ;;  %v351_v15 = vld [vmem:[%s11199_s14 + $0xb2] sm:$0xff] }
  0x7a   : > { %5198 = vmatprep.mubr.f32.mxu0 %v16374_v61  ;;  %16375 = vst [vmem:[#allocation56_spill] sm:$0xff] %v11874_v7  ;;  %16376 = vst [vmem:[#allocation57_spill] sm:$0xff] %v11877_v44  ;;  %v1898_v61 = vcombine.high %v11826_v43, %v11848_v40  ;;  %10200 = vmatprep.subr.bf16.mxu0 %v16346_v52  ;;  %v1709_v48 = vrot.slane %v1687_v54, %v11210_v18  ;;  %v11923_v43 = vld [vmem:[%s11199_s14 + $0xb8] sm:$0x3f] }
  0x7b   : > { %16377 = vst [vmem:[#allocation58_spill] sm:$0xff] %v11884_v4  ;;  %v1716_v31 = vrot.slane %v1688_v41, %v11210_v18  ;;  %v1781_v20 = vrot.slane %v1759_v39, %v11210_v18  ;;  %5199 = vmatmul.mubr.f32.gmra.mrb[22].mxu0 %v3685_v27  ;;  %v3864_v62 = vcombine.high %v11863_v28, %v11866_v23  ;;  %v11929_v40 = vld [vmem:[%s11199_s14 + $0xb9] sm:$0x3f] }
  0x7c   : > { %v11911_v17 = vrot.slane %v9682_v53, %v11210_v18  ;;  %v11914_v54 = vrot.slane %v9684_v8, %v11210_v18  ;;  %v1760_v41 = vcombine.high %v11780_v19, %v11834_v32  ;;  %5203 = vmatprep.mubr.f32.mxu0 %v3775_v46  ;;  %v3863_v39 = vcombine.low %v11863_v28, %v11866_v23  ;;  %v11926_v53 = vld [vmem:[%s11199_s14 + $0xc8] sm:$0x3f]  ;;  %v11937_v28 = vld [vmem:[%s11199_s14 + $0xba] sm:$0x3f]  ;;  %v2581_v23 = vld [vmem:[%s16071_s1 + $0x1d0] sm:$0xff] }
  0x7d   : > { %10202 = vmatpush1.bf16.msra.mxu0 %v10201_v3  ;;  %v10204_v22 = vpack.c.bf16 %v2580_v56, %v2579_v13  ;;  %v9690_v8 = vcombine.low %v1898_v61, %v11884_v4  ;;  %v1830_v21 = vcombine.low %v11890_v2, %v319_v12  ;;  %v1831_v32 = vcombine.high %v11890_v2, %v319_v12  ;;  %v2582_v3 = vld [vmem:[%s16071_s1 + $0x1d8] sm:$0xff]  ;;  %v293_v2 = vld [vmem:[%s11199_s14 + $0xe0] sm:$0xff] }
  0x7e   : > { %v2094_v46 = vcombine.low %v351_v15, %v11904_v16  ;;  %10203 = vmatprep.subr.bf16.mxu0 %v16346_v52  ;;  %v11948_v12 = vrot.slane %v1709_v48, %v11210_v18  ;;  %v11951_v13 = vrot.slane %v1716_v31, %v11210_v18  ;;  %v11954_v56 = vrot.slane %v1781_v20, %v11210_v18  ;;  %v355_v19 = vld [vmem:[%s11199_s14 + $0xd2] sm:$0xff] }
  0x7f   : > { %5204 = vmatmul.mubr.f32.gmra.mrb[24].mxu0 %v3774_v45  ;;  %v11959_v4 = vrot.slane %v1760_v41, %v11210_v18  ;;  %v1902_v61 = vcombine.low %v11923_v43, %v11929_v40  ;;  %v2095_v48 = vcombine.high %v351_v15, %v11904_v16  ;;  %v2167_v31 = vcombine.low %v11937_v28, %v11926_v53  ;;  %v11971_v41 = vld [vmem:[%s11199_s14 + $0xd0] sm:$0xff] }
  0x80   : > { %16379 = vst [vmem:[#allocation60_spill] sm:$0xff] %v11948_v12  ;;  %16380 = vst [vmem:[#allocation61_spill] sm:$0xff] %v11951_v13  ;;  %5208 = vmatprep.mubr.f32.mxu0 %v3864_v62  ;;  %v10207_v20 = vpack.c.bf16 %v2582_v3, %v2581_v23  ;;  %v11974_v27 = vrot.slane %v9690_v8, %v11210_v18  ;;  %v11977_v15 = vrot.slane %v1830_v21, %v11210_v18  ;;  %v2583_v23 = vld [vmem:[%s16071_s1 + $0x1e0] sm:$0xff]  ;;  %v2584_v21 = vld [vmem:[%s16071_s1 + $0x1e8] sm:$0xff] }
  0x81   : > { %16381 = vst [vmem:[#allocation62_spill] sm:$0xff] %v11954_v56  ;;  %10205 = vmatpush1.bf16.msra.mxu0 %v10204_v22  ;;  %16382 = vst [vmem:[#allocation63_spill] sm:$0xff] %v11971_v41  ;;  %v11980_v26 = vrot.slane %v1831_v32, %v11210_v18  ;;  %v11983_v62 = vrot.slane %v2094_v46, %v11210_v18  ;;  %v323_v22 = vld [vmem:[%s11199_s14 + $0xd1] sm:$0xff]  ;;  %v321_v32 = vld [vmem:[%s11199_s14 + $0xc1] sm:$0xff]  ;;  %v2380_v45 = vcombine.low %v355_v19, %v293_v2 }
  0x82   : > { %16383 = vst [vmem:[#allocation64_spill] sm:$0xff] %v11977_v15  ;;  %10206 = vmatprep.subr.bf16.mxu0 %v16346_v52  ;;  %v11997_v3 = vld [vmem:[%s11199_s14 + $0xc9] sm:$0x3f]  ;;  %v2117_v46 = vcombine.high %v11971_v41, %v323_v22  ;;  %v2381_v14 = vcombine.high %v355_v19, %v293_v2  ;;  %v1903_v37 = vcombine.high %v11923_v43, %v11929_v40 }
  0x83   : > { %16384 = vst [vmem:[#allocation65_spill] sm:$0xff] %v11980_v26  ;;  %5209 = vmatmul.mubr.f32.gmra.mrb[26].mxu0 %v3863_v39  ;;  %v12005_v60 = vrot.slane %v1902_v61, %v11210_v18  ;;  %v12008_v8 = vrot.slane %v2095_v48, %v11210_v18  ;;  %v16386_v42 = vcombine.high %v11839_v58, %v11842_v47  ;;  %v12022_v39 = vld [vmem:[%s11199_s14 + $0xe8] sm:$0x3f]  ;;  %v12025_v61 = vld [vmem:[%s11199_s14 + $0xda] sm:$0x3f] }
  0x84   : > { %v12018_v19 = vrot.slane %v2167_v31, %v11210_v18  ;;  %v2116_v2 = vcombine.low %v11971_v41, %v323_v22  ;;  %v10210_v40 = vpack.c.bf16 %v2584_v21, %v2583_v23  ;;  %16387 = vst [vmem:[#allocation67_spill] sm:$0xff] %v12022_v39  ;;  %16388 = vst [vmem:[#allocation68_spill] sm:$0xff] %v12025_v61  ;;  %v2586_v22 = vld [vmem:[%s16071_s1 + $0x1f8] sm:$0xff] }
  0x85   : > { %16385 = vst [vmem:[#allocation66_spill] sm:$0xff] %v12005_v60  ;;  %5213 = vmatprep.mubr.f32.mxu0 %v16386_v42  ;;  %10208 = vmatpush1.bf16.msra.mxu0 %v10207_v20  ;;  %v4220_v48 = vcombine.high %v11974_v27, %v11948_v12  ;;  %v2111_v63 = vcombine.high %v11977_v15, %v11983_v62  ;;  %v2585_v20 = vld [vmem:[%s16071_s1 + $0x1f0] sm:$0xff] }
  0x86   : > { %v1973_v42 = vcombine.low %v11904_v16, %v321_v32  ;;  %v2046_v31 = vcombine.high %v11926_v53, %v11997_v3  ;;  %10209 = vmatprep.subr.bf16.mxu0 %v16346_v52  ;;  %v12042_v23 = vrot.slane %v2117_v46, %v11210_v18  ;;  %v2188_v21 = vcombine.low %v12011_v6, %v324_v33 }
  0x87   : > { %v12046_v41 = vrot.slane %v2380_v45, %v11210_v18  ;;  %v12049_v0 = vrot.slane %v2381_v14, %v11210_v18  ;;  %v16390_v49 = vcombine.low %v11839_v58, %v11842_v47  ;;  %v12055_v5 = vrot.slane %v1903_v37, %v11210_v18  ;;  %v329_v45 = vld [vmem:[%s11199_s14 + $0x2] sm:$0xff] }
  0x88   : > { %16389 = vst [vmem:[#allocation69_spill] sm:$0xff] %v12042_v23  ;;  %v2113_v30 = vcombine.high %v11980_v26, %v12008_v8  ;;  %v1974_v46 = vcombine.high %v11904_v16, %v321_v32  ;;  %v2453_v34 = vcombine.low %v12025_v61, %v12022_v39  ;;  %v16392_v14 = vcombine.high %v11874_v7, %v11877_v44 }
  0x89   : > { %5214 = vmatmul.mubr.f32.gmra.mrb[28].mxu0 %v16390_v49  ;;  %16391 = vst [vmem:[#allocation70_spill] sm:$0xff] %v12055_v5  ;;  %v2184_v47 = vcombine.high %v12005_v60, %v12018_v19  ;;  %v12069_v49 = vrot.slane %v2116_v2, %v11210_v18  ;;  %v10213_v37 = vpack.c.bf16 %v2586_v22, %v2585_v20 }
  0x8a   : > { %5218 = vmatprep.mubr.f32.mxu0 %v16392_v14  ;;  %10211 = vmatpush1.bf16.msra.mxu0 %v10210_v40  ;;  %v9681_v58 = vcombine.low %v11959_v4, %v11977_v15  ;;  %v9696_v16 = vcombine.low %v2111_v63, %v11980_v26  ;;  %v2045_v32 = vcombine.low %v11926_v53, %v11997_v3 }
  0x8b   : > { %16393 = vst [vmem:[#allocation71_spill] sm:$0xff] %v12069_v49  ;;  %v2074_v61 = vrot.slane %v2046_v31, %v11210_v18  ;;  %10212 = vmatprep.subr.bf16.mxu0 %v16346_v52  ;;  %v12079_v14 = vrot.slane %v2188_v21, %v11210_v18  ;;  %v2397_v2 = vcombine.high %v12069_v49, %v12046_v41 }
  0x8c   : > { %v2399_v40 = vcombine.high %v12042_v23, %v12049_v0  ;;  %v459_v4 = vcombine.low %v329_v45, %v11285_v55  ;;  %v16395_v63 = vcombine.low %v11874_v7, %v11877_v44  ;;  %v1995_v3 = vrot.slane %v1973_v42, %v11210_v18 }
  0x8d   : > { %16394 = vst [vmem:[#allocation72_spill] sm:$0xff] %v12079_v14  ;;  %v2189_v31 = vcombine.high %v12011_v6, %v324_v33  ;;  %v12092_v20 = vrot.slane %v2453_v34, %v11210_v18  ;;  %v460_v22 = vcombine.high %v329_v45, %v11285_v55  ;;  %v16396_v21 = vcombine.high %v11911_v17, %v11914_v54 }
  0x8e   : > { %5219 = vmatmul.mubr.f32.gmra.mrb[30].mxu0 %v16395_v63  ;;  %v9702_v15 = vcombine.low %v2113_v30, %v12005_v60  ;;  %v9704_v39 = vcombine.low %v2184_v47, %v12055_v5  ;;  %v2002_v44 = vrot.slane %v1974_v46, %v11210_v18  ;;  %v330_v63 = vld [vmem:[%s11199_s14 + $0xa] sm:$0x3f]  ;;  %v12103_v42 = vrot.slane %v9681_v58, %v11210_v18 }
  0x8f   : > { %5223 = vmatprep.mubr.f32.mxu0 %v16396_v21  ;;  %10214 = vmatpush1.bf16.msra.mxu0 %v10213_v37  ;;  %v12106_v34 = vrot.slane %v9696_v16, %v11210_v18  ;;  %v2067_v55 = vrot.slane %v2045_v32, %v11210_v18  ;;  %v9699_v33 = vcombine.low %v2074_v61, %v12069_v49 }
  0x90   : > { %16397 = vst [vmem:[#allocation73_spill] sm:$0xff] %v12103_v42  ;;  %10215 = vmatprep.subr.bf16.mxu0 %v16346_v52  ;;  %v4219_v30 = vcombine.low %v11974_v27, %v11948_v12  ;;  %v9714_v47 = vcombine.low %v2397_v2, %v12042_v23  ;;  %v9716_v46 = vcombine.low %v2399_v40, %v12079_v14  ;;  %v11029_v12 = vld [vmem:[%s11199_s14 + $0x30] sm:$0xff] }
  0x91   : > { %v481_v45 = vrot.slane %v459_v4, %v11210_v18  ;;  %v16398_v58 = vcombine.low %v11911_v17, %v11914_v54  ;;  %v12120_v37 = vrot.slane %v2189_v31, %v11210_v18  ;;  %v2470_v61 = vcombine.high %v12079_v14, %v12092_v20 }
  0x92   : > { %v488_v16 = vrot.slane %v460_v22, %v11210_v18  ;;  %v549_v27 = vcombine.high %v330_v63, %v11301_v1  ;;  %v12127_v32 = vrot.slane %v9702_v15, %v11210_v18  ;;  %v12130_v2 = vrot.slane %v9704_v39, %v11210_v18 }
  0x93   : > { %5224 = vmatmul.mubr.f32.gmra.mrb[32].mxu0 %v16398_v58  ;;  %16399 = vst [vmem:[#allocation74_spill] sm:$0xff] %v12120_v37  ;;  %v12133_v17 = vrot.slane %v1995_v3, %v11210_v18  ;;  %v12136_v54 = vrot.slane %v2002_v44, %v11210_v18  ;;  %v4398_v40 = vcombine.high %v12103_v42, %v12106_v34  ;;  %v12187_v58 = vld [vmem:[%s11199_s14 + $0xaa] sm:$0x3f] }
  0x94   : > { %5228 = vmatprep.mubr.f32.mxu0 %v4220_v48  ;;  %v12141_v4 = vrot.slane %v2067_v55, %v11210_v18  ;;  %v12144_v48 = vrot.slane %v9699_v33, %v11210_v18  ;;  %v548_v15 = vcombine.low %v330_v63, %v11301_v1  ;;  %v4397_v39 = vcombine.low %v12103_v42, %v12106_v34  ;;  %v12165_v1 = vld [vmem:[%s16071_s1 + $0x200] sm:$0xff]  ;;  %v12170_v63 = vld [vmem:[%s16071_s1 + $0x208] sm:$0xff] }
  0x95   : > { %16400 = vst [vmem:[#allocation75_spill] sm:$0xff] %v12133_v17  ;;  %16401 = vst [vmem:[#allocation76_spill] sm:$0xff] %v12136_v54  ;;  %v12150_v3 = vrot.slane %v9714_v47, %v11210_v18  ;;  %v12153_v44 = vrot.slane %v9716_v46, %v11210_v18  ;;  %v12156_v31 = vrot.slane %v481_v45, %v11210_v18  ;;  %v12225_v47 = vld [vmem:[%s16071_s1 + $0x218] sm:$0xff]  ;;  %v11027_v46 = vld [vmem:[%s11199_s14 + $0x28] sm:$0x3f] }
  0x96   : > { %16402 = vst [vmem:[#allocation77_spill] sm:$0xff] %v12141_v4  ;;  %16403 = vst [vmem:[#allocation78_spill] sm:$0xff] %v12144_v48  ;;  %v9722_v22 = vcombine.low %v2470_v61, %v12120_v37  ;;  %v12160_v21 = vrot.slane %v488_v16, %v11210_v18  ;;  %v577_v34 = vrot.slane %v549_v27, %v11210_v18 }
  0x97   : > { %5229 = vmatmul.mubr.f32.gmra.mrb[34].mxu0 %v4219_v30  ;;  %v666_v55 = vcombine.low %v11316_v9, %v11322_v11  ;;  %v16404_v33 = vcombine.high %v11951_v13, %v11954_v56  ;;  %v4487_v30 = vcombine.high %v12127_v32, %v12130_v2  ;;  %v753_v45 = vcombine.low %v11339_v24, %v11355_v36 }
  0x98   : > { %v4486_v9 = vcombine.low %v12127_v32, %v12130_v2  ;;  %v570_v16 = vrot.slane %v548_v15, %v11210_v18  ;;  %v2025_v27 = vcombine.high %v12187_v58, %v11923_v43  ;;  %v12205_v2 = vld [vmem:[%s11199_s14 + $0x22] sm:$0xff]  ;;  %v16405_v15 = vcombine.low %v11951_v13, %v11954_v56  ;;  %v12220_v32 = vld [vmem:[%s16071_s1 + $0x210] sm:$0xff]  ;;  %v12238_v56 = vld [vmem:[%s11199_s14 + $0x1a] sm:$0x3f] }
  0x99   : > { %5233 = vmatprep.mubr.f32.mxu0 %v16404_v33  ;;  %v12211_v61 = vrot.slane %v9722_v22, %v11210_v18  ;;  %v9615_v33 = vcombine.low %v577_v34, %v11319_v10  ;;  %v9619_v24 = vcombine.high %v11319_v10, %v666_v55  ;;  %v2112_v10 = vcombine.low %v11980_v26, %v12008_v8 }
  0x9a   : > { %v2039_v34 = vrot.slane %v2025_v27, %v11210_v18  ;;  %v12234_v55 = vrot.slane %v570_v16, %v11210_v18  ;;  %v724_v42 = vcombine.high %v12238_v56, %v11027_v46  ;;  %v2168_v16 = vcombine.high %v11937_v28, %v11926_v53 }
  0x9b   : > { %5234 = vmatmul.mubr.f32.gmra.mrb[36].mxu0 %v16405_v15  ;;  %v9621_v15 = vcombine.high %v11322_v11, %v753_v45  ;;  %v12246_v11 = vld [vmem:[%s16071_s1 + $0x220] sm:$0xff]  ;;  %v12251_v45 = vld [vmem:[%s16071_s1 + $0x228] sm:$0xff]  ;;  %v2183_v22 = vcombine.low %v12005_v60, %v12018_v19  ;;  %v12264_v13 = vrot.slane %v9615_v33, %v11210_v18  ;;  %v12267_v53 = vrot.slane %v9619_v24, %v11210_v18 }
  0x9c   : > { %5238 = vmatprep.mubr.f32.mxu0 %v4398_v40  ;;  %v807_v40 = vcombine.low %v12205_v2, %v11347_v29  ;;  %v9695_v27 = vcombine.low %v2039_v34, %v11983_v62  ;;  %v9697_v29 = vcombine.high %v11983_v62, %v2112_v10  ;;  %v2182_v28 = vrot.slane %v2168_v16, %v11210_v18  ;;  %v354_v16 = vld [vmem:[%s11199_s14 + $0xca] sm:$0x3f] }
  0x9d   : > { %v12271_v62 = vrot.slane %v9621_v15, %v11210_v18  ;;  %v752_v24 = vrot.slane %v724_v42, %v11210_v18  ;;  %v9703_v15 = vcombine.high %v12008_v8, %v2183_v22  ;;  %v808_v34 = vcombine.high %v12205_v2, %v11029_v12  ;;  %v12360_v42 = vld [vmem:[%s11199_s14 + $0x42] sm:$0xff] }
  0x9e   : > { %v12279_v10 = vrot.slane %v9695_v27, %v11210_v18  ;;  %v12282_v33 = vrot.slane %v9697_v29, %v11210_v18  ;;  %v815_v46 = vrot.slane %v807_v40, %v11210_v18  ;;  %v2310_v29 = vcombine.low %v354_v16, %v12011_v6  ;;  %16417 = vst [vmem:[#allocation86_spill] sm:$0xff] %v12360_v42  ;;  %v16427_v60 = vld [vmem:[#allocation20_spill] sm:$0xff] }
  0x9f   : > { %5239 = vmatmul.mubr.f32.gmra.mrb[38].mxu0 %v4397_v39  ;;  %v12276_v39 = vld [vmem:[%s11199_s14 + $0x2a] sm:$0x3f]  ;;  %v12302_v12 = vrot.slane %v9703_v15, %v11210_v18  ;;  %v16409_v40 = vcombine.high %v12133_v17, %v12136_v54  ;;  %v2398_v7 = vcombine.low %v12042_v23, %v12049_v0  ;;  %v2469_v15 = vcombine.low %v12079_v14, %v12092_v20 }
  0xa0   : > { %5243 = vmatprep.mubr.f32.mxu0 %v4487_v30  ;;  %16406 = vst [vmem:[#allocation79_spill] sm:$0xff] %v12279_v10  ;;  %16407 = vst [vmem:[#allocation80_spill] sm:$0xff] %v12282_v33  ;;  %v2185_v30 = vcombine.low %v12055_v5, %v2182_v28  ;;  %v880_v8 = vcombine.low %v12276_v39, %v11377_v50  ;;  %v2318_v27 = vrot.slane %v2310_v29, %v11210_v18 }
  0xa1   : > { %16408 = vst [vmem:[#allocation81_spill] sm:$0xff] %v12302_v12  ;;  %v755_v50 = vcombine.low %v11380_v51, %v752_v24  ;;  %v9715_v28 = vcombine.high %v12046_v41, %v2398_v7  ;;  %v16411_v51 = vcombine.low %v12133_v17, %v12136_v54  ;;  %v12340_v7 = vld [vmem:[%s11199_s14 + $0x4a] sm:$0x3f]  ;;  %v16423_v54 = vld [vmem:[#allocation6_spill] sm:$0xff]  ;;  %v16426_v23 = vcombine.low %v12150_v3, %v12153_v44  ;;  %v16439_v12 = vld [vmem:[#allocation29_spill] sm:$0xff] }
  0xa2   : > { %v9705_v22 = vcombine.high %v12018_v19, %v2185_v30  ;;  %v1024_v19 = vcombine.high %v11391_v59, %v11387_v57  ;;  %v822_v57 = vrot.slane %v808_v34, %v11210_v18  ;;  %v888_v59 = vrot.slane %v880_v8, %v11210_v18  ;;  %16413 = vst [vmem:[#allocation83_spill] sm:$0xff] %v12340_v7  ;;  %v16424_v17 = vld [vmem:[#allocation12_spill] sm:$0xff] }
  0xa3   : > { %5244 = vmatmul.mubr.f32.gmra.mrb[40].mxu0 %v4486_v9  ;;  %v2311_v9 = vcombine.high %v354_v16, %v12011_v6  ;;  %v11030_v16 = vld [vmem:[%s11199_s14 + $0x38] sm:$0x3f]  ;;  %v9717_v34 = vcombine.high %v12049_v0, %v2469_v15  ;;  %v12348_v8 = vrot.slane %v9715_v28, %v11210_v18 }
  0xa4   : > { %5248 = vmatprep.mubr.f32.mxu0 %v16409_v40  ;;  %v12317_v30 = vrot.slane %v9705_v22, %v11210_v18  ;;  %v881_v29 = vcombine.high %v12276_v39, %v11030_v16  ;;  %v9627_v22 = vcombine.high %v11355_v36, %v755_v50  ;;  %v1038_v6 = vrot.slane %v1024_v19, %v11210_v18 }
  0xa5   : > { %v2325_v40 = vrot.slane %v2311_v9, %v11210_v18  ;;  %v16412_v9 = vcombine.high %v12141_v4, %v12144_v48  ;;  %16415 = vst [vmem:[#allocation85_spill] sm:$0xff] %v12348_v8  ;;  %v12366_v28 = vrot.slane %v9717_v34, %v11210_v18  ;;  %v16420_v36 = vcombine.low %v12141_v4, %v12144_v48  ;;  %v16421_v34 = vld [vmem:[#allocation15_spill] sm:$0xff] }
  0xa6   : > { %16410 = vst [vmem:[#allocation82_spill] sm:$0xff] %v12317_v30  ;;  %v12372_v50 = vrot.slane %v815_v46, %v11210_v18  ;;  %v12375_v19 = vrot.slane %v822_v57, %v11210_v18  ;;  %v12378_v15 = vrot.slane %v888_v59, %v11210_v18  ;;  %v1167_v46 = vcombine.high %v12340_v7, %v16421_v34  ;;  %v12413_v59 = vld [vmem:[%s16071_s1 + $0x248] sm:$0xff] }
  0xa7   : > { %5249 = vmatmul.mubr.f32.gmra.mrb[42].mxu0 %v16411_v51  ;;  %v9711_v16 = vcombine.low %v2325_v40, %v12046_v41  ;;  %v12344_v51 = vrot.slane %v2318_v27, %v11210_v18  ;;  %v895_v41 = vrot.slane %v881_v29, %v11210_v18  ;;  %v16416_v27 = vld [vmem:[#allocation9_spill] sm:$0xff]  ;;  %16419 = vst [vmem:[#allocation88_spill] sm:$0xff] %v12366_v28  ;;  %v16429_v28 = vld [vmem:[#allocation23_spill] sm:$0xff] }
  0xa8   : > { %5253 = vmatprep.mubr.f32.mxu0 %v16412_v9  ;;  %v968_v9 = vcombine.low %v11435_v25, %v11457_v35  ;;  %v1039_v40 = vcombine.low %v16416_v27, %v11460_v38  ;;  %v12383_v29 = vld [vmem:[%s16071_s1 + $0x230] sm:$0xff]  ;;  %v16422_v57 = vcombine.high %v12150_v3, %v12153_v44  ;;  %v1041_v5 = vcombine.low %v16424_v17, %v1038_v6  ;;  %v16432_v44 = vld [vmem:[#allocation16_spill] sm:$0xff]  ;;  %v12461_v3 = vld [vmem:[%s16071_s1 + $0x258] sm:$0xff] }
  0xa9   : > { %16414 = vst [vmem:[#allocation84_spill] sm:$0xff] %v12344_v51  ;;  %v12363_v0 = vrot.slane %v9711_v16, %v11210_v18  ;;  %v12388_v16 = vld [vmem:[%s16071_s1 + $0x238] sm:$0xff]  ;;  %v9631_v6 = vcombine.low %v895_v41, %v16423_v54  ;;  %v1166_v49 = vcombine.low %v12340_v7, %v16421_v34  ;;  %v16431_v17 = vcombine.high %v12211_v61, %v12211_v61  ;;  %v16464_v7 = vld [vmem:[#allocation55_spill] sm:$0xff] }
  0xaa   : > { %v9633_v4 = vcombine.high %v16423_v54, %v968_v9  ;;  %v12420_v9 = vrot.slane %v9627_v22, %v11210_v18  ;;  %v9639_v14 = vcombine.high %v11457_v35, %v1039_v40  ;;  %v16428_v22 = vld [vmem:[#allocation18_spill] sm:$0xff]  ;;  %v16433_v40 = vld [vmem:[#allocation17_spill] sm:$0xff]  ;;  %v9641_v8 = vcombine.high %v11460_v38, %v1041_v5 }
  0xab   : > { %16418 = vst [vmem:[#allocation87_spill] sm:$0xff] %v12363_v0  ;;  %5254 = vmatmul.mubr.f32.gmra.mrb[44].mxu0 %v16420_v36  ;;  %v16425_v36 = vld [vmem:[#allocation13_spill] sm:$0xff]  ;;  %v1254_v26 = vcombine.low %v16428_v22, %v16427_v60  ;;  %v16430_v54 = vld [vmem:[#allocation22_spill] sm:$0xff]  ;;  %v1310_v34 = vcombine.high %v16433_v40, %v16432_v44  ;;  %v12464_v44 = vld [vmem:[%s11199_s14 + $0x6a] sm:$0x3f]  ;;  %v12471_v38 = vrot.slane %v9631_v6, %v11210_v18 }
  0xac   : > { %5258 = vmatprep.mubr.f32.mxu0 %v16422_v57  ;;  %v12408_v57 = vld [vmem:[%s16071_s1 + $0x240] sm:$0xff]  ;;  %v1093_v24 = vcombine.low %v12360_v42, %v16425_v36  ;;  %v1094_v48 = vcombine.high %v12360_v42, %v16425_v36  ;;  %v1181_v36 = vrot.slane %v1167_v46, %v11210_v18  ;;  %v1325_v41 = vcombine.low %v16430_v54, %v16429_v28  ;;  %v16465_v42 = vld [vmem:[#allocation52_spill] sm:$0xff] }
  0xad   : > { %v12448_v46 = vrot.slane %v9633_v4, %v11210_v18  ;;  %16434 = vst [vmem:[#allocation15_spill] sm:$0xff] %v12464_v44  ;;  %v16435_v40 = vld [vmem:[#allocation19_spill] sm:$0xff]  ;;  %v16437_v5 = vcombine.high %v12156_v31, %v12160_v21  ;;  %v1324_v6 = vrot.slane %v1310_v34, %v11210_v18  ;;  %v1897_v27 = vcombine.low %v16465_v42, %v16464_v7  ;;  %v12722_v42 = vld [vmem:[%s16071_s1 + $0x2a8] sm:$0xff] }
  0xae   : > { %v1108_v0 = vrot.slane %v1094_v48, %v11210_v18  ;;  %v12474_v48 = vrot.slane %v9639_v14, %v11210_v18  ;;  %v9647_v35 = vcombine.low %v1181_v36, %v16435_v40  ;;  %v9651_v51 = vcombine.high %v16435_v40, %v1254_v26  ;;  %v12482_v4 = vld [vmem:[%s11199_s14 + $0x62] sm:$0xff] }
  0xaf   : > { %5259 = vmatmul.mubr.f32.gmra.mrb[46].mxu0 %v16426_v23  ;;  %v12456_v23 = vld [vmem:[%s16071_s1 + $0x250] sm:$0xff]  ;;  %v9653_v30 = vcombine.high %v16427_v60, %v1325_v41  ;;  %16436 = vst [vmem:[#allocation6_spill] sm:$0xff] %v12482_v4  ;;  %v1452_v36 = vcombine.low %v12464_v44, %v16439_v12  ;;  %v12495_v26 = vrot.slane %v9641_v8, %v11210_v18  ;;  %v16441_v40 = vld [vmem:[#allocation32_spill] sm:$0xff] }
  0xb0   : > { %5263 = vmatprep.mubr.f32.mxu0 %v16431_v17  ;;  %v1101_v17 = vrot.slane %v1093_v24, %v11210_v18  ;;  %v1174_v24 = vrot.slane %v1166_v49, %v11210_v18  ;;  %v12501_v41 = vrot.slane %v1108_v0, %v11210_v18  ;;  %v1453_v8 = vcombine.high %v12464_v44, %v16439_v12  ;;  %v12599_v34 = vld [vmem:[%s11199_s14 + $0x82] sm:$0xff] }
  0xb1   : > { %v12526_v33 = vrot.slane %v9653_v30, %v11210_v18  ;;  %v12543_v30 = vld [vmem:[%s16071_s1 + $0x268] sm:$0xff]  ;;  %16454 = vst [vmem:[#allocation16_spill] sm:$0xff] %v12599_v34 }
  0xb2   : > { %v12498_v60 = vrot.slane %v1101_v17, %v11210_v18  ;;  %v16442_v17 = vcombine.low %v12156_v31, %v12160_v21  ;;  %v12517_v0 = vrot.slane %v1174_v24, %v11210_v18  ;;  %v16446_v31 = vcombine.high %v12234_v55, %v12264_v13  ;;  %v16447_v21 = vld [vmem:[#allocation28_spill] sm:$0xff]  ;;  %v16448_v24 = vld [vmem:[#allocation41_spill] sm:$0xff] }
  0xb3   : > { %5264 = vmatmul.mubr.f32.gmra.mrb[48].mxu0 %v12211_v61  ;;  %v16438_v61 = vld [vmem:[#allocation27_spill] sm:$0xff]  ;;  %16444 = vst [vmem:[#allocation20_spill] sm:$0xff] %v12526_v33  ;;  %v1327_v12 = vcombine.low %v16447_v21, %v1324_v6  ;;  %v1467_v6 = vrot.slane %v1453_v8, %v11210_v18  ;;  %v12583_v8 = vld [vmem:[%s11199_s14 + $0x8a] sm:$0x3f]  ;;  %v16466_v33 = vcombine.high %v12420_v9, %v12372_v50 }
  0xb4   : > { %5333 = vmatprep.mubr.f32.mxu0 %v16437_v5  ;;  %v1380_v49 = vcombine.high %v12482_v4, %v16438_v61  ;;  %v16440_v5 = vld [vmem:[#allocation31_spill] sm:$0xff]  ;;  %v1379_v10 = vcombine.low %v12482_v4, %v16438_v61  ;;  %v16445_v61 = vpack.c.bf16 %v12170_v63, %v12165_v1  ;;  %v1460_v1 = vrot.slane %v1452_v36, %v11210_v18  ;;  %v12561_v36 = vld [vmem:[%s16071_s1 + $0x270] sm:$0xff] }
  0xb5   : > { %v1596_v14 = vcombine.high %v16441_v40, %v16440_v5  ;;  %v12520_v5 = vrot.slane %v9647_v35, %v11210_v18  ;;  %v12523_v40 = vrot.slane %v9651_v51, %v11210_v18  ;;  %v12538_v35 = vld [vmem:[%s16071_s1 + $0x260] sm:$0xff]  ;;  %16451 = vst [vmem:[#allocation23_spill] sm:$0xff] %v12583_v8 }
  0xb6   : > { %v1394_v51 = vrot.slane %v1380_v49, %v11210_v18  ;;  %v1387_v49 = vrot.slane %v1379_v10, %v11210_v18  ;;  %v12596_v21 = vrot.slane %v1460_v1, %v11210_v18  ;;  %v16458_v1 = vld [vmem:[#allocation36_spill] sm:$0xff]  ;;  %v12617_v4 = vld [vmem:[%s16071_s1 + $0x280] sm:$0xff] }
  0xb7   : > { %5334 = vmatmul.mubr.f32.vlgmr.msra.gmra.mrb[0].mxu0 %v16442_v17  ;;  %16443 = vst [vmem:[#allocation13_spill] sm:$0xff] %v12523_v40  ;;  %v1610_v17 = vrot.slane %v1596_v14, %v11210_v18  ;;  %v16449_v14 = vld [vmem:[#allocation38_spill] sm:$0xff]  ;;  %v9663_v44 = vcombine.low %v1467_v6, %v16458_v1  ;;  %v12622_v10 = vld [vmem:[%s16071_s1 + $0x288] sm:$0xff]  ;;  %v16461_v6 = vld [vmem:[#allocation39_spill] sm:$0xff] }
  0xb8   : > { %10217 = vmatpush1.bf16.msra.mxu0 %v16445_v61  ;;  %5338 = vmatprep.mubr.f32.mxu0 %v16446_v31  ;;  %v12566_v31 = vld [vmem:[%s16071_s1 + $0x278] sm:$0xff]  ;;  %v1540_v63 = vcombine.low %v16449_v14, %v16448_v24  ;;  %v16450_v61 = vcombine.low %v12234_v55, %v12264_v13  ;;  %v16452_v14 = vcombine.high %v12267_v53, %v12271_v62 }
  0xb9   : > { %10218 = vmatprep.subr.bf16.mxu0 %v16346_v52  ;;  %v16453_v13 = vpack.c.bf16 %v12225_v47, %v12220_v32  ;;  %v9659_v55 = vcombine.high %v16429_v28, %v1327_v12  ;;  %v16455_v47 = vld [vmem:[#allocation42_spill] sm:$0xff]  ;;  %v16456_v32 = vld [vmem:[#allocation40_spill] sm:$0xff] }
  0xba   : > { %v16457_v28 = vld [vmem:[#allocation44_spill] sm:$0xff]  ;;  %v9665_v54 = vcombine.high %v16458_v1, %v1540_v63  ;;  %v1665_v63 = vcombine.low %v12599_v34, %v16461_v6  ;;  %v1666_v1 = vcombine.high %v12599_v34, %v16461_v6  ;;  %v16468_v6 = vld [vmem:[#allocation45_spill] sm:$0xff]  ;;  %v16469_v34 = vld [vmem:[#allocation46_spill] sm:$0xff] }
  0xbb   : > { %5339 = vmatmul.mubr.f32.gmra.mrb[2].mxu0 %v16450_v61  ;;  %v12593_v61 = vrot.slane %v1394_v51, %v11210_v18  ;;  %v1613_v12 = vcombine.low %v16457_v28, %v1610_v17  ;;  %v12610_v51 = vrot.slane %v1387_v49, %v11210_v18  ;;  %v16460_v49 = vcombine.low %v12267_v53, %v12271_v62  ;;  %v16462_v28 = vld [vmem:[#allocation49_spill] sm:$0xff] }
  0xbc   : > { %5343 = vmatprep.mubr.f32.mxu0 %v16452_v14  ;;  %10220 = vmatpush1.bf16.msra.mxu0 %v16453_v13  ;;  %v1611_v13 = vcombine.low %v16456_v32, %v16455_v47  ;;  %v16459_v14 = vld [vmem:[#allocation43_spill] sm:$0xff]  ;;  %v16467_v53 = vpack.c.bf16 %v12251_v45, %v12246_v11  ;;  %v12644_v62 = vrot.slane %v9659_v55, %v11210_v18 }
  0xbd   : > { %10221 = vmatprep.subr.bf16.mxu0 %v16346_v52  ;;  %v1739_v17 = vcombine.high %v12583_v8, %v16459_v14  ;;  %v16463_v32 = vld [vmem:[#allocation47_spill] sm:$0xff]  ;;  %v9673_v40 = vcombine.high %v16455_v47, %v1613_v12  ;;  %v12658_v45 = vrot.slane %v9663_v44, %v11210_v18  ;;  %v12661_v55 = vrot.slane %v9665_v54, %v11210_v18  ;;  %v12674_v44 = vld [vmem:[%s16071_s1 + $0x290] sm:$0xff]  ;;  %v12679_v54 = vld [vmem:[%s16071_s1 + $0x298] sm:$0xff] }
  0xbe   : > { %v1826_v22 = vcombine.low %v16463_v32, %v16462_v28  ;;  %v1882_v32 = vcombine.high %v16469_v34, %v16468_v6  ;;  %v1738_v34 = vcombine.low %v12583_v8, %v16459_v14  ;;  %v1673_v47 = vrot.slane %v1665_v63, %v11210_v18  ;;  %v16471_v14 = vld [vmem:[#allocation48_spill] sm:$0xff] }
  0xbf   : > { %5344 = vmatmul.mubr.f32.gmra.mrb[4].mxu0 %v16460_v49  ;;  %v12694_v6 = vld [vmem:[%s11199_s14 + $0xa2] sm:$0xff] }
  0xc0   : > { %5348 = vmatprep.mubr.f32.mxu0 %v16466_v33  ;;  %10223 = vmatpush1.bf16.msra.mxu0 %v16467_v53  ;;  %v9671_v33 = vcombine.high %v16448_v24, %v1611_v13  ;;  %v1753_v53 = vrot.slane %v1739_v17, %v11210_v18  ;;  %v16470_v24 = vcombine.low %v12420_v9, %v12372_v50  ;;  %v353_v49 = vld [vmem:[%s11199_s14 + $0xc2] sm:$0xff] }
  0xc1   : > { %10224 = vmatprep.subr.bf16.mxu0 %v16346_v52  ;;  %v1680_v13 = vrot.slane %v1666_v1, %v11210_v18  ;;  %v9683_v12 = vcombine.high %v16471_v14, %v1826_v22  ;;  %v9685_v17 = vcombine.high %v16462_v28, %v1897_v27  ;;  %v16472_v50 = vcombine.high %v12375_v19, %v12378_v15  ;;  %v16480_v1 = vld [vmem:[#allocation67_spill] sm:$0xff] }
  0xc2   : > { %v16473_v9 = vpack.c.bf16 %v12388_v16, %v12383_v29  ;;  %16474 = vst [vmem:[#allocation17_spill] sm:$0xff] %v12694_v6  ;;  %v1896_v22 = vrot.slane %v1882_v32, %v11210_v18  ;;  %v12699_v27 = vrot.slane %v9671_v33, %v11210_v18  ;;  %v12702_v28 = vrot.slane %v9673_v40, %v11210_v18  ;;  %v16475_v29 = vld [vmem:[#allocation59_spill] sm:$0xff]  ;;  %v16481_v32 = vld [vmem:[#allocation68_spill] sm:$0xff] }
  0xc3   : > { %5349 = vmatmul.mubr.f32.gmra.mrb[6].mxu0 %v16470_v24  ;;  %v1952_v16 = vcombine.high %v12694_v6, %v16475_v29  ;;  %v2024_v24 = vcombine.low %v12187_v58, %v11923_v43  ;;  %v9679_v33 = vcombine.low %v1753_v53, %v16471_v14  ;;  %v12717_v40 = vld [vmem:[%s16071_s1 + $0x2a0] sm:$0xff]  ;;  %v16476_v43 = vcombine.low %v12375_v19, %v12378_v15 }
  0xc4   : > { %5353 = vmatprep.mubr.f32.mxu0 %v16472_v50  ;;  %10226 = vmatpush1.bf16.msra.mxu0 %v16473_v9  ;;  %v1746_v9 = vrot.slane %v1738_v34, %v11210_v18  ;;  %v12728_v58 = vrot.slane %v1673_v47, %v11210_v18  ;;  %v12731_v34 = vrot.slane %v1680_v13, %v11210_v18  ;;  %v16479_v47 = vld [vmem:[#allocation58_spill] sm:$0xff] }
  0xc5   : > { %10227 = vmatprep.subr.bf16.mxu0 %v16346_v52  ;;  %v12734_v53 = vrot.slane %v9683_v12, %v11210_v18  ;;  %v12737_v14 = vrot.slane %v9685_v17, %v11210_v18  ;;  %v16477_v50 = vcombine.high %v12471_v38, %v12448_v46  ;;  %v16478_v19 = vpack.c.bf16 %v12413_v59, %v12408_v57  ;;  %v12753_v17 = vld [vmem:[%s16071_s1 + $0x2b0] sm:$0xff] }
  0xc6   : > { %v1899_v13 = vcombine.low %v16479_v47, %v1896_v22  ;;  %v1951_v12 = vcombine.low %v12694_v6, %v16475_v29  ;;  %v1966_v22 = vrot.slane %v1952_v16, %v11210_v18  ;;  %v2032_v29 = vrot.slane %v2024_v24, %v11210_v18  ;;  %v11032_v16 = vld [vmem:[%s11199_s14 + $0x12] sm:$0xff] }
  0xc7   : > { %5354 = vmatmul.mubr.f32.gmra.mrb[8].mxu0 %v16476_v43  ;;  %v12773_v15 = vrot.slane %v9679_v33, %v11210_v18  ;;  %v2454_v59 = vcombine.high %v16481_v32, %v16480_v1  ;;  %v16482_v57 = vcombine.low %v12471_v38, %v12448_v46  ;;  %v16483_v43 = vcombine.high %v12474_v48, %v12495_v26  ;;  %v11031_v38 = vld [vmem:[%s11199_s14 + $0x21] sm:$0xff]  ;;  %v11033_v33 = vld [vmem:[%s11199_s14 + $0x11] sm:$0xff] }
  0xc8   : > { %5358 = vmatprep.mubr.f32.mxu0 %v16477_v50  ;;  %10229 = vmatpush1.bf16.msra.mxu0 %v16478_v19  ;;  %v12758_v50 = vld [vmem:[%s16071_s1 + $0x2b8] sm:$0xff]  ;;  %v12770_v19 = vrot.slane %v1746_v9, %v11210_v18  ;;  %v16484_v46 = vpack.c.bf16 %v12461_v3, %v12456_v23  ;;  %v1959_v1 = vrot.slane %v1951_v12, %v11210_v18  ;;  %v12809_v23 = vld [vmem:[%s16071_s1 + $0x2c0] sm:$0xff]  ;;  %v12814_v3 = vld [vmem:[%s16071_s1 + $0x2c8] sm:$0xff] }
  0xc9   : > { %10230 = vmatprep.subr.bf16.mxu0 %v16346_v52  ;;  %v9691_v32 = vcombine.high %v16464_v7, %v1899_v13  ;;  %v16486_v7 = vld [vmem:[#allocation63_spill] sm:$0xff]  ;;  %v669_v9 = vcombine.high %v11031_v38, %v12205_v2  ;;  %v16487_v24 = vcombine.low %v12474_v48, %v12495_v26  ;;  %v493_v63 = vcombine.low %v11033_v33, %v11032_v16 }
  0xca   : > { %v2237_v13 = vcombine.low %v353_v49, %v16486_v7  ;;  %v2238_v12 = vcombine.high %v353_v49, %v16486_v7  ;;  %v494_v11 = vcombine.high %v11033_v33, %v11032_v16  ;;  %v11034_v49 = vld [vmem:[%s11199_s14 + $0x19] sm:$0x3f]  ;;  %v12843_v26 = vrot.slane %v1959_v1, %v11210_v18  ;;  %v11035_v33 = vld [vmem:[%s11199_s14 + $0x29] sm:$0x3f] }
  0xcb   : > { %5359 = vmatmul.mubr.f32.gmra.mrb[10].mxu0 %v16482_v57  ;;  %v12801_v57 = vrot.slane %v1966_v22, %v11210_v18  ;;  %v582_v7 = vcombine.high %v11034_v49, %v12238_v56  ;;  %v668_v22 = vcombine.low %v11031_v38, %v12205_v2  ;;  %v12840_v48 = vrot.slane %v9691_v32, %v11210_v18  ;;  %v12857_v38 = vld [vmem:[%s16071_s1 + $0x2d0] sm:$0xff]  ;;  %v12862_v1 = vld [vmem:[%s16071_s1 + $0x2d8] sm:$0xff]  ;;  %v12867_v32 = vld [vmem:[%s16071_s1 + $0x2e0] sm:$0xff] }
  0xcc   : > { %5363 = vmatprep.mubr.f32.mxu0 %v16483_v43  ;;  %10232 = vmatpush1.bf16.msra.mxu0 %v16484_v46  ;;  %v12804_v43 = vrot.slane %v2032_v29, %v11210_v18  ;;  %v2468_v46 = vrot.slane %v2454_v59, %v11210_v18  ;;  %v16488_v29 = vcombine.high %v12498_v60, %v12501_v41 }
  0xcd   : > { %10233 = vmatprep.subr.bf16.mxu0 %v16346_v52  ;;  %v16489_v59 = vpack.c.bf16 %v12543_v30, %v12538_v35  ;;  %v2245_v35 = vrot.slane %v2237_v13, %v11210_v18  ;;  %v2252_v30 = vrot.slane %v2238_v12, %v11210_v18  ;;  %v12872_v13 = vld [vmem:[%s16071_s1 + $0x2e8] sm:$0xff]  ;;  %v16491_v16 = vcombine.low %v12498_v60, %v12501_v41 }
  0xce   : > { %16485 = vst [vmem:[#allocation19_spill] sm:$0xff] %v12804_v43  ;;  %v2471_v12 = vcombine.low %v12120_v37, %v2468_v46  ;;  %v503_v47 = vrot.slane %v493_v63, %v11210_v18  ;;  %v510_v6 = vrot.slane %v494_v11, %v11210_v18  ;;  %v598_v8 = vrot.slane %v582_v7, %v11210_v18  ;;  %v12914_v7 = vld [vmem:[%s16071_s1 + $0x2f0] sm:$0xff] }
  0xcf   : > { %5364 = vmatmul.mubr.f32.gmra.mrb[12].mxu0 %v16487_v24  ;;  %v756_v24 = vcombine.low %v11035_v33, %v12276_v39  ;;  %v678_v46 = vrot.slane %v668_v22, %v11210_v18  ;;  %v757_v11 = vcombine.high %v11035_v33, %v12276_v39  ;;  %v12901_v63 = vrot.slane %v2245_v35, %v11210_v18  ;;  %v16495_v33 = vld [vmem:[#allocation5_spill] sm:$0xff] }
  0xd0   : > { %5368 = vmatprep.mubr.f32.mxu0 %v16488_v29  ;;  %10235 = vmatpush1.bf16.msra.mxu0 %v16489_v59  ;;  %v581_v29 = vcombine.low %v11034_v49, %v12238_v56  ;;  %v12877_v59 = vrot.slane %v669_v9, %v11210_v18  ;;  %v16492_v56 = vcombine.high %v12517_v0, %v12520_v5 }
  0xd1   : > { %10236 = vmatprep.subr.bf16.mxu0 %v16346_v52  ;;  %v16493_v9 = vpack.c.bf16 %v12566_v31, %v12561_v36  ;;  %v12904_v22 = vrot.slane %v2252_v30, %v11210_v18  ;;  %v9723_v49 = vcombine.high %v12092_v20, %v2471_v12  ;;  %v701_v35 = vcombine.high %v678_v46, %v16495_v33  ;;  %v16498_v31 = vld [vmem:[#allocation13_spill] sm:$0xff]  ;;  %v16499_v36 = vld [vmem:[#allocation20_spill] sm:$0xff] }
  0xd2   : > { %16490 = vst [vmem:[#allocation27_spill] sm:$0xff] %v12877_v59  ;;  %v703_v30 = vcombine.high %v12877_v59, %v11435_v25  ;;  %v16497_v20 = vcombine.low %v12517_v0, %v12520_v5  ;;  %v12931_v12 = vrot.slane %v503_v47, %v11210_v18  ;;  %v591_v41 = vrot.slane %v581_v29, %v11210_v18  ;;  %v12946_v0 = vld [vmem:[%s16071_s1 + $0x300] sm:$0xff]  ;;  %v12951_v5 = vld [vmem:[%s16071_s1 + $0x308] sm:$0xff]  ;;  %v11036_v47 = vld [vmem:[%s11199_s14 + $0x31] sm:$0xff] }
  0xd3   : > { %5369 = vmatmul.mubr.f32.gmra.mrb[14].mxu0 %v16491_v16  ;;  %16494 = vst [vmem:[#allocation29_spill] sm:$0xff] %v12904_v22  ;;  %v12919_v16 = vld [vmem:[%s16071_s1 + $0x2f8] sm:$0xff]  ;;  %v9616_v60 = vcombine.low %v598_v8, %v678_v46  ;;  %v16500_v37 = vcombine.high %v16498_v31, %v16499_v36  ;;  %16502 = vst [vmem:[#allocation32_spill] sm:$0xff] %v12946_v0  ;;  %v12954_v8 = vrot.slane %v757_v11, %v11210_v18  ;;  %v12984_v46 = vld [vmem:[%s16071_s1 + $0x310] sm:$0xff] }
  0xd4   : > { %5373 = vmatprep.mubr.f32.mxu0 %v16492_v56  ;;  %10238 = vmatpush1.bf16.msra.mxu0 %v16493_v9  ;;  %v12925_v56 = vrot.slane %v756_v24, %v11210_v18  ;;  %v12934_v9 = vrot.slane %v510_v6, %v11210_v18  ;;  %v16501_v24 = vpack.c.bf16 %v12622_v10, %v12617_v4  ;;  %v16505_v6 = vld [vmem:[#allocation9_spill] sm:$0xff]  ;;  %v11038_v11 = vld [vmem:[%s11199_s14 + $0x39] sm:$0x3f] }
  0xd5   : > { %10239 = vmatprep.subr.bf16.mxu0 %v16346_v52  ;;  %16503 = vst [vmem:[#allocation41_spill] sm:$0xff] %v12951_v5  ;;  %16504 = vst [vmem:[#allocation42_spill] sm:$0xff] %v12954_v8  ;;  %v12960_v29 = vld [vmem:[%s11199_s14 + $0x32] sm:$0xff]  ;;  %v12977_v25 = vrot.slane %v9723_v49, %v11210_v18  ;;  %v9622_v43 = vcombine.low %v701_v35, %v12877_v59  ;;  %v13007_v59 = vld [vmem:[%s16071_s1 + $0x320] sm:$0xff]  ;;  %v16514_v49 = vcombine.low %v12644_v62, %v12610_v51 }
  0xd6   : > { %16496 = vst [vmem:[#allocation31_spill] sm:$0xff] %v12925_v56  ;;  %v827_v4 = vcombine.low %v11036_v47, %v12960_v29  ;;  %v9624_v10 = vcombine.low %v703_v30, %v12925_v56  ;;  %16506 = vst [vmem:[#allocation36_spill] sm:$0xff] %v12984_v46  ;;  %v12999_v30 = vrot.slane %v591_v41, %v11210_v18  ;;  %v11040_v5 = vld [vmem:[%s11199_s14 + $0x41] sm:$0xff]  ;;  %v16513_v22 = vld [vmem:[#allocation86_spill] sm:$0xff] }
  0xd7   : > { %5374 = vmatmul.mubr.f32.gmra.mrb[16].mxu0 %v16497_v20  ;;  %v828_v20 = vcombine.high %v11036_v47, %v12960_v29  ;;  %v12989_v47 = vld [vmem:[%s16071_s1 + $0x318] sm:$0xff]  ;;  %16509 = vst [vmem:[#allocation39_spill] sm:$0xff] %v13007_v59  ;;  %v16512_v41 = vpack.c.bf16 %v12679_v54, %v12674_v44  ;;  %v970_v44 = vcombine.low %v11040_v5, %v16513_v22  ;;  %v13059_v54 = vld [vmem:[%s16071_s1 + $0x330] sm:$0xff] }
  0xd8   : > { %5378 = vmatprep.mubr.f32.mxu0 %v16500_v37  ;;  %10241 = vmatpush1.bf16.msra.mxu0 %v16501_v24  ;;  %v789_v37 = vcombine.high %v12925_v56, %v16505_v6  ;;  %v12971_v24 = vld [vmem:[%s11199_s14 + $0x3a] sm:$0x3f]  ;;  %16507 = vst [vmem:[#allocation43_spill] sm:$0xff] %v12989_v47  ;;  %v16508_v6 = vcombine.low %v16498_v31, %v16499_v36  ;;  %v13012_v36 = vld [vmem:[%s16071_s1 + $0x328] sm:$0xff]  ;;  %16515 = vst [vmem:[#allocation55_spill] sm:$0xff] %v13059_v54 }
  0xd9   : > { %10242 = vmatprep.subr.bf16.mxu0 %v16346_v52  ;;  %v899_v33 = vcombine.low %v11038_v11, %v12971_v24  ;;  %v13002_v56 = vrot.slane %v9616_v60, %v11210_v18  ;;  %16510 = vst [vmem:[#allocation49_spill] sm:$0xff] %v13012_v36  ;;  %v16511_v31 = vcombine.high %v12644_v62, %v12610_v51  ;;  %v13064_v51 = vld [vmem:[%s16071_s1 + $0x338] sm:$0xff] }
  0xda   : > { %v9628_v35 = vcombine.low %v789_v37, %v12954_v8  ;;  %v844_v0 = vrot.slane %v828_v20, %v11210_v18  ;;  %v13037_v37 = vrot.slane %v9624_v10, %v11210_v18  ;;  %v2652_v20 = vld [vmem:[%s16071_s1 + $0x408] sm:$0xff]  ;;  %v971_v60 = vcombine.high %v11040_v5, %v16513_v22  ;;  %16516 = vst [vmem:[#allocation45_spill] sm:$0xff] %v13064_v51  ;;  %v13097_v36 = vld [vmem:[%s11199_s14 + $0x52] sm:$0xff] }
  0xdb   : > { %5379 = vmatmul.mubr.f32.gmra.mrb[18].mxu0 %v16508_v6  ;;  %v837_v6 = vrot.slane %v827_v4, %v11210_v18  ;;  %v900_v4 = vcombine.high %v11038_v11, %v12971_v24  ;;  %v16517_v62 = vcombine.high %v12593_v61, %v12596_v21  ;;  %v16518_v11 = vpack.c.bf16 %v12722_v42, %v12717_v40  ;;  %v11041_v10 = vld [vmem:[%s11199_s14 + $0x49] sm:$0x3f] }
  0xdc   : > { %5383 = vmatprep.mubr.f32.mxu0 %v16511_v31  ;;  %10244 = vmatpush1.bf16.msra.mxu0 %v16512_v41  ;;  %v909_v31 = vrot.slane %v899_v33, %v11210_v18  ;;  %v13034_v41 = vrot.slane %v9622_v43, %v11210_v18  ;;  %v2651_v33 = vld [vmem:[%s16071_s1 + $0x400] sm:$0xff]  ;;  %v13073_v5 = vrot.slane %v9628_v35, %v11210_v18 }
  0xdd   : > { %10245 = vmatprep.subr.bf16.mxu0 %v16346_v52  ;;  %v16521_v43 = vld [vmem:[#allocation83_spill] sm:$0xff]  ;;  %v13082_v59 = vrot.slane %v844_v0, %v11210_v18  ;;  %v13088_v42 = vrot.slane %v970_v44, %v11210_v18  ;;  %v10312_v40 = vpack.c.bf16 %v2652_v20, %v2651_v33  ;;  %v11043_v0 = vld [vmem:[%s11199_s14 + $0x51] sm:$0xff]  ;;  %v16522_v33 = vcombine.low %v12593_v61, %v12596_v21 }
  0xde   : > { %16519 = vst [vmem:[#allocation46_spill] sm:$0xff] %v13073_v5  ;;  %v1042_v8 = vcombine.low %v11041_v10, %v16521_v43  ;;  %v1113_v46 = vcombine.low %v11043_v0, %v13097_v36  ;;  %v2654_v44 = vld [vmem:[%s16071_s1 + $0x418] sm:$0xff]  ;;  %v916_v20 = vrot.slane %v900_v4, %v11210_v18  ;;  %v16524_v35 = vcombine.high %v12658_v45, %v12661_v55  ;;  %v2656_v4 = vld [vmem:[%s16071_s1 + $0x428] sm:$0xff] }
  0xdf   : > { %5384 = vmatmul.mubr.f32.gmra.mrb[20].mxu0 %v16514_v49  ;;  %v13076_v49 = vrot.slane %v837_v6, %v11210_v18  ;;  %v1114_v6 = vcombine.high %v11043_v0, %v13097_v36  ;;  %10313 = vmatpush3.bf16.msra.mxu1 %v10312_v40  ;;  %v16525_v54 = vpack.c.bf16 %v12758_v50, %v12753_v17  ;;  %v16527_v0 = vld [vmem:[#allocation21_spill] sm:$0xff]  ;;  %v16528_v17 = vld [vmem:[#allocation18_spill] sm:$0xff]  ;;  %v2655_v40 = vld [vmem:[%s16071_s1 + $0x420] sm:$0xff] }
  0xe0   : > { %5388 = vmatprep.mubr.f32.mxu0 %v16517_v62  ;;  %10247 = vmatpush1.bf16.msra.mxu0 %v16518_v11  ;;  %v13085_v62 = vrot.slane %v909_v31, %v11210_v18  ;;  %v2653_v31 = vld [vmem:[%s16071_s1 + $0x410] sm:$0xff]  ;;  %v13112_v11 = vrot.slane %v971_v60, %v11210_v18  ;;  %v1043_v21 = vcombine.high %v11041_v10, %v16521_v43  ;;  %v13138_v43 = vld [vmem:[%s11199_s14 + $0x5a] sm:$0x3f] }
  0xe1   : > { %16520 = vst [vmem:[#allocation48_spill] sm:$0xff] %v13076_v49  ;;  %10248 = vmatprep.subr.bf16.mxu0 %v16346_v52  ;;  %v13123_v61 = vrot.slane %v1042_v8, %v11210_v18  ;;  %v10315_v60 = vpack.c.bf16 %v2654_v44, %v2653_v31  ;;  %10314 = vmatprep.subr.bf16.mxu1 %v16346_v52  ;;  %v11046_v31 = vld [vmem:[%s11199_s14 + $0x61] sm:$0xff]  ;;  %v16529_v44 = vld [vmem:[#allocation6_spill] sm:$0xff] }
  0xe2   : > { %16523 = vst [vmem:[#allocation59_spill] sm:$0xff] %v13112_v11  ;;  %v1005_v50 = vcombine.high %v13112_v11, %v16528_v17  ;;  %v1123_v8 = vrot.slane %v1113_v46, %v11210_v18  ;;  %v1130_v46 = vrot.slane %v1114_v6, %v11210_v18  ;;  %v1257_v17 = vcombine.high %v11046_v31, %v16529_v44 }
  0xe3   : > { %5389 = vmatmul.mubr.f32.gmra.mrb[22].mxu0 %v16522_v33  ;;  %16526 = vst [vmem:[#allocation67_spill] sm:$0xff] %v13123_v61  ;;  %v1256_v33 = vcombine.low %v11046_v31, %v16529_v44  ;;  %10316 = vmatpush3.bf16.msra.mxu1 %v10315_v60  ;;  %v10318_v51 = vpack.c.bf16 %v2656_v4, %v2655_v40 }
  0xe4   : > { %5393 = vmatprep.mubr.f32.mxu0 %v16524_v35  ;;  %10250 = vmatpush1.bf16.msra.mxu0 %v16525_v54  ;;  %v1003_v35 = vcombine.high %v13088_v42, %v16527_v0  ;;  %v11044_v54 = vld [vmem:[%s11199_s14 + $0x59] sm:$0x3f]  ;;  %v16530_v0 = vcombine.low %v12658_v45, %v12661_v55  ;;  %v16531_v49 = vcombine.high %v12699_v27, %v12702_v28 }
  0xe5   : > { %10251 = vmatprep.subr.bf16.mxu0 %v16346_v52  ;;  %v1186_v10 = vcombine.high %v11044_v54, %v13138_v43  ;;  %v16532_v5 = vpack.c.bf16 %v12814_v3, %v12809_v23  ;;  %v13163_v45 = vrot.slane %v1043_v21, %v11210_v18  ;;  %v16534_v55 = vld [vmem:[#allocation22_spill] sm:$0xff]  ;;  %v9634_v60 = vcombine.low %v916_v20, %v13088_v42  ;;  %v13176_v3 = vld [vmem:[%s16071_s1 + $0x340] sm:$0xff] }
  0xe6   : > { %v1075_v6 = vcombine.high %v13123_v61, %v16534_v55  ;;  %v1185_v4 = vcombine.low %v11044_v54, %v13138_v43  ;;  %10317 = vmatprep.subr.bf16.mxu1 %v16346_v52  ;;  %v9642_v23 = vcombine.low %v1005_v50, %v13123_v61  ;;  %v13184_v42 = vrot.slane %v1123_v8, %v11210_v18  ;;  %v11047_v50 = vld [vmem:[%s11199_s14 + $0x69] sm:$0x3f]  ;;  %v16537_v54 = vld [vmem:[#allocation15_spill] sm:$0xff]  ;;  %v2657_v8 = vld [vmem:[%s16071_s1 + $0x430] sm:$0xff] }
  0xe7   : > { %5394 = vmatmul.mubr.f32.gmra.mrb[24].mxu0 %v16530_v0  ;;  %16533 = vst [vmem:[#allocation68_spill] sm:$0xff] %v13163_v45  ;;  %v1202_v20 = vrot.slane %v1186_v10, %v11210_v18  ;;  %v1266_v21 = vrot.slane %v1256_v33, %v11210_v18  ;;  %v16535_v40 = vcombine.low %v12699_v27, %v12702_v28  ;;  %v2658_v10 = vld [vmem:[%s16071_s1 + $0x438] sm:$0xff] }
  0xe8   : > { %5398 = vmatprep.mubr.f32.mxu0 %v16531_v49  ;;  %10253 = vmatpush1.bf16.msra.mxu0 %v16532_v5  ;;  %v9636_v49 = vcombine.low %v1003_v35, %v13112_v11  ;;  %v13181_v5 = vld [vmem:[%s16071_s1 + $0x348] sm:$0xff]  ;;  %v13192_v0 = vrot.slane %v1130_v46, %v11210_v18  ;;  %v13195_v35 = vrot.slane %v1257_v17, %v11210_v18  ;;  %v2663_v17 = vld [vmem:[%s16071_s1 + $0x460] sm:$0xff] }
  0xe9   : > { %10254 = vmatprep.subr.bf16.mxu0 %v16346_v52  ;;  %v1328_v31 = vcombine.low %v11047_v50, %v16537_v54  ;;  %10319 = vmatpush3.bf16.msra.mxu1 %v10318_v51  ;;  %v16538_v27 = vcombine.high %v12728_v58, %v12731_v34  ;;  %v16539_v28 = vpack.c.bf16 %v12862_v1, %v12857_v38  ;;  %v16560_v11 = vld [vmem:[#allocation19_spill] sm:$0xff] }
  0xea   : > { %16536 = vst [vmem:[#allocation63_spill] sm:$0xff] %v13195_v35  ;;  %v9644_v51 = vcombine.low %v1075_v6, %v13163_v45  ;;  %v1329_v44 = vcombine.high %v11047_v50, %v16537_v54  ;;  %v13217_v33 = vrot.slane %v9634_v60, %v11210_v18  ;;  %10320 = vmatprep.subr.bf16.mxu1 %v16346_v52  ;;  %v2659_v60 = vld [vmem:[%s16071_s1 + $0x440] sm:$0xff]  ;;  %v2660_v54 = vld [vmem:[%s16071_s1 + $0x448] sm:$0xff] }
  0xeb   : > { %5399 = vmatmul.mubr.f32.gmra.mrb[26].mxu0 %v16535_v40  ;;  %v1195_v40 = vrot.slane %v1185_v4, %v11210_v18  ;;  %v13224_v38 = vrot.slane %v9636_v49, %v11210_v18  ;;  %v9648_v1 = vcombine.low %v1202_v20, %v1266_v21  ;;  %v10321_v50 = vpack.c.bf16 %v2658_v10, %v2657_v8  ;;  %v13270_v20 = vld [vmem:[%s11199_s14 + $0x72] sm:$0xff]  ;;  %v16558_v45 = vld [vmem:[#allocation16_spill] sm:$0xff] }
  0xec   : > { %5403 = vmatprep.mubr.f32.mxu0 %v16538_v27  ;;  %10256 = vmatpush1.bf16.msra.mxu0 %v16539_v28  ;;  %v16540_v27 = vld [vmem:[#allocation35_spill] sm:$0xff]  ;;  %v16541_v4 = vcombine.low %v12728_v58, %v12731_v34  ;;  %v13237_v49 = vrot.slane %v9642_v23, %v11210_v18  ;;  %v13244_v10 = vrot.slane %v1328_v31, %v11210_v18  ;;  %v13258_v23 = vld [vmem:[%s16071_s1 + $0x350] sm:$0xff]  ;;  %v13263_v31 = vld [vmem:[%s16071_s1 + $0x358] sm:$0xff] }
  0xed   : > { %10257 = vmatprep.subr.bf16.mxu0 %v16346_v52  ;;  %v1289_v6 = vcombine.high %v1266_v21, %v16540_v27  ;;  %v16542_v21 = vld [vmem:[#allocation38_spill] sm:$0xff]  ;;  %v16544_v28 = vcombine.high %v12770_v19, %v12773_v15  ;;  %v16545_v58 = vpack.c.bf16 %v12872_v13, %v12867_v32  ;;  %v13253_v34 = vrot.slane %v9644_v51, %v11210_v18  ;;  %v16547_v13 = vld [vmem:[#allocation40_spill] sm:$0xff] }
  0xee   : > { %v1291_v8 = vcombine.high %v13195_v35, %v16542_v21  ;;  %16543 = vst [vmem:[#allocation13_spill] sm:$0xff] %v13244_v10  ;;  %v1361_v51 = vcombine.high %v13244_v10, %v16547_v13  ;;  %10322 = vmatpush3.bf16.msra.mxu1 %v10321_v50  ;;  %v10324_v46 = vpack.c.bf16 %v2660_v54, %v2659_v60  ;;  %v2661_v13 = vld [vmem:[%s16071_s1 + $0x450] sm:$0xff]  ;;  %v2662_v50 = vld [vmem:[%s16071_s1 + $0x458] sm:$0xff]  ;;  %v11052_v21 = vld [vmem:[%s11199_s14 + $0x81] sm:$0xff] }
  0xef   : > { %5404 = vmatmul.mubr.f32.gmra.mrb[28].mxu0 %v16541_v4  ;;  %v13266_v4 = vrot.slane %v1329_v44, %v11210_v18  ;;  %v13280_v44 = vrot.slane %v1195_v40, %v11210_v18  ;;  %v13283_v47 = vrot.slane %v9648_v1, %v11210_v18  ;;  %v9654_v27 = vcombine.low %v1289_v6, %v13195_v35 }
  0xf0   : > { %5408 = vmatprep.mubr.f32.mxu0 %v16544_v28  ;;  %10259 = vmatpush1.bf16.msra.mxu0 %v16545_v58  ;;  %v11048_v28 = vld [vmem:[%s11199_s14 + $0x71] sm:$0xff]  ;;  %v16548_v60 = vcombine.low %v12770_v19, %v12773_v15  ;;  %v9656_v54 = vcombine.low %v1291_v8, %v13244_v10  ;;  %v13311_v15 = vld [vmem:[%s16071_s1 + $0x368] sm:$0xff]  ;;  %v16549_v19 = vcombine.high %v12734_v53, %v12737_v14 }
  0xf1   : > { %16546 = vst [vmem:[#allocation20_spill] sm:$0xff] %v13266_v4  ;;  %v1399_v32 = vcombine.low %v11048_v28, %v13270_v20  ;;  %10260 = vmatprep.subr.bf16.mxu0 %v16346_v52  ;;  %v1400_v58 = vcombine.high %v11048_v28, %v13270_v20  ;;  %10323 = vmatprep.subr.bf16.mxu1 %v16346_v52  ;;  %v13306_v28 = vld [vmem:[%s16071_s1 + $0x360] sm:$0xff] }
  0xf2   : > { %v9660_v1 = vcombine.low %v1361_v51, %v13266_v4  ;;  %10325 = vmatpush3.bf16.msra.mxu1 %v10324_v46  ;;  %v13340_v51 = vrot.slane %v9654_v27, %v11210_v18  ;;  %v2664_v46 = vld [vmem:[%s16071_s1 + $0x468] sm:$0xff]  ;;  %v16553_v27 = vcombine.low %v12734_v53, %v12737_v14  ;;  %v536_v4 = vrot.slane %v12205_v2, %v11210_v18 }
  0xf3   : > { %5409 = vmatmul.mubr.f32.gmra.mrb[30].mxu0 %v16548_v60  ;;  %v16550_v60 = vpack.c.bf16 %v12919_v16, %v12914_v7  ;;  %v1409_v6 = vrot.slane %v1399_v32, %v11210_v18  ;;  %v13330_v7 = vld [vmem:[%s16071_s1 + $0x370] sm:$0xff]  ;;  %v13335_v16 = vld [vmem:[%s16071_s1 + $0x378] sm:$0xff]  ;;  %v10327_v32 = vpack.c.bf16 %v2662_v50, %v2661_v13  ;;  %10326 = vmatprep.subr.bf16.mxu1 %v16346_v52 }
  0xf4   : > { %5413 = vmatprep.mubr.f32.mxu0 %v16549_v19  ;;  %v1416_v19 = vrot.slane %v1400_v58, %v11210_v18  ;;  %16551 = vst [vmem:[#allocation86_spill] sm:$0xff] %v13330_v7  ;;  %16552 = vst [vmem:[#allocation83_spill] sm:$0xff] %v13335_v16  ;;  %v529_v13 = vcombine.high %v12205_v2, %v12205_v2  ;;  %v13357_v50 = vrot.slane %v9656_v54, %v11210_v18  ;;  %v13361_v58 = vld [vmem:[%s11199_s14 + $0x7a] sm:$0x3f] }
  0xf5   : > { %10262 = vmatpush1.bf16.msra.mxu0 %v16550_v60  ;;  %v11050_v60 = vld [vmem:[%s11199_s14 + $0x79] sm:$0x3f]  ;;  %v16554_v10 = vcombine.high %v12840_v48, %v12843_v26  ;;  %v13373_v14 = vrot.slane %v1409_v6, %v11210_v18  ;;  %v10330_v35 = vpack.c.bf16 %v2664_v46, %v2663_v17  ;;  %v1542_v53 = vcombine.low %v11052_v21, %v16558_v45  ;;  %v2665_v6 = vld [vmem:[%s16071_s1 + $0x470] sm:$0xff] }
  0xf6   : > { %10263 = vmatprep.subr.bf16.mxu0 %v16346_v52  ;;  %v1471_v8 = vcombine.low %v11050_v60, %v13361_v58  ;;  %v1472_v40 = vcombine.high %v11050_v60, %v13361_v58  ;;  %v13379_v60 = vrot.slane %v9660_v1, %v11210_v18  ;;  %v13382_v2 = vrot.slane %v1416_v19, %v11210_v18  ;;  %v2666_v1 = vld [vmem:[%s16071_s1 + $0x478] sm:$0xff] }
  0xf7   : > { %5414 = vmatmul.mubr.f32.gmra.mrb[32].mxu0 %v16553_v27  ;;  %16555 = vst [vmem:[#allocation6_spill] sm:$0xff] %v13373_v14  ;;  %v543_v27 = vrot.slane %v529_v13, %v11210_v18  ;;  %10328 = vmatpush3.bf16.msra.mxu1 %v10327_v32  ;;  %v616_v19 = vcombine.high %v12276_v39, %v12276_v39  ;;  %v16576_v14 = vld [vmem:[#allocation50_spill] sm:$0xff] }
  0xf8   : > { %5418 = vmatprep.mubr.f32.mxu0 %v16554_v10  ;;  %16556 = vst [vmem:[#allocation15_spill] sm:$0xff] %v13379_v60  ;;  %16557 = vst [vmem:[#allocation89_spill] sm:$0xff] %v13382_v2  ;;  %v544_v10 = vcombine.high %v536_v4, %v536_v4  ;;  %10329 = vmatprep.subr.bf16.mxu1 %v16346_v52  ;;  %v623_v17 = vrot.slane %v12276_v39, %v11210_v18 }
  0xf9   : > { %v545_v13 = vcombine.high %v543_v27, %v543_v27  ;;  %v16559_v32 = vcombine.low %v12840_v48, %v12843_v26  ;;  %v1481_v54 = vrot.slane %v1471_v8, %v11210_v18  ;;  %v13404_v61 = vrot.slane %v1472_v40, %v11210_v18 }
  0xfa   : > { %v1543_v55 = vcombine.high %v11052_v21, %v16558_v45  ;;  %v16561_v7 = vcombine.high %v12801_v57, %v16560_v11  ;;  %v10333_v16 = vpack.c.bf16 %v2666_v1, %v2665_v6  ;;  %v2746_v48 = vcombine.low %v536_v4, %v544_v10  ;;  %v16563_v10 = vld [vmem:[#allocation79_spill] sm:$0xff]  ;;  %v16564_v6 = vld [vmem:[#allocation80_spill] sm:$0xff] }
  0xfb   : > { %5419 = vmatmul.mubr.f32.gmra.mrb[34].mxu0 %v16559_v32  ;;  %v2747_v26 = vcombine.low %v543_v27, %v545_v13  ;;  %10331 = vmatpush3.bf16.msra.mxu1 %v10330_v35  ;;  %v630_v32 = vrot.slane %v616_v19, %v11210_v18  ;;  %v631_v46 = vcombine.high %v623_v17, %v623_v17  ;;  %v13444_v19 = vld [vmem:[%s16071_s1 + $0x380] sm:$0xff] }
  0xfc   : > { %5423 = vmatprep.mubr.f32.mxu0 %v16561_v7  ;;  %v711_v40 = vrot.slane %v12960_v29, %v11210_v18  ;;  %v704_v45 = vcombine.high %v12960_v29, %v12960_v29  ;;  %10332 = vmatprep.subr.bf16.mxu1 %v16346_v52  ;;  %v2754_v8 = vrot.slane %v2746_v48, %v11210_v18  ;;  %v16279_v7 = vmov 0.0  }
  0xfd   : > { %v16562_v4 = vcombine.low %v12801_v57, %v16560_v11  ;;  %9985 = vmatprep.mubr.msk.f32.mxu1 %vm11125_vm0, %v16279_v7  ;;  %v2761_v29 = vrot.slane %v2747_v26, %v11210_v18  ;;  %v2835_v27 = vcombine.low %v623_v17, %v631_v46  ;;  %v16565_v1 = vcombine.high %v16563_v10, %v16564_v6  ;;  %v13449_v17 = vld [vmem:[%s16071_s1 + $0x388] sm:$0xff] }
  0xfe   : > { %v13433_v13 = vrot.slane %v1481_v54, %v11210_v18  ;;  %v13436_v57 = vrot.slane %v1542_v53, %v11210_v18  ;;  %v13439_v11 = vrot.slane %v1543_v55, %v11210_v18  ;;  %16568 = vst [vmem:[#allocation79_spill] sm:$0xff] %v13444_v19  ;;  %16569 = vst [vmem:[#allocation80_spill] sm:$0xff] %v13449_v17  ;;  %v11053_v26 = vld [vmem:[%s11199_s14 + $0x89] sm:$0x3f] }
  0xff   : > { %5424 = vmatmul.mubr.f32.gmra.mrb[36].mxu0 %v16562_v4  ;;  %v2836_v46 = vcombine.low %v630_v32, %v711_v40  ;;  %10334 = vmatpush3.bf16.msra.mxu1 %v10333_v16  ;;  %v2762_v54 = vcombine.low %v2754_v8, %v2761_v29  ;;  %v2843_v53 = vrot.slane %v2835_v27, %v11210_v18  ;;  %v16570_v4 = vld [vmem:[#allocation23_spill] sm:$0xff]  ;;  %v16572_v29 = vld [vmem:[#allocation81_spill] sm:$0xff]  ;;  %v16573_v27 = vld [vmem:[#allocation82_spill] sm:$0xff] }
 0x100   : > { %5428 = vmatprep.mubr.f32.mxu0 %v16565_v1  ;;  %16566 = vst [vmem:[#allocation16_spill] sm:$0xff] %v13433_v13  ;;  %16567 = vst [vmem:[#allocation19_spill] sm:$0xff] %v13439_v11  ;;  %v718_v55 = vrot.slane %v704_v45, %v11210_v18  ;;  %v719_v48 = vcombine.high %v711_v40, %v711_v40  ;;  %v1614_v1 = vcombine.low %v11053_v26, %v16570_v4  ;;  %v16590_v19 = vld [vmem:[#allocation88_spill] sm:$0xff] }
 0x101   : > { %v1615_v35 = vcombine.high %v11053_v26, %v16570_v4  ;;  %v2850_v21 = vrot.slane %v2836_v46, %v11210_v18  ;;  %v798_v39 = vrot.slane %v12971_v24, %v11210_v18  ;;  %10335 = vmatprep.subr.bf16.mxu1 %v16346_v52  ;;  %v16571_v16 = vcombine.low %v16563_v10, %v16564_v6  ;;  %v13471_v26 = vld [vmem:[%s11199_s14 + $0x92] sm:$0xff] }
 0x102   : > { %v720_v40 = vcombine.high %v718_v55, %v718_v55  ;;  %v2924_v45 = vcombine.low %v719_v48, %v718_v55  ;;  %v791_v8 = vcombine.high %v12971_v24, %v12971_v24  ;;  %v16574_v46 = vcombine.high %v16572_v29, %v16573_v27  ;;  %v11055_v4 = vld [vmem:[%s11199_s14 + $0x91] sm:$0xff]  ;;  %9986 = vmatmul.mubr.f32.vlgmr.msra.gmra.mrb[0].mxu1 %v2762_v54 }
 0x103   : > { %5429 = vmatmul.mubr.f32.gmra.mrb[38].mxu0 %v16571_v16  ;;  %v1685_v7 = vcombine.low %v11055_v4, %v13471_v26  ;;  %v1686_v10 = vcombine.high %v11055_v4, %v13471_v26  ;;  %v2851_v6 = vcombine.low %v2843_v53, %v2850_v21  ;;  %v16575_v48 = vmov 0.0  }
 0x104   : > { %5433 = vmatprep.mubr.f32.mxu0 %v16574_v46  ;;  %9988 = vmatprep.mubr.msk.f32.mxu1 %vm11125_vm0, %v16575_v48  ;;  %v2925_v24 = vcombine.low %v720_v40, %v798_v39  ;;  %v2932_v16 = vrot.slane %v2924_v45, %v11210_v18  ;;  %v805_v46 = vrot.slane %v791_v8, %v11210_v18  ;;  %v11056_v8 = vld [vmem:[%s11199_s14 + $0x4a] sm:$0x3f] }
 0x105   : > { %v1575_v4 = vcombine.high %v13436_v57, %v16576_v14  ;;  %v806_v60 = vcombine.high %v798_v39, %v798_v39  ;;  %v870_v21 = vrot.slane %v16513_v22, %v11210_v18  ;;  %v16577_v54 = vcombine.low %v16572_v29, %v16573_v27  ;;  %v16578_v39 = vld [vmem:[#allocation29_spill] sm:$0xff]  ;;  %v16580_v14 = vld [vmem:[#allocation47_spill] sm:$0xff] }
 0x106   : > { %v9666_v53 = vcombine.low %v13404_v61, %v13436_v57  ;;  %v2939_v40 = vrot.slane %v2925_v24, %v11210_v18  ;;  %v863_v45 = vcombine.high %v16513_v22, %v16513_v22  ;;  %v941_v32 = vrot.slane %v11056_v8, %v11210_v18  ;;  %9989 = vmatmul.mubr.f32.gmra.mrb[2].mxu1 %v2851_v6 }
 0x107   : > { %5434 = vmatmul.mubr.f32.gmra.mrb[40].mxu0 %v16577_v54  ;;  %v16579_v55 = vcombine.high %v12901_v63, %v16578_v39  ;;  %v1577_v13 = vcombine.high %v13439_v11, %v16580_v14  ;;  %v878_v29 = vcombine.high %v870_v21, %v870_v21  ;;  %v3013_v27 = vcombine.low %v806_v60, %v805_v46 }
 0x108   : > { %v13504_v61 = vrot.slane %v1614_v1, %v11210_v18  ;;  %v13507_v57 = vrot.slane %v1615_v35, %v11210_v18  ;;  %9991 = vmatprep.mubr.msk.f32.mxu1 %vm11125_vm0, %v16575_v48  ;;  %v2940_v22 = vcombine.low %v2932_v16, %v2939_v40  ;;  %v877_v24 = vrot.slane %v863_v45, %v11210_v18  ;;  %v16584_v40 = vld [vmem:[#allocation84_spill] sm:$0xff]  ;;  %v16585_v45 = vld [vmem:[#allocation87_spill] sm:$0xff] }
 0x109   : > { %5438 = vmatprep.mubr.f32.mxu0 %v16579_v55  ;;  %v9668_v55 = vcombine.low %v1575_v4, %v13439_v11  ;;  %v3014_v54 = vcombine.low %v870_v21, %v878_v29  ;;  %v3021_v6 = vrot.slane %v3013_v27, %v11210_v18  ;;  %v949_v60 = vcombine.high %v941_v32, %v941_v32  ;;  %v13526_v27 = vld [vmem:[%s11199_s14 + $0x99] sm:$0x3f] }
 0x10a   : > { %16581 = vst [vmem:[#allocation23_spill] sm:$0xff] %v13504_v61  ;;  %16582 = vst [vmem:[#allocation81_spill] sm:$0xff] %v13507_v57  ;;  %v16583_v1 = vcombine.low %v12901_v63, %v16578_v39  ;;  %v1695_v35 = vrot.slane %v1685_v7, %v11210_v18  ;;  %v879_v46 = vcombine.high %v877_v24, %v877_v24  ;;  %9992 = vmatmul.mubr.f32.gmra.mrb[4].mxu1 %v2940_v22  ;;  %v13529_v63 = vld [vmem:[%s11199_s14 + $0x9a] sm:$0x3f] }
 0x10b   : > { %v934_v14 = vcombine.high %v11056_v8, %v11056_v8  ;;  %v1006_v16 = vcombine.high %v13097_v36, %v13097_v36  ;;  %v16586_v2 = vcombine.high %v16584_v40, %v16585_v45  ;;  %v1702_v4 = vrot.slane %v1686_v10, %v11210_v18  ;;  %9994 = vmatprep.mubr.msk.f32.mxu1 %vm11125_vm0, %v16575_v48  ;;  %v16587_v10 = vld [vmem:[#allocation52_spill] sm:$0xff] }
 0x10c   : > { %5439 = vmatmul.mubr.f32.gmra.mrb[42].mxu0 %v16583_v1  ;;  %v3028_v21 = vrot.slane %v3014_v54, %v11210_v18  ;;  %v3103_v29 = vcombine.low %v941_v32, %v949_v60  ;;  %v1757_v7 = vcombine.low %v13526_v27, %v13529_v63  ;;  %v3102_v8 = vcombine.low %v877_v24, %v879_v46 }
 0x10d   : > { %5443 = vmatprep.mubr.f32.mxu0 %v16586_v2  ;;  %v948_v39 = vrot.slane %v934_v14, %v11210_v18  ;;  %v1013_v2 = vrot.slane %v13097_v36, %v11210_v18  ;;  %v1647_v22 = vcombine.high %v13504_v61, %v16587_v10  ;;  %v1020_v60 = vrot.slane %v1006_v16, %v11210_v18  ;;  %v16589_v36 = vld [vmem:[#allocation85_spill] sm:$0xff] }
 0x10e   : > { %v3029_v32 = vcombine.low %v3021_v6, %v3028_v21  ;;  %v3117_v54 = vrot.slane %v3103_v29, %v11210_v18  ;;  %v16588_v1 = vcombine.low %v16584_v40, %v16585_v45  ;;  %v13546_v11 = vrot.slane %v9666_v53, %v11210_v18  ;;  %v13564_v45 = vld [vmem:[%s16071_s1 + $0x390] sm:$0xff] }
 0x10f   : > { %v3110_v14 = vrot.slane %v3102_v8, %v11210_v18  ;;  %v1021_v24 = vcombine.high %v1013_v2, %v1013_v2  ;;  %v3191_v46 = vcombine.low %v948_v39, %v1013_v2  ;;  %v16591_v17 = vcombine.high %v16589_v36, %v16590_v19 }
 0x110   : > { %5444 = vmatmul.mubr.f32.gmra.mrb[44].mxu0 %v16588_v1  ;;  %v13553_v6 = vrot.slane %v9668_v55, %v11210_v18  ;;  %v9674_v16 = vcombine.low %v1577_v13, %v13504_v61  ;;  %v1758_v40 = vcombine.high %v13526_v27, %v13529_v63  ;;  %9995 = vmatmul.mubr.f32.gmra.mrb[6].mxu1 %v3029_v32 }
 0x111   : > { %5448 = vmatprep.mubr.f32.mxu0 %v16591_v17  ;;  %v13559_v53 = vrot.slane %v1695_v35, %v11210_v18  ;;  %v13569_v17 = vld [vmem:[%s16071_s1 + $0x398] sm:$0xff]  ;;  %9997 = vmatprep.mubr.msk.f32.mxu1 %vm11125_vm0, %v16575_v48  ;;  %v3118_v13 = vcombine.low %v3110_v14, %v3117_v54  ;;  %v3192_v55 = vcombine.low %v1021_v24, %v1020_v60  ;;  %v11059_v54 = vld [vmem:[%s11199_s14 + $0x62] sm:$0xff] }
 0x112   : > { %v1022_v21 = vcombine.high %v1020_v60, %v1020_v60  ;;  %v9676_v29 = vcombine.low %v1647_v22, %v13507_v57  ;;  %v13575_v35 = vrot.slane %v1702_v4, %v11210_v18  ;;  %v3199_v27 = vrot.slane %v3191_v46, %v11210_v18  ;;  %v11067_v57 = vld [vmem:[%s11199_s14 + $0x8a] sm:$0x3f] }
 0x113   : > { %v1077_v8 = vcombine.high %v13138_v43, %v13138_v43  ;;  %v16592_v39 = vcombine.low %v16589_v36, %v16590_v19  ;;  %v3206_v2 = vrot.slane %v3192_v55, %v11210_v18  ;;  %v1084_v32 = vrot.slane %v13138_v43, %v11210_v18 }
 0x114   : > { %v1149_v22 = vcombine.high %v11059_v54, %v11059_v54  ;;  %v1156_v4 = vrot.slane %v11059_v54, %v11210_v18  ;;  %v16593_v60 = vcombine.high %v12977_v25, %v12977_v25  ;;  %v13592_v1 = vrot.slane %v9674_v16, %v11210_v18  ;;  %9998 = vmatmul.mubr.f32.gmra.mrb[8].mxu1 %v3118_v13  ;;  %v11060_v54 = vld [vmem:[%s11199_s14 + $0x6a] sm:$0x3f] }
 0x115   : > { %5449 = vmatmul.mubr.f32.gmra.mrb[46].mxu0 %v16592_v39  ;;  %v1091_v14 = vrot.slane %v1077_v8, %v11210_v18  ;;  %10000 = vmatprep.mubr.msk.f32.mxu1 %vm11125_vm0, %v16575_v48  ;;  %v3207_v43 = vcombine.low %v3199_v27, %v3206_v2  ;;  %v1092_v24 = vcombine.high %v1084_v32, %v1084_v32 }
 0x116   : > { %5453 = vmatprep.mubr.f32.mxu0 %v16593_v60  ;;  %v3280_v46 = vcombine.low %v1022_v21, %v1084_v32  ;;  %v1163_v36 = vrot.slane %v1149_v22, %v11210_v18  ;;  %v1767_v16 = vrot.slane %v1757_v7, %v11210_v18  ;;  %v1164_v39 = vcombine.high %v1156_v4, %v1156_v4  ;;  %v16597_v32 = vld [vmem:[#allocation32_spill] sm:$0xff] }
 0x117   : > { %v1220_v60 = vcombine.high %v11060_v54, %v11060_v54  ;;  %v3281_v8 = vcombine.low %v1092_v24, %v1091_v14  ;;  %v16594_v21 = vcombine.high %v12931_v12, %v12934_v9  ;;  %v1227_v22 = vrot.slane %v11060_v54, %v11210_v18 }
 0x118   : > { %v3288_v27 = vrot.slane %v3280_v46, %v11210_v18  ;;  %v1165_v2 = vcombine.high %v1163_v36, %v1163_v36  ;;  %10001 = vmatmul.mubr.f32.gmra.mrb[10].mxu1 %v3207_v43  ;;  %v3369_v7 = vcombine.low %v1156_v4, %v1164_v39  ;;  %v1299_v46 = vrot.slane %v13270_v20, %v11210_v18  ;;  %v11061_v4 = vld [vmem:[%s11199_s14 + $0xa1] sm:$0xff] }
 0x119   : > { %5454 = vmatmul.mubr.f32.gmra.mrb[48].mxu0 %v12977_v25  ;;  %10003 = vmatprep.mubr.msk.f32.mxu1 %vm11125_vm0, %v16575_v48  ;;  %v3295_v25 = vrot.slane %v3281_v8, %v11210_v18  ;;  %v1234_v24 = vrot.slane %v1220_v60, %v11210_v18  ;;  %v1235_v39 = vcombine.high %v1227_v22, %v1227_v22 }
 0x11a   : > { %5523 = vmatprep.mubr.f32.mxu0 %v16594_v21  ;;  %v3370_v14 = vcombine.low %v1163_v36, %v1165_v2  ;;  %v13621_v21 = vrot.slane %v9676_v29, %v11210_v18  ;;  %v3377_v43 = vrot.slane %v3369_v7, %v11210_v18  ;;  %v16595_v54 = vcombine.low %v12931_v12, %v12934_v9  ;;  %v16596_v2 = vld [vmem:[#allocation41_spill] sm:$0xff] }
 0x11b   : > { %v13630_v36 = vrot.slane %v1758_v40, %v11210_v18  ;;  %v3296_v60 = vcombine.low %v3288_v27, %v3295_v25  ;;  %v3459_v29 = vcombine.low %v1234_v24, %v1299_v46  ;;  %v16598_v13 = vpack.c.bf16 %v16596_v2, %v16597_v32  ;;  %v16600_v12 = vld [vmem:[#allocation17_spill] sm:$0xff]  ;;  %v16604_v2 = vld [vmem:[#allocation36_spill] sm:$0xff] }
 0x11c   : > { %v3384_v8 = vrot.slane %v3370_v14, %v11210_v18  ;;  %v16599_v7 = vcombine.high %v12999_v30, %v13002_v56  ;;  %v1828_v9 = vcombine.low %v11061_v4, %v16600_v12  ;;  %v3458_v40 = vcombine.low %v1227_v22, %v1235_v39  ;;  %v13649_v14 = vld [vmem:[%s11199_s14 + $0xaa] sm:$0x3f] }
 0x11d   : > { %5524 = vmatmul.mubr.f32.vlgmr.msra.gmra.mrb[0].mxu0 %v16595_v54  ;;  %v13642_v54 = vrot.slane %v1767_v16, %v11210_v18  ;;  %v1829_v27 = vcombine.high %v11061_v4, %v16600_v12  ;;  %10004 = vmatmul.mubr.f32.gmra.mrb[12].mxu1 %v3296_v60  ;;  %v3473_v32 = vrot.slane %v3459_v29, %v11210_v18  ;;  %v11064_v12 = vld [vmem:[%s11199_s14 + $0x82] sm:$0xff] }
 0x11e   : > { %10265 = vmatpush1.bf16.msra.mxu0 %v16598_v13  ;;  %5528 = vmatprep.mubr.f32.mxu0 %v16599_v7  ;;  %v3385_v25 = vcombine.low %v3377_v43, %v3384_v8  ;;  %v11062_v13 = vld [vmem:[%s11199_s14 + $0xa9] sm:$0x3f]  ;;  %v3466_v16 = vrot.slane %v3458_v40, %v11210_v18  ;;  %v1292_v22 = vcombine.high %v13270_v20, %v13270_v20 }
 0x11f   : > { %10266 = vmatprep.subr.bf16.mxu0 %v16346_v52  ;;  %v1900_v24 = vcombine.low %v11062_v13, %v13649_v14  ;;  %10006 = vmatprep.mubr.msk.f32.mxu1 %vm11125_vm0, %v16575_v48  ;;  %v1307_v4 = vcombine.high %v1299_v46, %v1299_v46  ;;  %v16601_v43 = vcombine.low %v12999_v30, %v13002_v56  ;;  %v16603_v46 = vld [vmem:[#allocation43_spill] sm:$0xff] }
 0x120   : > { %v1901_v8 = vcombine.high %v11062_v13, %v13649_v14  ;;  %v1363_v29 = vcombine.high %v13361_v58, %v13361_v58  ;;  %v16602_v20 = vcombine.high %v13034_v41, %v13037_v37  ;;  %v16605_v7 = vpack.c.bf16 %v16603_v46, %v16604_v2 }
 0x121   : > { %5529 = vmatmul.mubr.f32.gmra.mrb[2].mxu0 %v16601_v43  ;;  %v1306_v56 = vrot.slane %v1292_v22, %v11210_v18  ;;  %v1370_v30 = vrot.slane %v13361_v58, %v11210_v18  ;;  %v1442_v40 = vrot.slane %v11064_v12, %v11210_v18  ;;  %v13680_v13 = vrot.slane %v1828_v9, %v11210_v18  ;;  %v13683_v43 = vld [vmem:[%s11199_s14 + $0xb1] sm:$0xff] }
 0x122   : > { %5533 = vmatprep.mubr.f32.mxu0 %v16602_v20  ;;  %10268 = vmatpush1.bf16.msra.mxu0 %v16605_v7  ;;  %v13686_v20 = vld [vmem:[%s11199_s14 + $0xb2] sm:$0xff]  ;;  %v3474_v22 = vcombine.low %v3466_v16, %v3473_v32  ;;  %v1377_v7 = vrot.slane %v1363_v29, %v11210_v18  ;;  %v16606_v9 = vcombine.low %v13034_v41, %v13037_v37  ;;  %v16608_v16 = vld [vmem:[#allocation48_spill] sm:$0xff] }
 0x123   : > { %10269 = vmatprep.subr.bf16.mxu0 %v16346_v52  ;;  %v1971_v46 = vcombine.low %v13683_v43, %v13686_v20  ;;  %10007 = vmatmul.mubr.f32.gmra.mrb[14].mxu1 %v3385_v25  ;;  %v1308_v58 = vcombine.high %v1306_v56, %v1306_v56  ;;  %v3547_v2 = vcombine.low %v1307_v4, %v1306_v56  ;;  %v16607_v32 = vld [vmem:[#allocation46_spill] sm:$0xff]  ;;  %v16610_v4 = vld [vmem:[#allocation49_spill] sm:$0xff]  ;;  %v16611_v56 = vld [vmem:[#allocation39_spill] sm:$0xff] }
 0x124   : > { %10009 = vmatprep.mubr.msk.f32.mxu1 %vm11125_vm0, %v16575_v48  ;;  %v1378_v60 = vcombine.high %v1370_v30, %v1370_v30  ;;  %v13697_v39 = vrot.slane %v1829_v27, %v11210_v18  ;;  %v1450_v55 = vcombine.high %v1442_v40, %v1442_v40  ;;  %v1435_v19 = vcombine.high %v11064_v12, %v11064_v12 }
 0x125   : > { %5534 = vmatmul.mubr.f32.gmra.mrb[4].mxu0 %v16606_v9  ;;  %v1513_v25 = vrot.slane %v11067_v57, %v11210_v18  ;;  %v16609_v61 = vcombine.high %v16607_v32, %v16608_v16  ;;  %v16612_v29 = vpack.c.bf16 %v16610_v4, %v16611_v56  ;;  %v3548_v10 = vcombine.low %v1308_v58, %v1370_v30 }
 0x126   : > { %v3555_v41 = vrot.slane %v3547_v2, %v11210_v18  ;;  %v3636_v37 = vcombine.low %v1378_v60, %v1377_v7  ;;  %v13710_v27 = vrot.slane %v1900_v24, %v11210_v18  ;;  %v13713_v12 = vrot.slane %v1901_v8, %v11210_v18  ;;  %v16616_v2 = vld [vmem:[#allocation55_spill] sm:$0xff] }
 0x127   : > { %5538 = vmatprep.mubr.f32.mxu0 %v16609_v61  ;;  %10271 = vmatpush1.bf16.msra.mxu0 %v16612_v29  ;;  %v3637_v9 = vcombine.low %v1442_v40, %v1450_v55  ;;  %v3562_v61 = vrot.slane %v3548_v10, %v11210_v18  ;;  %v1449_v58 = vrot.slane %v1435_v19, %v11210_v18  ;;  %v16615_v19 = vld [vmem:[#allocation45_spill] sm:$0xff]  ;;  %v13749_v29 = vld [vmem:[%s11199_s14 + $0xb9] sm:$0x3f] }
 0x128   : > { %10272 = vmatprep.subr.bf16.mxu0 %v16346_v52  ;;  %10010 = vmatmul.mubr.f32.gmra.mrb[16].mxu1 %v3474_v22  ;;  %v3644_v30 = vrot.slane %v3636_v37, %v11210_v18  ;;  %v1521_v60 = vcombine.high %v1513_v25, %v1513_v25  ;;  %v16613_v24 = vcombine.low %v16607_v32, %v16608_v16  ;;  %v16618_v32 = vld [vmem:[#allocation64_spill] sm:$0xff]  ;;  %v13752_v37 = vld [vmem:[%s11199_s14 + $0xba] sm:$0x3f] }
 0x129   : > { %10012 = vmatprep.mubr.msk.f32.mxu1 %vm11125_vm0, %v16575_v48  ;;  %v9680_v8 = vcombine.low %v13630_v36, %v13680_v13  ;;  %v1972_v55 = vcombine.high %v13683_v43, %v13686_v20  ;;  %v3651_v40 = vrot.slane %v3637_v9, %v11210_v18  ;;  %v1506_v10 = vcombine.high %v11067_v57, %v11067_v57  ;;  %v13739_v36 = vld [vmem:[%s16071_s1 + $0x3a0] sm:$0xff]  ;;  %v13744_v57 = vld [vmem:[%s16071_s1 + $0x3a8] sm:$0xff] }
 0x12a   : > { %5539 = vmatmul.mubr.f32.gmra.mrb[6].mxu0 %v16613_v24  ;;  %v16614_v22 = vcombine.high %v13082_v59, %v13085_v62  ;;  %v16617_v7 = vpack.c.bf16 %v16615_v19, %v16616_v2  ;;  %v1861_v16 = vcombine.high %v13680_v13, %v16618_v32  ;;  %v3563_v43 = vcombine.low %v3555_v41, %v3562_v61  ;;  %v16620_v2 = vld [vmem:[#allocation65_spill] sm:$0xff] }
 0x12b   : > { %v1451_v4 = vcombine.high %v1449_v58, %v1449_v58  ;;  %v1981_v56 = vrot.slane %v1971_v46, %v11210_v18  ;;  %v2043_v13 = vcombine.low %v13749_v29, %v13752_v37  ;;  %v3726_v9 = vcombine.low %v1513_v25, %v1521_v60 }
 0x12c   : > { %5543 = vmatprep.mubr.f32.mxu0 %v16614_v22  ;;  %10274 = vmatpush1.bf16.msra.mxu0 %v16617_v7  ;;  %v1520_v24 = vrot.slane %v1506_v10, %v11210_v18  ;;  %v3652_v22 = vcombine.low %v3644_v30, %v3651_v40  ;;  %v1578_v41 = vcombine.high %v13471_v26, %v13471_v26 }
 0x12d   : > { %10275 = vmatprep.subr.bf16.mxu0 %v16346_v52  ;;  %10013 = vmatmul.mubr.f32.gmra.mrb[18].mxu1 %v3563_v43  ;;  %v3725_v19 = vcombine.low %v1449_v58, %v1451_v4  ;;  %v1585_v61 = vrot.slane %v13471_v26, %v11210_v18  ;;  %v16619_v46 = vcombine.low %v13082_v59, %v13085_v62  ;;  %v16623_v43 = vld [vmem:[#allocation66_spill] sm:$0xff] }
 0x12e   : > { %v1863_v7 = vcombine.high %v13697_v39, %v16620_v2  ;;  %v10294_v25 = vpack.c.bf16 %v13744_v57, %v13739_v36  ;;  %10015 = vmatprep.mubr.msk.f32.mxu1 %vm11125_vm0, %v16575_v48  ;;  %v3740_v30 = vrot.slane %v3726_v9, %v11210_v18  ;;  %v16621_v58 = vcombine.high %v13217_v33, %v13224_v38  ;;  %v2644_v36 = vld [vmem:[%s16071_s1 + $0x3c8] sm:$0xff] }
 0x12f   : > { %5544 = vmatmul.mubr.f32.gmra.mrb[8].mxu0 %v16619_v46  ;;  %v16622_v26 = vpack.c.bf16 %v13181_v5, %v13176_v3  ;;  %v3733_v59 = vrot.slane %v3725_v19, %v11210_v18  ;;  %v1592_v62 = vrot.slane %v1578_v41, %v11210_v18  ;;  %v1593_v60 = vcombine.high %v1585_v61, %v1585_v61 }
 0x130   : > { %5548 = vmatprep.mubr.f32.mxu0 %v16621_v58  ;;  %v13781_v40 = vrot.slane %v9680_v8, %v11210_v18  ;;  %v9686_v10 = vcombine.low %v1861_v16, %v13697_v39  ;;  %v1933_v4 = vcombine.high %v13710_v27, %v16623_v43  ;;  %v3814_v9 = vcombine.low %v1520_v24, %v1585_v61  ;;  %v11070_v58 = vld [vmem:[%s11199_s14 + $0xa2] sm:$0xff] }
 0x131   : > { %10277 = vmatpush1.bf16.msra.mxu0 %v16622_v26  ;;  %v13787_v46 = vrot.slane %v1981_v56, %v11210_v18  ;;  %v1988_v3 = vrot.slane %v1972_v55, %v11210_v18  ;;  %10016 = vmatmul.mubr.f32.gmra.mrb[20].mxu1 %v3652_v22  ;;  %v3741_v5 = vcombine.low %v3733_v59, %v3740_v30 }
 0x132   : > { %10278 = vmatprep.subr.bf16.mxu0 %v16346_v52  ;;  %v3815_v19 = vcombine.low %v1593_v60, %v1592_v62  ;;  %v16624_v41 = vcombine.low %v13217_v33, %v13224_v38  ;;  %10018 = vmatprep.mubr.msk.f32.mxu1 %vm11125_vm0, %v16575_v48  ;;  %v3822_v8 = vrot.slane %v3814_v9, %v11210_v18 }
 0x133   : > { %v1594_v16 = vcombine.high %v1592_v62, %v1592_v62  ;;  %v1649_v56 = vcombine.high %v13529_v63, %v13529_v63  ;;  %v16625_v55 = vcombine.high %v13237_v49, %v13253_v34  ;;  %v16626_v24 = vpack.c.bf16 %v13263_v31, %v13258_v23 }
 0x134   : > { %5549 = vmatmul.mubr.f32.gmra.mrb[10].mxu0 %v16624_v41  ;;  %v9688_v33 = vcombine.low %v1863_v7, %v13710_v27  ;;  %v3829_v38 = vrot.slane %v3815_v19, %v11210_v18  ;;  %v1656_v22 = vrot.slane %v13529_v63, %v11210_v18  ;;  %v9692_v61 = vcombine.low %v1933_v4, %v13713_v12 }
 0x135   : > { %5553 = vmatprep.mubr.f32.mxu0 %v16625_v55  ;;  %10280 = vmatpush1.bf16.msra.mxu0 %v16626_v24  ;;  %v1663_v30 = vrot.slane %v1649_v56, %v11210_v18  ;;  %v1721_v26 = vcombine.high %v11070_v58, %v11070_v58  ;;  %v1728_v59 = vrot.slane %v11070_v58, %v11210_v18  ;;  %v16633_v58 = vld [vmem:[#allocation86_spill] sm:$0xff] }
 0x136   : > { %10281 = vmatprep.subr.bf16.mxu0 %v16346_v52  ;;  %v2053_v23 = vrot.slane %v2043_v13, %v11210_v18  ;;  %v2044_v31 = vcombine.high %v13749_v29, %v13752_v37  ;;  %10019 = vmatmul.mubr.f32.gmra.mrb[22].mxu1 %v3741_v5  ;;  %v3830_v7 = vcombine.low %v3822_v8, %v3829_v38  ;;  %v13850_v38 = vld [vmem:[%s16071_s1 + $0x3b0] sm:$0xff] }
 0x137   : > { %v1664_v62 = vcombine.high %v1656_v22, %v1656_v22  ;;  %v16627_v63 = vcombine.low %v13237_v49, %v13253_v34  ;;  %v4078_v60 = vcombine.high %v13642_v54, %v13781_v40  ;;  %10021 = vmatprep.mubr.msk.f32.mxu1 %vm11125_vm0, %v16575_v48  ;;  %v3903_v4 = vcombine.low %v1594_v16, %v1656_v22 }
 0x138   : > { %v1735_v9 = vrot.slane %v1721_v26, %v11210_v18  ;;  %v16628_v13 = vcombine.high %v13184_v42, %v13192_v0  ;;  %v16629_v29 = vpack.c.bf16 %v13311_v15, %v13306_v28  ;;  %v4077_v49 = vcombine.low %v13642_v54, %v13781_v40  ;;  %v295_v40 = vld [vmem:[%s11199_s14 + $0xf0] sm:$0xff] }
 0x139   : > { %5554 = vmatmul.mubr.f32.gmra.mrb[12].mxu0 %v16627_v63  ;;  %v3904_v34 = vcombine.low %v1664_v62, %v1663_v30  ;;  %v1736_v5 = vcombine.high %v1728_v59, %v1728_v59  ;;  %v3911_v19 = vrot.slane %v3903_v4, %v11210_v18  ;;  %v1792_v8 = vcombine.high %v13649_v14, %v13649_v14  ;;  %v16632_v30 = vld [vmem:[#allocation83_spill] sm:$0xff] }
 0x13a   : > { %5558 = vmatprep.mubr.f32.mxu0 %v16628_v13  ;;  %10283 = vmatpush1.bf16.msra.mxu0 %v16629_v29  ;;  %v1737_v41 = vcombine.high %v1735_v9, %v1735_v9  ;;  %v1799_v16 = vrot.slane %v13649_v14, %v11210_v18  ;;  %v13839_v56 = vrot.slane %v9686_v10, %v11210_v18  ;;  %v13855_v14 = vld [vmem:[%s16071_s1 + $0x3b8] sm:$0xff] }
 0x13b   : > { %10284 = vmatprep.subr.bf16.mxu0 %v16346_v52  ;;  %10022 = vmatmul.mubr.f32.gmra.mrb[24].mxu1 %v3830_v7  ;;  %v3918_v28 = vrot.slane %v3904_v34, %v11210_v18  ;;  %v3992_v15 = vcombine.low %v1728_v59, %v1736_v5  ;;  %v1871_v55 = vrot.slane %v13686_v20, %v11210_v18 }
 0x13c   : > { %v16630_v24 = vcombine.low %v13184_v42, %v13192_v0  ;;  %v13858_v10 = vrot.slane %v1988_v3, %v11210_v18  ;;  %10024 = vmatprep.mubr.msk.f32.mxu1 %vm11125_vm0, %v16575_v48  ;;  %v3993_v22 = vcombine.low %v1735_v9, %v1737_v41  ;;  %v1806_v42 = vrot.slane %v1792_v8, %v11210_v18 }
 0x13d   : > { %v16631_v0 = vcombine.high %v13280_v44, %v13283_v47  ;;  %v16634_v26 = vpack.c.bf16 %v16632_v30, %v16633_v58  ;;  %v13870_v59 = vrot.slane %v9688_v33, %v11210_v18  ;;  %v3919_v7 = vcombine.low %v3911_v19, %v3918_v28  ;;  %v16638_v28 = vld [vmem:[#allocation79_spill] sm:$0xff] }
 0x13e   : > { %5559 = vmatmul.mubr.f32.gmra.mrb[14].mxu0 %v16630_v24  ;;  %v4000_v3 = vrot.slane %v3992_v15, %v11210_v18  ;;  %v13875_v62 = vrot.slane %v9692_v61, %v11210_v18  ;;  %v4007_v63 = vrot.slane %v3993_v22, %v11210_v18  ;;  %v1807_v4 = vcombine.high %v1799_v16, %v1799_v16  ;;  %v11072_v24 = vld [vmem:[%s11199_s14 + $0xc2] sm:$0xff] }
 0x13f   : > { %5563 = vmatprep.mubr.f32.mxu0 %v16631_v0  ;;  %10286 = vmatpush1.bf16.msra.mxu0 %v16634_v26  ;;  %v4082_v9 = vcombine.low %v1806_v42, %v1871_v55  ;;  %v10297_v13 = vpack.c.bf16 %v13855_v14, %v13850_v38  ;;  %v1864_v33 = vcombine.high %v13686_v20, %v13686_v20  ;;  %v16637_v20 = vld [vmem:[#allocation80_spill] sm:$0xff] }
 0x140   : > { %10287 = vmatprep.subr.bf16.mxu0 %v16346_v52  ;;  %10025 = vmatmul.mubr.f32.gmra.mrb[26].mxu1 %v3919_v7  ;;  %v1879_v29 = vcombine.high %v1871_v55, %v1871_v55  ;;  %v1942_v34 = vrot.slane %v13752_v37, %v11210_v18  ;;  %v16635_v61 = vcombine.low %v13280_v44, %v13283_v47 }
 0x141   : > { %10027 = vmatprep.mubr.msk.f32.mxu1 %vm11125_vm0, %v16575_v48  ;;  %v4008_v5 = vcombine.low %v4000_v3, %v4007_v63  ;;  %v4081_v19 = vcombine.low %v1799_v16, %v1807_v4  ;;  %v4096_v41 = vrot.slane %v4082_v9, %v11210_v18  ;;  %v16636_v8 = vcombine.high %v13340_v51, %v13357_v50  ;;  %v11071_v16 = vld [vmem:[%s11199_s14 + $0xc1] sm:$0xff]  ;;  %v16642_v9 = vld [vmem:[#allocation6_spill] sm:$0xff] }
 0x142   : > { %5564 = vmatmul.mubr.f32.gmra.mrb[16].mxu0 %v16635_v61  ;;  %v16639_v15 = vpack.c.bf16 %v16637_v20, %v16638_v28  ;;  %v13897_v55 = vrot.slane %v2053_v23, %v11210_v18  ;;  %v13900_v47 = vrot.slane %v2044_v31, %v11210_v18  ;;  %v1878_v44 = vrot.slane %v1864_v33, %v11210_v18  ;;  %v16641_v4 = vld [vmem:[#allocation15_spill] sm:$0xff]  ;;  %v13937_v28 = vld [vmem:[%s11199_s14 + $0xca] sm:$0x3f] }
 0x143   : > { %5568 = vmatprep.mubr.f32.mxu0 %v16636_v8  ;;  %v2114_v22 = vcombine.low %v11071_v16, %v11072_v24  ;;  %v4089_v42 = vrot.slane %v4081_v19, %v11210_v18  ;;  %v1935_v0 = vcombine.high %v13752_v37, %v13752_v37  ;;  %v1950_v30 = vcombine.high %v1942_v34, %v1942_v34 }
 0x144   : > { %10289 = vmatpush1.bf16.msra.mxu0 %v16639_v15  ;;  %v4167_v23 = vcombine.high %v13839_v56, %v13870_v59  ;;  %10028 = vmatmul.mubr.f32.gmra.mrb[28].mxu1 %v4008_v5  ;;  %v1880_v58 = vcombine.high %v1878_v44, %v1878_v44  ;;  %v4170_v31 = vcombine.low %v1879_v29, %v1878_v44 }
 0x145   : > { %10290 = vmatprep.subr.bf16.mxu0 %v16346_v52  ;;  %v2014_v26 = vrot.slane %v11072_v24, %v11210_v18  ;;  %v16640_v7 = vcombine.low %v13340_v51, %v13357_v50  ;;  %v4166_v3 = vcombine.low %v13839_v56, %v13870_v59  ;;  %10030 = vmatprep.mubr.msk.f32.mxu1 %vm11125_vm0, %v16575_v48 }
 0x146   : > { %v4097_v37 = vcombine.low %v4089_v42, %v4096_v41  ;;  %v1949_v63 = vrot.slane %v1935_v0, %v11210_v18  ;;  %v16643_v33 = vcombine.high %v16641_v4, %v16642_v9  ;;  %v16644_v29 = vpack.c.bf16 %v13569_v17, %v13564_v45  ;;  %v16647_v42 = vld [vmem:[#allocation16_spill] sm:$0xff] }
 0x147   : > { %5569 = vmatmul.mubr.f32.gmra.mrb[18].mxu0 %v16640_v7  ;;  %v4256_v51 = vcombine.high %v13875_v62, %v13787_v46  ;;  %v4255_v50 = vcombine.low %v13875_v62, %v13787_v46  ;;  %v4171_v61 = vcombine.low %v1880_v58, %v1942_v34  ;;  %v2115_v5 = vcombine.high %v11071_v16, %v11072_v24 }
 0x148   : > { %5573 = vmatprep.mubr.f32.mxu0 %v16643_v33  ;;  %10292 = vmatpush1.bf16.msra.mxu0 %v16644_v29  ;;  %v4178_v19 = vrot.slane %v4170_v31, %v11210_v18  ;;  %v2022_v41 = vcombine.high %v2014_v26, %v2014_v26  ;;  %v4259_v8 = vcombine.low %v1950_v30, %v1949_v63  ;;  %v11074_v30 = vld [vmem:[%s11199_s14 + $0xc9] sm:$0x3f]  ;;  %v13976_v29 = vld [vmem:[%s11199_s14 + $0xd2] sm:$0xff] }
 0x149   : > { %10293 = vmatprep.subr.bf16.mxu0 %v16346_v52  ;;  %v13933_v20 = vrot.slane %v2114_v22, %v11210_v18  ;;  %10031 = vmatmul.mubr.f32.gmra.mrb[30].mxu1 %v4097_v37  ;;  %v4185_v45 = vrot.slane %v4171_v61, %v11210_v18  ;;  %v2007_v17 = vcombine.high %v11072_v24, %v11072_v24  ;;  %v16646_v24 = vld [vmem:[#allocation89_spill] sm:$0xff] }
 0x14a   : > { %v2085_v34 = vrot.slane %v13937_v28, %v11210_v18  ;;  %v16645_v15 = vcombine.low %v16641_v4, %v16642_v9  ;;  %v4345_v44 = vcombine.high %v13858_v10, %v13897_v55  ;;  %v4344_v16 = vcombine.low %v13858_v10, %v13897_v55  ;;  %10033 = vmatprep.mubr.msk.f32.mxu1 %vm11125_vm0, %v16575_v48  ;;  %v16649_v4 = vld [vmem:[#allocation71_spill] sm:$0xff]  ;;  %v7312_v55 = vld [vmem:[%s16073_s3 + $0x28] sm:$0xff] }
 0x14b   : > { %v4260_v22 = vcombine.low %v2014_v26, %v2022_v41  ;;  %v16648_v0 = vcombine.high %v16646_v24, %v16647_v42  ;;  %v2186_v58 = vcombine.low %v11074_v30, %v13937_v28  ;;  %v4186_v31 = vcombine.low %v4178_v19, %v4185_v45  ;;  %v2643_v26 = vld [vmem:[%s16071_s1 + $0x3c0] sm:$0xff] }
 0x14c   : > { %5574 = vmatmul.mubr.f32.gmra.mrb[20].mxu0 %v16645_v15  ;;  %v4267_v7 = vrot.slane %v4259_v8, %v11210_v18  ;;  %v13961_v37 = vrot.slane %v2115_v5, %v11210_v18  ;;  %v2093_v63 = vcombine.high %v2085_v34, %v2085_v34  ;;  %v2147_v9 = vcombine.high %v13933_v20, %v16649_v4  ;;  %v7311_v10 = vld [vmem:[%s16073_s3 + $0x20] sm:$0xff] }
 0x14d   : > { %5578 = vmatprep.mubr.f32.mxu0 %v16648_v0  ;;  %10295 = vmatpush1.bf16.msra.mxu0 %v10294_v25  ;;  %v4274_v57 = vrot.slane %v4260_v22, %v11210_v18  ;;  %v2021_v25 = vrot.slane %v2007_v17, %v11210_v18  ;;  %v2078_v33 = vcombine.high %v13937_v28, %v13937_v28  ;;  %v2646_v0 = vld [vmem:[%s16071_s1 + $0x3d8] sm:$0xff] }
 0x14e   : > { %10296 = vmatprep.subr.bf16.mxu0 %v16346_v52  ;;  %10034 = vmatmul.mubr.f32.gmra.mrb[32].mxu1 %v4186_v31  ;;  %v2150_v61 = vcombine.high %v13976_v29, %v13976_v29  ;;  %v2157_v5 = vrot.slane %v13976_v29, %v11210_v18  ;;  %v16650_v19 = vcombine.low %v16646_v24, %v16647_v42 }
 0x14f   : > { %10036 = vmatprep.mubr.msk.f32.mxu1 %vm11125_vm0, %v16575_v48  ;;  %v4275_v41 = vcombine.low %v4267_v7, %v4274_v57  ;;  %v2023_v8 = vcombine.high %v2021_v25, %v2021_v25  ;;  %v4349_v45 = vcombine.low %v2085_v34, %v2093_v63  ;;  %v16651_v17 = vcombine.high %v13546_v11, %v13553_v6  ;;  %v2645_v34 = vld [vmem:[%s16071_s1 + $0x3d0] sm:$0xff] }
 0x150   : > { %5579 = vmatmul.mubr.f32.gmra.mrb[22].mxu0 %v16650_v19  ;;  %v10300_v15 = vpack.c.bf16 %v2644_v36, %v2643_v26  ;;  %v2092_v22 = vrot.slane %v2078_v33, %v11210_v18  ;;  %v2164_v24 = vrot.slane %v2150_v61, %v11210_v18  ;;  %v2187_v42 = vcombine.high %v11074_v30, %v13937_v28  ;;  %v14010_v26 = vld [vmem:[%s11199_s14 + $0xd1] sm:$0xff]  ;;  %v2647_v33 = vld [vmem:[%s16071_s1 + $0x3e0] sm:$0xff]  ;;  %v2648_v61 = vld [vmem:[%s16071_s1 + $0x3e8] sm:$0xff] }
 0x151   : > { %5583 = vmatprep.mubr.f32.mxu0 %v16651_v17  ;;  %10298 = vmatpush1.bf16.msra.mxu0 %v10297_v13  ;;  %v4348_v31 = vcombine.low %v2021_v25, %v2023_v8  ;;  %v4363_v38 = vrot.slane %v4349_v45, %v11210_v18  ;;  %v2165_v14 = vcombine.high %v2157_v5, %v2157_v5  ;;  %v16653_v57 = vld [vmem:[#allocation69_spill] sm:$0xff]  ;;  %v14036_v8 = vld [vmem:[%s11199_s14 + $0xda] sm:$0x3f] }
 0x152   : > { %10299 = vmatprep.subr.bf16.mxu0 %v16346_v52  ;;  %v9698_v13 = vcombine.low %v13900_v47, %v13933_v20  ;;  %v14007_v7 = vrot.slane %v2186_v58, %v11210_v18  ;;  %v2257_v28 = vcombine.low %v14010_v26, %v13976_v29  ;;  %10037 = vmatmul.mubr.f32.gmra.mrb[34].mxu1 %v4275_v41 }
 0x153   : > { %v4437_v30 = vcombine.low %v2092_v22, %v2157_v5  ;;  %v16652_v36 = vcombine.low %v13546_v11, %v13553_v6  ;;  %v2149_v25 = vcombine.high %v13961_v37, %v16653_v57  ;;  %10039 = vmatprep.mubr.msk.f32.mxu1 %vm11125_vm0, %v16575_v48  ;;  %v4356_v47 = vrot.slane %v4348_v31, %v11210_v18 }
 0x154   : > { %v4438_v20 = vcombine.low %v2165_v14, %v2164_v24  ;;  %v16654_v58 = vcombine.high %v13592_v1, %v13621_v21  ;;  %v9700_v63 = vcombine.low %v2147_v9, %v13961_v37  ;;  %v10303_v11 = vpack.c.bf16 %v2646_v0, %v2645_v34  ;;  %v14049_v34 = vld [vmem:[%s11199_s14 + $0xe2] sm:$0xff] }
 0x155   : > { %5584 = vmatmul.mubr.f32.gmra.mrb[24].mxu0 %v16652_v36  ;;  %v4445_v6 = vrot.slane %v4437_v30, %v11210_v18  ;;  %v4364_v5 = vcombine.low %v4356_v47, %v4363_v38  ;;  %v2166_v41 = vcombine.high %v2164_v24, %v2164_v24  ;;  %v2221_v9 = vcombine.high %v14036_v8, %v14036_v8 }
 0x156   : > { %5588 = vmatprep.mubr.f32.mxu0 %v16654_v58  ;;  %10301 = vmatpush1.bf16.msra.mxu0 %v10300_v15  ;;  %v4452_v19 = vrot.slane %v4438_v20, %v11210_v18  ;;  %v14041_v45 = vrot.slane %v9698_v13, %v11210_v18  ;;  %v14044_v17 = vrot.slane %v2187_v42, %v11210_v18  ;;  %v16655_v15 = vld [vmem:[#allocation72_spill] sm:$0xff] }
 0x157   : > { %10302 = vmatprep.subr.bf16.mxu0 %v16346_v52  ;;  %v2219_v22 = vcombine.high %v14007_v7, %v16655_v15  ;;  %v2228_v0 = vrot.slane %v14036_v8, %v11210_v18  ;;  %v16656_v24 = vcombine.low %v13592_v1, %v13621_v21  ;;  %10040 = vmatmul.mubr.f32.gmra.mrb[36].mxu1 %v4364_v5  ;;  %v2649_v1 = vld [vmem:[%s16071_s1 + $0x3f0] sm:$0xff]  ;;  %v2650_v21 = vld [vmem:[%s16071_s1 + $0x3f8] sm:$0xff] }
 0x158   : > { %v4453_v31 = vcombine.low %v4445_v6, %v4452_v19  ;;  %v2235_v38 = vrot.slane %v2221_v9, %v11210_v18  ;;  %v2293_v42 = vcombine.high %v14049_v34, %v14049_v34  ;;  %v16657_v14 = vcombine.high %v13559_v53, %v13575_v35  ;;  %10042 = vmatprep.mubr.msk.f32.mxu1 %vm11125_vm0, %v16575_v48  ;;  %v359_v19 = vld [vmem:[%s11199_s14 + $0xf2] sm:$0xff] }
 0x159   : > { %5589 = vmatmul.mubr.f32.gmra.mrb[26].mxu0 %v16656_v24  ;;  %v9706_v13 = vcombine.low %v2149_v25, %v14007_v7  ;;  %v10306_v30 = vpack.c.bf16 %v2648_v61, %v2647_v33  ;;  %v2236_v36 = vcombine.high %v2228_v0, %v2228_v0  ;;  %v14070_v47 = vrot.slane %v9700_v63, %v11210_v18  ;;  %v14106_v24 = vld [vmem:[%s11199_s14 + $0xe1] sm:$0xff] }
 0x15a   : > { %5593 = vmatprep.mubr.f32.mxu0 %v16657_v14  ;;  %10304 = vmatpush1.bf16.msra.mxu0 %v10303_v11  ;;  %v2258_v20 = vcombine.high %v14010_v26, %v13976_v29  ;;  %v4526_v25 = vcombine.low %v2166_v41, %v2228_v0  ;;  %v2267_v58 = vrot.slane %v2257_v28, %v11210_v18  ;;  %v14085_v29 = vld [vmem:[%s11199_s14 + $0xd9] sm:$0x3f] }
 0x15b   : > { %10305 = vmatprep.subr.bf16.mxu0 %v16346_v52  ;;  %v4527_v11 = vcombine.low %v2236_v36, %v2235_v38  ;;  %v2300_v6 = vrot.slane %v14049_v34, %v11210_v18  ;;  %v2307_v33 = vrot.slane %v2293_v42, %v11210_v18  ;;  %v16658_v63 = vcombine.low %v13559_v53, %v13575_v35 }
 0x15c   : > { %v2329_v26 = vcombine.low %v14085_v29, %v14036_v8  ;;  %v10309_v61 = vpack.c.bf16 %v2650_v21, %v2649_v1  ;;  %10043 = vmatmul.mubr.f32.gmra.mrb[38].mxu1 %v4453_v31  ;;  %v4534_v28 = vrot.slane %v4526_v25, %v11210_v18  ;;  %v9708_v41 = vcombine.low %v2219_v22, %v14044_v17  ;;  %v14109_v31 = vld [vmem:[%s11199_s14 + $0xea] sm:$0x3f] }
 0x15d   : > { %5594 = vmatmul.mubr.f32.gmra.mrb[28].mxu0 %v16658_v63  ;;  %v4541_v5 = vrot.slane %v4527_v11, %v11210_v18  ;;  %v2308_v53 = vcombine.high %v2300_v6, %v2300_v6  ;;  %v2309_v35 = vcombine.high %v2307_v33, %v2307_v33  ;;  %v14097_v9 = vrot.slane %v9706_v13, %v11210_v18 }
 0x15e   : > { %5598 = vmatprep.mubr.f32.mxu0 %v4078_v60  ;;  %10307 = vmatpush1.bf16.msra.mxu0 %v10306_v30  ;;  %v2330_v0 = vcombine.high %v14085_v29, %v14036_v8  ;;  %v2274_v60 = vrot.slane %v2258_v20, %v11210_v18  ;;  %v4434_v14 = vcombine.high %v14041_v45, %v14070_v47 }
 0x15f   : > { %10308 = vmatprep.subr.bf16.mxu0 %v16346_v52  ;;  %10045 = vmatprep.mubr.msk.f32.mxu1 %vm11125_vm0, %v16575_v48  ;;  %v4542_v22 = vcombine.low %v4534_v28, %v4541_v5  ;;  %v4615_v38 = vcombine.low %v2300_v6, %v2308_v53  ;;  %v4616_v42 = vcombine.low %v2307_v33, %v2309_v35  ;;  %v360_v6 = vld [vmem:[%s11199_s14 + $0xfa] sm:$0x3f]  ;;  %v14149_v5 = vld [vmem:[%s11199_s14 + $0xe9] sm:$0x3f] }
 0x160   : > { %v2364_v13 = vcombine.high %v14109_v31, %v14109_v31  ;;  %v2371_v30 = vrot.slane %v14109_v31, %v11210_v18  ;;  %v2443_v1 = vrot.slane %v359_v19, %v11210_v18  ;;  %v4433_v54 = vcombine.low %v14041_v45, %v14070_v47  ;;  %v14152_v35 = vld [vmem:[%s11199_s14 + $0xf8] sm:$0x3f]  ;;  %v7313_v45 = vld [vmem:[%s16073_s3 + $0x30] sm:$0xff] }
 0x161   : > { %5599 = vmatmul.mubr.f32.gmra.mrb[30].mxu0 %v4077_v49  ;;  %v327_v49 = vld [vmem:[%s11199_s14 + $0xf1] sm:$0xff]  ;;  %v4623_v21 = vrot.slane %v4615_v38, %v11210_v18  ;;  %v4630_v36 = vrot.slane %v4616_v42, %v11210_v18  ;;  %v14131_v20 = vrot.slane %v2267_v58, %v11210_v18  ;;  %v2400_v25 = vcombine.low %v14106_v24, %v14049_v34 }
 0x162   : > { %5603 = vmatprep.mubr.f32.mxu0 %v4167_v23  ;;  %10310 = vmatpush1.bf16.msra.mxu0 %v10309_v61  ;;  %v2378_v23 = vrot.slane %v2364_v13, %v11210_v18  ;;  %v2379_v11 = vcombine.high %v2371_v30, %v2371_v30  ;;  %v14138_v33 = vrot.slane %v9708_v41, %v11210_v18  ;;  %v14155_v41 = vld [vmem:[%s11199_s14 + $0xf9] sm:$0x3f] }
 0x163   : > { %10046 = vmatmul.mubr.f32.gmra.mrb[40].mxu1 %v4542_v22  ;;  %v4631_v63 = vcombine.low %v4623_v21, %v4630_v36  ;;  %v2436_v61 = vcombine.high %v359_v19, %v359_v19  ;;  %v2451_v28 = vcombine.high %v2443_v1, %v2443_v1  ;;  %v14146_v58 = vrot.slane %v2274_v60, %v11210_v18  ;;  %v7314_v47 = vld [vmem:[%s16073_s3 + $0x38] sm:$0xff] }
 0x164   : > { %10048 = vmatprep.mubr.msk.f32.mxu1 %vm11125_vm0, %v16575_v48  ;;  %v2402_v53 = vcombine.low %v295_v40, %v327_v49  ;;  %v4704_v22 = vcombine.low %v2371_v30, %v2379_v11  ;;  %v4705_v38 = vcombine.low %v2378_v23, %v2443_v1  ;;  %v2401_v56 = vcombine.high %v14106_v24, %v14049_v34  ;;  %v7308_v23 = vld [vmem:[%s16073_s3 + $0x8] sm:$0xff] }
 0x165   : > { %5604 = vmatmul.mubr.f32.gmra.mrb[32].mxu0 %v4166_v3  ;;  %v2403_v59 = vcombine.high %v295_v40, %v327_v49  ;;  %v2450_v3 = vrot.slane %v2436_v61, %v11210_v18  ;;  %v2514_v19 = vrot.slane %v360_v6, %v11210_v18  ;;  %v2346_v60 = vrot.slane %v2330_v0, %v11210_v18 }
 0x166   : > { %5608 = vmatprep.mubr.f32.mxu0 %v4256_v51  ;;  %v2410_v42 = vrot.slane %v2400_v25, %v11210_v18  ;;  %v4712_v13 = vrot.slane %v4704_v22, %v11210_v18  ;;  %v4719_v30 = vrot.slane %v4705_v38, %v11210_v18  ;;  %v2472_v51 = vcombine.low %v14149_v5, %v14109_v31  ;;  %v7307_v25 = vld [vmem:[%s16073_s3] sm:$0xff] }
 0x167   : > { %10049 = vmatmul.mubr.f32.gmra.mrb[42].mxu1 %v4631_v63  ;;  %v2474_v34 = vcombine.low %v14152_v35, %v14155_v41  ;;  %v2452_v1 = vcombine.high %v2450_v3, %v2450_v3  ;;  %v4793_v40 = vcombine.low %v2451_v28, %v2450_v3  ;;  %v14178_v0 = vrot.slane %v2402_v53, %v11210_v18  ;;  %v7309_v28 = vld [vmem:[%s16073_s3 + $0x10] sm:$0xff]  ;;  %v7310_v53 = vld [vmem:[%s16073_s3 + $0x18] sm:$0xff] }
 0x168   : > { %10051 = vmatprep.mubr.msk.f32.mxu1 %vm11125_vm0, %v16575_v48  ;;  %v4720_v49 = vcombine.low %v4712_v13, %v4719_v30  ;;  %v2507_v21 = vcombine.high %v360_v6, %v360_v6  ;;  %v2522_v36 = vcombine.high %v2514_v19, %v2514_v19  ;;  %v14190_v46 = vrot.slane %v2401_v56, %v11210_v18 }
 0x169   : > { %5609 = vmatmul.mubr.f32.gmra.mrb[34].mxu0 %v4255_v50  ;;  %v14193_v62 = vrot.slane %v2403_v59, %v11210_v18  ;;  %v4794_v50 = vcombine.low %v2452_v1, %v2514_v19  ;;  %v4801_v11 = vrot.slane %v4793_v40, %v11210_v18  ;;  %v4523_v6 = vcombine.high %v14097_v9, %v14138_v33 }
 0x16a   : > { %5613 = vmatprep.mubr.f32.mxu0 %v4345_v44  ;;  %v2339_v63 = vrot.slane %v2329_v26, %v11210_v18  ;;  %v2521_v44 = vrot.slane %v2507_v21, %v11210_v18  ;;  %v10336_v61 = vpack.c.bf16 %v7308_v23, %v7307_v25  ;;  %v9712_v22 = vcombine.low %v2346_v60, %v2410_v42 }
 0x16b   : > { %10052 = vmatmul.mubr.f32.gmra.mrb[44].mxu1 %v4720_v49  ;;  %v14210_v38 = vrot.slane %v2472_v51, %v11210_v18  ;;  %v2473_v8 = vcombine.high %v14149_v5, %v14109_v31  ;;  %v4808_v29 = vrot.slane %v4794_v50, %v11210_v18  ;;  %v2433_v26 = vcombine.high %v2410_v42, %v14178_v0 }
 0x16c   : > { %10054 = vmatprep.mubr.msk.f32.mxu1 %vm11125_vm0, %v16575_v48  ;;  %v14222_v56 = vrot.slane %v2474_v34, %v11210_v18  ;;  %v4846_v59 = vcombine.low %v2522_v36, %v2521_v44  ;;  %10337 = vmatpush1.bf16.msra.mxu1 %v10336_v61  ;;  %v2435_v31 = vcombine.high %v14190_v46, %v14193_v62  ;;  %v7315_v36 = vld [vmem:[%s16073_s3 + $0x40] sm:$0xff]  ;;  %v16659_v61 = vld [vmem:[#allocation8_spill] sm:$0xff] }
 0x16d   : > { %5614 = vmatmul.mubr.f32.gmra.mrb[36].mxu0 %v4344_v16  ;;  %v4809_v3 = vcombine.low %v4801_v11, %v4808_v29  ;;  %10338 = vmatprep.subr.bf16.mxu1 %v16346_v52  ;;  %v10339_v19 = vpack.c.bf16 %v7310_v53, %v7309_v28  ;;  %v4522_v16 = vcombine.low %v14097_v9, %v14138_v33  ;;  %v7317_v11 = vld [vmem:[%s16073_s3 + $0x50] sm:$0xff]  ;;  %v16660_v28 = vld [vmem:[#allocation27_spill] sm:$0xff] }
 0x16e   : > { %5618 = vmatprep.mubr.f32.mxu0 %v4434_v14  ;;  %v4612_v14 = vcombine.high %v14131_v20, %v14146_v58  ;;  %v4678_v60 = vrot.slane %v2339_v63, %v11210_v18  ;;  %v4853_v42 = vrot.slane %v4846_v59, %v11210_v18  ;;  %v4692_v13 = vrot.slane %v9712_v22, %v11210_v18  ;;  %v16661_v22 = vld [vmem:[#allocation9_spill] sm:$0xff]  ;;  %v7319_v59 = vld [vmem:[%s16073_s3 + $0x60] sm:$0xff] }
 0x16f   : > { %10055 = vmatmul.mubr.f32.gmra.mrb[46].mxu1 %v4809_v3  ;;  %v14247_v30 = vrot.slane %v2473_v8, %v11210_v18  ;;  %v2505_v9 = vcombine.high %v14210_v38, %v14222_v56  ;;  %v9718_v33 = vcombine.low %v2433_v26, %v14190_v46  ;;  %v9720_v51 = vcombine.low %v2435_v31, %v14210_v38  ;;  %v16662_v8 = vld [vmem:[#allocation31_spill] sm:$0xff]  ;;  %v7320_v31 = vld [vmem:[%s16073_s3 + $0x68] sm:$0xff]  ;;  %v16663_v3 = vld [vmem:[#allocation10_spill] sm:$0xff] }
 0x170   : > { %10057 = vmatprep.mubr.msk.f32.mxu1 %vm11125_vm0, %v16575_v48  ;;  %10340 = vmatpush1.bf16.msra.mxu1 %v10339_v19  ;;  %v10342_v34 = vpack.c.bf16 %v7312_v55, %v7311_v10  ;;  %v4611_v48 = vcombine.low %v14131_v20, %v14146_v58  ;;  %v10345_v21 = vpack.c.bf16 %v7314_v47, %v7313_v45  ;;  %v7316_v20 = vld [vmem:[%s16073_s3 + $0x48] sm:$0xff]  ;;  %v16664_v19 = vld [vmem:[#allocation7_spill] sm:$0xff]  ;;  %v16668_v45 = vld [vmem:[#allocation14_spill] sm:$0xff] }
 0x171   : > { %5619 = vmatmul.mubr.f32.gmra.mrb[38].mxu0 %v4433_v54  ;;  %10341 = vmatprep.subr.bf16.mxu1 %v16346_v52  ;;  %v4701_v54 = vcombine.high %v4678_v60, %v4692_v13  ;;  %v9724_v1 = vcombine.low %v2505_v9, %v14247_v30  ;;  %v4767_v40 = vrot.slane %v9718_v33, %v11210_v18  ;;  %v16665_v55 = vld [vmem:[#allocation12_spill] sm:$0xff]  ;;  %v7321_v33 = vld [vmem:[%s16073_s3 + $0x70] sm:$0xff]  ;;  %v16669_v47 = vld [vmem:[#allocation11_spill] sm:$0xff] }
 0x172   : > { %5623 = vmatprep.mubr.f32.mxu0 %v4523_v6  ;;  %v4781_v49 = vrot.slane %v9720_v51, %v11210_v18  ;;  %v4700_v58 = vcombine.low %v4678_v60, %v4692_v13  ;;  %v10348_v50 = vpack.c.bf16 %v7316_v20, %v7315_v36  ;;  %v7318_v6 = vld [vmem:[%s16073_s3 + $0x58] sm:$0xff]  ;;  %v702_v53 = vcombine.low %v16660_v28, %v16659_v61  ;;  %v16667_v60 = vld [vmem:[#allocation5_spill] sm:$0xff]  ;;  %v7324_v36 = vld [vmem:[%s16073_s3 + $0x88] sm:$0xff] }
 0x173   : > { %10058 = vmatmul.mubr.f32.gmra.mrb[48].mxu1 %v4853_v42  ;;  %v4836_v25 = vrot.slane %v9724_v1, %v11210_v18  ;;  %v788_v29 = vcombine.low %v16662_v8, %v16661_v22  ;;  %v10351_v26 = vpack.c.bf16 %v7318_v6, %v7317_v11  ;;  %v2745_v10 = vcombine.high %v16664_v19, %v16663_v3  ;;  %v7322_v51 = vld [vmem:[%s16073_s3 + $0x78] sm:$0xff]  ;;  %v16673_v28 = vld [vmem:[#allocation21_spill] sm:$0xff]  ;;  %v16675_v8 = vld [vmem:[#allocation67_spill] sm:$0xff] }
 0x174   : > { %10343 = vmatpush1.bf16.msra.mxu1 %v10342_v34  ;;  %v4790_v23 = vcombine.high %v4767_v40, %v4781_v49  ;;  %v4789_v63 = vcombine.low %v4767_v40, %v4781_v49  ;;  %v9623_v42 = vcombine.high %v16667_v60, %v702_v53  ;;  %v10354_v9 = vpack.c.bf16 %v7320_v31, %v7319_v59  ;;  %v16677_v59 = vld [vmem:[#allocation68_spill] sm:$0xff] }
 0x175   : > { %5624 = vmatmul.mubr.f32.gmra.mrb[40].mxu0 %v4522_v16  ;;  %10344 = vmatprep.subr.bf16.mxu1 %v16346_v52  ;;  %v4844_v44 = vcombine.high %v4836_v25, %v4836_v25  ;;  %v16666_v16 = vld [vmem:[#allocation42_spill] sm:$0xff]  ;;  %v9625_v13 = vcombine.high %v16659_v61, %v788_v29  ;;  %v2744_v34 = vcombine.low %v16664_v19, %v16663_v3 }
 0x176   : > { %5628 = vmatprep.mubr.f32.mxu0 %v4612_v14  ;;  %v790_v14 = vcombine.low %v16666_v16, %v16665_v55  ;;  %v2905_v1 = vrot.slane %v9623_v42, %v11210_v18  ;;  %v10357_v49 = vpack.c.bf16 %v7322_v51, %v7321_v33  ;;  %v2833_v20 = vcombine.low %v16669_v47, %v16668_v45  ;;  %v16678_v19 = vld [vmem:[#allocation26_spill] sm:$0xff] }
 0x177   : > { %v2919_v40 = vrot.slane %v9625_v13, %v11210_v18  ;;  %v16680_v13 = vld [vmem:[#allocation30_spill] sm:$0xff] }
 0x178   : > { %10346 = vmatpush1.bf16.msra.mxu1 %v10345_v21  ;;  %v7323_v21 = vld [vmem:[%s16073_s3 + $0x80] sm:$0xff] }
 0x179   : > { %5629 = vmatmul.mubr.f32.gmra.mrb[42].mxu0 %v4611_v48  ;;  %10347 = vmatprep.subr.bf16.mxu1 %v16346_v52  ;;  %v2834_v48 = vcombine.high %v16669_v47, %v16668_v45  ;;  %v10360_v6 = vpack.c.bf16 %v7324_v36, %v7323_v21  ;;  %v16681_v47 = vld [vmem:[#allocation38_spill] sm:$0xff]  ;;  %v16685_v36 = vld [vmem:[#allocation33_spill] sm:$0xff] }
 0x17a   : > { %5633 = vmatprep.mubr.f32.mxu0 %v4701_v54  ;;  %v9629_v54 = vcombine.high %v16661_v22, %v790_v14  ;;  %v16674_v22 = vld [vmem:[#allocation22_spill] sm:$0xff] }
 0x17b   : > { %v1074_v29 = vcombine.low %v16675_v8, %v16674_v22 }
 0x17c   : > { %10349 = vmatpush1.bf16.msra.mxu1 %v10348_v50  ;;  %v16671_v50 = vld [vmem:[#allocation59_spill] sm:$0xff] }
 0x17d   : > { %5634 = vmatmul.mubr.f32.gmra.mrb[44].mxu0 %v4700_v58  ;;  %10350 = vmatprep.subr.bf16.mxu1 %v16346_v52  ;;  %v2994_v58 = vrot.slane %v9629_v54, %v11210_v18 }
 0x17e   : > { %5638 = vmatprep.mubr.f32.mxu0 %v4790_v23  ;;  %v16670_v23 = vld [vmem:[#allocation18_spill] sm:$0xff] }
 0x17f   : > { %v1004_v11 = vcombine.low %v16671_v50, %v16670_v23  ;;  %v9643_v14 = vcombine.high %v16670_v23, %v1074_v29 }
 0x180   : > { %10352 = vmatpush1.bf16.msra.mxu1 %v10351_v26  ;;  %v16676_v26 = vld [vmem:[#allocation28_spill] sm:$0xff] }
 0x181   : > { %5639 = vmatmul.mubr.f32.gmra.mrb[46].mxu0 %v4789_v63  ;;  %10353 = vmatprep.subr.bf16.mxu1 %v16346_v52  ;;  %v2922_v63 = vcombine.low %v2905_v1, %v2919_v40  ;;  %v9637_v53 = vcombine.high %v16673_v28, %v1004_v11  ;;  %v1076_v31 = vcombine.low %v16677_v59, %v16676_v26  ;;  %v16688_v11 = vld [vmem:[#allocation44_spill] sm:$0xff]  ;;  %v16691_v28 = vld [vmem:[#allocation34_spill] sm:$0xff] }
 0x182   : > { %5643 = vmatprep.mubr.f32.mxu0 %v4844_v44  ;;  %v16672_v44 = vld [vmem:[#allocation24_spill] sm:$0xff]  ;;  %v3261_v33 = vrot.slane %v9643_v14, %v11210_v18 }
 0x183   : > { %v3012_v61 = vcombine.high %v2994_v58, %v16672_v44  ;;  %v3011_v3 = vcombine.low %v2994_v58, %v16672_v44  ;;  %v3186_v16 = vrot.slane %v9637_v53, %v11210_v18  ;;  %v9645_v60 = vcombine.high %v16674_v22, %v1076_v31 }
 0x184   : > { %10355 = vmatpush1.bf16.msra.mxu1 %v10354_v9 }
 0x185   : > { %5644 = vmatmul.mubr.f32.gmra.mrb[48].mxu0 %v4836_v25  ;;  %10356 = vmatprep.subr.bf16.mxu1 %v16346_v52  ;;  %v2923_v25 = vcombine.high %v2905_v1, %v2919_v40  ;;  %v3190_v9 = vcombine.high %v16680_v13, %v3186_v16  ;;  %v3275_v51 = vrot.slane %v9645_v60, %v11210_v18  ;;  %v16683_v1 = vld [vmem:[#allocation40_spill] sm:$0xff]  ;;  %v16684_v40 = vld [vmem:[#allocation13_spill] sm:$0xff]  ;;  %v16695_v60 = vld [vmem:[#allocation50_spill] sm:$0xff] }
 0x186   : > { %5713 = vmatprep.mubr.f32.mxu0 %v2745_v10  ;;  %v16679_v10 = vld [vmem:[#allocation25_spill] sm:$0xff] }
 0x187   : > { %v3101_v55 = vcombine.high %v16679_v10, %v16678_v19  ;;  %v3100_v42 = vcombine.low %v16679_v10, %v16678_v19  ;;  %v3279_v45 = vcombine.high %v3261_v33, %v3275_v51  ;;  %v3278_v21 = vcombine.low %v3261_v33, %v3275_v51  ;;  %v16693_v19 = vld [vmem:[#allocation19_spill] sm:$0xff]  ;;  %v16698_v51 = vld [vmem:[#allocation58_spill] sm:$0xff] }
 0x188   : > { %10358 = vmatpush1.bf16.msra.mxu1 %v10357_v49  ;;  %v1360_v49 = vcombine.low %v16684_v40, %v16683_v1 }
 0x189   : > { %5714 = vmatmul.mubr.f32.vlgmr.msra.gmra.mrb[0].mxu0 %v2744_v34  ;;  %10359 = vmatprep.subr.bf16.mxu1 %v16346_v52  ;;  %v3189_v34 = vcombine.low %v16680_v13, %v3186_v16  ;;  %v16694_v16 = vld [vmem:[#allocation53_spill] sm:$0xff]  ;;  %v16696_v13 = vld [vmem:[#allocation52_spill] sm:$0xff] }
 0x18a   : > { %5718 = vmatprep.mubr.f32.mxu0 %v2834_v48  ;;  %v16682_v48 = vld [vmem:[#allocation63_spill] sm:$0xff]  ;;  %v9657_v50 = vcombine.high %v16681_v47, %v1360_v49 }
 0x18b   : > { %v1290_v54 = vcombine.low %v16682_v48, %v16681_v47  ;;  %v16700_v48 = vld [vmem:[#allocation56_spill] sm:$0xff] }
 0x18c   : > { %10361 = vmatpush1.bf16.msra.mxu1 %v10360_v6  ;;  %v16689_v6 = vld [vmem:[#allocation20_spill] sm:$0xff]  ;;  %v3542_v8 = vrot.slane %v9657_v50, %v11210_v18 }
 0x18d   : > { %5719 = vmatmul.mubr.f32.gmra.mrb[2].mxu0 %v2833_v20  ;;  %10362 = vmatprep.subr.bf16.mxu1 %v16346_v52  ;;  %v16686_v20 = vld [vmem:[#allocation37_spill] sm:$0xff] }
 0x18e   : > { %5723 = vmatprep.mubr.f32.mxu0 %v2923_v25  ;;  %v3368_v58 = vcombine.high %v16686_v20, %v16685_v36  ;;  %v16687_v25 = vld [vmem:[#allocation35_spill] sm:$0xff]  ;;  %v3367_v44 = vcombine.low %v16686_v20, %v16685_v36  ;;  %v16702_v20 = vld [vmem:[#allocation57_spill] sm:$0xff] }
 0x18f   : > { %v9655_v23 = vcombine.high %v16687_v25, %v1290_v54  ;;  %v16701_v54 = vld [vmem:[#allocation54_spill] sm:$0xff] }
 0x190   : > { %v3723_v36 = vcombine.low %v16701_v54, %v16700_v48 }
 0x191   : > { %5724 = vmatmul.mubr.f32.gmra.mrb[4].mxu0 %v2922_v63  ;;  %v1362_v63 = vcombine.low %v16689_v6, %v16688_v11  ;;  %v3528_v22 = vrot.slane %v9655_v23, %v11210_v18  ;;  %v1862_v6 = vcombine.low %v13697_v39, %v16620_v2 }
 0x192   : > { %5728 = vmatprep.mubr.f32.mxu0 %v3012_v61  ;;  %v16690_v61 = vld [vmem:[#allocation51_spill] sm:$0xff] }
 0x193   : > { %v3457_v53 = vcombine.high %v16691_v28, %v16690_v61  ;;  %v9661_v29 = vcombine.high %v16683_v1, %v1362_v63  ;;  %v3456_v26 = vcombine.low %v16691_v28, %v16690_v61  ;;  %v3546_v59 = vcombine.high %v3528_v22, %v3542_v8  ;;  %v16703_v61 = vld [vmem:[#allocation61_spill] sm:$0xff]  ;;  %v16704_v28 = vld [vmem:[#allocation60_spill] sm:$0xff] }
 0x194   : > { %v3724_v1 = vcombine.high %v16701_v54, %v16700_v48  ;;  %v1932_v63 = vcombine.low %v13710_v27, %v16623_v43  ;;  %v3990_v39 = vcombine.low %v16704_v28, %v16703_v61  ;;  %v16707_v27 = vld [vmem:[#allocation62_spill] sm:$0xff] }
 0x195   : > { %5729 = vmatmul.mubr.f32.gmra.mrb[6].mxu0 %v3011_v3  ;;  %v3617_v31 = vrot.slane %v9661_v29, %v11210_v18  ;;  %v16692_v3 = vld [vmem:[#allocation47_spill] sm:$0xff]  ;;  %v16705_v29 = vld [vmem:[#allocation70_spill] sm:$0xff] }
 0x196   : > { %5733 = vmatprep.mubr.f32.mxu0 %v3101_v55  ;;  %v1576_v10 = vcombine.low %v16693_v19, %v16692_v3  ;;  %v3545_v55 = vcombine.low %v3528_v22, %v3542_v8  ;;  %v9687_v22 = vcombine.high %v16618_v32, %v1862_v6  ;;  %v9689_v8 = vcombine.high %v16620_v2, %v1932_v63 }
 0x197   : > { %v3635_v14 = vcombine.high %v3617_v31, %v16694_v16  ;;  %v3634_v47 = vcombine.low %v3617_v31, %v16694_v16  ;;  %v2218_v16 = vcombine.low %v14007_v7, %v16655_v15 }
 0x198   : > { %v4165_v19 = vrot.slane %v9689_v8, %v11210_v18 }
 0x199   : > { %5734 = vmatmul.mubr.f32.gmra.mrb[8].mxu0 %v3100_v42  ;;  %v9669_v42 = vcombine.high %v16695_v60, %v1576_v10  ;;  %v16708_v60 = vld [vmem:[#allocation74_spill] sm:$0xff] }
 0x19a   : > { %5738 = vmatprep.mubr.f32.mxu0 %v3190_v9  ;;  %v16697_v9 = vld [vmem:[#allocation23_spill] sm:$0xff] }
 0x19b   : > { %v1646_v33 = vcombine.low %v16697_v9, %v16696_v13  ;;  %v3809_v40 = vrot.slane %v9669_v42, %v11210_v18  ;;  %v16709_v42 = vld [vmem:[#allocation75_spill] sm:$0xff] }
 0x19d   : > { %5739 = vmatmul.mubr.f32.gmra.mrb[10].mxu0 %v3189_v34  ;;  %v16699_v34 = vld [vmem:[#allocation81_spill] sm:$0xff]  ;;  %v9675_v49 = vcombine.high %v16692_v3, %v1646_v33  ;;  %v3812_v50 = vcombine.low %v16702_v20, %v3809_v40  ;;  %v4151_v3 = vrot.slane %v9687_v22, %v11210_v18  ;;  %v9707_v33 = vcombine.high %v16653_v57, %v2218_v16 }
 0x19e   : > { %5743 = vmatprep.mubr.f32.mxu0 %v3279_v45  ;;  %v1648_v45 = vcombine.low %v16699_v34, %v16698_v51  ;;  %v11079_v34 = vld [vmem:[%s11199_s14 + $0xe0] sm:$0xff] }
 0x19f   : > { %v3884_v25 = vrot.slane %v9675_v49, %v11210_v18  ;;  %v2259_v7 = vcombine.low %v11079_v34, %v14106_v24 }
 0x1a1   : > { %5744 = vmatmul.mubr.f32.gmra.mrb[12].mxu0 %v3278_v21  ;;  %v9677_v21 = vcombine.high %v16696_v13, %v1648_v45  ;;  %v2260_v45 = vcombine.high %v11079_v34, %v14106_v24  ;;  %v2281_v49 = vrot.slane %v2259_v7, %v11210_v18 }
 0x1a2   : > { %5748 = vmatprep.mubr.f32.mxu0 %v3368_v58  ;;  %v3813_v58 = vcombine.high %v16702_v20, %v3809_v40  ;;  %v4507_v40 = vrot.slane %v9707_v33, %v11210_v18 }
 0x1a3   : > { %v3898_v23 = vrot.slane %v9677_v21, %v11210_v18  ;;  %v2288_v24 = vrot.slane %v2260_v45, %v11210_v18 }
 0x1a5   : > { %5749 = vmatmul.mubr.f32.gmra.mrb[14].mxu0 %v3367_v44  ;;  %v3902_v11 = vcombine.high %v3884_v25, %v3898_v23  ;;  %v3901_v44 = vcombine.low %v3884_v25, %v3898_v23  ;;  %v2475_v25 = vcombine.high %v14152_v35, %v14155_v41  ;;  %v4610_v6 = vrot.slane %v2288_v24, %v11210_v18  ;;  %v7337_v24 = vld [vmem:[%s16073_s3 + $0xf0] sm:$0xff] }
 0x1a6   : > { %5753 = vmatprep.mubr.f32.mxu0 %v3457_v53  ;;  %v3991_v53 = vcombine.high %v16704_v28, %v16703_v61  ;;  %v2504_v61 = vcombine.low %v14210_v38, %v14222_v56 }
 0x1a7   : > { %v2503_v35 = vrot.slane %v2475_v25, %v11210_v18 }
 0x1a9   : > { %5754 = vmatmul.mubr.f32.gmra.mrb[16].mxu0 %v3456_v26  ;;  %v1934_v26 = vcombine.low %v13713_v12, %v16705_v29  ;;  %v4169_v12 = vcombine.high %v4151_v3, %v4165_v19  ;;  %v9721_v29 = vcombine.high %v14193_v62, %v2504_v61 }
 0x1aa   : > { %5758 = vmatprep.mubr.f32.mxu0 %v3546_v59  ;;  %v16706_v59 = vld [vmem:[#allocation73_spill] sm:$0xff] }
 0x1ab   : > { %v4080_v31 = vcombine.high %v16707_v27, %v16706_v59  ;;  %v9693_v10 = vcombine.high %v16623_v43, %v1934_v26  ;;  %v4079_v32 = vcombine.low %v16707_v27, %v16706_v59  ;;  %v2220_v43 = vcombine.low %v14044_v17, %v16708_v60  ;;  %v16711_v17 = vld [vmem:[#allocation76_spill] sm:$0xff]  ;;  %v7329_v60 = vld [vmem:[%s16073_s3 + $0xb0] sm:$0xff] }
 0x1ac   : > { %v2506_v26 = vcombine.low %v14247_v30, %v2503_v35  ;;  %v4788_v59 = vrot.slane %v9721_v29, %v11210_v18 }
 0x1ad   : > { %5759 = vmatmul.mubr.f32.gmra.mrb[18].mxu0 %v3545_v55  ;;  %v4240_v2 = vrot.slane %v9693_v10, %v11210_v18  ;;  %v2148_v55 = vcombine.low %v13961_v37, %v16653_v57  ;;  %v9709_v37 = vcombine.high %v16655_v15, %v2220_v43  ;;  %v7328_v10 = vld [vmem:[%s16073_s3 + $0xa8] sm:$0xff]  ;;  %v7330_v43 = vld [vmem:[%s16073_s3 + $0xb8] sm:$0xff] }
 0x1ae   : > { %5763 = vmatprep.mubr.f32.mxu0 %v3635_v14  ;;  %v4168_v14 = vcombine.low %v4151_v3, %v4165_v19  ;;  %v9725_v27 = vcombine.high %v14222_v56, %v2506_v26  ;;  %v7327_v56 = vld [vmem:[%s16073_s3 + $0xa0] sm:$0xff] }
 0x1af   : > { %v4258_v13 = vcombine.high %v4240_v2, %v16709_v42  ;;  %v9701_v9 = vcombine.high %v16649_v4, %v2148_v55  ;;  %v4257_v51 = vcombine.low %v4240_v2, %v16709_v42  ;;  %v4521_v15 = vrot.slane %v9709_v37, %v11210_v18  ;;  %v7332_v37 = vld [vmem:[%s16073_s3 + $0xc8] sm:$0xff] }
 0x1b0   : > { %v4843_v19 = vrot.slane %v9725_v27, %v11210_v18  ;;  %v10366_v2 = vpack.c.bf16 %v7328_v10, %v7327_v56 }
 0x1b1   : > { %5764 = vmatmul.mubr.f32.gmra.mrb[20].mxu0 %v3634_v47  ;;  %v16710_v47 = vld [vmem:[#allocation77_spill] sm:$0xff]  ;;  %v4432_v54 = vrot.slane %v9701_v9, %v11210_v18  ;;  %v4524_v41 = vcombine.low %v4507_v40, %v4521_v15 }
 0x1b2   : > { %5768 = vmatprep.mubr.f32.mxu0 %v3724_v1  ;;  %v4347_v48 = vcombine.high %v16711_v17, %v16710_v47  ;;  %v11080_v1 = vld [vmem:[%s11199_s14 + $0xe8] sm:$0x3f]  ;;  %v4346_v57 = vcombine.low %v16711_v17, %v16710_v47  ;;  %v4845_v55 = vcombine.high %v4843_v19, %v4843_v19  ;;  %v7333_v47 = vld [vmem:[%s16073_s3 + $0xd0] sm:$0xff]  ;;  %v7334_v17 = vld [vmem:[%s16073_s3 + $0xd8] sm:$0xff]  ;;  %s15888_s14 = scalar_lea.vmem %s16076_s6, %s10886_s9 }
 0x1b3   : > { %v2332_v4 = vcombine.high %v11080_v1, %v14149_v5  ;;  %v2331_v21 = vcombine.low %v11080_v1, %v14149_v5 }
 0x1b5   : > { %5769 = vmatmul.mubr.f32.gmra.mrb[22].mxu0 %v3723_v36  ;;  %v16712_v36 = vld [vmem:[#allocation78_spill] sm:$0xff]  ;;  %v2353_v63 = vrot.slane %v2331_v21, %v11210_v18 }
 0x1b6   : > { %5773 = vmatprep.mubr.f32.mxu0 %v3813_v58  ;;  %v4436_v20 = vcombine.high %v16712_v36, %v4432_v54  ;;  %v2360_v58 = vrot.slane %v2332_v4, %v11210_v18  ;;  %v4435_v23 = vcombine.low %v16712_v36, %v4432_v54  ;;  %v7335_v4 = vld [vmem:[%s16073_s3 + $0xe0] sm:$0xff]  ;;  %v7338_v21 = vld [vmem:[%s16073_s3 + $0xf8] sm:$0xff] }
 0x1b7   : > { %v10381_v36 = vpack.c.bf16 %v7338_v21, %v7337_v24 }
 0x1b8   : > { %v9713_v5 = vcombine.low %v2360_v58, %v14178_v0 }
 0x1b9   : > { %5774 = vmatmul.mubr.f32.gmra.mrb[24].mxu0 %v3812_v50  ;;  %v4525_v50 = vcombine.high %v4507_v40, %v4521_v15 }
 0x1ba   : > { %5778 = vmatprep.mubr.f32.mxu0 %v3902_v11  ;;  %v4596_v11 = vrot.slane %v2281_v49, %v11210_v18  ;;  %v4699_v22 = vrot.slane %v9713_v5, %v11210_v18 }
 0x1bc   : > { %v4614_v28 = vcombine.high %v4596_v11, %v4610_v6 }
 0x1bd   : > { %5779 = vmatmul.mubr.f32.gmra.mrb[26].mxu0 %v3901_v44  ;;  %v2434_v44 = vcombine.low %v14190_v46, %v14193_v62  ;;  %v4613_v46 = vcombine.low %v4596_v11, %v4610_v6 }
 0x1be   : > { %5783 = vmatprep.mubr.f32.mxu0 %v3991_v53  ;;  %v4685_v53 = vrot.slane %v2353_v63, %v11210_v18 }
 0x1bf   : > { %v9719_v8 = vcombine.high %v14178_v0, %v2434_v44  ;;  %v7326_v0 = vld [vmem:[%s16073_s3 + $0x98] sm:$0xff] }
 0x1c0   : > { %v4703_v38 = vcombine.high %v4685_v53, %v4699_v22  ;;  %v4702_v62 = vcombine.low %v4685_v53, %v4699_v22 }
 0x1c1   : > { %5784 = vmatmul.mubr.f32.gmra.mrb[28].mxu0 %v3990_v39  ;;  %v4774_v39 = vrot.slane %v9719_v8, %v11210_v18 }
 0x1c2   : > { %5788 = vmatprep.mubr.f32.mxu0 %v4080_v31  ;;  %v7325_v31 = vld [vmem:[%s16073_s3 + $0x90] sm:$0xff] }
 0x1c3   : > { %v10363_v30 = vpack.c.bf16 %v7326_v0, %v7325_v31  ;;  %v4792_v3 = vcombine.high %v4774_v39, %v4788_v59 }
 0x1c5   : > { %5789 = vmatmul.mubr.f32.gmra.mrb[30].mxu0 %v4079_v32  ;;  %10364 = vmatpush1.bf16.msra.mxu1 %v10363_v30  ;;  %v4791_v32 = vcombine.low %v4774_v39, %v4788_v59 }
 0x1c6   : > { %5793 = vmatprep.mubr.f32.mxu0 %v4169_v12  ;;  %10365 = vmatprep.subr.bf16.mxu1 %v16346_v52 }
 0x1c9   : > { %5794 = vmatmul.mubr.f32.gmra.mrb[32].mxu0 %v4168_v14  ;;  %10367 = vmatpush1.bf16.msra.mxu1 %v10366_v2 }
 0x1ca   : > { %5798 = vmatprep.mubr.f32.mxu0 %v4258_v13  ;;  %10368 = vmatprep.subr.bf16.mxu1 %v16346_v52  ;;  %v10369_v13 = vpack.c.bf16 %v7330_v43, %v7329_v60 }
 0x1cd   : > { %5799 = vmatmul.mubr.f32.gmra.mrb[34].mxu0 %v4257_v51  ;;  %10370 = vmatpush1.bf16.msra.mxu1 %v10369_v13  ;;  %v7331_v51 = vld [vmem:[%s16073_s3 + $0xc0] sm:$0xff] }
 0x1ce   : > { %5803 = vmatprep.mubr.f32.mxu0 %v4347_v48  ;;  %10371 = vmatprep.subr.bf16.mxu1 %v16346_v52  ;;  %v10372_v34 = vpack.c.bf16 %v7332_v37, %v7331_v51  ;;  %v10375_v48 = vpack.c.bf16 %v7334_v17, %v7333_v47 }
 0x1d1   : > { %5804 = vmatmul.mubr.f32.gmra.mrb[36].mxu0 %v4346_v57  ;;  %10373 = vmatpush1.bf16.msra.mxu1 %v10372_v34  ;;  %v7336_v57 = vld [vmem:[%s16073_s3 + $0xe8] sm:$0xff] }
 0x1d2   : > { %5808 = vmatprep.mubr.f32.mxu0 %v4436_v20  ;;  %10374 = vmatprep.subr.bf16.mxu1 %v16346_v52  ;;  %v10378_v40 = vpack.c.bf16 %v7336_v57, %v7335_v4 }
 0x1d5   : > { %5809 = vmatmul.mubr.f32.gmra.mrb[38].mxu0 %v4435_v23  ;;  %v14467_v12 = vpop.f32.mrb[0].mxu1  ;;  %10376 = vmatpush1.bf16.msra.mxu1 %v10375_v48 }
 0x1d6   : > { %5813 = vmatprep.mubr.f32.mxu0 %v4525_v50  ;;  %v9987_v16 = vpop.f32.mrb[1].mxu1  ;;  %10377 = vmatprep.subr.bf16.mxu1 %v16346_v52 }
 0x1d9   : > { %5814 = vmatmul.mubr.f32.gmra.mrb[40].mxu0 %v4524_v41  ;;  %v14470_v14 = vpop.f32.mrb[2].mxu1  ;;  %10379 = vmatpush1.bf16.msra.mxu1 %v10378_v40 }
 0x1da   : > { %5818 = vmatprep.mubr.f32.mxu0 %v4614_v28  ;;  %v9990_v42 = vpop.f32.mrb[3].mxu1  ;;  %10380 = vmatprep.subr.bf16.mxu1 %v16346_v52 }
 0x1db   : > { %v14556_v42 = vld [vmem:[%s16072_s2] ss:$0 sm:$0xff] }
 0x1dd   : > { %5819 = vmatmul.mubr.f32.gmra.mrb[42].mxu0 %v4613_v46  ;;  %v14478_v9 = vpop.f32.mrb[4].mxu1  ;;  %10382 = vmatpush1.bf16.msra.mxu1 %v10381_v36 }
 0x1de   : > { %5823 = vmatprep.mubr.f32.mxu0 %v4703_v38  ;;  %v9993_v33 = vpop.f32.mrb[5].mxu1  ;;  %10383 = vmatprep.subr.bf16.mxu1 %v16346_v52 }
 0x1e1   : > { %5824 = vmatmul.mubr.f32.gmra.mrb[44].mxu0 %v4702_v62 }
 0x1e2   : > { %5828 = vmatprep.mubr.f32.mxu0 %v4792_v3 }
 0x1e3   : > { %v14487_v7 = vpop.f32.mrb[6].mxu1 }
 0x1e4   : > { %v9996_v45 = vpop.f32.mrb[7].mxu1 }
 0x1e5   : > { %5829 = vmatmul.mubr.f32.gmra.mrb[46].mxu0 %v4791_v32 }
 0x1e6   : > { %5833 = vmatprep.mubr.f32.mxu0 %v4845_v55 }
 0x1e7   : > { %v14496_v54 = vpop.f32.mrb[8].mxu1 }
 0x1e8   : > { %v9999_v1 = vpop.f32.mrb[9].mxu1 }
 0x1e9   : > { %5834 = vmatmul.mubr.f32.gmra.mrb[48].mxu0 %v4843_v19 }
 0x1eb   : > { %v14505_v15 = vpop.f32.mrb[10].mxu1 }
 0x1ec   : > { %v10002_v49 = vpop.f32.mrb[11].mxu1 }
 0x1f0   : > { %v14514_v20 = vpop.f32.mrb[12].mxu1 }
 0x1f1   : > { %v10005_v58 = vpop.f32.mrb[13].mxu1 }
 0x1f6   : > { %v14517_v25 = vpop.f32.mrb[14].mxu1 }
 0x1f7   : > { %v10008_v23 = vpop.f32.mrb[15].mxu1 }
 0x1fb   : > { %v14519_v50 = vpop.f32.mrb[16].mxu1 }
 0x1fc   : > { %v10011_v11 = vpop.f32.mrb[17].mxu1 }
 0x200   : > { %v14521_v6 = vpop.f32.mrb[18].mxu1 }
 0x201   : > { %v10014_v63 = vpop.f32.mrb[19].mxu1 }
 0x204   : > { %v14523_v5 = vpop.f32.mrb[20].mxu1 }
 0x205   : > { %v10017_v44 = vpop.f32.mrb[21].mxu1 }
 0x209   : > { %v14525_v61 = vpop.f32.mrb[22].mxu1 }
 0x20a   : > { %v10020_v35 = vpop.f32.mrb[23].mxu1 }
 0x20e   : > { %v14527_v41 = vpop.f32.mrb[24].mxu1 }
 0x20f   : > { %v10023_v28 = vpop.f32.mrb[25].mxu1 }
 0x213   : > { %v14529_v53 = vpop.f32.mrb[26].mxu1 }
 0x214   : > { %v10026_v22 = vpop.f32.mrb[27].mxu1 }
 0x217   : > { %v14531_v8 = vpop.f32.mrb[28].mxu1 }
 0x218   : > { %v10029_v29 = vpop.f32.mrb[29].mxu1 }
 0x21c   : > { %v14533_v26 = vpop.f32.mrb[30].mxu1 }
 0x21d   : > { %v10032_v46 = vpop.f32.mrb[31].mxu1 }
 0x221   : > { %v14535_v38 = vpop.f32.mrb[32].mxu1 }
 0x222   : > { %v10035_v39 = vpop.f32.mrb[33].mxu1 }
 0x225   : > { %v14537_v59 = vpop.f32.mrb[34].mxu1 }
 0x226   : > { %v10038_v27 = vpop.f32.mrb[35].mxu1 }
 0x22a   : > { %v14539_v31 = vpop.f32.mrb[36].mxu1 }
 0x22b   : > { %v10041_v0 = vpop.f32.mrb[37].mxu1 }
 0x22f   : > { %v14541_v62 = vpop.f32.mrb[38].mxu1 }
 0x230   : > { %v10044_v30 = vpop.f32.mrb[39].mxu1 }
 0x236   : > { %v14543_v3 = vpop.f32.mrb[40].mxu1 }
 0x237   : > { %v10047_v19 = vpop.f32.mrb[41].mxu1 }
 0x23a   : > { %v14545_v56 = vpop.f32.mrb[42].mxu1 }
 0x23b   : > { %v10050_v10 = vpop.f32.mrb[43].mxu1 }
 0x23e   : > { %v14547_v32 = vpop.f32.mrb[44].mxu1 }
 0x23f   : > { %v10053_v2 = vpop.f32.mrb[45].mxu1 }
 0x242   : > { %v14549_v55 = vpop.f32.mrb[46].mxu1 }
 0x243   : > { %v10056_v16 = vpop.f32.mrb[47].mxu1 }
 0x246   : > { %v14551_v60 = vpop.f32.mrb[48].mxu1 }
 0x247   : > { %v10059_v43 = vpop.f32.mrb[49].mxu1 }
 0x25c   : > { %v5715_v13 = vpop.f32.mrb[0].mxu0 }
 0x25d   : > { %v10559_v33 = vadd.f32 %v14556_v42, %v5715_v13  ;;  %v5717_v51 = vpop.f32.mrb[1].mxu0 }
 0x25f   : > { %v10560_v37 = vadd.f32 %v10559_v33, %v14467_v12 }
 0x260   : > { %v5720_v34 = vpop.f32.mrb[2].mxu0 }
 0x261   : > { %v6029_v45 = vmax.f32 %v10560_v37, 0.0  ;;  %v10561_v47 = vadd.f32 %v14556_v42, %v5720_v34  ;;  %v5722_v17 = vpop.f32.mrb[3].mxu0 }
 0x263   : > { %v6079_v48 = vcombine.high %v6029_v45, %v6029_v45  ;;  %v6086_v1 = vrot.slane %v6029_v45, %v11210_v18  ;;  %v10562_v4 = vadd.f32 %v10561_v47, %v14470_v14 }
 0x264   : > { %v5725_v57 = vpop.f32.mrb[4].mxu0 }
 0x265   : > { %v6093_v40 = vrot.slane %v6079_v48, %v11210_v18  ;;  %v6094_v49 = vcombine.high %v6086_v1, %v6086_v1  ;;  %v6030_v24 = vmax.f32 %v10562_v4, 0.0  ;;  %v10563_v21 = vadd.f32 %v14556_v42, %v5725_v57  ;;  %v5727_v36 = vpop.f32.mrb[5].mxu0 }
 0x267   : > { %v6095_v58 = vcombine.high %v6093_v40, %v6093_v40  ;;  %v6495_v12 = vcombine.low %v6086_v1, %v6094_v49  ;;  %v6096_v23 = vcombine.high %v6030_v24, %v6030_v24  ;;  %v6103_v11 = vrot.slane %v6030_v24, %v11210_v18 }
 0x268   : > { %v10564_v63 = vadd.f32 %v10563_v21, %v14478_v9  ;;  %v5730_v44 = vpop.f32.mrb[6].mxu0 }
 0x269   : > { %v6496_v35 = vcombine.low %v6093_v40, %v6095_v58  ;;  %v6110_v28 = vrot.slane %v6096_v23, %v11210_v18  ;;  %v6111_v14 = vcombine.high %v6103_v11, %v6103_v11  ;;  %v5732_v22 = vpop.f32.mrb[7].mxu0  ;;  %v10565_v46 = vadd.f32 %v14556_v42, %v5730_v44 }
 0x26a   : > { %v6031_v29 = vmax.f32 %v10564_v63, 0.0  ;;  %v6503_v39 = vrot.slane %v6495_v12, %v11210_v18  ;;  %v7339_v22 = vld [vmem:[%s16073_s3 + $0x100] sm:$0xff] }
 0x26b   : > { %v6510_v27 = vrot.slane %v6496_v35, %v11210_v18  ;;  %v6512_v0 = vcombine.low %v6103_v11, %v6111_v14  ;;  %v6112_v30 = vcombine.high %v6110_v28, %v6110_v28  ;;  %v10566_v9 = vadd.f32 %v10565_v46, %v14487_v7 }
 0x26c   : > { %v6113_v19 = vcombine.high %v6031_v29, %v6031_v29  ;;  %v6120_v10 = vrot.slane %v6031_v29, %v11210_v18  ;;  %v5735_v2 = vpop.f32.mrb[8].mxu0  ;;  %v6526_v13 = vrot.slane %v6110_v28, %v11210_v18  ;;  %v7340_v29 = vld [vmem:[%s16073_s3 + $0x108] sm:$0xff] }
 0x26d   : > { %v14573_v16 = vcombine.low %v6503_v39, %v6510_v27  ;;  %v6519_v43 = vrot.slane %v6512_v0, %v11210_v18  ;;  %v10567_v33 = vadd.f32 %v14556_v42, %v5735_v2  ;;  %v5737_v51 = vpop.f32.mrb[9].mxu0  ;;  %v6032_v47 = vmax.f32 %v10566_v9, 0.0 }
 0x26e   : > { %v6127_v37 = vrot.slane %v6113_v19, %v11210_v18  ;;  %v6128_v34 = vcombine.high %v6120_v10, %v6120_v10  ;;  %v6528_v45 = vcombine.low %v6112_v30, %v6120_v10  ;;  %v7342_v19 = vld [vmem:[%s16073_s3 + $0x118] sm:$0xff]  ;;  %v10384_v51 = vpack.c.bf16 %v7340_v29, %v7339_v22 }
 0x26f   : > { %6985 = vst [vmem:[#allocation2] sm:$0xff] %v14573_v16  ;;  %v6527_v17 = vcombine.low %v6519_v43, %v6526_v13  ;;  %v10568_v7 = vadd.f32 %v10567_v33, %v14496_v54  ;;  %v6130_v4 = vcombine.high %v6032_v47, %v6032_v47  ;;  %v6137_v40 = vrot.slane %v6032_v47, %v11210_v18 }
 0x270   : > { %v6529_v48 = vcombine.low %v6128_v34, %v6127_v37  ;;  %v6129_v1 = vcombine.high %v6127_v37, %v6127_v37  ;;  %v5740_v57 = vpop.f32.mrb[10].mxu0  ;;  %v14584_v36 = vrot.slane %v6528_v45, %v11210_v18  ;;  %v14613_v37 = vld [vmem:[%s16073_s3 + $0x120] sm:$0xff]  ;;  %v14618_v34 = vld [vmem:[%s16073_s3 + $0x128] sm:$0xff] }
 0x271   : > { %6986 = vst [vmem:[#allocation2 + $0x8] sm:$0x3f] %v6527_v17  ;;  %v6033_v49 = vmax.f32 %v10568_v7, 0.0  ;;  %v10569_v24 = vadd.f32 %v14556_v42, %v5740_v57  ;;  %v5742_v21 = vpop.f32.mrb[11].mxu0  ;;  %v6144_v12 = vrot.slane %v6130_v4, %v11210_v18  ;;  %v6145_v23 = vcombine.high %v6137_v40, %v6137_v40 }
 0x272   : > { %v6543_v58 = vrot.slane %v6529_v48, %v11210_v18  ;;  %v6545_v54 = vcombine.low %v6129_v1, %v6137_v40 }
 0x273   : > { %v6147_v11 = vcombine.high %v6033_v49, %v6033_v49  ;;  %v6154_v63 = vrot.slane %v6033_v49, %v11210_v18  ;;  %v6146_v35 = vcombine.high %v6144_v12, %v6144_v12  ;;  %v10570_v28 = vadd.f32 %v10569_v24, %v14505_v15  ;;  %v7341_v15 = vld [vmem:[%s16073_s3 + $0x110] sm:$0xff] }
 0x274   : > { %v14590_v44 = vcombine.low %v14584_v36, %v6543_v58  ;;  %v5745_v14 = vpop.f32.mrb[12].mxu0  ;;  %v6552_v46 = vrot.slane %v6545_v54, %v11210_v18  ;;  %v6559_v39 = vrot.slane %v6145_v23, %v11210_v18  ;;  %v10387_v1 = vpack.c.bf16 %v7342_v19, %v7341_v15  ;;  %v14636_v23 = vld [vmem:[%s16073_s3 + $0x130] sm:$0xff]  ;;  %v14641_v54 = vld [vmem:[%s16073_s3 + $0x138] sm:$0xff] }
 0x275   : > { %v6161_v27 = vrot.slane %v6147_v11, %v11210_v18  ;;  %v6162_v0 = vcombine.high %v6154_v63, %v6154_v63  ;;  %v5747_v30 = vpop.f32.mrb[13].mxu0  ;;  %v6561_v10 = vcombine.low %v6144_v12, %v6146_v35  ;;  %v6034_v9 = vmax.f32 %v10570_v28, 0.0  ;;  %v14653_v28 = vld [vmem:[%s16073_s3 + $0x140] sm:$0xff] }
 0x276   : > { %6987 = vst [vmem:[#allocation2 + $0x10] sm:$0xff] %v14590_v44  ;;  %v10571_v2 = vadd.f32 %v14556_v42, %v5745_v14  ;;  %v6560_v43 = vcombine.low %v6552_v46, %v6559_v39  ;;  %v14658_v14 = vld [vmem:[%s16073_s3 + $0x148] sm:$0xff] }
 0x277   : > { %v6163_v13 = vcombine.high %v6161_v27, %v6161_v27  ;;  %v6562_v33 = vcombine.low %v6154_v63, %v6162_v0  ;;  %v6164_v45 = vcombine.high %v6034_v9, %v6034_v9  ;;  %v6171_v47 = vrot.slane %v6034_v9, %v11210_v18 }
 0x278   : > { %v10572_v17 = vadd.f32 %v10571_v2, %v14514_v20  ;;  %v5750_v7 = vpop.f32.mrb[14].mxu0  ;;  %v7041_v48 = vld [vmem:[#allocation2 + $0x1] sm:$0xff]  ;;  %v14623_v4 = vrot.slane %v6561_v10, %v11210_v18  ;;  %6988 = vst [vmem:[#allocation2 + $0x18] sm:$0x3f] %v6560_v43  ;;  %v10390_v20 = vpack.c.bf16 %v14618_v34, %v14613_v37  ;;  %v10393_v10 = vpack.c.bf16 %v14641_v54, %v14636_v23 }
 0x279   : > { %v14626_v57 = vrot.slane %v6562_v33, %v11210_v18  ;;  %v6578_v40 = vcombine.low %v6161_v27, %v6163_v13  ;;  %v10573_v49 = vadd.f32 %v14556_v42, %v5750_v7  ;;  %v5752_v24 = vpop.f32.mrb[15].mxu0  ;;  %7786 = vmatprep.mubr.f32.mxu1 %v7041_v48  ;;  %v6178_v21 = vrot.slane %v6164_v45, %v11210_v18  ;;  %v7014_v0 = vld [vmem:[#allocation2 + $0x8] sm:$0xf] }
 0x27a   : > { %v6179_v58 = vcombine.high %v6171_v47, %v6171_v47  ;;  %v6035_v12 = vmax.f32 %v10572_v17, 0.0  ;;  %7787 = vmatmul.mubr.f32.vlgmr.msra.gmra.mrb[50].mxu1 %v14573_v16  ;;  %v6592_v16 = vrot.slane %v6171_v47, %v11210_v18  ;;  %v10396_v13 = vpack.c.bf16 %v14658_v14, %v14653_v28 }
 0x27b   : > { %v14645_v11 = vcombine.low %v14623_v4, %v14626_v57  ;;  %v6585_v63 = vrot.slane %v6578_v40, %v11210_v18  ;;  %v10574_v35 = vadd.f32 %v10573_v49, %v14517_v25  ;;  %10385 = vmatpush1.bf16.msra.mxu1 %v10384_v51  ;;  %v6180_v29 = vcombine.high %v6178_v21, %v6178_v21  ;;  %v7042_v40 = vld [vmem:[#allocation2 + $0x9] sm:$0xf] }
 0x27c   : > { %v6594_v22 = vcombine.low %v6179_v58, %v6178_v21  ;;  %v6181_v46 = vcombine.high %v6035_v12, %v6035_v12  ;;  %v6188_v39 = vrot.slane %v6035_v12, %v11210_v18  ;;  %v5755_v27 = vpop.f32.mrb[16].mxu0  ;;  %10386 = vmatprep.subr.bf16.mxu1 %v16346_v52  ;;  %v11096_v34 = vcombine.low %v7014_v0, %v14584_v36 }
 0x27d   : > { %6989 = vst [vmem:[#allocation2 + $0x20] sm:$0xff] %v14645_v11  ;;  %v6593_v25 = vcombine.low %v6585_v63, %v6592_v16  ;;  %v6036_v30 = vmax.f32 %v10574_v35, 0.0  ;;  %v10575_v15 = vadd.f32 %v14556_v42, %v5755_v27  ;;  %v5757_v19 = vpop.f32.mrb[17].mxu0  ;;  %v14689_v35 = vld [vmem:[%s16073_s3 + $0x150] sm:$0xff] }
 0x27e   : > { %v6195_v9 = vrot.slane %v6181_v46, %v11210_v18  ;;  %v6196_v2 = vcombine.high %v6188_v39, %v6188_v39  ;;  %v6595_v43 = vcombine.low %v6180_v29, %v6188_v39  ;;  %v14673_v45 = vrot.slane %v6594_v22, %v11210_v18  ;;  %v14694_v22 = vld [vmem:[%s16073_s3 + $0x158] sm:$0xff] }
 0x27f   : > { %6990 = vst [vmem:[#allocation2 + $0x28] sm:$0x3f] %v6593_v25  ;;  %v6198_v33 = vcombine.high %v6036_v30, %v6036_v30  ;;  %v6205_v51 = vrot.slane %v6036_v30, %v11210_v18  ;;  %v10576_v37 = vadd.f32 %v10575_v15, %v14519_v50  ;;  %10388 = vmatpush1.bf16.msra.mxu1 %v10387_v1  ;;  %v7043_v49 = vld [vmem:[#allocation2 + $0x11] sm:$0xff]  ;;  %v7044_v12 = vld [vmem:[#allocation2 + $0x19] sm:$0xf] }
 0x280   : > { %v6197_v47 = vcombine.high %v6195_v9, %v6195_v9  ;;  %v6609_v17 = vrot.slane %v6595_v43, %v11210_v18  ;;  %v6611_v7 = vcombine.low %v6196_v2, %v6195_v9  ;;  %v5760_v48 = vpop.f32.mrb[18].mxu0  ;;  %10389 = vmatprep.subr.bf16.mxu1 %v16346_v52  ;;  %v14679_v1 = vld [vmem:[#allocation2 + $0x18] sm:$0xf]  ;;  %v9728_v16 = vcombine.low %v7042_v40, %v7043_v49  ;;  %v14716_v40 = vld [vmem:[%s16073_s3 + $0x160] sm:$0xff] }
 0x281   : > { %v6212_v24 = vrot.slane %v6198_v33, %v11210_v18  ;;  %v6213_v21 = vcombine.high %v6205_v51, %v6205_v51  ;;  %v6037_v58 = vmax.f32 %v10576_v37, 0.0  ;;  %v10577_v50 = vadd.f32 %v14556_v42, %v5760_v48  ;;  %v5762_v36 = vpop.f32.mrb[19].mxu0 }
 0x282   : > { %v14682_v23 = vcombine.low %v14673_v45, %v6609_v17  ;;  %v6618_v54 = vrot.slane %v6611_v7, %v11210_v18  ;;  %v6625_v63 = vrot.slane %v6197_v47, %v11210_v18  ;;  %7791 = vmatprep.mubr.f32.mxu1 %v9728_v16  ;;  %v7203_v30 = vcombine.low %v14679_v1, %v7044_v12  ;;  %v14724_v36 = vld [vmem:[%s16073_s3 + $0x168] sm:$0xff]  ;;  %v14734_v12 = vld [vmem:[%s16073_s3 + $0x178] sm:$0xff] }
 0x283   : > { %v6214_v29 = vcombine.high %v6212_v24, %v6212_v24  ;;  %v6627_v46 = vcombine.low %v6205_v51, %v6213_v21  ;;  %v6215_v39 = vcombine.high %v6037_v58, %v6037_v58  ;;  %v6222_v27 = vrot.slane %v6037_v58, %v11210_v18  ;;  %10391 = vmatpush1.bf16.msra.mxu1 %v10390_v20 }
 0x284   : > { %v6626_v0 = vcombine.low %v6618_v54, %v6625_v63  ;;  %6991 = vst [vmem:[#allocation2 + $0x30] sm:$0xff] %v14682_v23  ;;  %v10578_v25 = vadd.f32 %v10577_v50, %v14521_v6  ;;  %v5765_v15 = vpop.f32.mrb[20].mxu0  ;;  %v7195_v19 = vcombine.high %v14590_v44, %v7043_v49  ;;  %7792 = vmatmul.mubr.f32.gmra.mrb[52].mxu1 %v11096_v34 }
 0x285   : > { %v6628_v9 = vcombine.low %v6212_v24, %v6214_v29  ;;  %v6229_v2 = vrot.slane %v6215_v39, %v11210_v18  ;;  %v6230_v43 = vcombine.high %v6222_v27, %v6222_v27  ;;  %v5767_v33 = vpop.f32.mrb[21].mxu0  ;;  %v10399_v20 = vpack.c.bf16 %v14694_v22, %v14689_v35  ;;  %10392 = vmatprep.subr.bf16.mxu1 %v16346_v52  ;;  %v14790_v22 = vld [vmem:[%s16073_s3 + $0x180] sm:$0xff] }
 0x286   : > { %6992 = vst [vmem:[#allocation2 + $0x38] sm:$0x3f] %v6626_v0  ;;  %v14705_v51 = vrot.slane %v6627_v46, %v11210_v18  ;;  %v6038_v37 = vmax.f32 %v10578_v25, 0.0  ;;  %v9736_v6 = vcombine.high %v7043_v49, %v7203_v30  ;;  %v10579_v47 = vadd.f32 %v14556_v42, %v5765_v15  ;;  %v7045_v48 = vld [vmem:[#allocation2 + $0x21] sm:$0xff] }
 0x287   : > { %v14710_v44 = vrot.slane %v6628_v9, %v11210_v18  ;;  %v6644_v17 = vcombine.low %v6222_v27, %v6230_v43  ;;  %v6231_v7 = vcombine.high %v6229_v2, %v6229_v2  ;;  %v9735_v34 = vcombine.low %v7195_v19, %v14679_v1  ;;  %10394 = vmatpush1.bf16.msra.mxu1 %v10393_v10  ;;  %v14729_v10 = vld [vmem:[%s16073_s3 + $0x170] sm:$0xff]  ;;  %v14742_v29 = vld [vmem:[#allocation2 + $0x28] sm:$0xf] }
 0x288   : > { %v6658_v49 = vrot.slane %v6229_v2, %v11210_v18  ;;  %v6232_v24 = vcombine.high %v6038_v37, %v6038_v37  ;;  %v6239_v21 = vrot.slane %v6038_v37, %v11210_v18  ;;  %7796 = vmatprep.mubr.f32.mxu1 %v9736_v6  ;;  %v10580_v58 = vadd.f32 %v10579_v47, %v14523_v5  ;;  %v5770_v50 = vpop.f32.mrb[22].mxu0  ;;  %v7046_v37 = vld [vmem:[#allocation2 + $0x29] sm:$0xf] }
 0x289   : > { %v14738_v54 = vcombine.low %v14705_v51, %v14710_v44  ;;  %v6651_v5 = vrot.slane %v6644_v17, %v11210_v18  ;;  %7797 = vmatmul.mubr.f32.gmra.mrb[54].mxu1 %v9735_v34  ;;  %v10581_v63 = vadd.f32 %v14556_v42, %v5770_v50  ;;  %v5772_v16 = vpop.f32.mrb[23].mxu0  ;;  %10395 = vmatprep.subr.bf16.mxu1 %v16346_v52 }
 0x28a   : > { %v6246_v46 = vrot.slane %v6232_v24, %v11210_v18  ;;  %v6247_v39 = vcombine.high %v6239_v21, %v6239_v21  ;;  %v6660_v27 = vcombine.low %v6231_v7, %v6239_v21  ;;  %v6039_v0 = vmax.f32 %v10580_v58, 0.0  ;;  %7801 = vmatprep.mubr.f32.mxu1 %v7045_v48 }
 0x28b   : > { %6993 = vst [vmem:[#allocation2 + $0x40] sm:$0xff] %v14738_v54  ;;  %v6659_v25 = vcombine.low %v6651_v5, %v6658_v49  ;;  %v10582_v30 = vadd.f32 %v10581_v63, %v14525_v61  ;;  %10397 = vmatpush1.bf16.msra.mxu1 %v10396_v13  ;;  %v10402_v15 = vpack.c.bf16 %v14724_v36, %v14716_v40 }
 0x28c   : > { %v10405_v19 = vpack.c.bf16 %v14734_v12, %v14729_v10  ;;  %v6661_v9 = vcombine.low %v6247_v39, %v6246_v46  ;;  %v6248_v2 = vcombine.high %v6246_v46, %v6246_v46  ;;  %v6249_v43 = vcombine.high %v6039_v0, %v6039_v0  ;;  %v5775_v33 = vpop.f32.mrb[24].mxu0  ;;  %10398 = vmatprep.subr.bf16.mxu1 %v16346_v52 }
 0x28d   : > { %v14757_v6 = vcombine.low %v14742_v29, %v14673_v45  ;;  %6994 = vst [vmem:[#allocation2 + $0x48] sm:$0x3f] %v6659_v25  ;;  %v14761_v61 = vrot.slane %v6660_v27, %v11210_v18  ;;  %v6256_v28 = vrot.slane %v6039_v0, %v11210_v18  ;;  %v6040_v14 = vmax.f32 %v10582_v30, 0.0  ;;  %7802 = vmatmul.mubr.f32.gmra.mrb[56].mxu1 %v14645_v11  ;;  %v5777_v47 = vpop.f32.mrb[25].mxu0  ;;  %v7047_v17 = vld [vmem:[#allocation2 + $0x31] sm:$0xff] }
 0x28e   : > { %v10583_v13 = vadd.f32 %v14556_v42, %v5775_v33  ;;  %v14766_v7 = vld [vmem:[#allocation2 + $0x38] sm:$0xf]  ;;  %v6675_v45 = vrot.slane %v6661_v9, %v11210_v18  ;;  %v6263_v34 = vrot.slane %v6249_v43, %v11210_v18  ;;  %v14770_v48 = vcombine.low %v7046_v37, %v7047_v17 }
 0x28f   : > { %16713 = vst [vmem:[#allocation82_spill] sm:$0xff] %v14757_v6  ;;  %v7048_v40 = vld [vmem:[#allocation2 + $0x39] sm:$0xf]  ;;  %v7201_v49 = vcombine.high %v14682_v23, %v7047_v17  ;;  %v6264_v24 = vcombine.high %v6256_v28, %v6256_v28  ;;  %v6677_v21 = vcombine.low %v6248_v2, %v6256_v28  ;;  %v6266_v58 = vcombine.high %v6040_v14, %v6040_v14 }
 0x290   : > { %16714 = vst [vmem:[#allocation29_spill] sm:$0xff] %v14770_v48  ;;  %v6273_v50 = vrot.slane %v6040_v14, %v11210_v18  ;;  %10400 = vmatpush1.bf16.msra.mxu1 %v10399_v20  ;;  %v14778_v36 = vcombine.low %v14761_v61, %v6675_v45  ;;  %v6265_v5 = vcombine.high %v6263_v34, %v6263_v34  ;;  %v5780_v16 = vpop.f32.mrb[26].mxu0  ;;  %v14808_v14 = vld [vmem:[%s16073_s3 + $0x190] sm:$0xff] }
 0x291   : > { %v10584_v63 = vadd.f32 %v10583_v13, %v14527_v41  ;;  %7806 = vmatprep.mubr.f32.mxu1 %v14770_v48  ;;  %v7206_v46 = vcombine.low %v14766_v7, %v7048_v40  ;;  %v6684_v39 = vrot.slane %v6677_v21, %v11210_v18  ;;  %v6691_v27 = vrot.slane %v6264_v24, %v11210_v18  ;;  %v5782_v35 = vpop.f32.mrb[27].mxu0  ;;  %v14795_v41 = vld [vmem:[%s16073_s3 + $0x188] sm:$0xff]  ;;  %v14813_v13 = vld [vmem:[%s16073_s3 + $0x198] sm:$0xff] }
 0x292   : > { %v6280_v0 = vrot.slane %v6266_v58, %v11210_v18  ;;  %v6281_v25 = vcombine.high %v6273_v50, %v6273_v50  ;;  %7807 = vmatmul.mubr.f32.gmra.mrb[58].mxu1 %v14757_v6  ;;  %6995 = vst [vmem:[#allocation2 + $0x50] sm:$0xff] %v14778_v36  ;;  %v6693_v20 = vcombine.low %v6263_v34, %v6265_v5 }
 0x293   : > { %v6041_v30 = vmax.f32 %v10584_v63, 0.0  ;;  %v10585_v9 = vadd.f32 %v14556_v42, %v5780_v16  ;;  %v14799_v2 = vcombine.high %v7047_v17, %v7206_v46  ;;  %10401 = vmatprep.subr.bf16.mxu1 %v16346_v52  ;;  %v6692_v43 = vcombine.low %v6684_v39, %v6691_v27  ;;  %v14838_v46 = vld [vmem:[%s16073_s3 + $0x1a0] sm:$0xff]  ;;  %v14843_v39 = vld [vmem:[%s16073_s3 + $0x1a8] sm:$0xff] }
 0x294   : > { %v6282_v33 = vcombine.high %v6280_v0, %v6280_v0  ;;  %v6694_v37 = vcombine.low %v6273_v50, %v6281_v25  ;;  %v14803_v28 = vcombine.low %v7201_v49, %v14766_v7  ;;  %10403 = vmatpush1.bf16.msra.mxu1 %v10402_v15  ;;  %v5785_v34 = vpop.f32.mrb[28].mxu0  ;;  %v14818_v40 = vld [vmem:[#allocation2 + $0x41] sm:$0xff]  ;;  %v10408_v15 = vpack.c.bf16 %v14795_v41, %v14790_v22  ;;  %v14858_v22 = vld [vmem:[%s16073_s3 + $0x1b0] sm:$0xff]  ;;  %v14863_v41 = vld [vmem:[%s16073_s3 + $0x1b8] sm:$0xff] }
 0x295   : > { %16715 = vst [vmem:[#allocation84_spill] sm:$0xff] %v14799_v2  ;;  %v6283_v47 = vcombine.high %v6041_v30, %v6041_v30  ;;  %v6290_v17 = vrot.slane %v6041_v30, %v11210_v18  ;;  %7811 = vmatprep.mubr.f32.mxu1 %v14799_v2  ;;  %v10586_v45 = vadd.f32 %v10585_v9, %v14529_v53  ;;  %6996 = vst [vmem:[#allocation2 + $0x58] sm:$0x3f] %v6692_v43  ;;  %v5787_v50 = vpop.f32.mrb[29].mxu0 }
 0x296   : > { %16716 = vst [vmem:[#allocation87_spill] sm:$0xff] %v14803_v28  ;;  %v14823_v49 = vrot.slane %v6693_v20, %v11210_v18  ;;  %v14826_v24 = vrot.slane %v6694_v37, %v11210_v18  ;;  %v6710_v21 = vcombine.low %v6280_v0, %v6282_v33  ;;  %v10587_v58 = vadd.f32 %v14556_v42, %v5785_v34  ;;  %v14866_v33 = vld [vmem:[#allocation2 + $0x48] sm:$0xf] }
 0x297   : > { %7812 = vmatmul.mubr.f32.gmra.mrb[60].mxu1 %v14803_v28  ;;  %v6297_v53 = vrot.slane %v6283_v47, %v11210_v18  ;;  %v6298_v5 = vcombine.high %v6290_v17, %v6290_v17  ;;  %v6042_v63 = vmax.f32 %v10586_v45, 0.0  ;;  %10404 = vmatprep.subr.bf16.mxu1 %v16346_v52  ;;  %v10411_v16 = vpack.c.bf16 %v14813_v13, %v14808_v14 }
 0x298   : > { %7816 = vmatprep.mubr.f32.mxu1 %v14818_v40  ;;  %v14847_v27 = vcombine.low %v14823_v49, %v14826_v24  ;;  %v6717_v0 = vrot.slane %v6710_v21, %v11210_v18  ;;  %v6724_v25 = vrot.slane %v6290_v17, %v11210_v18  ;;  %v10588_v35 = vadd.f32 %v10587_v58, %v14531_v8  ;;  %v5790_v8 = vpop.f32.mrb[30].mxu0 }
 0x299   : > { %10406 = vmatpush1.bf16.msra.mxu1 %v10405_v19  ;;  %v6726_v20 = vcombine.low %v6298_v5, %v6297_v53  ;;  %v6299_v30 = vcombine.high %v6297_v53, %v6297_v53  ;;  %v6300_v9 = vcombine.high %v6042_v63, %v6042_v63  ;;  %v6307_v43 = vrot.slane %v6042_v63, %v11210_v18  ;;  %v5792_v37 = vpop.f32.mrb[31].mxu0 }
 0x29a   : > { %10407 = vmatprep.subr.bf16.mxu1 %v16346_v52  ;;  %6997 = vst [vmem:[#allocation2 + $0x60] sm:$0xff] %v14847_v27  ;;  %v6725_v10 = vcombine.low %v6717_v0, %v6724_v25  ;;  %v6043_v12 = vmax.f32 %v10588_v35, 0.0  ;;  %v10589_v19 = vadd.f32 %v14556_v42, %v5790_v8  ;;  %v10414_v14 = vpack.c.bf16 %v14843_v39, %v14838_v46  ;;  %v14887_v0 = vld [vmem:[#allocation2 + $0x49] sm:$0xf] }
 0x29b   : > { %7817 = vmatmul.mubr.f32.gmra.mrb[62].mxu1 %v14738_v54  ;;  %v6314_v13 = vrot.slane %v6300_v9, %v11210_v18  ;;  %v6315_v47 = vcombine.high %v6307_v43, %v6307_v43  ;;  %v6727_v17 = vcombine.low %v6299_v30, %v6307_v43  ;;  %v14881_v50 = vcombine.low %v14866_v33, %v14761_v61  ;;  %v14915_v37 = vld [vmem:[%s16073_s3 + $0x1c8] sm:$0xff] }
 0x29c   : > { %6998 = vst [vmem:[#allocation2 + $0x68] sm:$0x3f] %v6725_v10  ;;  %v6317_v34 = vcombine.high %v6043_v12, %v6043_v12  ;;  %v6324_v21 = vrot.slane %v6043_v12, %v11210_v18  ;;  %v10590_v58 = vadd.f32 %v10589_v19, %v14533_v26  ;;  %v14884_v53 = vrot.slane %v6726_v20, %v11210_v18  ;;  %v5795_v39 = vpop.f32.mrb[32].mxu0  ;;  %v14889_v25 = vld [vmem:[#allocation2 + $0x51] sm:$0xff]  ;;  %v14896_v9 = vld [vmem:[#allocation2 + $0x59] sm:$0xf] }
 0x29d   : > { %16717 = vst [vmem:[#allocation85_spill] sm:$0xff] %v14881_v50  ;;  %10409 = vmatpush1.bf16.msra.mxu1 %v10408_v15  ;;  %v6316_v5 = vcombine.high %v6314_v13, %v6314_v13  ;;  %v6741_v63 = vrot.slane %v6727_v17, %v11210_v18  ;;  %v6743_v46 = vcombine.low %v6315_v47, %v6314_v13  ;;  %v5797_v30 = vpop.f32.mrb[33].mxu0  ;;  %v14894_v20 = vld [vmem:[#allocation2 + $0x58] sm:$0xf]  ;;  %v14910_v19 = vld [vmem:[%s16073_s3 + $0x1c0] sm:$0xff] }
 0x29e   : > { %10410 = vmatprep.subr.bf16.mxu1 %v16346_v52  ;;  %v6331_v26 = vrot.slane %v6317_v34, %v11210_v18  ;;  %v6332_v35 = vcombine.high %v6324_v21, %v6324_v21  ;;  %v6044_v61 = vmax.f32 %v10590_v58, 0.0  ;;  %v10591_v15 = vadd.f32 %v14556_v42, %v5795_v39 }
 0x29f   : > { %v14899_v43 = vcombine.low %v14884_v53, %v6741_v63  ;;  %v6750_v8 = vrot.slane %v6743_v46, %v11210_v18  ;;  %v6757_v10 = vrot.slane %v6316_v5, %v11210_v18  ;;  %v14905_v12 = vcombine.low %v14887_v0, %v14889_v25 }
 0x2a0   : > { %v6333_v13 = vcombine.high %v6331_v26, %v6331_v26  ;;  %v6759_v47 = vcombine.low %v6324_v21, %v6332_v35  ;;  %v6334_v17 = vcombine.high %v6044_v61, %v6044_v61  ;;  %v6341_v34 = vrot.slane %v6044_v61, %v11210_v18  ;;  %v5800_v46 = vpop.f32.mrb[34].mxu0 }
 0x2a1   : > { %16718 = vst [vmem:[#allocation88_spill] sm:$0xff] %v14905_v12  ;;  %10412 = vmatpush1.bf16.msra.mxu1 %v10411_v16  ;;  %v6758_v58 = vcombine.low %v6750_v8, %v6757_v10  ;;  %6999 = vst [vmem:[#allocation2 + $0x70] sm:$0xff] %v14899_v43  ;;  %7821 = vmatprep.mubr.f32.mxu1 %v14905_v12  ;;  %v10592_v5 = vadd.f32 %v10591_v15, %v14535_v38  ;;  %v5802_v16 = vpop.f32.mrb[35].mxu0 }
 0x2a2   : > { %v7226_v63 = vcombine.low %v14894_v20, %v14896_v9  ;;  %v7222_v39 = vcombine.high %v14778_v36, %v14889_v25  ;;  %v6760_v30 = vcombine.low %v6331_v26, %v6333_v13  ;;  %v6348_v21 = vrot.slane %v6334_v17, %v11210_v18  ;;  %7822 = vmatmul.mubr.f32.gmra.mrb[64].mxu1 %v14881_v50 }
 0x2a3   : > { %v6349_v35 = vcombine.high %v6341_v34, %v6341_v34  ;;  %7000 = vst [vmem:[#allocation2 + $0x78] sm:$0x3f] %v6758_v58  ;;  %v14930_v38 = vrot.slane %v6759_v47, %v11210_v18  ;;  %v6045_v15 = vmax.f32 %v10592_v5, 0.0  ;;  %v10593_v10 = vadd.f32 %v14556_v42, %v5800_v46  ;;  %10413 = vmatprep.subr.bf16.mxu1 %v16346_v52  ;;  %v14943_v58 = vld [vmem:[#allocation2 + $0x61] sm:$0xff]  ;;  %v14948_v47 = vld [vmem:[%s16073_s3 + $0x1d0] sm:$0xff] }
 0x2a4   : > { %v14933_v8 = vcombine.high %v14889_v25, %v7226_v63  ;;  %v14938_v26 = vrot.slane %v6760_v30, %v11210_v18  ;;  %v6350_v17 = vcombine.high %v6348_v21, %v6348_v21  ;;  %v14941_v16 = vcombine.low %v7222_v39, %v14894_v20  ;;  %v5805_v30 = vpop.f32.mrb[36].mxu0  ;;  %v14957_v39 = vld [vmem:[%s16073_s3 + $0x1d8] sm:$0xff]  ;;  %v14976_v61 = vld [vmem:[#allocation2 + $0x68] sm:$0xf] }
 0x2a5   : > { %v6776_v13 = vcombine.low %v6341_v34, %v6349_v35  ;;  %10415 = vmatpush1.bf16.msra.mxu1 %v10414_v14  ;;  %v6790_v5 = vrot.slane %v6348_v21, %v11210_v18  ;;  %v6351_v63 = vcombine.high %v6045_v15, %v6045_v15  ;;  %v6358_v46 = vrot.slane %v6045_v15, %v11210_v18  ;;  %v14962_v14 = vld [vmem:[%s16073_s3 + $0x1e0] sm:$0xff]  ;;  %v14967_v21 = vld [vmem:[%s16073_s3 + $0x1e8] sm:$0xff] }
 0x2a6   : > { %16719 = vst [vmem:[#allocation41_spill] sm:$0xff] %v14933_v8  ;;  %16720 = vst [vmem:[#allocation32_spill] sm:$0xff] %v14941_v16  ;;  %7826 = vmatprep.mubr.f32.mxu1 %v14933_v8  ;;  %v10594_v34 = vadd.f32 %v10593_v10, %v14537_v59  ;;  %v14971_v35 = vcombine.low %v14930_v38, %v14938_v26  ;;  %v10595_v15 = vadd.f32 %v14556_v42, %v5805_v30  ;;  %v5807_v10 = vpop.f32.mrb[37].mxu0  ;;  %v14990_v2 = vld [vmem:[#allocation2 + $0x69] sm:$0xf] }
 0x2a7   : > { %v6783_v59 = vrot.slane %v6776_v13, %v11210_v18  ;;  %7827 = vmatmul.mubr.f32.gmra.mrb[66].mxu1 %v14941_v16  ;;  %10416 = vmatprep.subr.bf16.mxu1 %v16346_v52  ;;  %v6365_v45 = vrot.slane %v6351_v63, %v11210_v18  ;;  %v6366_v8 = vcombine.high %v6358_v46, %v6358_v46 }
 0x2a8   : > { %v6792_v50 = vcombine.low %v6350_v17, %v6358_v46  ;;  %v6046_v12 = vmax.f32 %v10594_v34, 0.0  ;;  %7831 = vmatprep.mubr.f32.mxu1 %v14943_v58  ;;  %7001 = vst [vmem:[#allocation2 + $0x80] sm:$0xff] %v14971_v35  ;;  %v10596_v13 = vadd.f32 %v10595_v15, %v14539_v31  ;;  %v16721_v30 = vpack.c.bf16 %v14863_v41, %v14858_v22  ;;  %v5810_v34 = vpop.f32.mrb[38].mxu0 }
 0x2a9   : > { %v6791_v28 = vcombine.low %v6783_v59, %v6790_v5  ;;  %v10423_v10 = vpack.c.bf16 %v14957_v39, %v14948_v47  ;;  %v6793_v16 = vcombine.low %v6366_v8, %v6365_v45  ;;  %v6367_v17 = vcombine.high %v6365_v45, %v6365_v45  ;;  %v5812_v8 = vpop.f32.mrb[39].mxu0 }
 0x2aa   : > { %10418 = vmatpush1.bf16.msra.mxu1 %v16721_v30  ;;  %v6368_v46 = vcombine.high %v6046_v12, %v6046_v12  ;;  %v14994_v5 = vcombine.low %v14976_v61, %v14884_v53  ;;  %v14998_v31 = vrot.slane %v6792_v50, %v11210_v18  ;;  %v6375_v22 = vrot.slane %v6046_v12, %v11210_v18  ;;  %v15003_v47 = vld [vmem:[#allocation2 + $0x71] sm:$0xff]  ;;  %v15013_v50 = vld [vmem:[#allocation2 + $0x79] sm:$0xf] }
 0x2ab   : > { %10419 = vmatprep.subr.bf16.mxu1 %v16346_v52  ;;  %7002 = vst [vmem:[#allocation2 + $0x88] sm:$0x3f] %v6791_v28  ;;  %v6047_v41 = vmax.f32 %v10596_v13, 0.0  ;;  %7832 = vmatmul.mubr.f32.gmra.mrb[68].mxu1 %v14847_v27  ;;  %v10597_v45 = vadd.f32 %v14556_v42, %v5810_v34  ;;  %v15005_v39 = vld [vmem:[#allocation2 + $0x78] sm:$0xf]  ;;  %v6807_v53 = vrot.slane %v6793_v16, %v11210_v18  ;;  %16724 = vst [vmem:[#allocation36_spill] sm:$0xff] %v15013_v50 }
 0x2ac   : > { %16722 = vst [vmem:[#allocation17_spill] sm:$0xff] %v14994_v5  ;;  %v6382_v59 = vrot.slane %v6368_v46, %v11210_v18  ;;  %v15011_v28 = vcombine.low %v14990_v2, %v15003_v47  ;;  %v7242_v12 = vcombine.high %v14899_v43, %v15003_v47  ;;  %v6383_v15 = vcombine.high %v6375_v22, %v6375_v22  ;;  %v5815_v6 = vpop.f32.mrb[40].mxu0 }
 0x2ad   : > { %v6809_v13 = vcombine.low %v6367_v17, %v6375_v22  ;;  %v6385_v30 = vcombine.high %v6047_v41, %v6047_v41  ;;  %v6392_v34 = vrot.slane %v6047_v41, %v11210_v18  ;;  %v16725_v8 = vpack.c.bf16 %v14915_v37, %v14910_v19  ;;  %v5817_v37 = vpop.f32.mrb[41].mxu0 }
 0x2ae   : > { %16723 = vst [vmem:[#allocation43_spill] sm:$0xff] %v15011_v28  ;;  %v15022_v16 = vcombine.low %v14998_v31, %v6807_v53  ;;  %v6384_v46 = vcombine.high %v6382_v59, %v6382_v59  ;;  %v10598_v63 = vadd.f32 %v10597_v45, %v14541_v62  ;;  %7836 = vmatprep.mubr.f32.mxu1 %v15011_v28  ;;  %v7369_v37 = vld [vmem:[%s16073_s3 + $0x1f0] sm:$0xff] }
 0x2af   : > { %10421 = vmatpush1.bf16.msra.mxu1 %v16725_v8  ;;  %v7246_v48 = vcombine.low %v15005_v39, %v15013_v50  ;;  %v6816_v17 = vrot.slane %v6809_v13, %v11210_v18  ;;  %v6823_v22 = vrot.slane %v6383_v15, %v11210_v18  ;;  %v6399_v41 = vrot.slane %v6385_v30, %v11210_v18 }
 0x2b0   : > { %v6400_v19 = vcombine.high %v6392_v34, %v6392_v34  ;;  %7837 = vmatmul.mubr.f32.gmra.mrb[70].mxu1 %v14994_v5  ;;  %7003 = vst [vmem:[#allocation2 + $0x90] sm:$0xff] %v15022_v16  ;;  %v6825_v53 = vcombine.low %v6382_v59, %v6384_v46  ;;  %v6048_v62 = vmax.f32 %v10598_v63, 0.0  ;;  %v10599_v45 = vadd.f32 %v14556_v42, %v5815_v6  ;;  %v7370_v6 = vld [vmem:[%s16073_s3 + $0x1f8] sm:$0xff] }
 0x2b1   : > { %v15035_v8 = vcombine.high %v15003_v47, %v7246_v48  ;;  %10422 = vmatprep.subr.bf16.mxu1 %v16346_v52  ;;  %v6824_v13 = vcombine.low %v6816_v17, %v6823_v22  ;;  %v6401_v28 = vcombine.high %v6399_v41, %v6399_v41  ;;  %v15039_v30 = vcombine.low %v7242_v12, %v15005_v39 }
 0x2b2   : > { %v6826_v15 = vcombine.low %v6392_v34, %v6400_v19  ;;  %v6402_v63 = vcombine.high %v6048_v62, %v6048_v62  ;;  %v6409_v48 = vrot.slane %v6048_v62, %v11210_v18  ;;  %v10600_v59 = vadd.f32 %v10599_v45, %v14543_v3  ;;  %v5820_v34 = vpop.f32.mrb[42].mxu0  ;;  %v15050_v46 = vld [vmem:[#allocation2 + $0x81] sm:$0xff] }
 0x2b3   : > { %16726 = vst [vmem:[#allocation46_spill] sm:$0xff] %v15035_v8  ;;  %16727 = vst [vmem:[#allocation48_spill] sm:$0xff] %v15039_v30  ;;  %10424 = vmatpush1.bf16.msra.mxu1 %v10423_v10  ;;  %7841 = vmatprep.mubr.f32.mxu1 %v15035_v8  ;;  %v15053_v10 = vrot.slane %v6825_v53, %v11210_v18  ;;  %v6842_v17 = vcombine.low %v6399_v41, %v6401_v28  ;;  %v5822_v19 = vpop.f32.mrb[43].mxu0 }
 0x2b4   : > { %7004 = vst [vmem:[#allocation2 + $0x98] sm:$0x3f] %v6824_v13  ;;  %v15056_v12 = vrot.slane %v6826_v15, %v11210_v18  ;;  %v10601_v22 = vadd.f32 %v14556_v42, %v5820_v34  ;;  %7842 = vmatmul.mubr.f32.gmra.mrb[72].mxu1 %v15039_v30  ;;  %v6416_v62 = vrot.slane %v6402_v63, %v11210_v18  ;;  %v6049_v3 = vmax.f32 %v10600_v59, 0.0 }
 0x2b5   : > { %v6417_v8 = vcombine.high %v6409_v48, %v6409_v48  ;;  %7846 = vmatprep.mubr.f32.mxu1 %v15050_v46  ;;  %10425 = vmatprep.subr.bf16.mxu1 %v16346_v52  ;;  %v10429_v53 = vpack.c.bf16 %v7370_v6, %v7369_v37  ;;  %v6849_v28 = vrot.slane %v6842_v17, %v11210_v18  ;;  %v5825_v37 = vpop.f32.mrb[44].mxu0  ;;  %v15074_v6 = vld [vmem:[#allocation2 + $0x88] sm:$0xf] }
 0x2b6   : > { %v15065_v45 = vcombine.low %v15053_v10, %v15056_v12  ;;  %v6856_v41 = vrot.slane %v6409_v48, %v11210_v18  ;;  %v10602_v13 = vadd.f32 %v10601_v22, %v14545_v56  ;;  %v16728_v15 = vpack.c.bf16 %v14967_v21, %v14962_v14  ;;  %v5827_v14 = vpop.f32.mrb[45].mxu0 }
 0x2b7   : > { %v6858_v63 = vcombine.low %v6417_v8, %v6416_v62  ;;  %v6418_v59 = vcombine.high %v6416_v62, %v6416_v62  ;;  %v6419_v34 = vcombine.high %v6049_v3, %v6049_v3  ;;  %v6426_v19 = vrot.slane %v6049_v3, %v11210_v18 }
 0x2b8   : > { %10427 = vmatpush1.bf16.msra.mxu1 %v16728_v15  ;;  %7005 = vst [vmem:[#allocation2 + $0xa0] sm:$0xff] %v15065_v45  ;;  %v6857_v17 = vcombine.low %v6849_v28, %v6856_v41  ;;  %v6050_v48 = vmax.f32 %v10602_v13, 0.0  ;;  %v10603_v56 = vadd.f32 %v14556_v42, %v5825_v37  ;;  %v15085_v30 = vcombine.low %v15074_v6, %v14998_v31  ;;  %v5830_v37 = vpop.f32.mrb[46].mxu0 }
 0x2b9   : > { %10428 = vmatprep.subr.bf16.mxu1 %v16346_v52  ;;  %7847 = vmatmul.mubr.f32.gmra.mrb[74].mxu1 %v14971_v35  ;;  %v6433_v21 = vrot.slane %v6419_v34, %v11210_v18  ;;  %v6434_v8 = vcombine.high %v6426_v19, %v6426_v19  ;;  %v6859_v22 = vcombine.low %v6418_v59, %v6426_v19  ;;  %v15091_v59 = vld [vmem:[#allocation2 + $0x89] sm:$0xf] }
 0x2ba   : > { %7006 = vst [vmem:[#allocation2 + $0xa8] sm:$0x3f] %v6857_v17  ;;  %v6436_v62 = vcombine.high %v6050_v48, %v6050_v48  ;;  %v6443_v3 = vrot.slane %v6050_v48, %v11210_v18  ;;  %v10604_v15 = vadd.f32 %v10603_v56, %v14547_v32  ;;  %16729 = vst [vmem:[#allocation49_spill] sm:$0xff] %v15085_v30  ;;  %v5832_v48 = vpop.f32.mrb[47].mxu0 }
 0x2bb   : > { %v15088_v28 = vrot.slane %v6858_v63, %v11210_v18  ;;  %v6435_v41 = vcombine.high %v6433_v21, %v6433_v21  ;;  %v6873_v13 = vrot.slane %v6859_v22, %v11210_v18  ;;  %v6875_v34 = vcombine.low %v6434_v8, %v6433_v21  ;;  %v15093_v19 = vld [vmem:[#allocation2 + $0x91] sm:$0xff]  ;;  %v15100_v56 = vld [vmem:[#allocation2 + $0x99] sm:$0xf] }
 0x2bc   : > { %10430 = vmatpush1.bf16.msra.mxu1 %v10429_v53  ;;  %v6450_v32 = vrot.slane %v6436_v62, %v11210_v18  ;;  %v6451_v17 = vcombine.high %v6443_v3, %v6443_v3  ;;  %v6051_v31 = vmax.f32 %v10604_v15, 0.0  ;;  %v10605_v53 = vadd.f32 %v14556_v42, %v5830_v37  ;;  %v15098_v63 = vld [vmem:[#allocation2 + $0x98] sm:$0xf]  ;;  %16730 = vst [vmem:[#allocation39_spill] sm:$0xff] %v15100_v56 }
 0x2bd   : > { %10431 = vmatprep.subr.bf16.mxu1 %v16346_v52  ;;  %v15103_v14 = vcombine.low %v15088_v28, %v6873_v13  ;;  %v6882_v21 = vrot.slane %v6875_v34, %v11210_v18  ;;  %v6889_v8 = vrot.slane %v6435_v41, %v11210_v18  ;;  %v15109_v22 = vcombine.low %v15091_v59, %v15093_v19  ;;  %v5835_v41 = vpop.f32.mrb[48].mxu0 }
 0x2be   : > { %v6452_v62 = vcombine.high %v6450_v32, %v6450_v32  ;;  %v6891_v15 = vcombine.low %v6443_v3, %v6451_v17  ;;  %v6453_v5 = vcombine.high %v6051_v31, %v6051_v31  ;;  %v6460_v42 = vrot.slane %v6051_v31, %v11210_v18  ;;  %v5837_v31 = vpop.f32.mrb[49].mxu0 }
 0x2bf   : > { %16731 = vst [vmem:[#allocation45_spill] sm:$0xff] %v15109_v22  ;;  %v6890_v37 = vcombine.low %v6882_v21, %v6889_v8  ;;  %7007 = vst [vmem:[#allocation2 + $0xb0] sm:$0xff] %v15103_v14  ;;  %7851 = vmatprep.mubr.f32.mxu1 %v15109_v22  ;;  %v10606_v13 = vadd.f32 %v10605_v53, %v14549_v55  ;;  %v7266_v34 = vcombine.low %v15098_v63, %v15100_v56  ;;  %v11081_v53 = vld [vmem:[%s16072_s2] ss:$0 sm:$0xff] }
 0x2c0   : > { %v7262_v48 = vcombine.high %v15022_v16, %v15093_v19  ;;  %v6892_v50 = vcombine.low %v6450_v32, %v6452_v62  ;;  %v6467_v3 = vrot.slane %v6453_v5, %v11210_v18  ;;  %v6468_v17 = vcombine.high %v6460_v42, %v6460_v42  ;;  %7852 = vmatmul.mubr.f32.gmra.mrb[76].mxu1 %v15085_v30 }
 0x2c1   : > { %7008 = vst [vmem:[#allocation2 + $0xb8] sm:$0x3f] %v6890_v37  ;;  %v15122_v21 = vrot.slane %v6891_v15, %v11210_v18  ;;  %v6052_v8 = vmax.f32 %v10606_v13, 0.0  ;;  %v15125_v55 = vcombine.high %v15093_v19, %v7266_v34  ;;  %v10607_v22 = vadd.f32 %v11081_v53, %v5835_v41  ;;  %v15136_v37 = vld [vmem:[#allocation2 + $0xa1] sm:$0xff]  ;;  %v15152_v56 = vld [vmem:[#allocation2 + $0xa9] sm:$0xf] }
 0x2c2   : > { %v15131_v32 = vrot.slane %v6892_v50, %v11210_v18  ;;  %v6908_v5 = vcombine.low %v6460_v42, %v6468_v17  ;;  %v6469_v62 = vcombine.high %v6467_v3, %v6467_v3  ;;  %v15134_v31 = vcombine.low %v7262_v48, %v15098_v63 }
 0x2c3   : > { %16732 = vst [vmem:[#allocation55_spill] sm:$0xff] %v15125_v55  ;;  %v6470_v15 = vcombine.high %v6052_v8, %v6052_v8  ;;  %v6477_v13 = vrot.slane %v6052_v8, %v11210_v18  ;;  %7856 = vmatprep.mubr.f32.mxu1 %v15125_v55  ;;  %v10608_v34 = vadd.f32 %v10607_v22, %v14551_v60 }
 0x2c4   : > { %16733 = vst [vmem:[#allocation64_spill] sm:$0xff] %v15134_v31  ;;  %v15143_v41 = vcombine.low %v15122_v21, %v15131_v32  ;;  %v6915_v50 = vrot.slane %v6908_v5, %v11210_v18  ;;  %v6922_v42 = vrot.slane %v6467_v3, %v11210_v18  ;;  %7857 = vmatmul.mubr.f32.gmra.mrb[78].mxu1 %v15134_v31  ;;  %v15154_v5 = vld [vmem:[#allocation2 + $0xa8] sm:$0xf] }
 0x2c5   : > { %v6484_v48 = vrot.slane %v6470_v15, %v11210_v18  ;;  %v6485_v17 = vcombine.high %v6477_v13, %v6477_v13  ;;  %v6924_v53 = vcombine.low %v6469_v62, %v6477_v13  ;;  %v6053_v30 = vmax.f32 %v10608_v34, 0.0  ;;  %7861 = vmatprep.mubr.f32.mxu1 %v15136_v37 }
 0x2c6   : > { %7009 = vst [vmem:[#allocation2 + $0xc0] sm:$0xff] %v15143_v41  ;;  %v6923_v60 = vcombine.low %v6915_v50, %v6922_v42 }
 0x2c7   : > { %v6925_v22 = vcombine.low %v6485_v17, %v6484_v48  ;;  %v6486_v8 = vcombine.high %v6484_v48, %v6484_v48  ;;  %v6493_v55 = vrot.slane %v6053_v30, %v11210_v18  ;;  %v15157_v3 = vrot.slane %v6924_v53, %v11210_v18 }
 0x2c8   : > { %7010 = vst [vmem:[#allocation2 + $0xc8] sm:$0x3f] %v6923_v60  ;;  %7862 = vmatmul.mubr.f32.gmra.mrb[80].mxu1 %v15065_v45  ;;  %v15160_v62 = vld [vmem:[#allocation2 + $0xb1] sm:$0xff]  ;;  %v15164_v13 = vld [vmem:[#allocation2 + $0xb9] sm:$0xf]  ;;  %v15173_v48 = vcombine.low %v15154_v5, %v15088_v28 }
 0x2c9   : > { %16734 = vst [vmem:[#allocation65_spill] sm:$0xff] %v15157_v3  ;;  %v15162_v15 = vld [vmem:[#allocation2 + $0xb8] sm:$0xf]  ;;  %v6939_v34 = vrot.slane %v6925_v22, %v11210_v18  ;;  %v6494_v50 = vcombine.high %v6493_v55, %v6493_v55  ;;  %v6941_v30 = vcombine.low %v6486_v8, %v6493_v55  ;;  %v15169_v42 = vcombine.low %v15152_v56, %v15160_v62 }
 0x2ca   : > { %16736 = vst [vmem:[#allocation83_spill] sm:$0xff] %v15173_v48  ;;  %v7286_v17 = vcombine.low %v15162_v15, %v15164_v13  ;;  %v7282_v53 = vcombine.high %v15103_v14, %v15160_v62 }
 0x2cb   : > { %16735 = vst [vmem:[#allocation66_spill] sm:$0xff] %v15169_v42  ;;  %v15180_v60 = vcombine.low %v15157_v3, %v6939_v34  ;;  %v6948_v22 = vrot.slane %v6941_v30, %v11210_v18  ;;  %v6955_v55 = vrot.slane %v6494_v50, %v11210_v18  ;;  %7866 = vmatprep.mubr.f32.mxu1 %v15169_v42  ;;  %v7371_v34 = vld [vmem:[%s16073_s3 + $0x200] sm:$0xff]  ;;  %v7372_v50 = vld [vmem:[%s16073_s3 + $0x208] sm:$0xff]  ;;  %v11082_v30 = vld [vmem:[#allocation2 + $0x10] sm:$0xff] }
 0x2cc   : > { %7867 = vmatmul.mubr.f32.gmra.mrb[82].mxu1 %v15173_v48  ;;  %v15187_v28 = vcombine.high %v15160_v62, %v7286_v17  ;;  %v15192_v31 = vcombine.low %v7282_v53, %v15162_v15  ;;  %v10432_v17 = vpack.c.bf16 %v7372_v50, %v7371_v34  ;;  %v7373_v53 = vld [vmem:[%s16073_s3 + $0x210] sm:$0xff]  ;;  %v7374_v18 = vld [vmem:[%s16073_s3 + $0x218] sm:$0xff]  ;;  %v7070_v50 = vld [vmem:[#allocation2 + $0xa] sm:$0xf] }
 0x2cd   : > { %16737 = vst [vmem:[#allocation86_spill] sm:$0xff] %v15180_v60  ;;  %7011 = vst [vmem:[#allocation2 + $0xd0] sm:$0xff] %v15180_v60  ;;  %v6956_v8 = vcombine.low %v6948_v22, %v6955_v55  ;;  %v15201_v22 = vld [vmem:[#allocation2 + $0x42] sm:$0xff]  ;;  %v15203_v55 = vld [vmem:[#allocation2 + $0x1a] sm:$0xf] }
 0x2ce   : > { %16738 = vst [vmem:[#allocation80_spill] sm:$0xff] %v15187_v28  ;;  %7871 = vmatprep.mubr.f32.mxu1 %v15187_v28  ;;  %16739 = vst [vmem:[#allocation79_spill] sm:$0xff] %v15192_v31  ;;  %v7069_v60 = vld [vmem:[#allocation2 + $0x2] sm:$0xff]  ;;  %v7220_v34 = vcombine.high %v14818_v40, %v15201_v22  ;;  %v10435_v28 = vpack.c.bf16 %v7374_v18, %v7373_v53 }
 0x2cf   : > { %7012 = vst [vmem:[#allocation2 + $0xd8] sm:$0x3f] %v6956_v8  ;;  %v11102_v8 = vcombine.low %v14679_v1, %v14623_v4  ;;  %v15219_v48 = vld [vmem:[#allocation2 + $0x82] sm:$0xff] }
 0x2d0   : > { %7872 = vmatmul.mubr.f32.gmra.mrb[84].mxu1 %v15192_v31  ;;  %v15213_v31 = vld [vmem:[#allocation2 + $0x12] sm:$0xff]  ;;  %v7375_v1 = vld [vmem:[%s16073_s3 + $0x220] sm:$0xff]  ;;  %v7376_v40 = vld [vmem:[%s16073_s3 + $0x228] sm:$0xff] }
 0x2d1   : > { %7941 = vmatprep.mubr.f32.mxu1 %v11082_v30  ;;  %v15215_v30 = vld [vmem:[#allocation2 + $0x62] sm:$0xff]  ;;  %v9729_v42 = vcombine.low %v7070_v50, %v15213_v31  ;;  %v7197_v4 = vcombine.high %v15213_v31, %v14645_v11  ;;  %v10438_v50 = vpack.c.bf16 %v7376_v40, %v7375_v1 }
 0x2d2   : > { %v7240_v18 = vcombine.high %v14943_v58, %v15215_v30  ;;  %v15238_v53 = vld [vmem:[#allocation2 + $0xa2] sm:$0xff] }
 0x2d4   : > { %7942 = vmatmul.mubr.f32.vlgmr.msra.gmra.mrb[50].mxu1 %v7069_v60  ;;  %v15232_v60 = vcombine.low %v7220_v34, %v14887_v0  ;;  %v15241_v11 = vcombine.low %v7240_v18, %v14990_v2  ;;  %v9737_v34 = vcombine.low %v7197_v4, %v15203_v55 }
 0x2d5   : > { %7946 = vmatprep.mubr.f32.mxu1 %v11102_v8  ;;  %10433 = vmatpush1.bf16.msra.mxu1 %v10432_v17  ;;  %v11103_v17 = vcombine.low %v14626_v57, %v14742_v29  ;;  %v7260_v8 = vcombine.high %v15050_v46, %v15219_v48  ;;  %v7377_v57 = vld [vmem:[%s16073_s3 + $0x230] sm:$0xff]  ;;  %v7378_v29 = vld [vmem:[%s16073_s3 + $0x238] sm:$0xff] }
 0x2d6   : > { %10434 = vmatprep.subr.bf16.mxu1 %v16346_v52  ;;  %v10441_v4 = vpack.c.bf16 %v7378_v29, %v7377_v57  ;;  %v15279_v57 = vld [vmem:[#allocation2 + $0x32] sm:$0xff]  ;;  %v15282_v29 = vld [vmem:[#allocation2 + $0x2a] sm:$0xf] }
 0x2d7   : > { %v15256_v18 = vcombine.low %v7260_v8, %v15091_v59  ;;  %v7379_v8 = vld [vmem:[%s16073_s3 + $0x240] sm:$0xff]  ;;  %v15286_v40 = vcombine.low %v15282_v29, %v15279_v57  ;;  %v7218_v3 = vcombine.high %v15279_v57, %v14738_v54 }
 0x2d8   : > { %7947 = vmatmul.mubr.f32.gmra.mrb[52].mxu1 %v9729_v42  ;;  %v15253_v42 = vld [vmem:[#allocation2 + $0xc8] sm:$0xf]  ;;  %v7383_v54 = vld [vmem:[%s16073_s3 + $0x260] sm:$0xff] }
 0x2d9   : > { %7951 = vmatprep.mubr.f32.mxu1 %v11103_v17  ;;  %10436 = vmatpush1.bf16.msra.mxu1 %v10435_v28  ;;  %v7280_v28 = vcombine.high %v15136_v37, %v15238_v53  ;;  %v15267_v17 = vld [vmem:[#allocation2 + $0x3a] sm:$0xf] }
 0x2da   : > { %10437 = vmatprep.subr.bf16.mxu1 %v16346_v52 }
 0x2db   : > { %v15262_v1 = vcombine.low %v7280_v28, %v15152_v56 }
 0x2dc   : > { %7952 = vmatmul.mubr.f32.gmra.mrb[54].mxu1 %v9737_v34  ;;  %v11105_v34 = vcombine.low %v14766_v7, %v14705_v51  ;;  %v7381_v51 = vld [vmem:[%s16073_s3 + $0x250] sm:$0xff]  ;;  %v7382_v7 = vld [vmem:[%s16073_s3 + $0x258] sm:$0xff] }
 0x2dd   : > { %7956 = vmatprep.mubr.f32.mxu1 %v14682_v23  ;;  %10439 = vmatpush1.bf16.msra.mxu1 %v10438_v50  ;;  %v7380_v23 = vld [vmem:[%s16073_s3 + $0x248] sm:$0xff] }
 0x2de   : > { %10440 = vmatprep.subr.bf16.mxu1 %v16346_v52  ;;  %v15275_v50 = vld [vmem:[#allocation2 + $0x22] sm:$0xff]  ;;  %v10444_v28 = vpack.c.bf16 %v7380_v23, %v7379_v8  ;;  %v10447_v8 = vpack.c.bf16 %v7382_v7, %v7381_v51  ;;  %v9749_v23 = vcombine.low %v7218_v3, %v15267_v17  ;;  %v7385_v3 = vld [vmem:[%s16073_s3 + $0x270] sm:$0xff]  ;;  %v11107_v51 = vcombine.low %v14894_v20, %v14823_v49 }
 0x2df   : > { %v15320_v7 = vld [vmem:[#allocation2 + $0x52] sm:$0xff]  ;;  %v7387_v49 = vld [vmem:[%s16073_s3 + $0x280] sm:$0xff]  ;;  %v7388_v20 = vld [vmem:[%s16073_s3 + $0x288] sm:$0xff] }
 0x2e0   : > { %7957 = vmatmul.mubr.f32.gmra.mrb[56].mxu1 %v15275_v50 }
 0x2e1   : > { %7961 = vmatprep.mubr.f32.mxu1 %v11105_v34  ;;  %10442 = vmatpush1.bf16.msra.mxu1 %v10441_v4  ;;  %v11106_v4 = vcombine.low %v14710_v44, %v14866_v33  ;;  %v7384_v34 = vld [vmem:[%s16073_s3 + $0x268] sm:$0xff]  ;;  %v15310_v33 = vld [vmem:[#allocation2 + $0x5a] sm:$0xf] }
 0x2e2   : > { %10443 = vmatprep.subr.bf16.mxu1 %v16346_v52  ;;  %v10450_v44 = vpack.c.bf16 %v7384_v34, %v7383_v54  ;;  %v11108_v54 = vcombine.low %v14826_v24, %v14976_v61  ;;  %v10456_v34 = vpack.c.bf16 %v7388_v20, %v7387_v49  ;;  %v15350_v61 = vld [vmem:[#allocation2 + $0x7a] sm:$0xf] }
 0x2e4   : > { %7962 = vmatmul.mubr.f32.gmra.mrb[58].mxu1 %v15286_v40 }
 0x2e5   : > { %7966 = vmatprep.mubr.f32.mxu1 %v11106_v4  ;;  %10445 = vmatpush1.bf16.msra.mxu1 %v10444_v28  ;;  %v7386_v28 = vld [vmem:[%s16073_s3 + $0x278] sm:$0xff] }
 0x2e6   : > { %10446 = vmatprep.subr.bf16.mxu1 %v16346_v52  ;;  %v10453_v4 = vpack.c.bf16 %v7386_v28, %v7385_v3  ;;  %v7390_v3 = vld [vmem:[%s16073_s3 + $0x298] sm:$0xff]  ;;  %v7391_v28 = vld [vmem:[%s16073_s3 + $0x2a0] sm:$0xff] }
 0x2e8   : > { %7967 = vmatmul.mubr.f32.gmra.mrb[60].mxu1 %v9749_v23  ;;  %v7238_v23 = vcombine.high %v15320_v7, %v14847_v27 }
 0x2e9   : > { %7971 = vmatprep.mubr.f32.mxu1 %v14778_v36  ;;  %10448 = vmatpush1.bf16.msra.mxu1 %v10447_v8  ;;  %v15323_v36 = vld [vmem:[#allocation2 + $0x4a] sm:$0xf] }
 0x2ea   : > { %10449 = vmatprep.subr.bf16.mxu1 %v16346_v52  ;;  %v15327_v8 = vcombine.low %v15323_v36, %v15320_v7  ;;  %v9761_v27 = vcombine.low %v7238_v23, %v15310_v33  ;;  %v15361_v23 = vld [vmem:[#allocation2 + $0x72] sm:$0xff] }
 0x2ec   : > { %7972 = vmatmul.mubr.f32.gmra.mrb[62].mxu1 %v15201_v22 }
 0x2ed   : > { %7976 = vmatprep.mubr.f32.mxu1 %v11107_v51  ;;  %10451 = vmatpush1.bf16.msra.mxu1 %v10450_v44  ;;  %v7389_v44 = vld [vmem:[%s16073_s3 + $0x290] sm:$0xff]  ;;  %v7392_v51 = vld [vmem:[%s16073_s3 + $0x2a8] sm:$0xff] }
 0x2ee   : > { %10452 = vmatprep.subr.bf16.mxu1 %v16346_v52  ;;  %v10459_v24 = vpack.c.bf16 %v7390_v3, %v7389_v44  ;;  %v10462_v49 = vpack.c.bf16 %v7392_v51, %v7391_v28  ;;  %v7395_v44 = vld [vmem:[%s16073_s3 + $0x2c0] sm:$0xff]  ;;  %v7396_v3 = vld [vmem:[%s16073_s3 + $0x2c8] sm:$0xff]  ;;  %v7398_v28 = vld [vmem:[%s16073_s3 + $0x2d8] sm:$0xff]  ;;  %v11111_v51 = vcombine.low %v15098_v63, %v15053_v10 }
 0x2ef   : > { %v7399_v10 = vld [vmem:[%s16073_s3 + $0x2e0] sm:$0xff]  ;;  %v7400_v63 = vld [vmem:[%s16073_s3 + $0x2e8] sm:$0xff] }
 0x2f0   : > { %7977 = vmatmul.mubr.f32.gmra.mrb[64].mxu1 %v15327_v8 }
 0x2f1   : > { %7981 = vmatprep.mubr.f32.mxu1 %v11108_v54  ;;  %10454 = vmatpush1.bf16.msra.mxu1 %v10453_v4  ;;  %v11109_v4 = vcombine.low %v15005_v39, %v14930_v38  ;;  %v7258_v54 = vcombine.high %v15361_v23, %v14971_v35  ;;  %v7393_v38 = vld [vmem:[%s16073_s3 + $0x2b0] sm:$0xff]  ;;  %v7394_v39 = vld [vmem:[%s16073_s3 + $0x2b8] sm:$0xff] }
 0x2f2   : > { %10455 = vmatprep.subr.bf16.mxu1 %v16346_v52 }
 0x2f3   : > { %v9773_v35 = vcombine.low %v7258_v54, %v15350_v61 }
 0x2f4   : > { %7982 = vmatmul.mubr.f32.gmra.mrb[66].mxu1 %v9761_v27  ;;  %v10465_v27 = vpack.c.bf16 %v7394_v39, %v7393_v38  ;;  %v11112_v39 = vcombine.low %v15056_v12, %v15154_v5  ;;  %v15432_v5 = vld [vmem:[#allocation2 + $0xba] sm:$0xf] }
 0x2f5   : > { %7986 = vmatprep.mubr.f32.mxu1 %v14899_v43  ;;  %10457 = vmatpush1.bf16.msra.mxu1 %v10456_v34  ;;  %v15364_v43 = vld [vmem:[#allocation2 + $0x6a] sm:$0xf]  ;;  %v11110_v34 = vcombine.low %v14938_v26, %v15074_v6  ;;  %v10468_v26 = vpack.c.bf16 %v7396_v3, %v7395_v44  ;;  %v15391_v6 = vld [vmem:[#allocation2 + $0x9a] sm:$0xf]  ;;  %v11113_v3 = vcombine.low %v15162_v15, %v15122_v21 }
 0x2f6   : > { %10458 = vmatprep.subr.bf16.mxu1 %v16346_v52  ;;  %v15368_v20 = vcombine.low %v15364_v43, %v15361_v23  ;;  %v7402_v44 = vld [vmem:[%s16073_s3 + $0x2f8] sm:$0xff]  ;;  %v11114_v21 = vcombine.low %v15131_v32, %v15253_v42  ;;  %v7405_v32 = vld [vmem:[%s16073_s3 + $0x310] sm:$0xff] }
 0x2f8   : > { %7987 = vmatmul.mubr.f32.gmra.mrb[68].mxu1 %v15215_v30 }
 0x2f9   : > { %7991 = vmatprep.mubr.f32.mxu1 %v11109_v4  ;;  %10460 = vmatpush1.bf16.msra.mxu1 %v10459_v24  ;;  %v7397_v24 = vld [vmem:[%s16073_s3 + $0x2d0] sm:$0xff] }
 0x2fa   : > { %10461 = vmatprep.subr.bf16.mxu1 %v16346_v52  ;;  %v15402_v4 = vld [vmem:[#allocation2 + $0x92] sm:$0xff] }
 0x2fb   : > { %v7278_v38 = vcombine.high %v15402_v4, %v15065_v45 }
 0x2fc   : > { %7992 = vmatmul.mubr.f32.gmra.mrb[70].mxu1 %v15368_v20 }
 0x2fd   : > { %7996 = vmatprep.mubr.f32.mxu1 %v11110_v34  ;;  %10463 = vmatpush1.bf16.msra.mxu1 %v10462_v49  ;;  %v10471_v49 = vpack.c.bf16 %v7398_v28, %v7397_v24  ;;  %v10474_v34 = vpack.c.bf16 %v7400_v63, %v7399_v10  ;;  %v15440_v24 = vld [vmem:[#allocation2 + $0xaa] sm:$0xf]  ;;  %v7406_v10 = vld [vmem:[%s16073_s3 + $0x318] sm:$0xff]  ;;  %v9732_v63 = vcombine.low %v15203_v55, %v15275_v50  ;;  %v7407_v55 = vld [vmem:[%s16073_s3 + $0x320] sm:$0xff] }
 0x2fe   : > { %10464 = vmatprep.subr.bf16.mxu1 %v16346_v52 }
 0x300   : > { %7997 = vmatmul.mubr.f32.gmra.mrb[72].mxu1 %v9773_v35  ;;  %v7401_v35 = vld [vmem:[%s16073_s3 + $0x2f0] sm:$0xff] }
 0x301   : > { %8001 = vmatprep.mubr.f32.mxu1 %v15022_v16  ;;  %10466 = vmatpush1.bf16.msra.mxu1 %v10465_v27  ;;  %v15405_v16 = vld [vmem:[#allocation2 + $0x8a] sm:$0xf]  ;;  %v9785_v27 = vcombine.low %v7278_v38, %v15391_v6  ;;  %v10477_v12 = vpack.c.bf16 %v7402_v44, %v7401_v35  ;;  %v11085_v35 = vld [vmem:[#allocation2 + $0x19] sm:$0xf]  ;;  %v15469_v44 = vld [vmem:[#allocation2 + $0x21] sm:$0xff] }
 0x302   : > { %10467 = vmatprep.subr.bf16.mxu1 %v16346_v52  ;;  %v15409_v54 = vcombine.low %v15405_v16, %v15402_v4 }
 0x304   : > { %8002 = vmatmul.mubr.f32.gmra.mrb[74].mxu1 %v15219_v48 }
 0x305   : > { %8006 = vmatprep.mubr.f32.mxu1 %v11111_v51  ;;  %10469 = vmatpush1.bf16.msra.mxu1 %v10468_v26  ;;  %v15437_v26 = vld [vmem:[#allocation2 + $0xb2] sm:$0xff]  ;;  %v7403_v51 = vld [vmem:[%s16073_s3 + $0x300] sm:$0xff] }
 0x306   : > { %10470 = vmatprep.subr.bf16.mxu1 %v16346_v52  ;;  %v7298_v28 = vcombine.high %v15437_v26, %v15143_v41 }
 0x308   : > { %8007 = vmatmul.mubr.f32.gmra.mrb[76].mxu1 %v15409_v54  ;;  %v9797_v15 = vcombine.low %v7298_v28, %v15432_v5 }
 0x309   : > { %8011 = vmatprep.mubr.f32.mxu1 %v11112_v39  ;;  %10472 = vmatpush1.bf16.msra.mxu1 %v10471_v49  ;;  %v7404_v49 = vld [vmem:[%s16073_s3 + $0x308] sm:$0xff] }
 0x30a   : > { %10473 = vmatprep.subr.bf16.mxu1 %v16346_v52  ;;  %v10480_v38 = vpack.c.bf16 %v7404_v49, %v7403_v51  ;;  %v11083_v39 = vld [vmem:[#allocation2 + $0x29] sm:$0xf]  ;;  %v7409_v51 = vld [vmem:[%s16073_s3 + $0x330] sm:$0xff]  ;;  %v7410_v49 = vld [vmem:[%s16073_s3 + $0x338] sm:$0xff] }
 0x30c   : > { %8012 = vmatmul.mubr.f32.gmra.mrb[78].mxu1 %v9785_v27  ;;  %v11084_v27 = vld [vmem:[#allocation2 + $0x11] sm:$0xff] }
 0x30d   : > { %8016 = vmatprep.mubr.f32.mxu1 %v15103_v14  ;;  %10475 = vmatpush1.bf16.msra.mxu1 %v10474_v34  ;;  %v15444_v14 = vcombine.low %v15440_v24, %v15437_v26  ;;  %v7205_v34 = vcombine.low %v11083_v39, %v15282_v29  ;;  %v7408_v29 = vld [vmem:[%s16073_s3 + $0x328] sm:$0xff] }
 0x30e   : > { %10476 = vmatprep.subr.bf16.mxu1 %v16346_v52 }
 0x30f   : > { %v9740_v28 = vcombine.high %v15275_v50, %v7205_v34  ;;  %v11087_v34 = vld [vmem:[#allocation2 + $0x31] sm:$0xff] }
 0x310   : > { %8017 = vmatmul.mubr.f32.gmra.mrb[80].mxu1 %v15238_v53 }
 0x311   : > { %8021 = vmatprep.mubr.f32.mxu1 %v11113_v3  ;;  %10478 = vmatpush1.bf16.msra.mxu1 %v10477_v12  ;;  %v9731_v12 = vcombine.low %v11085_v35, %v15469_v44  ;;  %v7199_v3 = vcombine.high %v15469_v44, %v15275_v50  ;;  %v15501_v35 = vld [vmem:[#allocation2 + $0x41] sm:$0xff] }
 0x312   : > { %10479 = vmatprep.subr.bf16.mxu1 %v16346_v52 }
 0x314   : > { %8022 = vmatmul.mubr.f32.gmra.mrb[82].mxu1 %v15444_v14 }
 0x315   : > { %8026 = vmatprep.mubr.f32.mxu1 %v11114_v21  ;;  %v10486_v21 = vpack.c.bf16 %v7408_v29, %v7407_v55  ;;  %v7415_v29 = vld [vmem:[%s16073_s3 + $0x360] sm:$0xff] }
 0x318   : > { %8027 = vmatmul.mubr.f32.gmra.mrb[84].mxu1 %v9797_v15  ;;  %v9739_v15 = vcombine.low %v7199_v3, %v11083_v39  ;;  %v7225_v39 = vcombine.low %v14887_v0, %v15323_v36  ;;  %v7413_v3 = vld [vmem:[%s16073_s3 + $0x350] sm:$0xff]  ;;  %v7414_v0 = vld [vmem:[%s16073_s3 + $0x358] sm:$0xff] }
 0x319   : > { %8096 = vmatprep.mubr.f32.mxu1 %v15213_v31  ;;  %v10483_v31 = vpack.c.bf16 %v7406_v10, %v7405_v32  ;;  %v7411_v32 = vld [vmem:[%s16073_s3 + $0x340] sm:$0xff]  ;;  %v7412_v10 = vld [vmem:[%s16073_s3 + $0x348] sm:$0xff]  ;;  %v10495_v55 = vpack.c.bf16 %v7414_v0, %v7413_v3  ;;  %v7425_v0 = vld [vmem:[%s16073_s3 + $0x3b0] sm:$0xff] }
 0x31a   : > { %v9752_v36 = vcombine.high %v15201_v22, %v7225_v39  ;;  %v7423_v39 = vld [vmem:[%s16073_s3 + $0x3a0] sm:$0xff] }
 0x31c   : > { %8097 = vmatmul.mubr.f32.vlgmr.msra.gmra.mrb[50].mxu1 %v11084_v27  ;;  %v10492_v27 = vpack.c.bf16 %v7412_v10, %v7411_v32  ;;  %v9757_v32 = vcombine.low %v14896_v9, %v14943_v58  ;;  %v7419_v10 = vld [vmem:[%s16073_s3 + $0x380] sm:$0xff]  ;;  %v7421_v9 = vld [vmem:[%s16073_s3 + $0x390] sm:$0xff]  ;;  %v7422_v58 = vld [vmem:[%s16073_s3 + $0x398] sm:$0xff] }
 0x31d   : > { %8101 = vmatprep.mubr.f32.mxu1 %v9732_v63  ;;  %10481 = vmatpush1.bf16.msra.mxu1 %v10480_v38  ;;  %v10489_v38 = vpack.c.bf16 %v7410_v49, %v7409_v51  ;;  %v9746_v63 = vcombine.low %v15267_v17, %v15201_v22  ;;  %v7418_v51 = vld [vmem:[%s16073_s3 + $0x378] sm:$0xff]  ;;  %v9758_v49 = vcombine.low %v15310_v33, %v15215_v30 }
 0x31e   : > { %10482 = vmatprep.subr.bf16.mxu1 %v16346_v52 }
 0x320   : > { %8102 = vmatmul.mubr.f32.gmra.mrb[52].mxu1 %v9731_v12 }
 0x321   : > { %8106 = vmatprep.mubr.f32.mxu1 %v9740_v28  ;;  %10484 = vmatpush1.bf16.msra.mxu1 %v10483_v31  ;;  %v11088_v31 = vld [vmem:[#allocation2 + $0x39] sm:$0xf]  ;;  %v7416_v28 = vld [vmem:[%s16073_s3 + $0x368] sm:$0xff] }
 0x322   : > { %10485 = vmatprep.subr.bf16.mxu1 %v16346_v52  ;;  %v9745_v12 = vcombine.low %v11088_v31, %v15501_v35 }
 0x324   : > { %8107 = vmatmul.mubr.f32.gmra.mrb[54].mxu1 %v9739_v15  ;;  %v7417_v15 = vld [vmem:[%s16073_s3 + $0x370] sm:$0xff] }
 0x325   : > { %8111 = vmatprep.mubr.f32.mxu1 %v15279_v57  ;;  %10487 = vmatpush1.bf16.msra.mxu1 %v10486_v21  ;;  %v10498_v21 = vpack.c.bf16 %v7416_v28, %v7415_v29  ;;  %v7429_v29 = vld [vmem:[%s16073_s3 + $0x3d0] sm:$0xff]  ;;  %v7430_v28 = vld [vmem:[%s16073_s3 + $0x3d8] sm:$0xff] }
 0x326   : > { %10488 = vmatprep.subr.bf16.mxu1 %v16346_v52 }
 0x328   : > { %8112 = vmatmul.mubr.f32.gmra.mrb[56].mxu1 %v11087_v34  ;;  %v7424_v34 = vld [vmem:[%s16073_s3 + $0x3a8] sm:$0xff] }
 0x329   : > { %8116 = vmatprep.mubr.f32.mxu1 %v9746_v63  ;;  %10490 = vmatpush1.bf16.msra.mxu1 %v10489_v38  ;;  %v10501_v38 = vpack.c.bf16 %v7418_v51, %v7417_v15  ;;  %v7420_v63 = vld [vmem:[%s16073_s3 + $0x388] sm:$0xff]  ;;  %v10510_v31 = vpack.c.bf16 %v7424_v34, %v7423_v39  ;;  %v10519_v15 = vpack.c.bf16 %v7430_v28, %v7429_v29  ;;  %v16741_v51 = vld [vmem:[#allocation39_spill] sm:$0xff] }
 0x32a   : > { %10491 = vmatprep.subr.bf16.mxu1 %v16346_v52  ;;  %v15629_v34 = vld [vmem:[#allocation2 + $0xc1] sm:$0xff] }
 0x32b   : > { %v7443_v28 = vld [vmem:[%s16073_s3 + $0x440] sm:$0xff] }
 0x32c   : > { %8117 = vmatmul.mubr.f32.gmra.mrb[58].mxu1 %v9745_v12  ;;  %v16740_v12 = vld [vmem:[#allocation36_spill] sm:$0xff] }
 0x32d   : > { %8121 = vmatprep.mubr.f32.mxu1 %v9752_v36  ;;  %10493 = vmatpush1.bf16.msra.mxu1 %v10492_v27  ;;  %v9770_v27 = vcombine.low %v15350_v61, %v15219_v48  ;;  %v9769_v3 = vcombine.low %v16740_v12, %v15050_v46  ;;  %v7426_v36 = vld [vmem:[%s16073_s3 + $0x3b8] sm:$0xff]  ;;  %v7427_v46 = vld [vmem:[%s16073_s3 + $0x3c0] sm:$0xff]  ;;  %v7437_v12 = vld [vmem:[%s16073_s3 + $0x410] sm:$0xff] }
 0x32e   : > { %10494 = vmatprep.subr.bf16.mxu1 %v16346_v52 }
 0x330   : > { %8122 = vmatmul.mubr.f32.gmra.mrb[60].mxu1 %v15232_v60  ;;  %v7245_v60 = vcombine.low %v14990_v2, %v15364_v43  ;;  %v10507_v43 = vpack.c.bf16 %v7422_v58, %v7421_v9  ;;  %v15623_v9 = vld [vmem:[#allocation2 + $0xca] sm:$0xf] }
 0x331   : > { %8126 = vmatprep.mubr.f32.mxu1 %v15320_v7  ;;  %10496 = vmatpush1.bf16.msra.mxu1 %v10495_v55 }
 0x332   : > { %10497 = vmatprep.subr.bf16.mxu1 %v16346_v52  ;;  %v9764_v2 = vcombine.high %v15215_v30, %v7245_v60  ;;  %v7431_v60 = vld [vmem:[%s16073_s3 + $0x3e0] sm:$0xff] }
 0x334   : > { %8127 = vmatmul.mubr.f32.gmra.mrb[62].mxu1 %v14889_v25  ;;  %v10504_v25 = vpack.c.bf16 %v7420_v63, %v7419_v10  ;;  %v7435_v10 = vld [vmem:[%s16073_s3 + $0x400] sm:$0xff]  ;;  %v7436_v63 = vld [vmem:[%s16073_s3 + $0x408] sm:$0xff] }
 0x335   : > { %8131 = vmatprep.mubr.f32.mxu1 %v9758_v49  ;;  %10499 = vmatpush1.bf16.msra.mxu1 %v10498_v21  ;;  %v9782_v21 = vcombine.low %v15391_v6, %v15238_v53  ;;  %v9781_v49 = vcombine.low %v16741_v51, %v15136_v37  ;;  %v7445_v51 = vld [vmem:[%s16073_s3 + $0x450] sm:$0xff] }
 0x336   : > { %10500 = vmatprep.subr.bf16.mxu1 %v16346_v52 }
 0x338   : > { %8132 = vmatmul.mubr.f32.gmra.mrb[64].mxu1 %v9757_v32  ;;  %v7434_v32 = vld [vmem:[%s16073_s3 + $0x3f8] sm:$0xff] }
 0x339   : > { %8136 = vmatprep.mubr.f32.mxu1 %v9764_v2  ;;  %10502 = vmatpush1.bf16.msra.mxu1 %v10501_v38  ;;  %v7432_v38 = vld [vmem:[%s16073_s3 + $0x3e8] sm:$0xff] }
 0x33a   : > { %10503 = vmatprep.subr.bf16.mxu1 %v16346_v52  ;;  %v15619_v2 = vld [vmem:[#allocation2 + $0xc2] sm:$0xff] }
 0x33b   : > { %v9794_v39 = vcombine.low %v15432_v5, %v15619_v2 }
 0x33c   : > { %8137 = vmatmul.mubr.f32.gmra.mrb[66].mxu1 %v15241_v11  ;;  %v7265_v11 = vcombine.low %v15091_v59, %v15405_v16  ;;  %v7428_v16 = vld [vmem:[%s16073_s3 + $0x3c8] sm:$0xff] }
 0x33d   : > { %8141 = vmatprep.mubr.f32.mxu1 %v15361_v23  ;;  %10505 = vmatpush1.bf16.msra.mxu1 %v10504_v25  ;;  %v10516_v55 = vpack.c.bf16 %v7428_v16, %v7427_v46  ;;  %v15621_v25 = vld [vmem:[#allocation2 + $0xc9] sm:$0xf]  ;;  %v7442_v46 = vld [vmem:[%s16073_s3 + $0x438] sm:$0xff] }
 0x33e   : > { %10506 = vmatprep.subr.bf16.mxu1 %v16346_v52  ;;  %v9776_v59 = vcombine.high %v15219_v48, %v7265_v11  ;;  %v7300_v11 = vcombine.high %v15629_v34, %v15619_v2  ;;  %v16743_v16 = vld [vmem:[#allocation82_spill] sm:$0xff] }
 0x340   : > { %8142 = vmatmul.mubr.f32.gmra.mrb[68].mxu1 %v15003_v47  ;;  %v10513_v47 = vpack.c.bf16 %v7426_v36, %v7425_v0  ;;  %v7440_v0 = vld [vmem:[%s16073_s3 + $0x428] sm:$0xff]  ;;  %v11090_v36 = vld [vmem:[#allocation2 + $0x20] sm:$0xff] }
 0x341   : > { %8146 = vmatprep.mubr.f32.mxu1 %v9770_v27  ;;  %10508 = vmatpush1.bf16.msra.mxu1 %v10507_v43  ;;  %v10527_v43 = vpack.c.bf16 %v7436_v63, %v7435_v10  ;;  %v9793_v27 = vcombine.low %v15164_v13, %v15629_v34  ;;  %v7449_v63 = vld [vmem:[%s16073_s3 + $0x470] sm:$0xff] }
 0x342   : > { %10509 = vmatprep.subr.bf16.mxu1 %v16346_v52 }
 0x344   : > { %8147 = vmatmul.mubr.f32.gmra.mrb[70].mxu1 %v9769_v3  ;;  %v7439_v3 = vld [vmem:[%s16073_s3 + $0x420] sm:$0xff] }
 0x345   : > { %8151 = vmatprep.mubr.f32.mxu1 %v9776_v59  ;;  %10511 = vmatpush1.bf16.msra.mxu1 %v10510_v31  ;;  %v9799_v31 = vcombine.low %v7300_v11, %v15621_v25  ;;  %v16742_v59 = vld [vmem:[#allocation29_spill] sm:$0xff]  ;;  %v16750_v11 = vld [vmem:[#allocation43_spill] sm:$0xff] }
 0x346   : > { %10512 = vmatprep.subr.bf16.mxu1 %v16346_v52 }
 0x348   : > { %8152 = vmatmul.mubr.f32.gmra.mrb[72].mxu1 %v15256_v18  ;;  %v7285_v18 = vcombine.low %v15152_v56, %v15440_v24  ;;  %v7433_v24 = vld [vmem:[%s16073_s3 + $0x3f0] sm:$0xff] }
 0x349   : > { %8156 = vmatprep.mubr.f32.mxu1 %v15402_v4  ;;  %10514 = vmatpush1.bf16.msra.mxu1 %v10513_v47  ;;  %v10525_v58 = vpack.c.bf16 %v7434_v32, %v7433_v24  ;;  %v10535_v47 = vpack.c.bf16 %v7440_v0, %v7439_v3  ;;  %v16747_v24 = vld [vmem:[#allocation85_spill] sm:$0xff] }
 0x34a   : > { %10515 = vmatprep.subr.bf16.mxu1 %v16346_v52  ;;  %v9788_v56 = vcombine.high %v15238_v53, %v7285_v18  ;;  %v16745_v18 = vld [vmem:[#allocation87_spill] sm:$0xff]  ;;  %v16748_v32 = vld [vmem:[#allocation41_spill] sm:$0xff] }
 0x34b   : > { %v16754_v3 = vld [vmem:[#allocation45_spill] sm:$0xff] }
 0x34c   : > { %8157 = vmatmul.mubr.f32.gmra.mrb[74].mxu1 %v15093_v19  ;;  %v10522_v19 = vpack.c.bf16 %v7432_v38, %v7431_v60  ;;  %v11091_v60 = vld [vmem:[#allocation2 + $0x40] sm:$0xff]  ;;  %v16746_v38 = vld [vmem:[#allocation88_spill] sm:$0xff]  ;;  %v16755_v0 = vld [vmem:[#allocation49_spill] sm:$0xff] }
 0x34d   : > { %8161 = vmatprep.mubr.f32.mxu1 %v9782_v21  ;;  %10517 = vmatpush1.bf16.msra.mxu1 %v10516_v55  ;;  %v16744_v55 = vld [vmem:[#allocation84_spill] sm:$0xff] }
 0x34e   : > { %10518 = vmatprep.subr.bf16.mxu1 %v16346_v52  ;;  %v7444_v21 = vld [vmem:[%s16073_s3 + $0x448] sm:$0xff] }
 0x350   : > { %8162 = vmatmul.mubr.f32.gmra.mrb[76].mxu1 %v9781_v49  ;;  %v7446_v49 = vld [vmem:[%s16073_s3 + $0x458] sm:$0xff] }
 0x351   : > { %8166 = vmatprep.mubr.f32.mxu1 %v9788_v56  ;;  %10520 = vmatpush1.bf16.msra.mxu1 %v10519_v15  ;;  %v10543_v15 = vpack.c.bf16 %v7444_v21, %v7443_v28  ;;  %v10547_v56 = vpack.c.bf16 %v7446_v49, %v7445_v51  ;;  %v7068_v28 = vld [vmem:[#allocation2 + $0xd9] sm:$0xf]  ;;  %v7189_v51 = vcombine.high %v15275_v50, %v15275_v50  ;;  %v16763_v49 = vld [vmem:[#allocation65_spill] sm:$0xff] }
 0x352   : > { %10521 = vmatprep.subr.bf16.mxu1 %v16346_v52 }
 0x354   : > { %8167 = vmatmul.mubr.f32.gmra.mrb[78].mxu1 %v15262_v1  ;;  %v7305_v1 = vcombine.low %v15621_v25, %v15623_v9 }
 0x355   : > { %8171 = vmatprep.mubr.f32.mxu1 %v15437_v26  ;;  %10523 = vmatpush1.bf16.msra.mxu1 %v10522_v19  ;;  %v7448_v19 = vld [vmem:[%s16073_s3 + $0x468] sm:$0xff] }
 0x356   : > { %10524 = vmatprep.subr.bf16.mxu1 %v16346_v52  ;;  %v9800_v52 = vcombine.high %v15619_v2, %v7305_v1 }
 0x358   : > { %8172 = vmatmul.mubr.f32.gmra.mrb[80].mxu1 %v15160_v62  ;;  %v7438_v62 = vld [vmem:[%s16073_s3 + $0x418] sm:$0xff] }
 0x359   : > { %8176 = vmatprep.mubr.f32.mxu1 %v9794_v39  ;;  %10526 = vmatpush1.bf16.msra.mxu1 %v10525_v58  ;;  %v10531_v13 = vpack.c.bf16 %v7438_v62, %v7437_v12  ;;  %v7450_v58 = vld [vmem:[%s16073_s3 + $0x478] sm:$0xff]  ;;  %v11092_v39 = vld [vmem:[#allocation2 + $0x61] sm:$0xff] }
 0x35a   : > { %10528 = vmatprep.subr.bf16.mxu1 %v10527_v43  ;;  %v10555_v1 = vpack.c.bf16 %v7450_v58, %v7449_v63  ;;  %v16753_v12 = vld [vmem:[#allocation48_spill] sm:$0xff] }
 0x35b   : > { %v11094_v62 = vld [vmem:[#allocation2 + $0x81] sm:$0xff] }
 0x35c   : > { %8177 = vmatmul.mubr.f32.gmra.mrb[82].mxu1 %v9793_v27  ;;  %v11093_v27 = vld [vmem:[#allocation2 + $0x60] sm:$0xff] }
 0x35d   : > { %8181 = vmatprep.mubr.f32.mxu1 %v9800_v52  ;;  %v16751_v52 = vld [vmem:[#allocation17_spill] sm:$0xff] }
 0x360   : > { %8182 = vmatmul.mubr.f32.gmra.mrb[84].mxu1 %v9799_v31  ;;  %v16752_v31 = vld [vmem:[#allocation46_spill] sm:$0xff] }
 0x361   : > { %8251 = vmatprep.mubr.f32.mxu1 %v15469_v44  ;;  %v7441_v44 = vld [vmem:[%s16073_s3 + $0x430] sm:$0xff] }
 0x362   : > { %v10539_v29 = vpack.c.bf16 %v7442_v46, %v7441_v44  ;;  %v16759_v44 = vld [vmem:[#allocation83_spill] sm:$0xff]  ;;  %v16760_v46 = vld [vmem:[#allocation80_spill] sm:$0xff] }
 0x364   : > { %8252 = vmatmul.mubr.f32.vlgmr.msra.gmra.mrb[50].mxu1 %v11090_v36  ;;  %v16756_v36 = vld [vmem:[#allocation55_spill] sm:$0xff] }
 0x365   : > { %8256 = vmatprep.mubr.f32.mxu1 %v16742_v59  ;;  %10530 = vmatpush3.bf16.msra.mxu1 %v10527_v43  ;;  %v16749_v43 = vld [vmem:[#allocation32_spill] sm:$0xff] }
 0x366   : > { %10532 = vmatprep.subr.bf16.mxu1 %v10531_v13  ;;  %v16757_v59 = vld [vmem:[#allocation64_spill] sm:$0xff] }
 0x368   : > { %8257 = vmatmul.mubr.f32.gmra.mrb[52].mxu1 %v16743_v16  ;;  %v16761_v16 = vld [vmem:[#allocation79_spill] sm:$0xff] }
 0x369   : > { %8261 = vmatprep.mubr.f32.mxu1 %v16744_v55  ;;  %10534 = vmatpush3.bf16.msra.mxu1 %v10531_v13  ;;  %v11095_v13 = vld [vmem:[#allocation2 + $0x80] sm:$0xff]  ;;  %v7067_v55 = vld [vmem:[#allocation2 + $0xd1] sm:$0xff] }
 0x36a   : > { %10536 = vmatprep.subr.bf16.mxu1 %v10535_v47  ;;  %v9796_v21 = vcombine.low %v15621_v25, %v7067_v55  ;;  %v7202_v25 = vcombine.high %v15279_v57, %v15279_v57 }
 0x36c   : > { %8262 = vmatmul.mubr.f32.gmra.mrb[54].mxu1 %v16745_v18 }
 0x36d   : > { %8266 = vmatprep.mubr.f32.mxu1 %v15501_v35  ;;  %10538 = vmatpush3.bf16.msra.mxu1 %v10535_v47  ;;  %v7447_v35 = vld [vmem:[%s16073_s3 + $0x460] sm:$0xff]  ;;  %v16758_v47 = vld [vmem:[#allocation66_spill] sm:$0xff] }
 0x36e   : > { %10540 = vmatprep.subr.bf16.mxu1 %v10539_v29  ;;  %v10551_v10 = vpack.c.bf16 %v7448_v19, %v7447_v35  ;;  %v7223_v35 = vcombine.high %v15320_v7, %v15320_v7 }
 0x370   : > { %8267 = vmatmul.mubr.f32.gmra.mrb[56].mxu1 %v11091_v60  ;;  %v16764_v60 = vcombine.low %v15253_v42, %v16763_v49  ;;  %v7505_v57 = vcombine.low %v7223_v35, %v15310_v33  ;;  %v7263_v33 = vcombine.high %v15402_v4, %v15402_v4  ;;  %v7095_v4 = vld [vmem:[#allocation2 + $0xd2] sm:$0xff]  ;;  %v15759_v49 = vld [vmem:[%s16074_s4] ss:$0 sm:$0xff] }
 0x371   : > { %8271 = vmatprep.mubr.f32.mxu1 %v16746_v38  ;;  %10542 = vmatpush3.bf16.msra.mxu1 %v10539_v29  ;;  %v7040_v29 = vld [vmem:[#allocation2 + $0xd8] sm:$0xf]  ;;  %v16765_v35 = vld [vmem:[#allocation3_spill] sm:$0xff] }
 0x372   : > { %10544 = vmatprep.subr.bf16.mxu1 %v10543_v15  ;;  %v7306_v18 = vcombine.low %v7040_v29, %v7068_v28 }
 0x374   : > { %8272 = vmatmul.mubr.f32.gmra.mrb[58].mxu1 %v16747_v24  ;;  %v7303_v24 = vcombine.high %v7095_v4, %v7095_v4 }
 0x375   : > { %8276 = vmatprep.mubr.f32.mxu1 %v16748_v32  ;;  %10546 = vmatpush3.bf16.msra.mxu1 %v10543_v15  ;;  %v9802_v15 = vcombine.high %v7067_v55, %v7306_v18 }
 0x376   : > { %10548 = vmatprep.subr.bf16.mxu1 %v10547_v56 }
 0x378   : > { %8277 = vmatmul.mubr.f32.gmra.mrb[60].mxu1 %v16749_v43 }
 0x379   : > { %8281 = vmatprep.mubr.f32.mxu1 %v11092_v39  ;;  %10550 = vmatpush3.bf16.msra.mxu1 %v10547_v56  ;;  %v7484_v56 = vcombine.low %v7202_v25, %v15267_v17  ;;  %v7243_v17 = vcombine.high %v15361_v23, %v15361_v23 }
 0x37a   : > { %10552 = vmatprep.subr.bf16.mxu1 %v10551_v10 }
 0x37c   : > { %8282 = vmatmul.mubr.f32.gmra.mrb[62].mxu1 %v11093_v27 }
 0x37d   : > { %8286 = vmatprep.mubr.f32.mxu1 %v16750_v11  ;;  %10554 = vmatpush3.bf16.msra.mxu1 %v10551_v10 }
 0x37e   : > { %10556 = vmatprep.subr.bf16.mxu1 %v10555_v1 }
 0x380   : > { %8287 = vmatmul.mubr.f32.gmra.mrb[64].mxu1 %v16751_v52 }
 0x381   : > { %8291 = vmatprep.mubr.f32.mxu1 %v16752_v31  ;;  %10558 = vmatpush3.bf16.msra.mxu1 %v10555_v1 }
 0x384   : > { %8292 = vmatmul.mubr.f32.gmra.mrb[66].mxu1 %v16753_v12 }
 0x385   : > { %8296 = vmatprep.mubr.f32.mxu1 %v11094_v62 }
 0x388   : > { %8297 = vmatmul.mubr.f32.gmra.mrb[68].mxu1 %v11095_v13 }
 0x389   : > { %8301 = vmatprep.mubr.f32.mxu1 %v16754_v3 }
 0x38c   : > { %8302 = vmatmul.mubr.f32.gmra.mrb[70].mxu1 %v16755_v0 }
 0x38d   : > { %8306 = vmatprep.mubr.f32.mxu1 %v16756_v36 }
 0x390   : > { %8307 = vmatmul.mubr.f32.gmra.mrb[72].mxu1 %v16757_v59 }
 0x391   : > { %8311 = vmatprep.mubr.f32.mxu1 %v15136_v37 }
 0x394   : > { %8312 = vmatmul.mubr.f32.gmra.mrb[74].mxu1 %v15065_v45  ;;  %v16762_v45 = vld [vmem:[#allocation86_spill] sm:$0xff] }
 0x395   : > { %8316 = vmatprep.mubr.f32.mxu1 %v16758_v47  ;;  %v7302_v37 = vcombine.high %v16762_v45, %v7067_v55 }
 0x397   : > { %v9801_v38 = vcombine.low %v7302_v37, %v7040_v29 }
 0x398   : > { %8317 = vmatmul.mubr.f32.gmra.mrb[76].mxu1 %v16759_v44 }
 0x399   : > { %8321 = vmatprep.mubr.f32.mxu1 %v16760_v46 }
 0x39c   : > { %8322 = vmatmul.mubr.f32.gmra.mrb[78].mxu1 %v16761_v16 }
 0x39d   : > { %8326 = vmatprep.mubr.f32.mxu1 %v15629_v34  ;;  %v7466_v34 = vcombine.low %v15275_v50, %v7189_v51  ;;  %v7233_v50 = vcombine.high %v15215_v30, %v15215_v30 }
 0x39f   : > { %v7512_v19 = vcombine.low %v15215_v30, %v7233_v50  ;;  %v7273_v30 = vcombine.high %v15238_v53, %v15238_v53  ;;  %v15766_v50 = vsub.s32 0, %v16765_v35 }
 0x3a0   : > { %8327 = vmatmul.mubr.f32.gmra.mrb[80].mxu1 %v15143_v41  ;;  %v7213_v41 = vcombine.high %v15201_v22, %v15201_v22 }
 0x3a1   : > { %8331 = vmatprep.mubr.f32.mxu1 %v9796_v21  ;;  %v7554_v23 = vcombine.low %v15238_v53, %v7273_v30  ;;  %v7096_v53 = vld [vmem:[#allocation2 + $0xda] sm:$0xf] }
 0x3a2   : > { %v7491_v42 = vcombine.low %v15201_v22, %v7213_v41  ;;  %v7253_v22 = vcombine.high %v15219_v48, %v15219_v48 }
 0x3a4   : > { %8332 = vmatmul.mubr.f32.gmra.mrb[82].mxu1 %v16764_v60  ;;  %v7533_v7 = vcombine.low %v15219_v48, %v7253_v22  ;;  %v7293_v48 = vcombine.high %v15619_v2, %v15619_v2 }
 0x3a5   : > { %8336 = vmatprep.mubr.f32.mxu1 %v9802_v15 }
 0x3a8   : > { %8337 = vmatmul.mubr.f32.gmra.mrb[84].mxu1 %v9801_v38 }
 0x3a9   : > { %10092 = vmatprep.mubr.f32.mxu1 %v7466_v34 }
 0x3ac   : > { %10093 = vmatmul.mubr.f32.vlgmr.msra.gmra.mrb[86].mxu1 %v15286_v40  ;;  %v7526_v40 = vcombine.low %v7243_v17, %v15350_v61  ;;  %v7283_v61 = vcombine.high %v15437_v26, %v15437_v26  ;;  %v7589_v26 = vcombine.low %v7303_v24, %v7096_v53  ;;  %v16766_v24 = vld [vmem:[#allocation4_spill] sm:$0xff] }
 0x3ad   : > { %10095 = vmatprep.mubr.f32.mxu1 %v7484_v56 }
 0x3b0   : > { %10096 = vmatmul.mubr.f32.gmra.mrb[88].mxu1 %v7491_v42 }
 0x3b1   : > { %10098 = vmatprep.mubr.f32.mxu1 %v15327_v8  ;;  %v7547_v8 = vcombine.low %v7263_v33, %v15391_v6  ;;  %v7582_v6 = vcombine.low %v15623_v9, %v7095_v4 }
 0x3b4   : > { %10099 = vmatmul.mubr.f32.gmra.mrb[90].mxu1 %v7505_v57 }
 0x3b5   : > { %10101 = vmatprep.mubr.f32.mxu1 %v7512_v19 }
 0x3b8   : > { %10102 = vmatmul.mubr.f32.gmra.mrb[92].mxu1 %v15368_v20  ;;  %v7568_v20 = vcombine.low %v7283_v61, %v15432_v5 }
 0x3b9   : > { %10104 = vmatprep.mubr.f32.mxu1 %v7526_v40 }
 0x3bc   : > { %10105 = vmatmul.mubr.f32.gmra.mrb[94].mxu1 %v7533_v7 }
 0x3bd   : > { %10107 = vmatprep.mubr.f32.mxu1 %v15409_v54  ;;  %v7575_v54 = vcombine.low %v15619_v2, %v7293_v48 }
 0x3c0   : > { %10108 = vmatmul.mubr.f32.gmra.mrb[96].mxu1 %v7547_v8 }
 0x3c1   : > { %10110 = vmatprep.mubr.f32.mxu1 %v7554_v23 }
 0x3c4   : > { %10111 = vmatmul.mubr.f32.gmra.mrb[98].mxu1 %v15444_v14 }
 0x3c5   : > { %10113 = vmatprep.mubr.f32.mxu1 %v7568_v20 }
 0x3c8   : > { %10114 = vmatmul.mubr.f32.gmra.mrb[100].mxu1 %v7575_v54 }
 0x3c9   : > { %10116 = vmatprep.mubr.f32.mxu1 %v7582_v6 }
 0x3cc   : > { %10117 = vmatmul.mubr.f32.gmra.mrb[102].mxu1 %v7589_v26 }
 0x437   : > { %v8253_v32 = vpop.f32.mrb[50].mxu1 }
 0x438   : > { %v8255_v10 = vpop.f32.mrb[51].mxu1  ;;  %v10609_v34 = vadd.f32 %v15759_v49, %v8253_v32 }
 0x43b   : > { %v8258_v63 = vpop.f32.mrb[52].mxu1 }
 0x43c   : > { %v8260_v58 = vpop.f32.mrb[53].mxu1  ;;  %v10610_v38 = vadd.f32 %v15759_v49, %v8258_v63 }
 0x43f   : > { %v8263_v43 = vpop.f32.mrb[54].mxu1 }
 0x440   : > { %v8265_v5 = vpop.f32.mrb[55].mxu1  ;;  %v10611_v41 = vadd.f32 %v15759_v49, %v8263_v43 }
 0x443   : > { %v8268_v39 = vpop.f32.mrb[56].mxu1 }
 0x444   : > { %v8270_v1 = vpop.f32.mrb[57].mxu1  ;;  %v10612_v57 = vadd.f32 %v15759_v49, %v8268_v39 }
 0x447   : > { %v8273_v14 = vpop.f32.mrb[58].mxu1 }
 0x448   : > { %v8275_v27 = vpop.f32.mrb[59].mxu1  ;;  %v15770_v19 = vadd.f32 %v15759_v49, %v8273_v14 }
 0x44b   : > { %v8278_v11 = vpop.f32.mrb[60].mxu1 }
 0x44c   : > { %v8280_v2 = vpop.f32.mrb[61].mxu1  ;;  %v15773_v17 = vadd.f32 %v15759_v49, %v8278_v11 }
 0x44f   : > { %v8283_v52 = vpop.f32.mrb[62].mxu1 }
 0x450   : > { %v8285_v31 = vpop.f32.mrb[63].mxu1  ;;  %v15781_v40 = vadd.f32 %v15759_v49, %v8283_v52 }
 0x453   : > { %v8288_v9 = vpop.f32.mrb[64].mxu1 }
 0x454   : > { %v8290_v12 = vpop.f32.mrb[65].mxu1  ;;  %v15784_v7 = vadd.f32 %v15759_v49, %v8288_v9 }
 0x457   : > { %v8293_v62 = vpop.f32.mrb[66].mxu1 }
 0x458   : > { %v8295_v13 = vpop.f32.mrb[67].mxu1  ;;  %v15787_v33 = vadd.f32 %v15759_v49, %v8293_v62 }
 0x45b   : > { %v8298_v3 = vpop.f32.mrb[68].mxu1 }
 0x45c   : > { %v8300_v0 = vpop.f32.mrb[69].mxu1  ;;  %v15790_v8 = vadd.f32 %v15759_v49, %v8298_v3 }
 0x45f   : > { %v8303_v36 = vpop.f32.mrb[70].mxu1 }
 0x460   : > { %v8305_v59 = vpop.f32.mrb[71].mxu1  ;;  %v15793_v23 = vadd.f32 %v15759_v49, %v8303_v36 }
 0x463   : > { %v8308_v47 = vpop.f32.mrb[72].mxu1 }
 0x464   : > { %v8310_v44 = vpop.f32.mrb[73].mxu1  ;;  %v15796_v61 = vadd.f32 %v15759_v49, %v8308_v47 }
 0x467   : > { %v8313_v46 = vpop.f32.mrb[74].mxu1 }
 0x468   : > { %v8315_v16 = vpop.f32.mrb[75].mxu1  ;;  %v15799_v4 = vadd.f32 %v15759_v49, %v8313_v46 }
 0x46b   : > { %v8318_v55 = vpop.f32.mrb[76].mxu1 }
 0x46c   : > { %v8320_v29 = vpop.f32.mrb[77].mxu1  ;;  %v15806_v32 = vadd.f32 %v15759_v49, %v8318_v55 }
 0x46f   : > { %v8323_v28 = vpop.f32.mrb[78].mxu1 }
 0x470   : > { %v8325_v21 = vpop.f32.mrb[79].mxu1  ;;  %v15813_v31 = vadd.f32 %v15759_v49, %v8323_v28 }
 0x473   : > { %v8328_v18 = vpop.f32.mrb[80].mxu1 }
 0x474   : > { %v8330_v45 = vpop.f32.mrb[81].mxu1  ;;  %v15817_v47 = vadd.f32 %v15759_v49, %v8328_v18 }
 0x477   : > { %v15752_v37 = vpop.f32.mrb[82].mxu1 }
 0x478   : > { %v8335_v15 = vpop.f32.mrb[83].mxu1 }
 0x47b   : > { %v15754_v51 = vpop.f32.mrb[84].mxu1 }
 0x47c   : > { %v8340_v60 = vpop.f32.mrb[85].mxu1 }
 0x47f   : > { %v10094_v25 = vpop.f32.mrb[86].mxu1 }
 0x480   : > { %v8414_v56 = vadd.f32 %v10610_v38, %v10094_v25  ;;  %v8408_v42 = vpop.f32.mrb[87].mxu1 }
 0x481   : > { %v8409_v22 = vadd.f32 %v10609_v34, %v8408_v42 }
 0x482   : > { %v8498_v30 = vmax.f32 %v8414_v56, 0.0 }
 0x483   : > { %v8497_v48 = vmax.f32 %v8409_v22, 0.0  ;;  %v10097_v20 = vpop.f32.mrb[88].mxu1 }
 0x484   : > { %v15801_v54 = vcombine.high %v8498_v30, %v8498_v30  ;;  %8582 = vst [vmem:[%s15778_s8 + $0x8] sm:$0xf] %v8498_v30  ;;  %v8627_v6 = vrot.slane %v8498_v30, %v16766_v24  ;;  %v8424_v53 = vadd.f32 %v10612_v57, %v10097_v20  ;;  %v8418_v26 = vpop.f32.mrb[89].mxu1 }
 0x485   : > { %v8533_v10 = vcombine.high %v8497_v48, %v8497_v48  ;;  %v8611_v63 = vrot.slane %v8497_v48, %v16766_v24  ;;  %v8419_v58 = vadd.f32 %v10611_v41, %v8418_v26 }
 0x486   : > { %v8634_v43 = vrot.slane %v15801_v54, %v16766_v24  ;;  %v8635_v5 = vcombine.high %v8627_v6, %v8627_v6  ;;  %v9807_v39 = vrot.slane %v8627_v6, 9  ;;  %v8500_v1 = vmax.f32 %v8424_v53, 0.0 }
 0x487   : > { %v8557_v14 = vcombine.low %v8497_v48, %v8533_v10  ;;  %v8618_v27 = vrot.slane %v8533_v10, %v16766_v24  ;;  %v8619_v11 = vcombine.high %v8611_v63, %v8611_v63  ;;  %v9803_v2 = vrot.slane %v8611_v63, 9  ;;  %v10100_v52 = vpop.f32.mrb[90].mxu1 }
 0x488   : > { %v8636_v9 = vcombine.high %v8634_v43, %v8634_v43  ;;  %v9808_v12 = vrot.slane %v8635_v5, 9  ;;  %v9809_v62 = vrot.slane %v8634_v43, 9  ;;  %v8428_v13 = vpop.f32.mrb[91].mxu1  ;;  %v8536_v16 = vcombine.high %v8500_v1, %v8500_v1 }
 0x489   : > { %8581 = vst [vmem:[%s15778_s8] sm:$0xff] %v8557_v14  ;;  %v8620_v3 = vcombine.high %v8618_v27, %v8618_v27  ;;  %v9804_v0 = vrot.slane %v8619_v11, 9  ;;  %v9805_v36 = vrot.slane %v8618_v27, 9  ;;  %v9181_v59 = vmax.f32 %v8611_v63, %v9803_v2 }
 0x48a   : > { %v9810_v44 = vrot.slane %v8636_v9, 9  ;;  %v9187_v46 = vmax.f32 %v8634_v43, %v9809_v62  ;;  %v15819_v55 = vmax.f32 %v8627_v6, %v9807_v39  ;;  %v15822_v21 = vrot.slane %v8500_v1, %v16766_v24 }
 0x48b   : > { %v9806_v29 = vrot.slane %v8620_v3, 9  ;;  %v9182_v28 = vmax.f32 %v8619_v11, %v9804_v0  ;;  %v10103_v45 = vpop.f32.mrb[92].mxu1  ;;  %v8559_v38 = vcombine.low %v8500_v1, %v8536_v16  ;;  %v8666_v34 = vrot.slane %v8536_v16, %v16766_v24 }
 0x48c   : > { %v9188_v15 = vmax.f32 %v8636_v9, %v9810_v44  ;;  %v9253_v60 = vmax.f32 %v9181_v59, %v9187_v46  ;;  %v8438_v25 = vpop.f32.mrb[93].mxu1  ;;  %v15825_v18 = vmax.f32 %v8635_v5, %v9808_v12  ;;  %v9183_v41 = vmax.f32 %v8618_v27, %v9805_v36 }
 0x48d   : > { %v15829_v56 = vcombine.high %v15822_v21, %v15822_v21  ;;  %v8499_v42 = vmax.f32 %v8419_v58, 0.0  ;;  %v15831_v35 = vmax.f32 %v8620_v3, %v9806_v29  ;;  %8585 = vst [vmem:[%s15778_s8 + $0x20] sm:$0xff] %v8559_v38  ;;  %v8668_v22 = vcombine.high %v8666_v34, %v8666_v34 }
 0x48e   : > { %v9254_v57 = vmax.f32 %v9182_v28, %v9188_v15  ;;  %v9817_v30 = vrot.slane %v8666_v34, 9  ;;  %v9328_v48 = vrot.slane %v9253_v60, %v15766_v50  ;;  %v9815_v20 = vrot.slane %v15822_v21, 9 }
 0x48f   : > { %v8535_v6 = vcombine.high %v8499_v42, %v8499_v42  ;;  %v8558_v53 = vcombine.low %v15801_v54, %v8499_v42  ;;  %v15837_v26 = vpop.f32.mrb[94].mxu1  ;;  %v9816_v63 = vrot.slane %v15829_v56, 9  ;;  %v9818_v58 = vrot.slane %v8668_v22, 9 }
 0x490   : > { %v9332_v10 = vrot.slane %v9254_v57, %v15766_v50  ;;  %v8643_v43 = vrot.slane %v8499_v42, %v16766_v24  ;;  %v15842_v5 = vpop.f32.mrb[95].mxu1  ;;  %v15844_v39 = vmax.f32 %v8666_v34, %v9817_v30  ;;  %v8434_v54 = vadd.f32 %v15773_v17, %v10100_v52 }
 0x491   : > { %8583 = vst [vmem:[%s15778_s8 + $0x10] sm:$0xff] %v8558_v53  ;;  %8584 = vst [vmem:[%s15778_s8 + $0x18] sm:$0xf] %v8535_v6  ;;  %v8650_v1 = vrot.slane %v8535_v6, %v16766_v24  ;;  %v8429_v14 = vadd.f32 %v15770_v19, %v8428_v13  ;;  %v15852_v11 = vmax.f32 %v8668_v22, %v9818_v58 }
 0x492   : > { %v9470_v27 = vsel %vm9469_vm1, %v9332_v10, %v9328_v48  ;;  %v8651_v2 = vcombine.high %v8643_v43, %v8643_v43  ;;  %v9811_v9 = vrot.slane %v8643_v43, 9  ;;  %v8502_v3 = vmax.f32 %v8434_v54, 0.0 }
 0x493   : > { %v8652_v12 = vcombine.high %v8650_v1, %v8650_v1  ;;  %v9813_v62 = vrot.slane %v8650_v1, 9  ;;  %v8501_v0 = vmax.f32 %v8429_v14, 0.0  ;;  %v15854_v36 = vpop.f32.mrb[96].mxu1  ;;  %v8444_v19 = vadd.f32 %v15784_v7, %v10103_v45 }
 0x494   : > { %v9812_v59 = vrot.slane %v8651_v2, 9  ;;  %v9189_v17 = vmax.f32 %v8643_v43, %v9811_v9  ;;  %v8439_v52 = vadd.f32 %v15781_v40, %v8438_v25  ;;  %v15858_v13 = vpop.f32.mrb[97].mxu1  ;;  %v8538_v16 = vcombine.high %v8502_v3, %v8502_v3 }
 0x495   : > { %v9814_v44 = vrot.slane %v8652_v12, 9  ;;  %v9191_v46 = vmax.f32 %v8650_v1, %v9813_v62  ;;  %v8691_v29 = vrot.slane %v8502_v3, %v16766_v24  ;;  %8586 = vst [vmem:[%s15778_s8 + $0x28] sm:$0xf] %v8501_v0  ;;  %v8537_v60 = vcombine.high %v8501_v0, %v8501_v0 }
 0x496   : > { %v9190_v28 = vmax.f32 %v8651_v2, %v9812_v59  ;;  %v9255_v15 = vmax.f32 %v9183_v41, %v9189_v17  ;;  %v8675_v38 = vrot.slane %v8501_v0, %v16766_v24  ;;  %8588 = vst [vmem:[%s15778_s8 + $0x38] sm:$0xf] %v8538_v16  ;;  %v8698_v40 = vrot.slane %v8538_v16, %v16766_v24 }
 0x497   : > { %v9192_v34 = vmax.f32 %v8652_v12, %v9814_v44  ;;  %v9257_v42 = vmax.f32 %v15819_v55, %v9191_v46  ;;  %v8699_v7 = vcombine.high %v8691_v29, %v8691_v29  ;;  %v15866_v45 = vpop.f32.mrb[98].mxu1  ;;  %v9823_v22 = vrot.slane %v8691_v29, 9 }
 0x498   : > { %v9256_v25 = vmax.f32 %v15831_v35, %v9190_v28  ;;  %v9336_v57 = vrot.slane %v9255_v15, %v15766_v50  ;;  %v8560_v41 = vcombine.low %v8537_v60, %v8502_v3  ;;  %v15871_v30 = vpop.f32.mrb[99].mxu1  ;;  %v8700_v6 = vcombine.high %v8698_v40, %v8698_v40 }
 0x499   : > { %v9258_v48 = vmax.f32 %v15825_v18, %v9192_v34  ;;  %v9344_v55 = vrot.slane %v9257_v42, %v15766_v50  ;;  %v9824_v53 = vrot.slane %v8699_v7, 9  ;;  %v9825_v43 = vrot.slane %v8698_v40, 9 }
 0x49a   : > { %v9340_v10 = vrot.slane %v9256_v25, %v15766_v50  ;;  %v9472_v58 = vsel %vm9471_vm2, %v9336_v57, %v9470_v27  ;;  %v9201_v1 = vmax.f32 %v8691_v29, %v9823_v22  ;;  %8587 = vst [vmem:[%s15778_s8 + $0x30] sm:$0xff] %v8560_v41  ;;  %v9826_v54 = vrot.slane %v8700_v6, 9 }
 0x49b   : > { %v9348_v35 = vrot.slane %v9258_v48, %v15766_v50  ;;  %v9202_v14 = vmax.f32 %v8699_v7, %v9824_v53  ;;  %v8682_v2 = vrot.slane %v8537_v60, %v16766_v24  ;;  %v15880_v9 = vpop.f32.mrb[100].mxu1  ;;  %v9193_v18 = vmax.f32 %v15822_v21, %v9815_v20 }
 0x49c   : > { %v9474_v27 = vsel %vm9473_vm3, %v9340_v10, %v9472_v58  ;;  %v9261_v12 = vmax.f32 %v15844_v39, %v9201_v1  ;;  %v8683_v62 = vcombine.high %v8675_v38, %v8675_v38  ;;  %v15892_v3 = vpop.f32.mrb[101].mxu1  ;;  %v9203_v59 = vmax.f32 %v8698_v40, %v9825_v43 }
 0x49d   : > { %v9476_v0 = vsel %vm9475_vm4, %v9344_v55, %v9474_v27  ;;  %v9262_v17 = vmax.f32 %v15852_v11, %v9202_v14  ;;  %v8684_v44 = vcombine.high %v8682_v2, %v8682_v2  ;;  %v9204_v20 = vmax.f32 %v8700_v6, %v9826_v54 }
 0x49e   : > { %v9478_v21 = vsel %vm9477_vm5, %v9348_v35, %v9476_v0  ;;  %v9819_v46 = vrot.slane %v8675_v38, 9  ;;  %v9820_v16 = vrot.slane %v8683_v62, 9  ;;  %v9194_v29 = vmax.f32 %v15829_v56, %v9816_v63 }
 0x49f   : > { %9510 = vst [vmem:[%s15888_s14] sm:$0x3f] %v9478_v21  ;;  %v9821_v39 = vrot.slane %v8682_v2, 9  ;;  %v9822_v28 = vrot.slane %v8684_v44, 9  ;;  %v8504_v15 = vmax.f32 %v8444_v19, 0.0  ;;  %v15901_v60 = vpop.f32.mrb[102].mxu1  ;;  %v8503_v11 = vmax.f32 %v8439_v52, 0.0 }
 0x4a0   : > { %v9197_v34 = vmax.f32 %v8675_v38, %v9819_v46  ;;  %v9198_v42 = vmax.f32 %v8683_v62, %v9820_v16  ;;  %v8454_v40 = vadd.f32 %v15790_v8, %v15837_v26  ;;  %v15905_v7 = vpop.f32.mrb[103].mxu1  ;;  %v15914_v52 = vadd.f32 %v15759_v49, %v15752_v37 }
 0x4a1   : > { %v9199_v25 = vmax.f32 %v8682_v2, %v9821_v39  ;;  %v9200_v57 = vmax.f32 %v8684_v44, %v9822_v28  ;;  %v15907_v22 = vcombine.high %v8504_v15, %v8504_v15  ;;  %8590 = vst [vmem:[%s15778_s8 + $0x48] sm:$0xf] %v8504_v15  ;;  %v8723_v56 = vrot.slane %v8504_v15, %v16766_v24 }
 0x4a2   : > { %v9263_v63 = vmax.f32 %v9197_v34, %v9203_v59  ;;  %v9264_v41 = vmax.f32 %v9198_v42, %v9204_v20  ;;  %v8539_v19 = vcombine.high %v8503_v11, %v8503_v11  ;;  %v8707_v38 = vrot.slane %v8503_v11, %v16766_v24 }
 0x4a3   : > { %v9259_v8 = vmax.f32 %v9193_v18, %v9199_v25  ;;  %v9260_v26 = vmax.f32 %v9194_v29, %v9200_v57  ;;  %v8730_v48 = vrot.slane %v15907_v22, %v16766_v24  ;;  %v15920_v55 = vadd.f32 %v15759_v49, %v15754_v51 }
 0x4a4   : > { %v9360_v6 = vrot.slane %v9261_v12, %v15766_v50  ;;  %v9364_v53 = vrot.slane %v9262_v17, %v15766_v50  ;;  %v8561_v10 = vcombine.low %v8503_v11, %v8539_v19  ;;  %v8731_v37 = vcombine.high %v8723_v56, %v8723_v56 }
 0x4a5   : > { %v9352_v58 = vrot.slane %v9259_v8, %v15766_v50  ;;  %v9356_v43 = vrot.slane %v9260_v26, %v15766_v50  ;;  %v8732_v1 = vcombine.high %v8730_v48, %v8730_v48  ;;  %v9368_v35 = vrot.slane %v9263_v63, %v15766_v50 }
 0x4a6   : > { %v9833_v54 = vrot.slane %v8730_v48, 9  ;;  %8589 = vst [vmem:[%s15778_s8 + $0x40] sm:$0xff] %v8561_v10  ;;  %v8714_v14 = vrot.slane %v8539_v19, %v16766_v24  ;;  %v8715_v2 = vcombine.high %v8707_v38, %v8707_v38  ;;  %v9831_v49 = vrot.slane %v8723_v56, 9 }
 0x4a7   : > { %v9479_v51 = vsel %vm9469_vm1, %v9356_v43, %v9352_v58  ;;  %v9834_v18 = vrot.slane %v8732_v1, 9  ;;  %v9827_v27 = vrot.slane %v8707_v38, 9  ;;  %v9372_v17 = vrot.slane %v9264_v41, %v15766_v50 }
 0x4a8   : > { %v9480_v12 = vsel %vm9471_vm2, %v9360_v6, %v9479_v51  ;;  %v9211_v62 = vmax.f32 %v8730_v48, %v9833_v54  ;;  %v8716_v0 = vcombine.high %v8714_v14, %v8714_v14  ;;  %v9828_v59 = vrot.slane %v8715_v2, 9 }
 0x4a9   : > { %v9481_v44 = vsel %vm9473_vm3, %v9364_v53, %v9480_v12  ;;  %v9212_v21 = vmax.f32 %v8732_v1, %v9834_v18  ;;  %v9205_v20 = vmax.f32 %v8707_v38, %v9827_v27  ;;  %v9832_v16 = vrot.slane %v8731_v37, 9 }
 0x4aa   : > { %v9482_v46 = vsel %vm9475_vm4, %v9368_v35, %v9481_v44  ;;  %v9206_v29 = vmax.f32 %v8715_v2, %v9828_v59  ;;  %v8506_v39 = vmax.f32 %v8454_v40, 0.0  ;;  %v15935_v15 = vmax.f32 %v8723_v56, %v9831_v49 }
 0x4ab   : > { %v9483_v28 = vsel %vm9477_vm5, %v9372_v17, %v9482_v46  ;;  %v9265_v34 = vmax.f32 %v9205_v20, %v9211_v62  ;;  %v8449_v42 = vadd.f32 %v15787_v33, %v15842_v5  ;;  %v9829_v11 = vrot.slane %v8714_v14, 9 }
 0x4ac   : > { %9511 = vst [vmem:[%s15888_s14 + $0x8] sm:$0x3f] %v9483_v28  ;;  %v9830_v25 = vrot.slane %v8716_v0, 9  ;;  %v9266_v57 = vmax.f32 %v9206_v29, %v9212_v21  ;;  %v8542_v63 = vcombine.high %v8506_v39, %v8506_v39  ;;  %v15941_v41 = vrot.slane %v8506_v39, %v16766_v24 }
 0x4ad   : > { %v8505_v19 = vmax.f32 %v8449_v42, 0.0  ;;  %v8464_v40 = vadd.f32 %v15796_v61, %v15854_v36  ;;  %v8459_v56 = vadd.f32 %v15793_v23, %v15858_v13  ;;  %v9376_v33 = vrot.slane %v9265_v34, %v15766_v50 }
 0x4ae   : > { %v9380_v5 = vrot.slane %v9266_v57, %v15766_v50  ;;  %v8563_v38 = vcombine.low %v8506_v39, %v8542_v63  ;;  %v8762_v8 = vrot.slane %v8542_v63, %v16766_v24  ;;  %v9210_v26 = vmax.f32 %v8731_v37, %v9832_v16 }
 0x4af   : > { %v8541_v48 = vcombine.high %v8505_v19, %v8505_v19  ;;  %v8562_v6 = vcombine.low %v15907_v22, %v8505_v19  ;;  %v8739_v53 = vrot.slane %v8505_v19, %v16766_v24  ;;  %v9207_v10 = vmax.f32 %v8714_v14, %v9829_v11 }
 0x4b0   : > { %v9484_v61 = vsel %vm9469_vm1, %v9380_v5, %v9376_v33  ;;  %8593 = vst [vmem:[%s15778_s8 + $0x60] sm:$0xff] %v8563_v38  ;;  %v8764_v36 = vcombine.high %v8762_v8, %v8762_v8  ;;  %v9841_v23 = vrot.slane %v8762_v8, 9  ;;  %v9208_v13 = vmax.f32 %v8716_v0, %v9830_v25 }
 0x4b1   : > { %8591 = vst [vmem:[%s15778_s8 + $0x50] sm:$0xff] %v8562_v6  ;;  %8592 = vst [vmem:[%s15778_s8 + $0x58] sm:$0xf] %v8541_v48  ;;  %v8746_v58 = vrot.slane %v8541_v48, %v16766_v24  ;;  %v8747_v43 = vcombine.high %v8739_v53, %v8739_v53  ;;  %v9835_v1 = vrot.slane %v8739_v53, 9  ;;  %v15959_v37 = vcombine.high %v15941_v41, %v15941_v41 }
 0x4b2   : > { %v9839_v22 = vrot.slane %v15941_v41, 9  ;;  %v9842_v35 = vrot.slane %v8764_v36, 9  ;;  %v8508_v54 = vmax.f32 %v8464_v40, 0.0  ;;  %v15962_v18 = vmax.f32 %v8762_v8, %v9841_v23 }
 0x4b3   : > { %v8748_v14 = vcombine.high %v8746_v58, %v8746_v58  ;;  %v9836_v2 = vrot.slane %v8747_v43, 9  ;;  %v9837_v51 = vrot.slane %v8746_v58, 9  ;;  %v9213_v49 = vmax.f32 %v8739_v53, %v9835_v1 }
 0x4b4   : > { %v8544_v27 = vcombine.high %v8508_v54, %v8508_v54  ;;  %v8787_v12 = vrot.slane %v8508_v54, %v16766_v24  ;;  %v8507_v62 = vmax.f32 %v8459_v56, 0.0  ;;  %v9220_v33 = vmax.f32 %v8764_v36, %v9842_v35 }
 0x4b5   : > { %v9838_v0 = vrot.slane %v8748_v14, 9  ;;  %v9214_v59 = vmax.f32 %v8747_v43, %v9836_v2  ;;  %v9215_v17 = vmax.f32 %v8746_v58, %v9837_v51  ;;  %v9267_v44 = vmax.f32 %v9207_v10, %v9213_v49 }
 0x4b6   : > { %8596 = vst [vmem:[%s15778_s8 + $0x78] sm:$0xf] %v8544_v27  ;;  %v8794_v21 = vrot.slane %v8544_v27, %v16766_v24  ;;  %v8795_v20 = vcombine.high %v8787_v12, %v8787_v12  ;;  %v9847_v46 = vrot.slane %v8787_v12, 9  ;;  %v8543_v16 = vcombine.high %v8507_v62, %v8507_v62  ;;  %8594 = vst [vmem:[%s15778_s8 + $0x68] sm:$0xf] %v8507_v62 }
 0x4b7   : > { %v9216_v29 = vmax.f32 %v8748_v14, %v9838_v0  ;;  %v9268_v39 = vmax.f32 %v9208_v13, %v9214_v59  ;;  %v9269_v28 = vmax.f32 %v15935_v15, %v9215_v17  ;;  %v9384_v34 = vrot.slane %v9267_v44, %v15766_v50 }
 0x4b8   : > { %v8796_v42 = vcombine.high %v8794_v21, %v8794_v21  ;;  %v9848_v11 = vrot.slane %v8795_v20, 9  ;;  %v9849_v25 = vrot.slane %v8794_v21, 9  ;;  %v9225_v57 = vmax.f32 %v8787_v12, %v9847_v46 }
 0x4b9   : > { %v9270_v63 = vmax.f32 %v9210_v26, %v9216_v29  ;;  %v9388_v19 = vrot.slane %v9268_v39, %v15766_v50  ;;  %v9392_v40 = vrot.slane %v9269_v28, %v15766_v50  ;;  %v9485_v56 = vsel %vm9471_vm2, %v9384_v34, %v9484_v61 }
 0x4ba   : > { %v9850_v5 = vrot.slane %v8796_v42, 9  ;;  %v9226_v38 = vmax.f32 %v8795_v20, %v9848_v11  ;;  %v9273_v15 = vmax.f32 %v15962_v18, %v9225_v57  ;;  %v8564_v6 = vcombine.low %v8543_v16, %v8508_v54 }
 0x4bb   : > { %v9396_v8 = vrot.slane %v9270_v63, %v15766_v50  ;;  %v9486_v48 = vsel %vm9473_vm3, %v9388_v19, %v9485_v56  ;;  %v8771_v26 = vrot.slane %v8507_v62, %v16766_v24  ;;  %v9840_v53 = vrot.slane %v15959_v37, 9 }
 0x4bc   : > { %v9487_v10 = vsel %vm9475_vm4, %v9392_v40, %v9486_v48  ;;  %v9227_v23 = vmax.f32 %v8794_v21, %v9849_v25  ;;  %v9274_v13 = vmax.f32 %v9220_v33, %v9226_v38  ;;  %8595 = vst [vmem:[%s15778_s8 + $0x70] sm:$0xff] %v8564_v6  ;;  %v8778_v36 = vrot.slane %v8543_v16, %v16766_v24 }
 0x4bd   : > { %v9488_v61 = vsel %vm9477_vm5, %v9396_v8, %v9487_v10  ;;  %v8779_v58 = vcombine.high %v8771_v26, %v8771_v26  ;;  %v9843_v43 = vrot.slane %v8771_v26, 9  ;;  %v9228_v1 = vmax.f32 %v8796_v42, %v9850_v5 }
 0x4be   : > { %9512 = vst [vmem:[%s15888_s14 + $0x10] sm:$0x3f] %v9488_v61  ;;  %v8474_v35 = vadd.f32 %v15806_v32, %v15866_v45  ;;  %v8469_v54 = vadd.f32 %v15799_v4, %v15871_v30  ;;  %v8484_v14 = vadd.f32 %v15817_v47, %v15880_v9  ;;  %v8780_v2 = vcombine.high %v8778_v36, %v8778_v36 }
 0x4bf   : > { %v9844_v51 = vrot.slane %v8779_v58, 9  ;;  %v9845_v49 = vrot.slane %v8778_v36, 9  ;;  %v9221_v18 = vmax.f32 %v8771_v26, %v9843_v43  ;;  %v9217_v27 = vmax.f32 %v15941_v41, %v9839_v22 }
 0x4c0   : > { %v8510_v12 = vmax.f32 %v8474_v35, 0.0  ;;  %v8509_v62 = vmax.f32 %v8469_v54, 0.0  ;;  %v8479_v0 = vadd.f32 %v15813_v31, %v15892_v3  ;;  %v9846_v59 = vrot.slane %v8780_v2, 9 }
 0x4c1   : > { %v9222_v32 = vmax.f32 %v8779_v58, %v9844_v51  ;;  %v9223_v45 = vmax.f32 %v8778_v36, %v9845_v49  ;;  %v9275_v17 = vmax.f32 %v9221_v18, %v9227_v23  ;;  %v9218_v4 = vmax.f32 %v15959_v37, %v9840_v53 }
 0x4c2   : > { %v15993_v30 = vcombine.high %v8510_v12, %v8510_v12  ;;  %8598 = vst [vmem:[%s15778_s8 + $0x88] sm:$0xf] %v8510_v12  ;;  %v8819_v47 = vrot.slane %v8510_v12, %v16766_v24  ;;  %v8545_v9 = vcombine.high %v8509_v62, %v8509_v62  ;;  %v9224_v44 = vmax.f32 %v8780_v2, %v9846_v59 }
 0x4c3   : > { %v9271_v41 = vmax.f32 %v9217_v27, %v9223_v45  ;;  %v9276_v22 = vmax.f32 %v9222_v32, %v9228_v1  ;;  %v8803_v21 = vrot.slane %v8509_v62, %v16766_v24  ;;  %v9408_v31 = vrot.slane %v9273_v15, %v15766_v50 }
 0x4c4   : > { %v9412_v3 = vrot.slane %v9274_v13, %v15766_v50  ;;  %v8826_v20 = vrot.slane %v15993_v30, %v16766_v24  ;;  %v8565_v37 = vcombine.low %v8509_v62, %v8545_v9  ;;  %v9272_v46 = vmax.f32 %v9218_v4, %v9224_v44 }
 0x4c5   : > { %v8827_v16 = vcombine.high %v8819_v47, %v8819_v47  ;;  %v8810_v29 = vrot.slane %v8545_v9, %v16766_v24  ;;  %v8512_v39 = vmax.f32 %v8484_v14, 0.0  ;;  %v9400_v28 = vrot.slane %v9271_v41, %v15766_v50 }
 0x4c6   : > { %v9416_v34 = vrot.slane %v9275_v17, %v15766_v50  ;;  %v8828_v42 = vcombine.high %v8826_v20, %v8826_v20  ;;  %v9857_v11 = vrot.slane %v8826_v20, 9  ;;  %8597 = vst [vmem:[%s15778_s8 + $0x80] sm:$0xff] %v8565_v37  ;;  %v9404_v25 = vrot.slane %v9272_v46, %v15766_v50 }
 0x4c7   : > { %v8811_v57 = vcombine.high %v8803_v21, %v8803_v21  ;;  %v8812_v63 = vcombine.high %v8810_v29, %v8810_v29  ;;  %v9851_v19 = vrot.slane %v8803_v21, 9  ;;  %v9420_v40 = vrot.slane %v9276_v22, %v15766_v50 }
 0x4c8   : > { %v9855_v56 = vrot.slane %v8819_v47, 9  ;;  %v9858_v33 = vrot.slane %v8828_v42, 9  ;;  %v9235_v5 = vmax.f32 %v8826_v20, %v9857_v11  ;;  %v9489_v38 = vsel %vm9469_vm1, %v9404_v25, %v9400_v28 }
 0x4c9   : > { %v9856_v15 = vrot.slane %v8827_v16, 9  ;;  %v9852_v8 = vrot.slane %v8811_v57, 9  ;;  %v9229_v48 = vmax.f32 %v8803_v21, %v9851_v19  ;;  %v9490_v6 = vsel %vm9471_vm2, %v9408_v31, %v9489_v38 }
 0x4ca   : > { %v9236_v26 = vmax.f32 %v8828_v42, %v9858_v33  ;;  %v9853_v53 = vrot.slane %v8810_v29, 9  ;;  %v8548_v10 = vcombine.high %v8512_v39, %v8512_v39  ;;  %v9491_v23 = vsel %vm9473_vm3, %v9412_v3, %v9490_v6 }
 0x4cb   : > { %v9854_v13 = vrot.slane %v8812_v63, 9  ;;  %v9230_v61 = vmax.f32 %v8811_v57, %v9852_v8  ;;  %v9277_v36 = vmax.f32 %v9229_v48, %v9235_v5  ;;  %v9492_v58 = vsel %vm9475_vm4, %v9416_v34, %v9491_v23 }
 0x4cc   : > { %v8567_v43 = vcombine.low %v8512_v39, %v8548_v10  ;;  %v16013_v1 = vrot.slane %v8512_v39, %v16766_v24  ;;  %v8858_v35 = vrot.slane %v8548_v10, %v16766_v24  ;;  %v9493_v54 = vsel %vm9477_vm5, %v9420_v40, %v9492_v58 }
 0x4cd   : > { %v9233_v14 = vmax.f32 %v8819_v47, %v9855_v56  ;;  %v9278_v2 = vmax.f32 %v9230_v61, %v9236_v26  ;;  %v8511_v51 = vmax.f32 %v8479_v0, 0.0  ;;  %9513 = vst [vmem:[%s15888_s14 + $0x18] sm:$0x3f] %v9493_v54  ;;  %v9234_v49 = vmax.f32 %v8827_v16, %v9856_v15 }
 0x4ce   : > { %v9424_v18 = vrot.slane %v9277_v36, %v15766_v50  ;;  %8601 = vst [vmem:[%s15778_s8 + $0xa0] sm:$0xff] %v8567_v43  ;;  %v16022_v27 = vcombine.high %v16013_v1, %v16013_v1  ;;  %v8860_v12 = vcombine.high %v8858_v35, %v8858_v35  ;;  %v9231_v0 = vmax.f32 %v8810_v29, %v9853_v53 }
 0x4cf   : > { %v9428_v62 = vrot.slane %v9278_v2, %v15766_v50  ;;  %v8547_v59 = vcombine.high %v8511_v51, %v8511_v51  ;;  %v8566_v32 = vcombine.low %v15993_v30, %v8511_v51  ;;  %v8835_v45 = vrot.slane %v8511_v51, %v16766_v24 }
 0x4d0   : > { %v9232_v17 = vmax.f32 %v8812_v63, %v9854_v13  ;;  %v9865_v4 = vrot.slane %v8858_v35, 9  ;;  %v9866_v47 = vrot.slane %v8860_v12, 9  ;;  %v9863_v21 = vrot.slane %v16013_v1, 9 }
 0x4d1   : > { %v9494_v9 = vsel %vm9469_vm1, %v9428_v62, %v9424_v18  ;;  %8599 = vst [vmem:[%s15778_s8 + $0x90] sm:$0xff] %v8566_v32  ;;  %8600 = vst [vmem:[%s15778_s8 + $0x98] sm:$0xf] %v8547_v59  ;;  %v8842_v44 = vrot.slane %v8547_v59, %v16766_v24  ;;  %v8843_v41 = vcombine.high %v8835_v45, %v8835_v45  ;;  %v9859_v22 = vrot.slane %v8835_v45, 9 }
 0x4d2   : > { %v9864_v31 = vrot.slane %v16022_v27, 9  ;;  %v8494_v30 = vadd.f32 %v15920_v55, %v15901_v60  ;;  %v8489_v3 = vadd.f32 %v15914_v52, %v15905_v7  ;;  %v9243_v29 = vmax.f32 %v8858_v35, %v9865_v4 }
 0x4d3   : > { %v8844_v20 = vcombine.high %v8842_v44, %v8842_v44  ;;  %v9860_v37 = vrot.slane %v8843_v41, 9  ;;  %v9861_v46 = vrot.slane %v8842_v44, 9  ;;  %v9237_v16 = vmax.f32 %v8835_v45, %v9859_v22 }
 0x4d4   : > { %v9244_v39 = vmax.f32 %v8860_v12, %v9866_v47  ;;  %v8514_v28 = vmax.f32 %v8494_v30, 0.0  ;;  %v8513_v34 = vmax.f32 %v8489_v3, 0.0 }
 0x4d5   : > { %v9862_v42 = vrot.slane %v8844_v20, 9  ;;  %v9238_v11 = vmax.f32 %v8843_v41, %v9860_v37  ;;  %v9239_v25 = vmax.f32 %v8842_v44, %v9861_v46  ;;  %v9279_v57 = vmax.f32 %v9231_v0, %v9237_v16 }
 0x4d6   : > { %v8550_v63 = vcombine.high %v8514_v28, %v8514_v28  ;;  %v8883_v60 = vrot.slane %v8514_v28, %v16766_v24  ;;  %v8549_v55 = vcombine.high %v8513_v34, %v8513_v34  ;;  %8602 = vst [vmem:[%s15778_s8 + $0xa8] sm:$0xf] %v8513_v34  ;;  %v8867_v7 = vrot.slane %v8513_v34, %v16766_v24 }
 0x4d7   : > { %v9240_v52 = vmax.f32 %v8844_v20, %v9862_v42  ;;  %v9280_v19 = vmax.f32 %v9232_v17, %v9238_v11  ;;  %v9281_v40 = vmax.f32 %v9233_v14, %v9239_v25  ;;  %v9432_v56 = vrot.slane %v9279_v57, %v15766_v50 }
 0x4d8   : > { %8604 = vst [vmem:[%s15778_s8 + $0xb8] sm:$0xf] %v8550_v63  ;;  %v8890_v33 = vrot.slane %v8550_v63, %v16766_v24  ;;  %v8891_v5 = vcombine.high %v8883_v60, %v8883_v60  ;;  %v9871_v38 = vrot.slane %v8883_v60, 9  ;;  %v8568_v15 = vcombine.low %v8549_v55, %v8514_v28 }
 0x4d9   : > { %v9282_v8 = vmax.f32 %v9234_v49, %v9240_v52  ;;  %v9436_v48 = vrot.slane %v9280_v19, %v15766_v50  ;;  %v9440_v6 = vrot.slane %v9281_v40, %v15766_v50  ;;  %v9495_v26 = vsel %vm9471_vm2, %v9432_v56, %v9494_v9 }
 0x4da   : > { %v8892_v53 = vcombine.high %v8890_v33, %v8890_v33  ;;  %v9872_v10 = vrot.slane %v8891_v5, 9  ;;  %v9873_v23 = vrot.slane %v8890_v33, 9  ;;  %v9249_v13 = vmax.f32 %v8883_v60, %v9871_v38  ;;  %8603 = vst [vmem:[%s15778_s8 + $0xb0] sm:$0xff] %v8568_v15 }
 0x4db   : > { %v9444_v61 = vrot.slane %v9282_v8, %v15766_v50  ;;  %v9496_v36 = vsel %vm9473_vm3, %v9436_v48, %v9495_v26  ;;  %v8874_v58 = vrot.slane %v8549_v55, %v16766_v24  ;;  %v8875_v43 = vcombine.high %v8867_v7, %v8867_v7 }
 0x4dc   : > { %v9497_v35 = vsel %vm9475_vm4, %v9440_v6, %v9496_v36  ;;  %v9874_v54 = vrot.slane %v8892_v53, 9  ;;  %v9250_v14 = vmax.f32 %v8891_v5, %v9872_v10  ;;  %v9251_v2 = vmax.f32 %v8890_v33, %v9873_v23 }
 0x4dd   : > { %v9498_v51 = vsel %vm9477_vm5, %v9444_v61, %v9497_v35  ;;  %v9285_v49 = vmax.f32 %v9243_v29, %v9249_v13  ;;  %v8876_v18 = vcombine.high %v8874_v58, %v8874_v58  ;;  %v9867_v12 = vrot.slane %v8867_v7, 9 }
 0x4de   : > { %9514 = vst [vmem:[%s15888_s14 + $0x20] sm:$0x3f] %v9498_v51  ;;  %v9252_v62 = vmax.f32 %v8892_v53, %v9874_v54  ;;  %v9286_v59 = vmax.f32 %v9244_v39, %v9250_v14  ;;  %v9868_v32 = vrot.slane %v8875_v43, 9  ;;  %v9869_v45 = vrot.slane %v8874_v58, 9 }
 0x4df   : > { %v9870_v0 = vrot.slane %v8876_v18, 9  ;;  %v9245_v17 = vmax.f32 %v8867_v7, %v9867_v12  ;;  %v9241_v24 = vmax.f32 %v16013_v1, %v9863_v21  ;;  %v9242_v9 = vmax.f32 %v16022_v27, %v9864_v31 }
 0x4e0   : > { %v9246_v4 = vmax.f32 %v8875_v43, %v9868_v32  ;;  %v9247_v47 = vmax.f32 %v8874_v58, %v9869_v45  ;;  %v9456_v46 = vrot.slane %v9285_v49, %v15766_v50  ;;  %v9460_v16 = vrot.slane %v9286_v59, %v15766_v50 }
 0x4e1   : > { %v9248_v44 = vmax.f32 %v8876_v18, %v9870_v0  ;;  %v9287_v41 = vmax.f32 %v9245_v17, %v9251_v2 }
 0x4e2   : > { %v9283_v22 = vmax.f32 %v9241_v24, %v9247_v47  ;;  %v9288_v30 = vmax.f32 %v9246_v4, %v9252_v62 }
 0x4e3   : > { %v9284_v3 = vmax.f32 %v9242_v9, %v9248_v44  ;;  %v9464_v21 = vrot.slane %v9287_v41, %v15766_v50 }
 0x4e4   : > { %v9448_v20 = vrot.slane %v9283_v22, %v15766_v50  ;;  %v9468_v31 = vrot.slane %v9288_v30, %v15766_v50 }
 0x4e5   : > { %v9452_v37 = vrot.slane %v9284_v3, %v15766_v50 }
 0x4e7   : > { %v9499_v1 = vsel %vm9469_vm1, %v9452_v37, %v9448_v20 }
 0x4e8   : > { %v9500_v27 = vsel %vm9471_vm2, %v9456_v46, %v9499_v1 }
 0x4e9   : > { %v9501_v29 = vsel %vm9473_vm3, %v9460_v16, %v9500_v27 }
 0x4ea   : > { %v9502_v39 = vsel %vm9475_vm4, %v9464_v21, %v9501_v29 }
 0x4eb   : > { %v9503_v28 = vsel %vm9477_vm5, %v9468_v31, %v9502_v39 }
 0x4ec   : > { %9515 = vst [vmem:[%s15888_s14 + $0x28] sm:$0x3f] %v9503_v28 }
 0x4ed PF: > { %s17_s21 = sadd.s32 1, %s11121_s21  }
 0x4ee   : > { %p14_p4 = scmp.ge.s32.totalorder %s17_s21, 4  }
 0x4f0   :  { %16 = sbr.rel (!%p14_p4) target bundleno = 1 (0x1), region = 82 }

</bundles_post_ra>
